<compile_context>
chip_gen: v7x
topology: tpu7x:2x2x1
jax: 0.10.0
libtpu: 0.0.40
codegen_flags: <defaults>
</compile_context>

<pallas_src>
import numpy as np
import jax
import jax.numpy as jnp
from jax import lax
from jax.experimental import pallas as pl
from jax.experimental.pallas import tpu as pltpu


# ----------------------------------------------------------------------------
# Host-side folding of a ConvBlock into a single dense operator (numpy glue).
# Flattening convention: activation (H, W, C) -> flat index (i*W + j)*C + c.
# ----------------------------------------------------------------------------
def conv_tap_maps(Hin, Win, upsample=False, downsample=False):
    """Per-tap spatial operators for (nearest up2) -> zeropad1 -> conv3x3 -> (avgpool2)."""
    if upsample:
        H1, W1 = 2 * Hin, 2 * Win
        U = np.zeros((H1 * W1, Hin * Win), np.float32)
        for i in range(H1):
            for j in range(W1):
                U[i * W1 + j, (i // 2) * Win + (j // 2)] = 1.0
    else:
        H1, W1 = Hin, Win
        U = np.eye(H1 * W1, dtype=np.float32)
    if downsample:
        H2, W2 = H1 // 2, W1 // 2
        P = np.zeros((H2 * W2, H1 * W1), np.float32)
        for i in range(H2):
            for j in range(W2):
                for a in range(2):
                    for c in range(2):
                        P[i * W2 + j, (2 * i + a) * W1 + (2 * j + c)] = 0.25
    else:
        P = np.eye(H1 * W1, dtype=np.float32)
    taps = []
    for di in range(3):
        for dj in range(3):
            S = np.zeros((H1 * W1, H1 * W1), np.float32)
            for i in range(H1):
                for j in range(W1):
                    ii, jj = i + di - 1, j + dj - 1
                    if 0 <= ii < H1 and 0 <= jj < W1:
                        S[i * W1 + j, ii * W1 + jj] = 1.0
            taps.append(P @ S @ U)
    return np.stack(taps, axis=0)                      # (9, P_out, P_in)


def repack_conv3x3(w):
    """(C_out, C_in, 3, 3) -> (9, C_in, C_out), tap index t = di*3 + dj."""
    return np.ascontiguousarray(
        np.transpose(w, (2, 3, 1, 0)).reshape(9, w.shape[1], w.shape[0]))


def fold_conv3x3(w, Hin, upsample=False, downsample=False):
    """Fold (up2?) -> zero-pad(1) -> conv3x3 -> (avgpool2?) into one dense M:
    out_flat = in_flat @ M, with flat index p*C + c."""
    A = conv_tap_maps(Hin, Hin, upsample=upsample, downsample=downsample)   # (9, P_out, P_in)
    Wt = repack_conv3x3(w)                                                  # (9, C_in, C_out)
    P_out, P_in = A.shape[1], A.shape[2]
    C_in, C_out = Wt.shape[1], Wt.shape[2]
    M = np.einsum('tqp,tco->pcqo', A, Wt).reshape(P_in * C_in, P_out * C_out)
    return np.ascontiguousarray(M.astype(np.float32))


def bias_row(b, P_out):
    """Per-channel bias tiled over spatial positions as a (1, P_out*C_out) row."""
    return np.ascontiguousarray(np.tile(np.asarray(b, np.float32), P_out)[None, :])


def fold_upsample1x1(w, b):
    """Upsample1x1: relu -> conv1x1 (C_in -> 4*C_out) -> view(B, C_out, 2, 2).
    Returns (M, b_row) with out_flat[p*C_out + c] = relu(x) @ M[:, p*C_out+c] + b_row."""
    Cout4, Cin = w.shape[0], w.shape[1]
    Cout = Cout4 // 4
    w10 = w[:, :, 0, 0].astype(np.float32)                         # (4*Cout, Cin)
    # y[c*4 + p] feeds out[c, i, j] with p = i*2 + j.
    M = np.transpose(w10.reshape(Cout, 4, Cin), (2, 1, 0)).reshape(Cin, 4 * Cout)
    brow = np.asarray(b, np.float32).reshape(Cout, 4).T.reshape(1, 4 * Cout)
    return np.ascontiguousarray(M), np.ascontiguousarray(brow)


# ----------------------------------------------------------------------------
# Deterministic parameter construction (synthetic; no checkpoint loading).
# ----------------------------------------------------------------------------
def init_conv(rng, c_out, c_in, k):
    fan_in = c_in * k * k
    bound = 1.0 / np.sqrt(fan_in)
    w = rng.uniform(-bound, bound, size=(c_out, c_in, k, k)).astype(np.float32)
    b = rng.uniform(-bound, bound, size=(c_out,)).astype(np.float32)
    return w, b


def build_hourglass(C_in, C_max, size, n_downs, seed=0):
    assert size == n_downs ** 2 and size == 2 ** n_downs
    rng = np.random.default_rng(seed)
    lefts = []
    c, H = C_in, size
    for _ in range(n_downs):
        c_out = min(c * 2, C_max)
        w, b = init_conv(rng, c_out, c, 3)
        lefts.append(dict(cin=c, cout=c_out, Hin=H, w=w, b=b))
        c, H = c_out, H // 2
    # self.mids is built by __init__ but never used in forward() -> omitted.
    rights = []
    for i, lb in enumerate(lefts[::-1]):
        c_out = lb['cin']
        c_in = lb['cout']
        channel_in = c_in * 2 if i else c_in
        if i == 0:
            w, b = init_conv(rng, c_out * 4, channel_in, 1)
            rights.append(dict(kind='up1x1', cin=channel_in, cout=c_out, w=w, b=b))
        else:
            w, b = init_conv(rng, c_out, channel_in, 3)
            rights.append(dict(kind='up', cin=channel_in, cout=c_out, w=w, b=b))
    return lefts, rights


def build_fused_operands(lefts, rights, n_downs):
    """Fold every block of the HourGlass into (M, bias-row) constants, in the
    order consumed by the fused kernel."""
    consts = []
    for lb in lefts:                                   # downsampling blocks
        consts.append(fold_conv3x3(lb['w'], lb['Hin'], downsample=True))
        consts.append(bias_row(lb['b'], (lb['Hin'] // 2) ** 2))
    H, cur_C = 1, None
    for i, rb in enumerate(rights):
        if rb['kind'] == 'up1x1':
            M, brow = fold_upsample1x1(rb['w'], rb['b'])
            consts += [M, brow]
            H, cur_C = 2, rb['cout']
        else:                                          # cat -> relu -> up2 -> pad -> conv3x3
            lf_C = lefts[n_downs - 1 - i]['cout']
            Ca = cur_C
            assert Ca + lf_C == rb['cin']
            consts.append(fold_conv3x3(rb['w'][:, :Ca], H, upsample=True))    # current-x half
            consts.append(fold_conv3x3(rb['w'][:, Ca:], H, upsample=True))    # skip-feature half
            H *= 2
            consts.append(bias_row(rb['b'], H * H))
            cur_C = rb['cout']
    return consts


# ----------------------------------------------------------------------------
# Single fused Pallas kernel for the whole HourGlass forward.
# ----------------------------------------------------------------------------
def hourglass_fused_call(x_flat, consts, n_downs, n_out):
    """x_flat: (B, 1, P0*C0) flattened input; consts: folded (M, bias) list."""
    B = x_flat.shape[0]
    n_const = len(consts)

    def kernel(*refs):
        x_ref = refs[0]
        cref = refs[1:1 + n_const]
        o_ref = refs[1 + n_const]

        def mm(h, m_ref):                               # pre-activation ReLU + folded block
            return jnp.dot(jnp.maximum(h, 0.0), m_ref[...],
                           preferred_element_type=jnp.float32)

        it = iter(cref)
        h = x_ref[0]                                    # (1, P0*C0)
        feats = []
        for _ in range(n_downs):                        # left / downsampling blocks
            m, b = next(it), next(it)
            h = mm(h, m) + b[...]
            feats.append(h)
        m, b = next(it), next(it)                       # Upsample1x1 (1x1 conv + view)
        h = mm(h, m) + b[...]
        for i in range(1, n_downs):                     # right / upsampling blocks
            ma, mb, b = next(it), next(it), next(it)
            lf = feats[n_downs - 1 - i]                 # channel concat == split matmul
            h = mm(h, ma) + mm(lf, mb) + b[...]
        o_ref[0] = h.astype(o_ref.dtype)                # lane-dense final store

    in_specs = [pl.BlockSpec((1, 1, x_flat.shape[2]), lambda b: (b, 0, 0))]
    in_specs += [pl.BlockSpec(c.shape, lambda b: (0, 0)) for c in consts]

    return pl.pallas_call(
        kernel,
        out_shape=jax.ShapeDtypeStruct((B, 1, n_out), jnp.float32),
        grid=(B,),
        in_specs=in_specs,
        out_specs=pl.BlockSpec((1, 1, n_out), lambda b: (b, 0, 0)),
        compiler_params=pltpu.CompilerParams(
            dimension_semantics=("parallel",),          # v7x: one batch elem per TensorCore
            vmem_limit_bytes=48 * 1024 * 1024),         # constants (~8 MiB) x double-buffer
    )(x_flat, *consts)


def hourglass_pallas(x_nchw, lefts, rights, size, n_downs):
    B, C0 = x_nchw.shape[0], x_nchw.shape[1]
    consts = [jnp.asarray(a) for a in build_fused_operands(lefts, rights, n_downs)]
    # NCHW -> flattened (spatial-major, channel-minor) row per batch element.
    x_flat = jnp.transpose(x_nchw, (0, 2, 3, 1)).reshape(B, 1, size * size * C0)
    C_out = rights[-1]['cout']
    n_out = size * size * C_out
    out_flat = hourglass_fused_call(x_flat, consts, n_downs, n_out)
    out = out_flat.reshape(B, size, size, C_out)
    return jnp.transpose(out, (0, 3, 1, 2))             # -> NCHW


# ----------------------------------------------------------------------------
# Pure-JAX reference (NCHW), for verification.
# ----------------------------------------------------------------------------
def ref_convblock(x, w, b, upsample=False, downsample=False):
    x = jnp.maximum(x, 0.0)
    if upsample:
        x = jnp.repeat(jnp.repeat(x, 2, axis=2), 2, axis=3)
    y = lax.conv_general_dilated(x, jnp.asarray(w), (1, 1), ((1, 1), (1, 1)),
                                 dimension_numbers=('NCHW', 'OIHW', 'NCHW'),
                                 precision=lax.Precision.HIGHEST)
    y = y + jnp.asarray(b)[None, :, None, None]
    if downsample:
        B, C, Hh, Ww = y.shape
        y = y.reshape(B, C, Hh // 2, 2, Ww // 2, 2).mean(axis=(3, 5))
    return y


def hourglass_ref(x, lefts, rights, n_downs):
    feats = []
    for lb in lefts:
        x = ref_convblock(x, lb['w'], lb['b'], downsample=True)
        feats.append(x)
    for i, rb in enumerate(rights):
        if i:
            x = jnp.concatenate([x, feats[n_downs - 1 - i]], axis=1)
        if rb['kind'] == 'up1x1':
            xr = jnp.maximum(x, 0.0)
            y = lax.conv_general_dilated(xr, jnp.asarray(rb['w']), (1, 1), 'VALID',
                                         dimension_numbers=('NCHW', 'OIHW', 'NCHW'),
                                         precision=lax.Precision.HIGHEST)
            y = y + jnp.asarray(rb['b'])[None, :, None, None]
            B, C = y.shape[:2]
            x = y.reshape(B, C // 4, 2, 2)
        else:
            x = ref_convblock(x, rb['w'], rb['b'], upsample=True)
    return x


if __name__ == "__main__":
    B, C_in, C_max, n_downs = 2, 4, 32, 4
    size = n_downs ** 2                      # = 16 = 2**n_downs (module asserts both)

    lefts, rights = build_hourglass(C_in, C_max, size, n_downs, seed=0)
    x = jax.random.normal(jax.random.PRNGKey(0), (B, C_in, size, size), jnp.float32)

    out = hourglass_pallas(x, lefts, rights, size, n_downs)
    out = jax.block_until_ready(out)

    ref = hourglass_ref(x, lefts, rights, n_downs)
    assert out.shape == (B, C_in, size, size)
    np.testing.assert_allclose(np.asarray(out), np.asarray(ref), rtol=2e-3, atol=2e-3)

    print("KERNEL_OK")
</pallas_src>

<mosaic_0001>
module attributes {stable_mosaic.version = 11 : i64} {
  func.func @kernel(%arg0: i32, %arg1: memref<1x1x1024xf32, #tpu.memory_space<vmem>>, %arg2: memref<1024x512xf32, #tpu.memory_space<vmem>>, %arg3: memref<1x512xf32, #tpu.memory_space<vmem>>, %arg4: memref<512x256xf32, #tpu.memory_space<vmem>>, %arg5: memref<1x256xf32, #tpu.memory_space<vmem>>, %arg6: memref<256x128xf32, #tpu.memory_space<vmem>>, %arg7: memref<1x128xf32, #tpu.memory_space<vmem>>, %arg8: memref<128x32xf32, #tpu.memory_space<vmem>>, %arg9: memref<1x32xf32, #tpu.memory_space<vmem>>, %arg10: memref<32x128xf32, #tpu.memory_space<vmem>>, %arg11: memref<1x128xf32, #tpu.memory_space<vmem>>, %arg12: memref<128x256xf32, #tpu.memory_space<vmem>>, %arg13: memref<128x256xf32, #tpu.memory_space<vmem>>, %arg14: memref<1x256xf32, #tpu.memory_space<vmem>>, %arg15: memref<256x512xf32, #tpu.memory_space<vmem>>, %arg16: memref<256x512xf32, #tpu.memory_space<vmem>>, %arg17: memref<1x512xf32, #tpu.memory_space<vmem>>, %arg18: memref<512x1024xf32, #tpu.memory_space<vmem>>, %arg19: memref<512x1024xf32, #tpu.memory_space<vmem>>, %arg20: memref<1x1024xf32, #tpu.memory_space<vmem>>, %arg21: memref<1x1x1024xf32, #tpu.memory_space<vmem>>) attributes {dimension_semantics = [#tpu.dimension_semantics<parallel>], iteration_bounds = array<i64: 2>, scalar_prefetch = 0 : i64, scratch_operands = 0 : i64, tpu.core_type = #tpu.core_type<tc>, window_params = [{transform_indices = @transform_0, window_bounds = array<i64: 1, 1, 1024>}, {pipeline_mode = #tpu.pipeline_mode<synchronous>, transform_indices = @transform_1, window_bounds = array<i64: 1024, 512>}, {pipeline_mode = #tpu.pipeline_mode<synchronous>, transform_indices = @transform_2, window_bounds = array<i64: 1, 512>}, {pipeline_mode = #tpu.pipeline_mode<synchronous>, transform_indices = @transform_3, window_bounds = array<i64: 512, 256>}, {pipeline_mode = #tpu.pipeline_mode<synchronous>, transform_indices = @transform_4, window_bounds = array<i64: 1, 256>}, {pipeline_mode = #tpu.pipeline_mode<synchronous>, transform_indices = @transform_5, window_bounds = array<i64: 256, 128>}, {pipeline_mode = #tpu.pipeline_mode<synchronous>, transform_indices = @transform_6, window_bounds = array<i64: 1, 128>}, {pipeline_mode = #tpu.pipeline_mode<synchronous>, transform_indices = @transform_7, window_bounds = array<i64: 128, 32>}, {pipeline_mode = #tpu.pipeline_mode<synchronous>, transform_indices = @transform_8, window_bounds = array<i64: 1, 32>}, {pipeline_mode = #tpu.pipeline_mode<synchronous>, transform_indices = @transform_9, window_bounds = array<i64: 32, 128>}, {pipeline_mode = #tpu.pipeline_mode<synchronous>, transform_indices = @transform_10, window_bounds = array<i64: 1, 128>}, {pipeline_mode = #tpu.pipeline_mode<synchronous>, transform_indices = @transform_11, window_bounds = array<i64: 128, 256>}, {pipeline_mode = #tpu.pipeline_mode<synchronous>, transform_indices = @transform_12, window_bounds = array<i64: 128, 256>}, {pipeline_mode = #tpu.pipeline_mode<synchronous>, transform_indices = @transform_13, window_bounds = array<i64: 1, 256>}, {pipeline_mode = #tpu.pipeline_mode<synchronous>, transform_indices = @transform_14, window_bounds = array<i64: 256, 512>}, {pipeline_mode = #tpu.pipeline_mode<synchronous>, transform_indices = @transform_15, window_bounds = array<i64: 256, 512>}, {pipeline_mode = #tpu.pipeline_mode<synchronous>, transform_indices = @transform_16, window_bounds = array<i64: 1, 512>}, {pipeline_mode = #tpu.pipeline_mode<synchronous>, transform_indices = @transform_17, window_bounds = array<i64: 512, 1024>}, {pipeline_mode = #tpu.pipeline_mode<synchronous>, transform_indices = @transform_18, window_bounds = array<i64: 512, 1024>}, {pipeline_mode = #tpu.pipeline_mode<synchronous>, transform_indices = @transform_19, window_bounds = array<i64: 1, 1024>}, {transform_indices = @transform_20, window_bounds = array<i64: 1, 1, 1024>}]} {
    %c0 = arith.constant 0 : index
    %c0_0 = arith.constant 0 : index
    %c0_1 = arith.constant 0 : index
    %0 = vector.load %arg1[%c0, %c0_0, %c0_1] : memref<1x1x1024xf32, #tpu.memory_space<vmem>>, vector<1x1x1024xf32>
    %1 = vector.shape_cast %0 : vector<1x1x1024xf32> to vector<1x1024xf32>
    %cst = arith.constant 0.000000e+00 : f32
    %2 = vector.broadcast %cst : f32 to vector<1x1024xf32>
    %3 = arith.maximumf %1, %2 : vector<1x1024xf32>
    %c0_2 = arith.constant 0 : index
    %c0_3 = arith.constant 0 : index
    %4 = vector.load %arg2[%c0_2, %c0_3] : memref<1024x512xf32, #tpu.memory_space<vmem>>, vector<1024x512xf32>
    %cst_4 = arith.constant dense<0.000000e+00> : vector<1x512xf32>
    %5 = tpu.matmul %3, %4, %cst_4 {dimension_numbers = #tpu.dot_dimension_numbers<[1], [0], [0], [1], [0, 0, 1, 1], [], []>} : vector<1x1024xf32>, vector<1024x512xf32>, vector<1x512xf32> -> vector<1x512xf32>
    %c0_5 = arith.constant 0 : index
    %c0_6 = arith.constant 0 : index
    %6 = vector.load %arg3[%c0_5, %c0_6] : memref<1x512xf32, #tpu.memory_space<vmem>>, vector<1x512xf32>
    %7 = arith.addf %5, %6 : vector<1x512xf32>
    %cst_7 = arith.constant 0.000000e+00 : f32
    %8 = vector.broadcast %cst_7 : f32 to vector<1x512xf32>
    %9 = arith.maximumf %7, %8 : vector<1x512xf32>
    %c0_8 = arith.constant 0 : index
    %c0_9 = arith.constant 0 : index
    %10 = vector.load %arg4[%c0_8, %c0_9] : memref<512x256xf32, #tpu.memory_space<vmem>>, vector<512x256xf32>
    %cst_10 = arith.constant dense<0.000000e+00> : vector<1x256xf32>
    %11 = tpu.matmul %9, %10, %cst_10 {dimension_numbers = #tpu.dot_dimension_numbers<[1], [0], [0], [1], [0, 0, 1, 1], [], []>} : vector<1x512xf32>, vector<512x256xf32>, vector<1x256xf32> -> vector<1x256xf32>
    %c0_11 = arith.constant 0 : index
    %c0_12 = arith.constant 0 : index
    %12 = vector.load %arg5[%c0_11, %c0_12] : memref<1x256xf32, #tpu.memory_space<vmem>>, vector<1x256xf32>
    %13 = arith.addf %11, %12 : vector<1x256xf32>
    %cst_13 = arith.constant 0.000000e+00 : f32
    %14 = vector.broadcast %cst_13 : f32 to vector<1x256xf32>
    %15 = arith.maximumf %13, %14 : vector<1x256xf32>
    %c0_14 = arith.constant 0 : index
    %c0_15 = arith.constant 0 : index
    %16 = vector.load %arg6[%c0_14, %c0_15] : memref<256x128xf32, #tpu.memory_space<vmem>>, vector<256x128xf32>
    %cst_16 = arith.constant dense<0.000000e+00> : vector<1x128xf32>
    %17 = tpu.matmul %15, %16, %cst_16 {dimension_numbers = #tpu.dot_dimension_numbers<[1], [0], [0], [1], [0, 0, 1, 1], [], []>} : vector<1x256xf32>, vector<256x128xf32>, vector<1x128xf32> -> vector<1x128xf32>
    %c0_17 = arith.constant 0 : index
    %c0_18 = arith.constant 0 : index
    %18 = vector.load %arg7[%c0_17, %c0_18] : memref<1x128xf32, #tpu.memory_space<vmem>>, vector<1x128xf32>
    %19 = arith.addf %17, %18 : vector<1x128xf32>
    %cst_19 = arith.constant 0.000000e+00 : f32
    %20 = vector.broadcast %cst_19 : f32 to vector<1x128xf32>
    %21 = arith.maximumf %19, %20 : vector<1x128xf32>
    %c0_20 = arith.constant 0 : index
    %c0_21 = arith.constant 0 : index
    %22 = vector.load %arg8[%c0_20, %c0_21] : memref<128x32xf32, #tpu.memory_space<vmem>>, vector<128x32xf32>
    %cst_22 = arith.constant dense<0.000000e+00> : vector<1x32xf32>
    %23 = tpu.matmul %21, %22, %cst_22 {dimension_numbers = #tpu.dot_dimension_numbers<[1], [0], [0], [1], [0, 0, 1, 1], [], []>} : vector<1x128xf32>, vector<128x32xf32>, vector<1x32xf32> -> vector<1x32xf32>
    %c0_23 = arith.constant 0 : index
    %c0_24 = arith.constant 0 : index
    %24 = vector.load %arg9[%c0_23, %c0_24] : memref<1x32xf32, #tpu.memory_space<vmem>>, vector<1x32xf32>
    %25 = arith.addf %23, %24 : vector<1x32xf32>
    %cst_25 = arith.constant 0.000000e+00 : f32
    %26 = vector.broadcast %cst_25 : f32 to vector<1x32xf32>
    %27 = arith.maximumf %25, %26 : vector<1x32xf32>
    %c0_26 = arith.constant 0 : index
    %c0_27 = arith.constant 0 : index
    %28 = vector.load %arg10[%c0_26, %c0_27] : memref<32x128xf32, #tpu.memory_space<vmem>>, vector<32x128xf32>
    %cst_28 = arith.constant dense<0.000000e+00> : vector<1x128xf32>
    %29 = tpu.matmul %27, %28, %cst_28 {dimension_numbers = #tpu.dot_dimension_numbers<[1], [0], [0], [1], [0, 0, 1, 1], [], []>} : vector<1x32xf32>, vector<32x128xf32>, vector<1x128xf32> -> vector<1x128xf32>
    %c0_29 = arith.constant 0 : index
    %c0_30 = arith.constant 0 : index
    %30 = vector.load %arg11[%c0_29, %c0_30] : memref<1x128xf32, #tpu.memory_space<vmem>>, vector<1x128xf32>
    %31 = arith.addf %29, %30 : vector<1x128xf32>
    %cst_31 = arith.constant 0.000000e+00 : f32
    %32 = vector.broadcast %cst_31 : f32 to vector<1x128xf32>
    %33 = arith.maximumf %31, %32 : vector<1x128xf32>
    %c0_32 = arith.constant 0 : index
    %c0_33 = arith.constant 0 : index
    %34 = vector.load %arg12[%c0_32, %c0_33] : memref<128x256xf32, #tpu.memory_space<vmem>>, vector<128x256xf32>
    %cst_34 = arith.constant dense<0.000000e+00> : vector<1x256xf32>
    %35 = tpu.matmul %33, %34, %cst_34 {dimension_numbers = #tpu.dot_dimension_numbers<[1], [0], [0], [1], [0, 0, 1, 1], [], []>} : vector<1x128xf32>, vector<128x256xf32>, vector<1x256xf32> -> vector<1x256xf32>
    %cst_35 = arith.constant 0.000000e+00 : f32
    %36 = vector.broadcast %cst_35 : f32 to vector<1x128xf32>
    %37 = arith.maximumf %19, %36 : vector<1x128xf32>
    %c0_36 = arith.constant 0 : index
    %c0_37 = arith.constant 0 : index
    %38 = vector.load %arg13[%c0_36, %c0_37] : memref<128x256xf32, #tpu.memory_space<vmem>>, vector<128x256xf32>
    %cst_38 = arith.constant dense<0.000000e+00> : vector<1x256xf32>
    %39 = tpu.matmul %37, %38, %cst_38 {dimension_numbers = #tpu.dot_dimension_numbers<[1], [0], [0], [1], [0, 0, 1, 1], [], []>} : vector<1x128xf32>, vector<128x256xf32>, vector<1x256xf32> -> vector<1x256xf32>
    %40 = arith.addf %35, %39 : vector<1x256xf32>
    %c0_39 = arith.constant 0 : index
    %c0_40 = arith.constant 0 : index
    %41 = vector.load %arg14[%c0_39, %c0_40] : memref<1x256xf32, #tpu.memory_space<vmem>>, vector<1x256xf32>
    %42 = arith.addf %40, %41 : vector<1x256xf32>
    %cst_41 = arith.constant 0.000000e+00 : f32
    %43 = vector.broadcast %cst_41 : f32 to vector<1x256xf32>
    %44 = arith.maximumf %42, %43 : vector<1x256xf32>
    %c0_42 = arith.constant 0 : index
    %c0_43 = arith.constant 0 : index
    %45 = vector.load %arg15[%c0_42, %c0_43] : memref<256x512xf32, #tpu.memory_space<vmem>>, vector<256x512xf32>
    %cst_44 = arith.constant dense<0.000000e+00> : vector<1x512xf32>
    %46 = tpu.matmul %44, %45, %cst_44 {dimension_numbers = #tpu.dot_dimension_numbers<[1], [0], [0], [1], [0, 0, 1, 1], [], []>} : vector<1x256xf32>, vector<256x512xf32>, vector<1x512xf32> -> vector<1x512xf32>
    %cst_45 = arith.constant 0.000000e+00 : f32
    %47 = vector.broadcast %cst_45 : f32 to vector<1x256xf32>
    %48 = arith.maximumf %13, %47 : vector<1x256xf32>
    %c0_46 = arith.constant 0 : index
    %c0_47 = arith.constant 0 : index
    %49 = vector.load %arg16[%c0_46, %c0_47] : memref<256x512xf32, #tpu.memory_space<vmem>>, vector<256x512xf32>
    %cst_48 = arith.constant dense<0.000000e+00> : vector<1x512xf32>
    %50 = tpu.matmul %48, %49, %cst_48 {dimension_numbers = #tpu.dot_dimension_numbers<[1], [0], [0], [1], [0, 0, 1, 1], [], []>} : vector<1x256xf32>, vector<256x512xf32>, vector<1x512xf32> -> vector<1x512xf32>
    %51 = arith.addf %46, %50 : vector<1x512xf32>
    %c0_49 = arith.constant 0 : index
    %c0_50 = arith.constant 0 : index
    %52 = vector.load %arg17[%c0_49, %c0_50] : memref<1x512xf32, #tpu.memory_space<vmem>>, vector<1x512xf32>
    %53 = arith.addf %51, %52 : vector<1x512xf32>
    %cst_51 = arith.constant 0.000000e+00 : f32
    %54 = vector.broadcast %cst_51 : f32 to vector<1x512xf32>
    %55 = arith.maximumf %53, %54 : vector<1x512xf32>
    %c0_52 = arith.constant 0 : index
    %c0_53 = arith.constant 0 : index
    %56 = vector.load %arg18[%c0_52, %c0_53] : memref<512x1024xf32, #tpu.memory_space<vmem>>, vector<512x1024xf32>
    %cst_54 = arith.constant dense<0.000000e+00> : vector<1x1024xf32>
    %57 = tpu.matmul %55, %56, %cst_54 {dimension_numbers = #tpu.dot_dimension_numbers<[1], [0], [0], [1], [0, 0, 1, 1], [], []>} : vector<1x512xf32>, vector<512x1024xf32>, vector<1x1024xf32> -> vector<1x1024xf32>
    %cst_55 = arith.constant 0.000000e+00 : f32
    %58 = vector.broadcast %cst_55 : f32 to vector<1x512xf32>
    %59 = arith.maximumf %7, %58 : vector<1x512xf32>
    %c0_56 = arith.constant 0 : index
    %c0_57 = arith.constant 0 : index
    %60 = vector.load %arg19[%c0_56, %c0_57] : memref<512x1024xf32, #tpu.memory_space<vmem>>, vector<512x1024xf32>
    %cst_58 = arith.constant dense<0.000000e+00> : vector<1x1024xf32>
    %61 = tpu.matmul %59, %60, %cst_58 {dimension_numbers = #tpu.dot_dimension_numbers<[1], [0], [0], [1], [0, 0, 1, 1], [], []>} : vector<1x512xf32>, vector<512x1024xf32>, vector<1x1024xf32> -> vector<1x1024xf32>
    %62 = arith.addf %57, %61 : vector<1x1024xf32>
    %c0_59 = arith.constant 0 : index
    %c0_60 = arith.constant 0 : index
    %63 = vector.load %arg20[%c0_59, %c0_60] : memref<1x1024xf32, #tpu.memory_space<vmem>>, vector<1x1024xf32>
    %64 = arith.addf %62, %63 : vector<1x1024xf32>
    %c0_61 = arith.constant 0 : index
    %c0_62 = arith.constant 0 : index
    %c0_63 = arith.constant 0 : index
    %65 = vector.load %arg21[%c0_61, %c0_62, %c0_63] : memref<1x1x1024xf32, #tpu.memory_space<vmem>>, vector<1x1x1024xf32>
    %66 = vector.shape_cast %65 : vector<1x1x1024xf32> to vector<1x1024xf32>
    %67 = vector.shape_cast %64 : vector<1x1024xf32> to vector<1x1x1024xf32>
    tpu.vector_store %arg21[%c0_61, %c0_62, %c0_63], %67 {strides = array<i32>} : memref<1x1x1024xf32, #tpu.memory_space<vmem>>, vector<1x1x1024xf32>,
    return
  }
  func.func @transform_0(%arg0: i32) -> (i32, i32, i32) {
    %c0_i32 = arith.constant 0 : i32
    %c0_i32_0 = arith.constant 0 : i32
    %c0_i32_1 = arith.constant 0 : i32
    return %arg0, %c0_i32, %c0_i32_0 : i32, i32, i32
  }
  func.func @transform_1(%arg0: i32) -> (i32, i32) {
    %c0_i32 = arith.constant 0 : i32
    %c0_i32_0 = arith.constant 0 : i32
    %c0_i32_1 = arith.constant 0 : i32
    return %c0_i32, %c0_i32_0 : i32, i32
  }
  func.func @transform_2(%arg0: i32) -> (i32, i32) {
    %c0_i32 = arith.constant 0 : i32
    %c0_i32_0 = arith.constant 0 : i32
    %c0_i32_1 = arith.constant 0 : i32
    return %c0_i32, %c0_i32_0 : i32, i32
  }
  func.func @transform_3(%arg0: i32) -> (i32, i32) {
    %c0_i32 = arith.constant 0 : i32
    %c0_i32_0 = arith.constant 0 : i32
    %c0_i32_1 = arith.constant 0 : i32
    return %c0_i32, %c0_i32_0 : i32, i32
  }
  func.func @transform_4(%arg0: i32) -> (i32, i32) {
    %c0_i32 = arith.constant 0 : i32
    %c0_i32_0 = arith.constant 0 : i32
    %c0_i32_1 = arith.constant 0 : i32
    return %c0_i32, %c0_i32_0 : i32, i32
  }
  func.func @transform_5(%arg0: i32) -> (i32, i32) {
    %c0_i32 = arith.constant 0 : i32
    %c0_i32_0 = arith.constant 0 : i32
    %c0_i32_1 = arith.constant 0 : i32
    return %c0_i32, %c0_i32_0 : i32, i32
  }
  func.func @transform_6(%arg0: i32) -> (i32, i32) {
    %c0_i32 = arith.constant 0 : i32
    %c0_i32_0 = arith.constant 0 : i32
    %c0_i32_1 = arith.constant 0 : i32
    return %c0_i32, %c0_i32_0 : i32, i32
  }
  func.func @transform_7(%arg0: i32) -> (i32, i32) {
    %c0_i32 = arith.constant 0 : i32
    %c0_i32_0 = arith.constant 0 : i32
    %c0_i32_1 = arith.constant 0 : i32
    return %c0_i32, %c0_i32_0 : i32, i32
  }
  func.func @transform_8(%arg0: i32) -> (i32, i32) {
    %c0_i32 = arith.constant 0 : i32
    %c0_i32_0 = arith.constant 0 : i32
    %c0_i32_1 = arith.constant 0 : i32
    return %c0_i32, %c0_i32_0 : i32, i32
  }
  func.func @transform_9(%arg0: i32) -> (i32, i32) {
    %c0_i32 = arith.constant 0 : i32
    %c0_i32_0 = arith.constant 0 : i32
    %c0_i32_1 = arith.constant 0 : i32
    return %c0_i32, %c0_i32_0 : i32, i32
  }
  func.func @transform_10(%arg0: i32) -> (i32, i32) {
    %c0_i32 = arith.constant 0 : i32
    %c0_i32_0 = arith.constant 0 : i32
    %c0_i32_1 = arith.constant 0 : i32
    return %c0_i32, %c0_i32_0 : i32, i32
  }
  func.func @transform_11(%arg0: i32) -> (i32, i32) {
    %c0_i32 = arith.constant 0 : i32
    %c0_i32_0 = arith.constant 0 : i32
    %c0_i32_1 = arith.constant 0 : i32
    return %c0_i32, %c0_i32_0 : i32, i32
  }
  func.func @transform_12(%arg0: i32) -> (i32, i32) {
    %c0_i32 = arith.constant 0 : i32
    %c0_i32_0 = arith.constant 0 : i32
    %c0_i32_1 = arith.constant 0 : i32
    return %c0_i32, %c0_i32_0 : i32, i32
  }
  func.func @transform_13(%arg0: i32) -> (i32, i32) {
    %c0_i32 = arith.constant 0 : i32
    %c0_i32_0 = arith.constant 0 : i32
    %c0_i32_1 = arith.constant 0 : i32
    return %c0_i32, %c0_i32_0 : i32, i32
  }
  func.func @transform_14(%arg0: i32) -> (i32, i32) {
    %c0_i32 = arith.constant 0 : i32
    %c0_i32_0 = arith.constant 0 : i32
    %c0_i32_1 = arith.constant 0 : i32
    return %c0_i32, %c0_i32_0 : i32, i32
  }
  func.func @transform_15(%arg0: i32) -> (i32, i32) {
    %c0_i32 = arith.constant 0 : i32
    %c0_i32_0 = arith.constant 0 : i32
    %c0_i32_1 = arith.constant 0 : i32
    return %c0_i32, %c0_i32_0 : i32, i32
  }
  func.func @transform_16(%arg0: i32) -> (i32, i32) {
    %c0_i32 = arith.constant 0 : i32
    %c0_i32_0 = arith.constant 0 : i32
    %c0_i32_1 = arith.constant 0 : i32
    return %c0_i32, %c0_i32_0 : i32, i32
  }
  func.func @transform_17(%arg0: i32) -> (i32, i32) {
    %c0_i32 = arith.constant 0 : i32
    %c0_i32_0 = arith.constant 0 : i32
    %c0_i32_1 = arith.constant 0 : i32
    return %c0_i32, %c0_i32_0 : i32, i32
  }
  func.func @transform_18(%arg0: i32) -> (i32, i32) {
    %c0_i32 = arith.constant 0 : i32
    %c0_i32_0 = arith.constant 0 : i32
    %c0_i32_1 = arith.constant 0 : i32
    return %c0_i32, %c0_i32_0 : i32, i32
  }
  func.func @transform_19(%arg0: i32) -> (i32, i32) {
    %c0_i32 = arith.constant 0 : i32
    %c0_i32_0 = arith.constant 0 : i32
    %c0_i32_1 = arith.constant 0 : i32
    return %c0_i32, %c0_i32_0 : i32, i32
  }
  func.func @transform_20(%arg0: i32) -> (i32, i32, i32) {
    %c0_i32 = arith.constant 0 : i32
    %c0_i32_0 = arith.constant 0 : i32
    %c0_i32_1 = arith.constant 0 : i32
    return %arg0, %c0_i32, %c0_i32_0 : i32, i32, i32
  }
}

</mosaic_0001>

<bundles_post_ra>
// kernel: tpu_custom_call.1
= control target key start
LH: loop header
LB: loop body
LE: loop exit
PB: predicated region body
PF: predicated region fallthrough
CT: control target
= control target key end

     0   :  { %s10031_s0 = inlined_call_operand.hbm [shape: f32[2,1,1024], index: 0, kind: input, shape index: {}]   ;;  %s10032_s1 = inlined_call_operand.hbm [shape: f32[1024,512], index: 1, kind: input, shape index: {}]   ;;  %s10033_s2 = inlined_call_operand.hbm [shape: f32[1,512], index: 2, kind: input, shape index: {}]   ;;  %s10034_s3 = inlined_call_operand.hbm [shape: f32[512,256], index: 3, kind: input, shape index: {}]   ;;  %s10035_s4 = inlined_call_operand.hbm [shape: f32[1,256], index: 4, kind: input, shape index: {}]   ;;  %s10036_s5 = inlined_call_operand.hbm [shape: f32[256,128], index: 5, kind: input, shape index: {}]   ;;  %s10037_s6 = inlined_call_operand.hbm [shape: f32[1,128], index: 6, kind: input, shape index: {}]   ;;  %s10038_s7 = inlined_call_operand.vmem [shape: f32[128,32], index: 7, kind: input, shape index: {}]   ;;  %s10039_s8 = inlined_call_operand.hbm [shape: f32[1,32], index: 8, kind: input, shape index: {}]   ;;  %s10040_s9 = inlined_call_operand.hbm [shape: f32[32,128], index: 9, kind: input, shape index: {}]   ;;  %s10041_s10 = inlined_call_operand.hbm [shape: f32[1,128], index: 10, kind: input, shape index: {}]   ;;  %s10042_s11 = inlined_call_operand.hbm [shape: f32[128,256], index: 11, kind: input, shape index: {}]   ;;  %s10043_s12 = inlined_call_operand.hbm [shape: f32[128,256], index: 12, kind: input, shape index: {}]   ;;  %s10044_s13 = inlined_call_operand.hbm [shape: f32[1,256], index: 13, kind: input, shape index: {}]   ;;  %s10045_s14 = inlined_call_operand.hbm [shape: f32[256,512], index: 14, kind: input, shape index: {}]   ;;  %s10046_s15 = inlined_call_operand.hbm [shape: f32[256,512], index: 15, kind: input, shape index: {}]   ;;  %s10047_s16 = inlined_call_operand.hbm [shape: f32[1,512], index: 16, kind: input, shape index: {}]   ;;  %s10048_s17 = inlined_call_operand.hbm [shape: f32[512,1024], index: 17, kind: input, shape index: {}]   ;;  %s10049_s18 = inlined_call_operand.hbm [shape: f32[512,1024], index: 18, kind: input, shape index: {}]   ;;  %s10050_s19 = inlined_call_operand.hbm [shape: f32[1,1024], index: 19, kind: input, shape index: {}]   ;;  %s10051_s20 = inlined_call_operand.hbm [shape: f32[2,1,1024], index: 20, kind: output, shape index: {}]  }
   0x1   :  { %10087 = sst [smem:[#allocation50_spill]] %s10031_s0 }
   0x2   :  { %10088 = sst [smem:[#allocation51_spill]] %s10032_s1 }
   0x3   :  { %10089 = sst [smem:[#allocation52_spill]] %s10033_s2 }
   0x4   :  { %10090 = sst [smem:[#allocation53_spill]] %s10034_s3 }
   0x5   :  { %10091 = sst [smem:[#allocation54_spill]] %s10035_s4 }
   0x6   :  { %10092 = sst [smem:[#allocation55_spill]] %s10036_s5 }
   0x7   :  { %10093 = sst [smem:[#allocation56_spill]] %s10037_s6 }
   0x8   :  { %10094 = sst [smem:[#allocation57_spill]] %s10038_s7 }
   0x9   :  { %10095 = sst [smem:[#allocation58_spill]] %s10039_s8 }
   0xa   :  { %10096 = sst [smem:[#allocation59_spill]] %s10048_s17 }
   0xb   :  { %10097 = sst [smem:[#allocation60_spill]] %s10050_s19 }
   0xc   :  { %10098 = sst [smem:[#allocation61_spill]] %s10051_s20 }
   0xd   :  { %25 = vsyncpa [#allocation3], 0 }
   0xe   :  { %27 = vsyncpa [#allocation3 + $0x1], 0 }
   0xf   :  { %28 = vsyncpa [#allocation6], 0 }
  0x10   :  { %29 = vsyncpa [#allocation9], 0 }
  0x11   :  { %30 = vsyncpa [#allocation12], 0 }
  0x12   :  { %31 = vsyncpa [#allocation15], 0 }
  0x13   :  { %32 = vsyncpa [#allocation18], 0 }
  0x14   :  { %33 = vsyncpa [#allocation21], 0 }
  0x15   :  { %34 = vsyncpa [#allocation24], 0 }
  0x16   :  { %35 = vsyncpa [#allocation27], 0 }
  0x17   :  { %36 = vsyncpa [#allocation30], 0 }
  0x18   :  { %37 = vsyncpa [#allocation4], 0 }
  0x19   :  { %39 = vsyncpa [#allocation4 + $0x1], 0  ;;  %s9179_s1 = smov 0   ;;  %s9181_s22 = smov 0  }
  0x1a   :  { %s9183_s23 = smov 0   ;;  %s9185_s24 = smov 0  }
  0x1b LB: > { %10099 = sst [smem:[#allocation44_spill]] %s9028_s1  ;;  %s9042_s2 = smov [#allocation5]   ;;  %s9040_s24 = sphi %s9185_s24, %s9633_s24   ;;  %s9036_s23 = sphi %s9183_s23, %s10169_s23   ;;  %s9032_s22 = sphi %s9181_s22, %s10168_s22   ;;  %s9028_s1 = sphi %s9179_s1, %s10167_s1  }
  0x1c   : > { %10100 = sst [smem:[#allocation45_spill]] %s9032_s22  ;;  %s513_s25 = sshll.u32 %s9042_s2, 4  ;;  %s9205_s25 = int_to_ptr.vmem [resolvable:$true] %s513_s25 }
  0x1d   : > { %10101 = sst [smem:[#allocation46_spill]] %s9036_s23  ;;  %s9200_s3 = sadd.s32 4294967295, %s9040_s24  }
  0x1e   : > { %10102 = sst [smem:[#allocation47_spill]] %s9040_s24  ;;  %p5914_p0 = scmp.ge.s32.totalorder %s9040_s24, 1 }
  0x1f   : > { %10103 = sst [smem:[#allocation48_spill]] %s9200_s3  ;;  %p10069_p1 = scmp.eq.s32.totalorder %s9200_s3, 0 }
  0x20   : > { %p501_p2 = scmp.lt.s32.totalorder %s9040_s24, 3  ;;  %s9043_s27 = smov [#allocation8]  }
  0x21   : > { %s537_s28 = sshll.u32 %s9043_s27, 4  ;;  %s9044_s29 = smov [#allocation11]   ;;  %s9220_s28 = int_to_ptr.vmem [resolvable:$true] %s537_s28 }
  0x22   : > { %p9207_p3 = pnand %p5914_p0, %p501_p2  ;;  %s9222_s30 = sshll.u32 %s9044_s29, 4  ;;  %s562_s30 = int_to_ptr.vmem [resolvable:$true] %s9222_s30 }
  0x23   : > { %s10107_s2 = sld [smem:[#allocation51_spill]] }
  0x24   : > { %s10104_s26 = scalar_select %p9207_p3, 1, 0 }
  0x25   : > { %p8241_p5 = pneg %p9207_p3 }
  0x26   : > { %10105 = sst [smem:[#allocation49_spill]] %s10104_s26 }
  0x27   : > { %p9216_p6 = pnand %p8241_p5, %p10069_p1 }
  0x29   : > { %s8404_s20 = scalar_lea.hbm %s10107_s2, 65536  ;;  %p9232_p8 = pneg %p9216_p6 }
  0x2a   : > { %p8405_p7 = scmp.ne.s32.totalorder %s10107_s2, %s8404_s20  ;;  %p8411_p11 = scmp.lt.u32.totalorder %s8404_s20, %s10107_s2 }
  0x2c   : > { %p8407_p9 = pnand %p9232_p8, %p8405_p7 }
  0x2e   : > { %p8408_p10 = pneg %p8407_p9 }
  0x30   : > { %p8413_p12 = pnand %p8411_p11, %p8408_p10 }
  0x32   : > { %8416 = shalt.err (!%p8413_p12)
}
  0x33   : > { %s8417_s7 = scalar_lea.vmem %s9205_s25, 65536  ;;  %p8425_p5 = scmp.lt.s32.totalorder %s9205_s25, %s9205_s25 }
  0x34   : > { %p8418_p13 = scmp.ne.s32.totalorder %s9205_s25, %s8417_s7  ;;  %p8426_p4 = scmp.lt.s32.totalorder %s8417_s7, %s8417_s7 }
  0x36   : > { %p8420_p0 = pnand %p8418_p13, %p9232_p8  ;;  %p8427_p7 = por %p8426_p4, %p8425_p5 }
  0x38   : > { %p8421_p2 = pneg %p8420_p0 }
  0x3a   : > { %p8428_p9 = pnand %p8427_p7, %p8421_p2 }
  0x3c   : > { %8431 = shalt.err (!%p8428_p9)
}
  0x3d   : > { %s10071_s26 = smov 512   ;;  %s10073_s20 = smov 32  }
  0x3e   : > { %8244 = dma.hbm_to_vmem [thread:$0]  (!%p9216_p6), %s10107_s2, 65536, %s9205_s25, [#allocation6], %s10071_s26, %s10071_s26, %s10073_s20  }
  0x3f   : > { %s10109_s1 = sld [smem:[#allocation53_spill]] }
  0x45   : > { %s10110_s19 = smov %s10109_s1  ;;  %s8432_s7 = scalar_lea.hbm %s10109_s1, 16384 }
  0x46   : > { %p8433_p4 = scmp.ne.s32.totalorder %s10110_s19, %s8432_s7  ;;  %p8439_p12 = scmp.lt.u32.totalorder %s8432_s7, %s10110_s19 }
  0x48   : > { %p8435_p10 = pnand %p8433_p4, %p9232_p8 }
  0x4a   : > { %p8436_p11 = pneg %p8435_p10 }
  0x4c   : > { %p8441_p13 = pnand %p8439_p12, %p8436_p11 }
  0x4e   : > { %8444 = shalt.err (!%p8441_p13)
}
  0x4f   : > { %s8445_s25 = scalar_lea.vmem %s9220_s28, 16384  ;;  %p8453_p7 = scmp.lt.s32.totalorder %s9220_s28, %s9220_s28 }
  0x50   : > { %p8446_p0 = scmp.ne.s32.totalorder %s9220_s28, %s8445_s25  ;;  %p8454_p9 = scmp.lt.s32.totalorder %s8445_s25, %s8445_s25 }
  0x52   : > { %p8448_p2 = pnand %p8446_p0, %p9232_p8  ;;  %p8455_p4 = por %p8454_p9, %p8453_p7 }
  0x54   : > { %p8449_p5 = pneg %p8448_p2 }
  0x56   : > { %p8456_p10 = pnand %p8455_p4, %p8449_p5 }
  0x58   : > { %8459 = shalt.err (!%p8456_p10)
}
  0x59   : > { %s10075_s1 = smov 256   ;;  %s10077_s17 = smov 16  }
  0x5a   : > { %8250 = dma.hbm_to_vmem [thread:$0]  (!%p9216_p6), %s10110_s19, 16384, %s9220_s28, [#allocation9], %s10075_s1, %s10075_s1, %s10077_s17  }
  0x5b   : > { %s10111_s5 = sld [smem:[#allocation55_spill]] }
  0x61   : > { %s8460_s0 = scalar_lea.hbm %s10111_s5, 4096 }
  0x62   : > { %p8461_p11 = scmp.ne.s32.totalorder %s10111_s5, %s8460_s0  ;;  %p8467_p0 = scmp.lt.u32.totalorder %s8460_s0, %s10111_s5 }
  0x64   : > { %p8463_p12 = pnand %p8461_p11, %p9232_p8 }
  0x66   : > { %p8464_p13 = pneg %p8463_p12 }
  0x68   : > { %p8469_p2 = pnand %p8467_p0, %p8464_p13 }
  0x6a   : > { %8472 = shalt.err (!%p8469_p2)
}
  0x6b   : > { %s8473_s22 = scalar_lea.vmem %s562_s30, 4096  ;;  %p8481_p4 = scmp.lt.s32.totalorder %s562_s30, %s562_s30 }
  0x6c   : > { %p8474_p5 = scmp.ne.s32.totalorder %s562_s30, %s8473_s22  ;;  %p8482_p10 = scmp.lt.s32.totalorder %s8473_s22, %s8473_s22 }
  0x6e   : > { %p8476_p7 = pnand %p8474_p5, %p9232_p8  ;;  %p8483_p1 = por %p8482_p10, %p8481_p4 }
  0x70   : > { %p8477_p9 = pneg %p8476_p7 }
  0x72   : > { %p8484_p3 = pnand %p8483_p1, %p8477_p9 }
  0x74   : > { %8487 = shalt.err (!%p8484_p3)
}
  0x75   : > { %s10080_s28 = smov 128   ;;  %s10081_s23 = smov 8  }
  0x76   : > { %8256 = dma.hbm_to_vmem [thread:$0]  (!%p9216_p6), %s10111_s5, 4096, %s562_s30, [#allocation12], %s10080_s28, %s10080_s28, %s10081_s23  }
  0x77   : > { %s9051_s0 = smov [#allocation14]   ;;  %s9052_s29 = smov [#allocation17]  }
  0x78   : > { %s589_s21 = sshll.u32 %s9051_s0, 4  ;;  %s613_s7 = sshll.u32 %s9052_s29, 4  ;;  %s590_s21 = int_to_ptr.vmem [resolvable:$true] %s589_s21  ;;  %s614_s7 = int_to_ptr.vmem [resolvable:$true] %s613_s7 }
  0x79   : > { %s10112_s8 = sld [smem:[#allocation58_spill]] }
  0x7f   : > { %s8488_s26 = scalar_lea.hbm %s10112_s8, 16 }
  0x80   : > { %p8489_p1 = scmp.ne.s32.totalorder %s10112_s8, %s8488_s26  ;;  %p8495_p12 = scmp.lt.u32.totalorder %s8488_s26, %s10112_s8 }
  0x82   : > { %p8491_p3 = pnand %p8489_p1, %p9232_p8 }
  0x84   : > { %p8492_p11 = pneg %p8491_p3 }
  0x86   : > { %p8497_p13 = pnand %p8495_p12, %p8492_p11 }
  0x88   : > { %8500 = shalt.err (!%p8497_p13)
}
  0x89   : > { %s8501_s30 = scalar_lea.vmem %s590_s21, 16  ;;  %s8508_s24 = scalar_lea.vmem %s590_s21, 32 }
  0x8a   : > { %p8502_p0 = scmp.ne.s32.totalorder %s590_s21, %s8501_s30  ;;  %p8509_p7 = scmp.lt.s32.totalorder %s590_s21, %s590_s21 }
  0x8b   : > { %p8510_p9 = scmp.lt.s32.totalorder %s8508_s24, %s8501_s30 }
  0x8c   : > { %p8504_p2 = pnand %p8502_p0, %p9232_p8 }
  0x8d   : > { %p8511_p4 = por %p8510_p9, %p8509_p7 }
  0x8e   : > { %p8505_p5 = pneg %p8504_p2 }
  0x90   : > { %p8512_p10 = pnand %p8511_p4, %p8505_p5 }
  0x92   : > { %8515 = shalt.err (!%p8512_p10)
}
  0x93   : > { %8262 = dma.hbm_to_vmem [thread:$0]  (!%p9216_p6), %s10112_s8, 16, %s590_s21, [#allocation15]  }
  0x94   : > { %s8516_s17 = scalar_lea.hbm %s10041_s10, 16 }
  0x95   : > { %p8517_p1 = scmp.ne.s32.totalorder %s10041_s10, %s8516_s17  ;;  %p8523_p12 = scmp.lt.u32.totalorder %s8516_s17, %s10041_s10 }
  0x97   : > { %p8519_p3 = pnand %p8517_p1, %p9232_p8 }
  0x99   : > { %p8520_p11 = pneg %p8519_p3 }
  0x9b   : > { %p8525_p13 = pnand %p8523_p12, %p8520_p11 }
  0x9d   : > { %8528 = shalt.err (!%p8525_p13)
}
  0x9e   : > { %s8529_s22 = scalar_lea.vmem %s614_s7, 16  ;;  %s8536_s21 = scalar_lea.vmem %s614_s7, 32 }
  0x9f   : > { %p8530_p0 = scmp.ne.s32.totalorder %s614_s7, %s8529_s22  ;;  %p8537_p7 = scmp.lt.s32.totalorder %s614_s7, %s614_s7 }
  0xa0   : > { %p8538_p9 = scmp.lt.s32.totalorder %s8536_s21, %s8529_s22 }
  0xa1   : > { %p8532_p2 = pnand %p8530_p0, %p9232_p8 }
  0xa2   : > { %p8539_p4 = por %p8538_p9, %p8537_p7 }
  0xa3   : > { %p8533_p5 = pneg %p8532_p2 }
  0xa5   : > { %p8540_p10 = pnand %p8539_p4, %p8533_p5 }
  0xa7   : > { %8543 = shalt.err (!%p8540_p10)
}
  0xa8   : > { %8268 = dma.hbm_to_vmem [thread:$0]  (!%p9216_p6), %s10041_s10, 16, %s614_s7, [#allocation18]  }
  0xa9   : > { %s9053_s20 = smov [#allocation20]   ;;  %s9054_s2 = smov [#allocation23]  }
  0xaa   : > { %s636_s1 = sshll.u32 %s9053_s20, 4  ;;  %s660_s26 = sshll.u32 %s9054_s2, 4  ;;  %s637_s1 = int_to_ptr.vmem [resolvable:$true] %s636_s1  ;;  %s661_s26 = int_to_ptr.vmem [resolvable:$true] %s660_s26 }
  0xab   : > { %s8544_s0 = scalar_lea.hbm %s10043_s12, 4096 }
  0xac   : > { %p8545_p1 = scmp.ne.s32.totalorder %s10043_s12, %s8544_s0  ;;  %p8551_p12 = scmp.lt.u32.totalorder %s8544_s0, %s10043_s12 }
  0xae   : > { %p8547_p3 = pnand %p8545_p1, %p9232_p8 }
  0xb0   : > { %p8548_p11 = pneg %p8547_p3 }
  0xb2   : > { %p8553_p13 = pnand %p8551_p12, %p8548_p11 }
  0xb4   : > { %8556 = shalt.err (!%p8553_p13)
}
  0xb5   : > { %s8557_s7 = scalar_lea.vmem %s637_s1, 4096  ;;  %p8565_p7 = scmp.lt.s32.totalorder %s637_s1, %s637_s1 }
  0xb6   : > { %p8558_p0 = scmp.ne.s32.totalorder %s637_s1, %s8557_s7  ;;  %p8566_p9 = scmp.lt.s32.totalorder %s8557_s7, %s8557_s7 }
  0xb8   : > { %p8560_p2 = pnand %p8558_p0, %p9232_p8  ;;  %p8567_p4 = por %p8566_p9, %p8565_p7 }
  0xba   : > { %p8561_p5 = pneg %p8560_p2 }
  0xbc   : > { %p8568_p10 = pnand %p8567_p4, %p8561_p5 }
  0xbe   : > { %8571 = shalt.err (!%p8568_p10)
}
  0xbf   : > { %s10113_s30 = smov 16   ;;  %s10114_s24 = smov 256  }
  0xc0   : > { %8274 = dma.hbm_to_vmem [thread:$0]  (!%p9216_p6), %s10043_s12, 4096, %s637_s1, [#allocation21], %s10114_s24, %s10114_s24, %s10113_s30  }
  0xc1   : > { %s8572_s0 = scalar_lea.hbm %s10045_s14, 16384 }
  0xc2   : > { %p8573_p1 = scmp.ne.s32.totalorder %s10045_s14, %s8572_s0  ;;  %p8579_p12 = scmp.lt.u32.totalorder %s8572_s0, %s10045_s14 }
  0xc4   : > { %p8575_p3 = pnand %p8573_p1, %p9232_p8 }
  0xc6   : > { %p8576_p11 = pneg %p8575_p3 }
  0xc8   : > { %p8581_p13 = pnand %p8579_p12, %p8576_p11 }
  0xca   : > { %8584 = shalt.err (!%p8581_p13)
}
  0xcb   : > { %s8585_s7 = scalar_lea.vmem %s661_s26, 16384  ;;  %p8593_p7 = scmp.lt.s32.totalorder %s661_s26, %s661_s26 }
  0xcc   : > { %p8586_p0 = scmp.ne.s32.totalorder %s661_s26, %s8585_s7  ;;  %p8594_p9 = scmp.lt.s32.totalorder %s8585_s7, %s8585_s7 }
  0xce   : > { %p8588_p2 = pnand %p8586_p0, %p9232_p8  ;;  %p8595_p4 = por %p8594_p9, %p8593_p7 }
  0xd0   : > { %p8589_p5 = pneg %p8588_p2 }
  0xd2   : > { %p8596_p10 = pnand %p8595_p4, %p8589_p5 }
  0xd4   : > { %8599 = shalt.err (!%p8596_p10)
}
  0xd5   : > { %s10115_s1 = smov 32   ;;  %s10116_s20 = smov 512  }
  0xd6   : > { %8280 = dma.hbm_to_vmem [thread:$0]  (!%p9216_p6), %s10045_s14, 16384, %s661_s26, [#allocation24], %s10116_s20, %s10116_s20, %s10115_s1  }
  0xd7   : > { %s9055_s3 = smov [#allocation26]   ;;  %s8600_s22 = scalar_lea.hbm %s10047_s16, 64 }
  0xd8   : > { %s687_s0 = sshll.u32 %s9055_s3, 4  ;;  %p8601_p1 = scmp.ne.s32.totalorder %s10047_s16, %s8600_s22  ;;  %s688_s0 = int_to_ptr.vmem [resolvable:$true] %s687_s0 }
  0xd9   : > { %p8607_p12 = scmp.lt.u32.totalorder %s8600_s22, %s10047_s16 }
  0xda   : > { %p8603_p3 = pnand %p8601_p1, %p9232_p8 }
  0xdc   : > { %p8604_p11 = pneg %p8603_p3 }
  0xde   : > { %p8609_p13 = pnand %p8607_p12, %p8604_p11 }
  0xe0   : > { %8612 = shalt.err (!%p8609_p13)
}
  0xe1   : > { %s8613_s26 = scalar_lea.vmem %s688_s0, 64  ;;  %p8621_p7 = scmp.lt.s32.totalorder %s688_s0, %s688_s0 }
  0xe2   : > { %p8614_p0 = scmp.ne.s32.totalorder %s688_s0, %s8613_s26  ;;  %p8622_p9 = scmp.lt.s32.totalorder %s8613_s26, %s8613_s26 }
  0xe4   : > { %p8616_p2 = pnand %p8614_p0, %p9232_p8  ;;  %p8623_p4 = por %p8622_p9, %p8621_p7 }
  0xe6   : > { %p8617_p5 = pneg %p8616_p2 }
  0xe8   : > { %p8624_p10 = pnand %p8623_p4, %p8617_p5 }
  0xea   : > { %8627 = shalt.err (!%p8624_p10)
}
  0xeb   : > { %8286 = dma.hbm_to_vmem [thread:$0]  (!%p9216_p6), %s10047_s16, 64, %s688_s0, [#allocation27]  }
  0xec   : > { %s9056_s28 = smov [#allocation29]   ;;  %s9057_s3 = smov [#allocation7]  }
  0xed   : > { %s710_s23 = sshll.u32 %s9056_s28, 4  ;;  %s527_s29 = sshll.u32 %s9057_s3, 4  ;;  %s711_s23 = int_to_ptr.vmem [resolvable:$true] %s710_s23  ;;  %s9400_s29 = int_to_ptr.vmem [resolvable:$true] %s527_s29 }
  0xee   : > { %s8628_s21 = scalar_lea.hbm %s10049_s18, 65536 }
  0xef   : > { %p8629_p1 = scmp.ne.s32.totalorder %s10049_s18, %s8628_s21  ;;  %p8635_p12 = scmp.lt.u32.totalorder %s8628_s21, %s10049_s18 }
  0xf1   : > { %p8631_p3 = pnand %p8629_p1, %p9232_p8 }
  0xf3   : > { %p8632_p11 = pneg %p8631_p3 }
  0xf5   : > { %p8637_p13 = pnand %p8635_p12, %p8632_p11 }
  0xf7   : > { %8640 = shalt.err (!%p8637_p13)
}
  0xf8   : > { %s8641_s17 = scalar_lea.vmem %s711_s23, 65536  ;;  %p8649_p7 = scmp.lt.s32.totalorder %s711_s23, %s711_s23 }
  0xf9   : > { %p8642_p0 = scmp.ne.s32.totalorder %s711_s23, %s8641_s17  ;;  %p8650_p9 = scmp.lt.s32.totalorder %s8641_s17, %s8641_s17 }
  0xfb   : > { %p8644_p2 = pnand %p8642_p0, %p9232_p8  ;;  %p8651_p4 = por %p8650_p9, %p8649_p7 }
  0xfd   : > { %p8645_p5 = pneg %p8644_p2 }
  0xff   : > { %p8652_p10 = pnand %p8651_p4, %p8645_p5 }
 0x101   : > { %8655 = shalt.err (!%p8652_p10)
}
 0x102   : > { %s10082_s28 = smov 1024   ;;  %s10083_s3 = smov 64  }
 0x103   : > { %8292 = dma.hbm_to_vmem [thread:$0]  (!%p9216_p6), %s10049_s18, 65536, %s711_s23, [#allocation30], %s10082_s28, %s10082_s28, %s10083_s3  }
 0x104   : > { %s10117_s26 = sld [smem:[#allocation52_spill]] }
 0x10a   : > { %s8656_s2 = scalar_lea.hbm %s10117_s26, 64 }
 0x10b   : > { %p8657_p1 = scmp.ne.s32.totalorder %s10117_s26, %s8656_s2  ;;  %p8663_p12 = scmp.lt.u32.totalorder %s8656_s2, %s10117_s26 }
 0x10d   : > { %p8659_p3 = pnand %p8657_p1, %p9232_p8 }
 0x10f   : > { %p8660_p11 = pneg %p8659_p3 }
 0x111   : > { %p8665_p13 = pnand %p8663_p12, %p8660_p11 }
 0x113   : > { %8668 = shalt.err (!%p8665_p13)
}
 0x114   : > { %s8669_s23 = scalar_lea.vmem %s9400_s29, 64  ;;  %p8677_p7 = scmp.lt.s32.totalorder %s9400_s29, %s9400_s29 }
 0x115   : > { %p8670_p0 = scmp.ne.s32.totalorder %s9400_s29, %s8669_s23  ;;  %p8678_p9 = scmp.lt.s32.totalorder %s8669_s23, %s8669_s23 }
 0x117   : > { %p8672_p2 = pnand %p8670_p0, %p9232_p8  ;;  %p8679_p4 = por %p8678_p9, %p8677_p7 }
 0x119   : > { %p8673_p5 = pneg %p8672_p2 }
 0x11b   : > { %p8680_p10 = pnand %p8679_p4, %p8673_p5 }
 0x11d   : > { %8683 = shalt.err (!%p8680_p10)
}
 0x11e   : > { %8247 = dma.hbm_to_vmem [thread:$0]  (!%p9216_p6), %s10117_s26, 64, %s9400_s29, [#allocation6]  }
 0x11f   : > { %s9060_s25 = smov [#allocation10]   ;;  %s9061_s21 = smov [#allocation13]  }
 0x120   : > { %s551_s22 = sshll.u32 %s9060_s25, 4  ;;  %s575_s7 = sshll.u32 %s9061_s21, 4  ;;  %s552_s22 = int_to_ptr.vmem [resolvable:$true] %s551_s22  ;;  %s9446_s7 = int_to_ptr.vmem [resolvable:$true] %s575_s7 }
 0x121   : > { %s10118_s17 = sld [smem:[#allocation54_spill]] }
 0x127   : > { %s8684_s23 = scalar_lea.hbm %s10118_s17, 32 }
 0x128   : > { %p8685_p1 = scmp.ne.s32.totalorder %s10118_s17, %s8684_s23  ;;  %p8691_p12 = scmp.lt.u32.totalorder %s8684_s23, %s10118_s17 }
 0x12a   : > { %p8687_p3 = pnand %p8685_p1, %p9232_p8 }
 0x12c   : > { %p8688_p11 = pneg %p8687_p3 }
 0x12e   : > { %p8693_p13 = pnand %p8691_p12, %p8688_p11 }
 0x130   : > { %8696 = shalt.err (!%p8693_p13)
}
 0x131   : > { %s8697_s8 = scalar_lea.vmem %s552_s22, 32  ;;  %p8705_p7 = scmp.lt.s32.totalorder %s552_s22, %s552_s22 }
 0x132   : > { %p8698_p0 = scmp.ne.s32.totalorder %s552_s22, %s8697_s8  ;;  %p8706_p9 = scmp.lt.s32.totalorder %s8697_s8, %s8697_s8 }
 0x134   : > { %p8700_p2 = pnand %p8698_p0, %p9232_p8  ;;  %p8707_p4 = por %p8706_p9, %p8705_p7 }
 0x136   : > { %p8701_p5 = pneg %p8700_p2 }
 0x138   : > { %p8708_p10 = pnand %p8707_p4, %p8701_p5 }
 0x13a   : > { %8711 = shalt.err (!%p8708_p10)
}
 0x13b   : > { %8253 = dma.hbm_to_vmem [thread:$0]  (!%p9216_p6), %s10118_s17, 32, %s552_s22, [#allocation9]  }
 0x13c   : > { %s10119_s6 = sld [smem:[#allocation56_spill]] }
 0x142   : > { %s8712_s2 = scalar_lea.hbm %s10119_s6, 16 }
 0x143   : > { %p8713_p1 = scmp.ne.s32.totalorder %s10119_s6, %s8712_s2  ;;  %p8719_p12 = scmp.lt.u32.totalorder %s8712_s2, %s10119_s6 }
 0x145   : > { %p8715_p3 = pnand %p8713_p1, %p9232_p8 }
 0x147   : > { %p8716_p11 = pneg %p8715_p3 }
 0x149   : > { %p8721_p13 = pnand %p8719_p12, %p8716_p11 }
 0x14b   : > { %8724 = shalt.err (!%p8721_p13)
}
 0x14c   : > { %s8725_s22 = scalar_lea.vmem %s9446_s7, 16  ;;  %s8732_s8 = scalar_lea.vmem %s9446_s7, 32 }
 0x14d   : > { %p8726_p0 = scmp.ne.s32.totalorder %s9446_s7, %s8725_s22  ;;  %p8733_p7 = scmp.lt.s32.totalorder %s9446_s7, %s9446_s7 }
 0x14e   : > { %p8734_p9 = scmp.lt.s32.totalorder %s8732_s8, %s8725_s22 }
 0x14f   : > { %p8728_p2 = pnand %p8726_p0, %p9232_p8 }
 0x150   : > { %p8735_p4 = por %p8734_p9, %p8733_p7 }
 0x151   : > { %p8729_p5 = pneg %p8728_p2 }
 0x153   : > { %p8736_p10 = pnand %p8735_p4, %p8729_p5 }
 0x155   : > { %8739 = shalt.err (!%p8736_p10)
}
 0x156   : > { %8259 = dma.hbm_to_vmem [thread:$0]  (!%p9216_p6), %s10119_s6, 16, %s9446_s7, [#allocation12]  }
 0x157   : > { %s9062_s25 = smov [#allocation16]   ;;  %s9063_s2 = smov [#allocation19]  }
 0x158   : > { %s599_s21 = sshll.u32 %s9062_s25, 4  ;;  %s623_s0 = sshll.u32 %s9063_s2, 4  ;;  %s600_s21 = int_to_ptr.vmem [resolvable:$true] %s599_s21  ;;  %s9490_s0 = int_to_ptr.vmem [resolvable:$true] %s623_s0 }
 0x159   : > { %s8740_s29 = scalar_lea.hbm %s10040_s9, 512 }
 0x15a   : > { %p8741_p1 = scmp.ne.s32.totalorder %s10040_s9, %s8740_s29  ;;  %p8747_p12 = scmp.lt.u32.totalorder %s8740_s29, %s10040_s9 }
 0x15c   : > { %p8743_p3 = pnand %p8741_p1, %p9232_p8 }
 0x15e   : > { %p8744_p11 = pneg %p8743_p3 }
 0x160   : > { %p8749_p13 = pnand %p8747_p12, %p8744_p11 }
 0x162   : > { %8752 = shalt.err (!%p8749_p13)
}
 0x163   : > { %s8753_s3 = scalar_lea.vmem %s600_s21, 512  ;;  %p8761_p7 = scmp.lt.s32.totalorder %s600_s21, %s600_s21 }
 0x164   : > { %p8754_p0 = scmp.ne.s32.totalorder %s600_s21, %s8753_s3  ;;  %p8762_p9 = scmp.lt.s32.totalorder %s8753_s3, %s8753_s3 }
 0x166   : > { %p8756_p2 = pnand %p8754_p0, %p9232_p8  ;;  %p8763_p4 = por %p8762_p9, %p8761_p7 }
 0x168   : > { %p8757_p5 = pneg %p8756_p2 }
 0x16a   : > { %p8764_p10 = pnand %p8763_p4, %p8757_p5 }
 0x16c   : > { %8767 = shalt.err (!%p8764_p10)
}
 0x16d   : > { %s10120_s25 = smov 8   ;;  %s10121_s2 = smov 128  }
 0x16e   : > { %8265 = dma.hbm_to_vmem [thread:$0]  (!%p9216_p6), %s10040_s9, 512, %s600_s21, [#allocation15], %s10121_s2, %s10121_s2, %s10120_s25  }
 0x16f   : > { %s8768_s8 = scalar_lea.hbm %s10042_s11, 4096 }
 0x170   : > { %p8769_p1 = scmp.ne.s32.totalorder %s10042_s11, %s8768_s8  ;;  %p8775_p12 = scmp.lt.u32.totalorder %s8768_s8, %s10042_s11 }
 0x172   : > { %p8771_p3 = pnand %p8769_p1, %p9232_p8 }
 0x174   : > { %p8772_p11 = pneg %p8771_p3 }
 0x176   : > { %p8777_p13 = pnand %p8775_p12, %p8772_p11 }
 0x178   : > { %8780 = shalt.err (!%p8777_p13)
}
 0x179   : > { %s8781_s21 = scalar_lea.vmem %s9490_s0, 4096  ;;  %p8789_p7 = scmp.lt.s32.totalorder %s9490_s0, %s9490_s0 }
 0x17a   : > { %p8782_p0 = scmp.ne.s32.totalorder %s9490_s0, %s8781_s21  ;;  %p8790_p9 = scmp.lt.s32.totalorder %s8781_s21, %s8781_s21 }
 0x17c   : > { %p8784_p2 = pnand %p8782_p0, %p9232_p8  ;;  %p8791_p4 = por %p8790_p9, %p8789_p7 }
 0x17e   : > { %p8785_p5 = pneg %p8784_p2 }
 0x180   : > { %p8792_p10 = pnand %p8791_p4, %p8785_p5 }
 0x182   : > { %8795 = shalt.err (!%p8792_p10)
}
 0x183   : > { %8271 = dma.hbm_to_vmem [thread:$0]  (!%p9216_p6), %s10042_s11, 4096, %s9490_s0, [#allocation18], %s10114_s24, %s10114_s24, %s10113_s30  }
 0x184   : > { %s9064_s2 = smov [#allocation22]   ;;  %s9065_s5 = smov [#allocation25]  }
 0x185   : > { %s650_s23 = sshll.u32 %s9064_s2, 4  ;;  %s673_s29 = sshll.u32 %s9065_s5, 4  ;;  %s651_s23 = int_to_ptr.vmem [resolvable:$true] %s650_s23  ;;  %s9539_s29 = int_to_ptr.vmem [resolvable:$true] %s673_s29 }
 0x186   : > { %s8796_s28 = scalar_lea.hbm %s10044_s13, 32 }
 0x187   : > { %p8797_p1 = scmp.ne.s32.totalorder %s10044_s13, %s8796_s28  ;;  %p8803_p12 = scmp.lt.u32.totalorder %s8796_s28, %s10044_s13 }
 0x189   : > { %p8799_p3 = pnand %p8797_p1, %p9232_p8 }
 0x18b   : > { %p8800_p11 = pneg %p8799_p3 }
 0x18d   : > { %p8805_p13 = pnand %p8803_p12, %p8800_p11 }
 0x18f   : > { %8808 = shalt.err (!%p8805_p13)
}
 0x190   : > { %s8809_s24 = scalar_lea.vmem %s651_s23, 32  ;;  %p8817_p7 = scmp.lt.s32.totalorder %s651_s23, %s651_s23 }
 0x191   : > { %p8810_p0 = scmp.ne.s32.totalorder %s651_s23, %s8809_s24  ;;  %p8818_p9 = scmp.lt.s32.totalorder %s8809_s24, %s8809_s24 }
 0x193   : > { %p8812_p2 = pnand %p8810_p0, %p9232_p8  ;;  %p8819_p4 = por %p8818_p9, %p8817_p7 }
 0x195   : > { %p8813_p5 = pneg %p8812_p2 }
 0x197   : > { %p8820_p10 = pnand %p8819_p4, %p8813_p5 }
 0x199   : > { %8823 = shalt.err (!%p8820_p10)
}
 0x19a   : > { %8277 = dma.hbm_to_vmem [thread:$0]  (!%p9216_p6), %s10044_s13, 32, %s651_s23, [#allocation21]  }
 0x19b   : > { %s8824_s5 = scalar_lea.hbm %s10046_s15, 16384 }
 0x19c   : > { %p8825_p1 = scmp.ne.s32.totalorder %s10046_s15, %s8824_s5  ;;  %p8831_p12 = scmp.lt.u32.totalorder %s8824_s5, %s10046_s15 }
 0x19e   : > { %p8827_p3 = pnand %p8825_p1, %p9232_p8 }
 0x1a0   : > { %p8828_p11 = pneg %p8827_p3 }
 0x1a2   : > { %p8833_p13 = pnand %p8831_p12, %p8828_p11 }
 0x1a4   : > { %8836 = shalt.err (!%p8833_p13)
}
 0x1a5   : > { %s8837_s23 = scalar_lea.vmem %s9539_s29, 16384  ;;  %p8845_p7 = scmp.lt.s32.totalorder %s9539_s29, %s9539_s29 }
 0x1a6   : > { %p8838_p0 = scmp.ne.s32.totalorder %s9539_s29, %s8837_s23  ;;  %p8846_p9 = scmp.lt.s32.totalorder %s8837_s23, %s8837_s23 }
 0x1a8   : > { %p8840_p2 = pnand %p8838_p0, %p9232_p8  ;;  %p8847_p4 = por %p8846_p9, %p8845_p7 }
 0x1aa   : > { %p8841_p5 = pneg %p8840_p2 }
 0x1ac   : > { %p8848_p10 = pnand %p8847_p4, %p8841_p5 }
 0x1ae   : > { %8851 = shalt.err (!%p8848_p10)
}
 0x1af   : > { %8283 = dma.hbm_to_vmem [thread:$0]  (!%p9216_p6), %s10046_s15, 16384, %s9539_s29, [#allocation24], %s10116_s20, %s10116_s20, %s10115_s1  }
 0x1b0   : > { %s9066_s30 = smov [#allocation28]   ;;  %s9067_s0 = smov [#allocation31]  }
 0x1b1   : > { %s697_s24 = sshll.u32 %s9066_s30, 4  ;;  %s724_s6 = sshll.u32 %s9067_s0, 4  ;;  %s698_s24 = int_to_ptr.vmem [resolvable:$true] %s697_s24  ;;  %s9585_s6 = int_to_ptr.vmem [resolvable:$true] %s724_s6 }
 0x1b2   : > { %s10122_s5 = sld [smem:[#allocation59_spill]] }
 0x1b8   : > { %s8852_s22 = scalar_lea.hbm %s10122_s5, 65536 }
 0x1b9   : > { %p8853_p1 = scmp.ne.s32.totalorder %s10122_s5, %s8852_s22  ;;  %p8859_p12 = scmp.lt.u32.totalorder %s8852_s22, %s10122_s5 }
 0x1bb   : > { %p8855_p3 = pnand %p8853_p1, %p9232_p8 }
 0x1bd   : > { %p8856_p11 = pneg %p8855_p3 }
 0x1bf   : > { %p8861_p13 = pnand %p8859_p12, %p8856_p11 }
 0x1c1   : > { %8864 = shalt.err (!%p8861_p13)
}
 0x1c2   : > { %s8865_s20 = scalar_lea.vmem %s698_s24, 65536  ;;  %p8873_p7 = scmp.lt.s32.totalorder %s698_s24, %s698_s24 }
 0x1c3   : > { %p8866_p0 = scmp.ne.s32.totalorder %s698_s24, %s8865_s20  ;;  %p8874_p9 = scmp.lt.s32.totalorder %s8865_s20, %s8865_s20 }
 0x1c5   : > { %p8868_p2 = pnand %p8866_p0, %p9232_p8  ;;  %p8875_p4 = por %p8874_p9, %p8873_p7 }
 0x1c7   : > { %p8869_p5 = pneg %p8868_p2 }
 0x1c9   : > { %p8876_p10 = pnand %p8875_p4, %p8869_p5 }
 0x1cb   : > { %8879 = shalt.err (!%p8876_p10)
}
 0x1cc   : > { %s10123_s29 = smov 64   ;;  %s10124_s23 = smov 1024  }
 0x1cd   : > { %8289 = dma.hbm_to_vmem [thread:$0]  (!%p9216_p6), %s10122_s5, 65536, %s698_s24, [#allocation27], %s10124_s23, %s10124_s23, %s10123_s29  }
 0x1ce   : > { %s10125_s25 = sld [smem:[#allocation60_spill]] }
 0x1d4   : > { %s8880_s2 = scalar_lea.hbm %s10125_s25, 128 }
 0x1d5   : > { %p8881_p1 = scmp.ne.s32.totalorder %s10125_s25, %s8880_s2  ;;  %p8887_p12 = scmp.lt.u32.totalorder %s8880_s2, %s10125_s25 }
 0x1d7   : > { %p8883_p3 = pnand %p8881_p1, %p9232_p8 }
 0x1d9   : > { %p8884_p11 = pneg %p8883_p3 }
 0x1db   : > { %p8889_p13 = pnand %p8887_p12, %p8884_p11 }
 0x1dd   : > { %8892 = shalt.err (!%p8889_p13)
}
 0x1de   : > { %s8893_s24 = scalar_lea.vmem %s9585_s6, 128  ;;  %p8901_p7 = scmp.lt.s32.totalorder %s9585_s6, %s9585_s6 }
 0x1df   : > { %p8894_p0 = scmp.ne.s32.totalorder %s9585_s6, %s8893_s24  ;;  %p8902_p9 = scmp.lt.s32.totalorder %s8893_s24, %s8893_s24 }
 0x1e1   : > { %p8896_p2 = pnand %p8894_p0, %p9232_p8  ;;  %p8903_p4 = por %p8902_p9, %p8901_p7 }
 0x1e3   : > { %p8897_p5 = pneg %p8896_p2 }
 0x1e5   : > { %p8904_p10 = pnand %p8903_p4, %p8897_p5 }
 0x1e7   : > { %8907 = shalt.err (!%p8904_p10)
}
 0x1e8   : > { %s10126_s29 = sld [smem:[#allocation47_spill]]  ;;  %s10127_s23 = sld [smem:[#allocation46_spill]] }
 0x1e9   : > { %s10128_s3 = sld [smem:[#allocation45_spill]]  ;;  %s10129_s27 = sld [smem:[#allocation44_spill]] }
 0x1ea   : > { %s10130_s21 = sld [smem:[#allocation48_spill]] }
 0x1eb   : > { %8295 = dma.hbm_to_vmem [thread:$0]  (!%p9216_p6), %s10125_s25, 128, %s9585_s6, [#allocation30]  }
 0x1ee   : > { %s5913_s4 = sadd.s32 4294967294, %s10126_s29   ;;  %s9633_s24 = sadd.s32 1, %s10126_s29  }
 0x1ef   : > { %s49_s30 = ssub.s32 %s10126_s29, %s9633_s24  ;;  %s52_s0 = sadd.s32 1, %s10127_s23 }
 0x1f0   : > { %p50_p8 = scmp.eq.s32.totalorder %s49_s30, 0  ;;  %p59_p1 = scmp.ne.s32.totalorder %s10127_s23, %s10128_s3 }
 0x1f1   : > { %p60_p3 = scmp.eq.s32.totalorder %s10126_s29, 0  ;;  %p65_p11 = scmp.ne.s32.totalorder %s10128_s3, %s10129_s27 }
 0x1f2   : > { %s9644_s2 = scalar_select %p50_p8, %s10127_s23, %s52_s0  }
 0x1f3   : > { %p9646_p12 = por %p60_p3, %p59_p1  ;;  %p10132_p13 = scmp.eq.s32.totalorder %s10130_s21, 0 }
 0x1f4   : > { %p488_p0 = scmp.eq.s32.totalorder %s10130_s21, 1  ;;  %p494_p2 = scmp.eq.s32.totalorder %s5913_s4, 1 }
 0x1f5   : > { %p9652_p6 = por %p10132_p13, %p65_p11  ;;  %p8322_p5 = scmp.lt.s32.totalorder %s10126_s29, 2 }
 0x1f6   : > { %s735_s8 = sand.u32 1, %s10127_s23   ;;  %p9659_p7 = por %p488_p0, %p59_p1 }
 0x1f7   : > { %p9663_p9 = por %p494_p2, %p65_p11  ;;  %s5934_s1 = sshll.u32 %s735_s8, 3 }
 0x1f8   : > { %s10134_s28 = scalar_select %p9659_p7, 1, 0 }
 0x1f9   : > { %s10135_s7 = scalar_select %p9663_p9, 1, 0 }
 0x1fa   : > { %s5964_s20 = sshll.u32 %s10126_s29, 7  ;;  %s10136_s30 = sld [smem:[#allocation50_spill]] }
 0x1fb   : > { %s739_s23 = scalar_lea.vmem [#allocation2], %s5934_s1  ;;  %p9677_p4 = pnand %p8322_p5, %p9646_p12 }
 0x1fc   : > { %s747_s21 = sshll.u32 %s739_s23, 4  ;;  %s736_s29 = scalar_lea.sflag [#allocation3], %s735_s8  ;;  %s9673_s21 = int_to_ptr.vmem [resolvable:$true] %s747_s21 }
 0x1fd   : > { %p8910_p8 = pneg %p9677_p4 }
 0x200   : > { %s9671_s0 = scalar_lea.hbm %s10136_s30, %s5964_s20  ;;  %s8913_s3 = scalar_lea.hbm %s10136_s30, 256 }
 0x201   : > { %s8908_s5 = scalar_lea.hbm %s9671_s0, 128  ;;  %p8914_p11 = scmp.lt.u32.totalorder %s9671_s0, %s10136_s30 }
 0x202   : > { %p8909_p10 = scmp.ne.s32.totalorder %s9671_s0, %s8908_s5  ;;  %p8915_p12 = scmp.lt.u32.totalorder %s8913_s3, %s8908_s5 }
 0x203   : > { %p8917_p0 = scmp.lt.u32.totalorder %s8908_s5, %s9671_s0 }
 0x204   : > { %p8911_p1 = pnand %p8910_p8, %p8909_p10  ;;  %p8916_p13 = por %p8915_p12, %p8914_p11 }
 0x206   : > { %p8912_p3 = pneg %p8911_p1  ;;  %p8918_p2 = por %p8917_p0, %p8916_p13 }
 0x208   : > { %p8919_p5 = pnand %p8918_p2, %p8912_p3 }
 0x20a   : > { %8922 = shalt.err (!%p8919_p5)
}
 0x20b   : > { %s8923_s8 = scalar_lea.vmem %s9673_s21, 128  ;;  %s9068_s23 = smov [#allocation2]  }
 0x20c   : > { %p8924_p10 = scmp.ne.s32.totalorder %s9673_s21, %s8923_s8  ;;  %s8928_s1 = sshll.u32 %s9068_s23, 4  ;;  %s8929_s1 = int_to_ptr.vmem [resolvable:$false] %s8928_s1 }
 0x20d   : > { %s8930_s20 = scalar_lea.vmem %s8929_s1, 256  ;;  %p8931_p7 = scmp.lt.s32.totalorder %s9673_s21, %s8929_s1 }
 0x20e   : > { %p8926_p1 = pnand %p8924_p10, %p8910_p8  ;;  %p8932_p11 = scmp.lt.s32.totalorder %s8930_s20, %s8923_s8 }
 0x210   : > { %p8927_p9 = pneg %p8926_p1  ;;  %p8933_p12 = por %p8932_p11, %p8931_p7 }
 0x212   : > { %p8934_p13 = pnand %p8933_p12, %p8927_p9 }
 0x214   : > { %8937 = shalt.err (!%p8934_p13)
}
 0x215   : > { %8299 = dma.hbm_to_vmem [thread:$0]  (!%p9677_p4), %s9671_s0, 128, %s9673_s21, %s736_s29  }
 0x216   : > { %s10138_s5 = sld [smem:[#allocation49_spill]] }
 0x21c   : > { %p10139_p3 = scmp.ne.s32.totalorder %s10138_s5, 0 }
 0x21d   : > { %s10140_s3 = sld [smem:[#allocation45_spill]] (!%p10139_p3) }
 0x21e   : > { %756 = sbr.rel (%p10139_p3) target bundleno = 2965 (0xb95), region = 100 }
 0x223   : > { %s9709_s22 = sand.u32 (!%p10139_p3), 1, %s10140_s3  }
 0x224   : > { %s5938_s27 = sshll.u32 (!%p10139_p3), %s9709_s22, 3  ;;  %s759_s8 = scalar_lea.sflag (!%p10139_p3), [#allocation3], %s9709_s22 }
 0x225   : > { %s9715_s23 = scalar_lea.vmem [#allocation2], %s5938_s27 }
 0x226   : > { %8983 = dma.done.wait (%p9652_p6), %s759_s8, 128  }
 0x227   : > { %8985 = vsyncadd (%p9652_p6), %s759_s8, 4294967168  ;;  %s10141_s0 = sld [smem:[#allocation48_spill]] }
 0x22d   : > { %p10142_p7 = scmp.eq.s32.totalorder %s10141_s0, 0 }
 0x22f   : > { %8987 = dma.done.wait (%p10142_p7), [#allocation6], 65600   ;;  %p10143_p9 = pmov %p10142_p7 }
 0x230   : > { %p10144_p4 = pmov %p10142_p7 }
 0x231   : > { %8989 = vsyncadd (%p10143_p9), [#allocation6], 4294901696 }
 0x232   : > { %8991 = dma.done.wait (%p10144_p4), [#allocation9], 16416   ;;  %p10145_p8 = pmov %p10144_p4 }
 0x233   : > { %p10146_p0 = pmov %p10144_p4 }
 0x234   : > { %8993 = vsyncadd (%p10145_p8), [#allocation9], 4294950880 }
 0x235   : > { %8995 = dma.done.wait (%p10146_p0), [#allocation12], 4112   ;;  %p10147_p2 = pmov %p10146_p0 }
 0x236   : > { %p10148_p6 = pmov %p10146_p0 }
 0x237   : > { %8997 = vsyncadd (%p10147_p2), [#allocation12], 4294963184 }
 0x238   : > { %8999 = dma.done.wait (%p10148_p6), [#allocation15], 528   ;;  %p10149_p5 = pmov %p10146_p0 }
 0x239   : > { %p10150_p10 = pmov %p10146_p0 }
 0x23a   : > { %9001 = vsyncadd (%p10149_p5), [#allocation15], 4294966768 }
 0x23b   : > { %9003 = dma.done.wait (%p10150_p10), [#allocation18], 4112   ;;  %p10151_p1 = pmov %p10146_p0 }
 0x23c   : > { %p10152_p11 = pmov %p10146_p0 }
 0x23d   : > { %9005 = vsyncadd (%p10151_p1), [#allocation18], 4294963184 }
 0x23e   : > { %9007 = dma.done.wait (%p10152_p11), [#allocation21], 4128   ;;  %p10153_p12 = pmov %p10146_p0 }
 0x23f   : > { %p10154_p13 = pmov %p10146_p0 }
 0x240   : > { %9009 = vsyncadd (%p10153_p12), [#allocation21], 4294963168 }
 0x241   : > { %9011 = dma.done.wait (%p10154_p13), [#allocation24], 32768   ;;  %p10155_p3 = pmov %p10146_p0 }
 0x242   : > { %p10156_p7 = pmov %p10146_p0 }
 0x243   : > { %9013 = vsyncadd (%p10155_p3), [#allocation24], 4294934528 }
 0x244   : > { %9015 = dma.done.wait (%p10156_p7), [#allocation27], 65600   ;;  %p10157_p9 = pmov %p10146_p0 }
 0x245   : > { %p10158_p4 = pmov %p10146_p0 }
 0x246   : > { %9017 = vsyncadd (%p10157_p9), [#allocation27], 4294901696 }
 0x247   : > { %9019 = dma.done.wait (%p10158_p4), [#allocation30], 65664   ;;  %p10159_p8 = pmov %p10146_p0 }
 0x248   : > { %v894_v0 = vld [vmem:[#allocation5 + $0x8] sm:$0xff]  ;;  %v896_v2 = vld [vmem:[#allocation5 + $0x18] sm:$0xff]  ;;  %v893_v5 = vld [vmem:[#allocation5] sm:$0xff]  ;;  %s10160_s4 = sld [smem:[#allocation57_spill]]  ;;  %vm9070_vm0 = vmmov 0   ;;  %vm2521_vm1 = vcmask 261120  }
 0x249   : > { %9021 = vsyncadd (%p10159_p8), [#allocation30], 4294901632  ;;  %v898_v1 = vld [vmem:[#allocation5 + $0x28] sm:$0xff]  ;;  %v900_v4 = vld [vmem:[#allocation5 + $0x38] sm:$0xff]  ;;  %s5965_s5 = sshll.u32 %s10141_s0, 7  ;;  %s890_s3 = scalar_lea.vmem [#allocation32], %s5938_s27 }
 0x24a   : > { %v6069_v3 = vpack.c.bf16 %v898_v1, %v894_v0  ;;  %v897_v6 = vld [vmem:[#allocation5 + $0x20] sm:$0xff]  ;;  %v6325_v7 = vpack.c.bf16 %v900_v4, %v896_v2  ;;  %v895_v9 = vld [vmem:[#allocation5 + $0x10] sm:$0xff]  ;;  %v902_v11 = vld [vmem:[#allocation5 + $0x48] sm:$0xff]  ;;  %s5672_s8 = sshll.u32 %s890_s3, 4  ;;  %s10161_s21 = sld [smem:[#allocation61_spill]]  ;;  %s9989_s8 = int_to_ptr.vmem [resolvable:$true] %s5672_s8 }
 0x24b   : > { %v6071_v8 = vpack.c.bf16 %v897_v6, %v893_v5  ;;  %v899_v10 = vld [vmem:[#allocation5 + $0x30] sm:$0xff]  ;;  %v906_v13 = vld [vmem:[#allocation5 + $0x68] sm:$0xff]  ;;  %v904_v14 = vld [vmem:[#allocation5 + $0x58] sm:$0xff]  ;;  %s5658_s1 = scalar_lea.sflag [#allocation4], %s9709_s22  ;;  %s8938_s20 = scalar_lea.vmem %s9989_s8, 128 }
 0x24c   : > { %6070 = vmatprep.subr.bf16.mxu0 %v6069_v3  ;;  %v6327_v12 = vpack.c.bf16 %v899_v10, %v895_v9  ;;  %v908_v15 = vld [vmem:[#allocation5 + $0x78] sm:$0xff]  ;;  %6326 = vmatprep.subr.bf16.mxu1 %v6325_v7  ;;  %v6073_v16 = vpack.c.bf16 %v906_v13, %v902_v11  ;;  %v901_v18 = vld [vmem:[#allocation5 + $0x40] sm:$0xff]  ;;  %v903_v20 = vld [vmem:[#allocation5 + $0x50] sm:$0xff]  ;;  %p8939_p0 = scmp.ne.s32.totalorder %s9989_s8, %s8938_s20  ;;  %p10162_p2 = scmp.ne.s32.totalorder %s10134_s28, 0 }
 0x24d   : > { %6072 = vmatpush1.bf16.msra.mxu0 %v6071_v8  ;;  %v6329_v17 = vpack.c.bf16 %v908_v15, %v904_v14  ;;  %v905_v19 = vld [vmem:[#allocation5 + $0x60] sm:$0xff]  ;;  %v907_v22 = vld [vmem:[#allocation5 + $0x70] sm:$0xff]  ;;  %v910_v23 = vld [vmem:[#allocation5 + $0x88] sm:$0xff]  ;;  %s9073_s27 = smov [#allocation32]  }
 0x24e   : > { %6328 = vmatpush1.bf16.msra.mxu1 %v6327_v12  ;;  %v6075_v21 = vpack.c.bf16 %v905_v19, %v901_v18  ;;  %v914_v24 = vld [vmem:[#allocation5 + $0xa8] sm:$0xff]  ;;  %6074 = vmatprep.subr.bf16.mxu0 %v6073_v16  ;;  %v6331_v25 = vpack.c.bf16 %v907_v22, %v903_v20  ;;  %v912_v27 = vld [vmem:[#allocation5 + $0x98] sm:$0xff]  ;;  %v909_v29 = vld [vmem:[#allocation5 + $0x80] sm:$0xff]  ;;  %p8940_p6 = pnand %p8939_p0, %p10162_p2  ;;  %s8942_s0 = sshll.u32 %s9073_s27, 4  ;;  %s8943_s0 = int_to_ptr.vmem [resolvable:$false] %s8942_s0 }
 0x24f   : > { %6330 = vmatprep.subr.bf16.mxu1 %v6329_v17  ;;  %v6077_v26 = vpack.c.bf16 %v914_v24, %v910_v23  ;;  %v916_v28 = vld [vmem:[#allocation5 + $0xb8] sm:$0xff]  ;;  %v913_v31 = vld [vmem:[#allocation5 + $0xa0] sm:$0xff]  ;;  %v911_v32 = vld [vmem:[#allocation5 + $0x90] sm:$0xff]  ;;  %p8945_p10 = scmp.lt.s32.totalorder %s9989_s8, %s8943_s0 }
 0x250   : > { %v6333_v30 = vpack.c.bf16 %v916_v28, %v912_v27  ;;  %v915_v33 = vld [vmem:[#allocation5 + $0xb0] sm:$0xff]  ;;  %v6079_v34 = vpack.c.bf16 %v913_v31, %v909_v29  ;;  %v918_v35 = vld [vmem:[#allocation5 + $0xc8] sm:$0xff]  ;;  %v920_v37 = vld [vmem:[#allocation5 + $0xd8] sm:$0xff]  ;;  %s9987_s29 = scalar_lea.hbm %s10161_s21, %s5965_s5  ;;  %p8941_p5 = pneg %p8940_p6 }
 0x251   : > { %6076 = vmatpush1.bf16.msra.mxu0 %v6075_v21  ;;  %v922_v36 = vld [vmem:[#allocation5 + $0xe8] sm:$0xff]  ;;  %v6335_v38 = vpack.c.bf16 %v915_v33, %v911_v32  ;;  %v924_v40 = vld [vmem:[#allocation5 + $0xf8] sm:$0xff]  ;;  %v917_v41 = vld [vmem:[#allocation5 + $0xc0] sm:$0xff] }
 0x252   : > { %6332 = vmatpush1.bf16.msra.mxu1 %v6331_v25  ;;  %6078 = vmatprep.subr.bf16.mxu0 %v6077_v26  ;;  %v6081_v39 = vpack.c.bf16 %v922_v36, %v918_v35  ;;  %v921_v42 = vld [vmem:[#allocation5 + $0xe0] sm:$0xff]  ;;  %v6337_v43 = vpack.c.bf16 %v924_v40, %v920_v37  ;;  %v919_v44 = vld [vmem:[#allocation5 + $0xd0] sm:$0xff]  ;;  %v926_v46 = vld [vmem:[#allocation5 + $0x108] sm:$0xff] }
 0x253   : > { %6334 = vmatprep.subr.bf16.mxu1 %v6333_v30  ;;  %v923_v45 = vld [vmem:[#allocation5 + $0xf0] sm:$0xff]  ;;  %v930_v47 = vld [vmem:[#allocation5 + $0x128] sm:$0xff]  ;;  %v928_v48 = vld [vmem:[#allocation5 + $0x118] sm:$0xff]  ;;  %v6083_v50 = vpack.c.bf16 %v921_v42, %v917_v41 }
 0x254   : > { %v932_v49 = vld [vmem:[#allocation5 + $0x138] sm:$0xff]  ;;  %v6339_v51 = vpack.c.bf16 %v923_v45, %v919_v44  ;;  %v6085_v52 = vpack.c.bf16 %v930_v47, %v926_v46  ;;  %v925_v53 = vld [vmem:[#allocation5 + $0x100] sm:$0xff]  ;;  %v927_v55 = vld [vmem:[#allocation5 + $0x110] sm:$0xff] }
 0x255   : > { %6080 = vmatpush1.bf16.msra.mxu0 %v6079_v34  ;;  %v929_v54 = vld [vmem:[#allocation5 + $0x120] sm:$0xff]  ;;  %v6341_v56 = vpack.c.bf16 %v932_v49, %v928_v48  ;;  %v931_v57 = vld [vmem:[#allocation5 + $0x130] sm:$0xff]  ;;  %v934_v58 = vld [vmem:[#allocation5 + $0x148] sm:$0xff] }
 0x256   : > { %6336 = vmatpush1.bf16.msra.mxu1 %v6335_v38  ;;  %6082 = vmatprep.subr.bf16.mxu0 %v6081_v39  ;;  %v938_v59 = vld [vmem:[#allocation5 + $0x168] sm:$0xff]  ;;  %v936_v60 = vld [vmem:[#allocation5 + $0x158] sm:$0xff]  ;;  %v6087_v62 = vpack.c.bf16 %v929_v54, %v925_v53  ;;  %v6343_v63 = vpack.c.bf16 %v931_v57, %v927_v55  ;;  %v933_v1 = vld [vmem:[#allocation5 + $0x140] sm:$0xff] }
 0x257   : > { %6338 = vmatprep.subr.bf16.mxu1 %v6337_v43  ;;  %v940_v61 = vld [vmem:[#allocation5 + $0x178] sm:$0xff]  ;;  %v6089_v0 = vpack.c.bf16 %v938_v59, %v934_v58  ;;  %v937_v2 = vld [vmem:[#allocation5 + $0x160] sm:$0xff]  ;;  %v935_v3 = vld [vmem:[#allocation5 + $0x150] sm:$0xff] }
 0x258   : > { %v6345_v4 = vpack.c.bf16 %v940_v61, %v936_v60  ;;  %v939_v5 = vld [vmem:[#allocation5 + $0x170] sm:$0xff]  ;;  %v942_v6 = vld [vmem:[#allocation5 + $0x188] sm:$0xff]  ;;  %v944_v8 = vld [vmem:[#allocation5 + $0x198] sm:$0xff]  ;;  %v6091_v10 = vpack.c.bf16 %v937_v2, %v933_v1 }
 0x259   : > { %6084 = vmatpush1.bf16.msra.mxu0 %v6083_v50  ;;  %v946_v7 = vld [vmem:[#allocation5 + $0x1a8] sm:$0xff]  ;;  %v948_v9 = vld [vmem:[#allocation5 + $0x1b8] sm:$0xff]  ;;  %v6347_v11 = vpack.c.bf16 %v939_v5, %v935_v3  ;;  %v941_v13 = vld [vmem:[#allocation5 + $0x180] sm:$0xff] }
 0x25a   : > { %6340 = vmatpush1.bf16.msra.mxu1 %v6339_v51  ;;  %6086 = vmatprep.subr.bf16.mxu0 %v6085_v52  ;;  %v6093_v12 = vpack.c.bf16 %v946_v7, %v942_v6  ;;  %v945_v14 = vld [vmem:[#allocation5 + $0x1a0] sm:$0xff]  ;;  %v943_v15 = vld [vmem:[#allocation5 + $0x190] sm:$0xff]  ;;  %v6349_v16 = vpack.c.bf16 %v948_v9, %v944_v8  ;;  %v950_v18 = vld [vmem:[#allocation5 + $0x1c8] sm:$0xff]  ;;  %v1407_v52 = vlaneseq }
 0x25b   : > { %6342 = vmatprep.subr.bf16.mxu1 %v6341_v56  ;;  %v947_v17 = vld [vmem:[#allocation5 + $0x1b0] sm:$0xff]  ;;  %v954_v19 = vld [vmem:[#allocation5 + $0x1e8] sm:$0xff]  ;;  %v952_v20 = vld [vmem:[#allocation5 + $0x1d8] sm:$0xff]  ;;  %v6095_v22 = vpack.c.bf16 %v945_v14, %v941_v13 }
 0x25c   : > { %v956_v21 = vld [vmem:[#allocation5 + $0x1f8] sm:$0xff]  ;;  %v6351_v23 = vpack.c.bf16 %v947_v17, %v943_v15  ;;  %v6097_v24 = vpack.c.bf16 %v954_v19, %v950_v18  ;;  %v949_v25 = vld [vmem:[#allocation5 + $0x1c0] sm:$0xff]  ;;  %v951_v27 = vld [vmem:[#allocation5 + $0x1d0] sm:$0xff]  ;;  %v9757_v1 = vshrl.u32 %v1407_v52, 7 }
 0x25d   : > { %6088 = vmatpush1.bf16.msra.mxu0 %v6087_v62  ;;  %v953_v26 = vld [vmem:[#allocation5 + $0x1e0] sm:$0xff]  ;;  %v6353_v28 = vpack.c.bf16 %v956_v21, %v952_v20  ;;  %v955_v29 = vld [vmem:[#allocation5 + $0x1f0] sm:$0xff]  ;;  %v958_v30 = vld [vmem:[#allocation5 + $0x208] sm:$0xff] }
 0x25e   : > { %6344 = vmatpush1.bf16.msra.mxu1 %v6343_v63  ;;  %6090 = vmatprep.subr.bf16.mxu0 %v6089_v0  ;;  %v962_v31 = vld [vmem:[#allocation5 + $0x228] sm:$0xff]  ;;  %v960_v32 = vld [vmem:[#allocation5 + $0x218] sm:$0xff]  ;;  %v6099_v34 = vpack.c.bf16 %v953_v26, %v949_v25  ;;  %v6355_v35 = vpack.c.bf16 %v955_v29, %v951_v27  ;;  %v957_v37 = vld [vmem:[#allocation5 + $0x200] sm:$0xff]  ;;  %v9760_v15 = vsub.s32 1, %v9757_v1 }
 0x25f   : > { %6346 = vmatprep.subr.bf16.mxu1 %v6345_v4  ;;  %v964_v33 = vld [vmem:[#allocation5 + $0x238] sm:$0xff]  ;;  %v6101_v36 = vpack.c.bf16 %v962_v31, %v958_v30  ;;  %v961_v38 = vld [vmem:[#allocation5 + $0x220] sm:$0xff]  ;;  %v959_v39 = vld [vmem:[#allocation5 + $0x210] sm:$0xff] }
 0x260   : > { %v6357_v40 = vpack.c.bf16 %v964_v33, %v960_v32  ;;  %v963_v41 = vld [vmem:[#allocation5 + $0x230] sm:$0xff]  ;;  %v966_v42 = vld [vmem:[#allocation5 + $0x248] sm:$0xff]  ;;  %v968_v44 = vld [vmem:[#allocation5 + $0x258] sm:$0xff]  ;;  %v6103_v46 = vpack.c.bf16 %v961_v38, %v957_v37 }
 0x261   : > { %6092 = vmatpush1.bf16.msra.mxu0 %v6091_v10  ;;  %v970_v43 = vld [vmem:[#allocation5 + $0x268] sm:$0xff]  ;;  %v972_v45 = vld [vmem:[#allocation5 + $0x278] sm:$0xff]  ;;  %v6359_v47 = vpack.c.bf16 %v963_v41, %v959_v39  ;;  %v965_v49 = vld [vmem:[#allocation5 + $0x240] sm:$0xff] }
 0x262   : > { %6348 = vmatpush1.bf16.msra.mxu1 %v6347_v11  ;;  %6094 = vmatprep.subr.bf16.mxu0 %v6093_v12  ;;  %v6105_v48 = vpack.c.bf16 %v970_v43, %v966_v42  ;;  %v969_v50 = vld [vmem:[#allocation5 + $0x260] sm:$0xff]  ;;  %v967_v51 = vld [vmem:[#allocation5 + $0x250] sm:$0xff]  ;;  %v6361_v53 = vpack.c.bf16 %v972_v45, %v968_v44  ;;  %v974_v55 = vld [vmem:[#allocation5 + $0x288] sm:$0xff] }
 0x263   : > { %6350 = vmatprep.subr.bf16.mxu1 %v6349_v16  ;;  %v971_v54 = vld [vmem:[#allocation5 + $0x270] sm:$0xff]  ;;  %v978_v56 = vld [vmem:[#allocation5 + $0x2a8] sm:$0xff]  ;;  %v976_v57 = vld [vmem:[#allocation5 + $0x298] sm:$0xff]  ;;  %v6107_v59 = vpack.c.bf16 %v969_v50, %v965_v49 }
 0x264   : > { %v980_v58 = vld [vmem:[#allocation5 + $0x2b8] sm:$0xff]  ;;  %v6363_v60 = vpack.c.bf16 %v971_v54, %v967_v51  ;;  %v6109_v61 = vpack.c.bf16 %v978_v56, %v974_v55  ;;  %v973_v62 = vld [vmem:[#allocation5 + $0x280] sm:$0xff]  ;;  %v975_v0 = vld [vmem:[#allocation5 + $0x290] sm:$0xff] }
 0x265   : > { %6096 = vmatpush1.bf16.msra.mxu0 %v6095_v22  ;;  %v977_v63 = vld [vmem:[#allocation5 + $0x2a0] sm:$0xff]  ;;  %v6365_v2 = vpack.c.bf16 %v980_v58, %v976_v57  ;;  %v979_v3 = vld [vmem:[#allocation5 + $0x2b0] sm:$0xff]  ;;  %v982_v4 = vld [vmem:[#allocation5 + $0x2c8] sm:$0xff] }
 0x266   : > { %6352 = vmatpush1.bf16.msra.mxu1 %v6351_v23  ;;  %6098 = vmatprep.subr.bf16.mxu0 %v6097_v24  ;;  %v986_v5 = vld [vmem:[#allocation5 + $0x2e8] sm:$0xff]  ;;  %v984_v6 = vld [vmem:[#allocation5 + $0x2d8] sm:$0xff]  ;;  %v6111_v8 = vpack.c.bf16 %v977_v63, %v973_v62  ;;  %v981_v9 = vld [vmem:[#allocation5 + $0x2c0] sm:$0xff]  ;;  %v6367_v10 = vpack.c.bf16 %v979_v3, %v975_v0 }
 0x267   : > { %6354 = vmatprep.subr.bf16.mxu1 %v6353_v28  ;;  %v988_v7 = vld [vmem:[#allocation5 + $0x2f8] sm:$0xff]  ;;  %v6113_v11 = vpack.c.bf16 %v986_v5, %v982_v4  ;;  %v985_v12 = vld [vmem:[#allocation5 + $0x2e0] sm:$0xff]  ;;  %v983_v13 = vld [vmem:[#allocation5 + $0x2d0] sm:$0xff] }
 0x268   : > { %v987_v14 = vld [vmem:[#allocation5 + $0x2f0] sm:$0xff]  ;;  %v6369_v16 = vpack.c.bf16 %v988_v7, %v984_v6  ;;  %v990_v17 = vld [vmem:[#allocation5 + $0x308] sm:$0xff]  ;;  %v992_v20 = vld [vmem:[#allocation5 + $0x318] sm:$0xff]  ;;  %v6115_v23 = vpack.c.bf16 %v985_v12, %v981_v9  ;;  %v9768_v9 = vsub.s32 0, %v9757_v1 }
 0x269   : > { %6100 = vmatpush1.bf16.msra.mxu0 %v6099_v34  ;;  %v994_v18 = vld [vmem:[#allocation5 + $0x328] sm:$0xff]  ;;  %v891_v19 = vld [vmem:[%s9715_s23] sm:$0xff]  ;;  %v6371_v24 = vpack.c.bf16 %v987_v14, %v983_v13  ;;  %v989_v26 = vld [vmem:[#allocation5 + $0x300] sm:$0xff] }
 0x26a   : > { %6356 = vmatpush1.bf16.msra.mxu1 %v6355_v35  ;;  %6102 = vmatprep.subr.bf16.mxu0 %v6101_v36  ;;  %v996_v21 = vld [vmem:[#allocation5 + $0x338] sm:$0xff]  ;;  %v9763_v22 = vmax.f32 %v891_v19, 0.0  ;;  %v6117_v25 = vpack.c.bf16 %v994_v18, %v990_v17  ;;  %v993_v27 = vld [vmem:[#allocation5 + $0x320] sm:$0xff]  ;;  %v991_v28 = vld [vmem:[#allocation5 + $0x310] sm:$0xff] }
 0x26b   : > { %6358 = vmatprep.subr.bf16.mxu1 %v6357_v40  ;;  %v6373_v30 = vpack.c.bf16 %v996_v21, %v992_v20  ;;  %v995_v31 = vld [vmem:[#allocation5 + $0x330] sm:$0xff]  ;;  %v998_v32 = vld [vmem:[#allocation5 + $0x348] sm:$0xff]  ;;  %v1000_v34 = vld [vmem:[#allocation5 + $0x358] sm:$0xff]  ;;  %v6119_v36 = vpack.c.bf16 %v993_v27, %v989_v26  ;;  %v9771_v21 = vsub.s32 3, %v9757_v1 }
 0x26c   : > { %v1414_v29 = vrot.slane %v9763_v22, %v9760_v15  ;;  %v1002_v33 = vld [vmem:[#allocation5 + $0x368] sm:$0xff]  ;;  %v1004_v35 = vld [vmem:[#allocation5 + $0x378] sm:$0xff]  ;;  %v6375_v37 = vpack.c.bf16 %v995_v31, %v991_v28  ;;  %v997_v39 = vld [vmem:[#allocation5 + $0x340] sm:$0xff] }
 0x26d   : > { %6104 = vmatpush1.bf16.msra.mxu0 %v6103_v46  ;;  %v6121_v38 = vpack.c.bf16 %v1002_v33, %v998_v32  ;;  %v1001_v40 = vld [vmem:[#allocation5 + $0x360] sm:$0xff]  ;;  %v999_v41 = vld [vmem:[#allocation5 + $0x350] sm:$0xff]  ;;  %v6377_v42 = vpack.c.bf16 %v1004_v35, %v1000_v34  ;;  %v1006_v44 = vld [vmem:[#allocation5 + $0x388] sm:$0xff] }
 0x26e   : > { %6360 = vmatpush1.bf16.msra.mxu1 %v6359_v47  ;;  %6106 = vmatprep.subr.bf16.mxu0 %v6105_v48  ;;  %v1003_v43 = vld [vmem:[#allocation5 + $0x370] sm:$0xff]  ;;  %v1010_v45 = vld [vmem:[#allocation5 + $0x3a8] sm:$0xff]  ;;  %v1008_v46 = vld [vmem:[#allocation5 + $0x398] sm:$0xff]  ;;  %v6123_v48 = vpack.c.bf16 %v1001_v40, %v997_v39 }
 0x26f   : > { %6362 = vmatprep.subr.bf16.mxu1 %v6361_v53  ;;  %1532 = vmatprep.mubr.f32.mxu0 %v1414_v29  ;;  %v1012_v47 = vld [vmem:[#allocation5 + $0x3b8] sm:$0xff]  ;;  %v6379_v49 = vpack.c.bf16 %v1003_v43, %v999_v41  ;;  %v6125_v50 = vpack.c.bf16 %v1010_v45, %v1006_v44  ;;  %v1005_v51 = vld [vmem:[#allocation5 + $0x380] sm:$0xff]  ;;  %v1007_v53 = vld [vmem:[#allocation5 + $0x390] sm:$0xff] }
 0x270   : > { %1816 = vmatprep.mubr.f32.mxu1 %v1414_v29  ;;  %v1009_v52 = vld [vmem:[#allocation5 + $0x3a0] sm:$0xff]  ;;  %v6381_v54 = vpack.c.bf16 %v1012_v47, %v1008_v46  ;;  %v1011_v55 = vld [vmem:[#allocation5 + $0x3b0] sm:$0xff]  ;;  %v1014_v56 = vld [vmem:[#allocation5 + $0x3c8] sm:$0xff] }
 0x271   : > { %6108 = vmatpush1.bf16.msra.mxu0 %v6107_v59  ;;  %v1018_v57 = vld [vmem:[#allocation5 + $0x3e8] sm:$0xff]  ;;  %v1016_v58 = vld [vmem:[#allocation5 + $0x3d8] sm:$0xff]  ;;  %v1013_v63 = vld [vmem:[#allocation5 + $0x3c0] sm:$0xff] }
 0x272   : > { %6364 = vmatpush1.bf16.msra.mxu1 %v6363_v60  ;;  %6110 = vmatprep.subr.bf16.mxu0 %v6109_v61  ;;  %v1020_v59 = vld [vmem:[#allocation5 + $0x3f8] sm:$0xff]  ;;  %v6127_v60 = vpack.c.bf16 %v1009_v52, %v1005_v51  ;;  %v6383_v61 = vpack.c.bf16 %v1011_v55, %v1007_v53  ;;  %v6129_v62 = vpack.c.bf16 %v1018_v57, %v1014_v56  ;;  %v1017_v0 = vld [vmem:[#allocation5 + $0x3e0] sm:$0xff]  ;;  %v1019_v4 = vld [vmem:[#allocation5 + $0x3f0] sm:$0xff] }
 0x273   : > { %6366 = vmatprep.subr.bf16.mxu1 %v6365_v2  ;;  %v1015_v2 = vld [vmem:[#allocation5 + $0x3d0] sm:$0xff]  ;;  %v6385_v3 = vpack.c.bf16 %v1020_v59, %v1016_v58  ;;  %v1022_v5 = vld [vmem:[#allocation5 + $0x408] sm:$0xff]  ;;  %v1024_v7 = vld [vmem:[#allocation5 + $0x418] sm:$0xff] }
 0x274   : > { %v1026_v6 = vld [vmem:[#allocation5 + $0x428] sm:$0xff]  ;;  %v1021_v13 = vld [vmem:[#allocation5 + $0x400] sm:$0xff]  ;;  %v1027_v18 = vld [vmem:[#allocation5 + $0x430] sm:$0xff] }
 0x275   : > { %6112 = vmatpush1.bf16.msra.mxu0 %v6111_v8  ;;  %v1028_v8 = vld [vmem:[#allocation5 + $0x438] sm:$0xff]  ;;  %v6133_v12 = vpack.c.bf16 %v1026_v6, %v1022_v5  ;;  %v1025_v14 = vld [vmem:[#allocation5 + $0x420] sm:$0xff]  ;;  %v1030_v19 = vld [vmem:[#allocation5 + $0x448] sm:$0xff] }
 0x276   : > { %6368 = vmatpush1.bf16.msra.mxu1 %v6367_v10  ;;  %6114 = vmatprep.subr.bf16.mxu0 %v6113_v11  ;;  %v6131_v10 = vpack.c.bf16 %v1017_v0, %v1013_v63  ;;  %v6387_v11 = vpack.c.bf16 %v1019_v4, %v1015_v2  ;;  %v6389_v17 = vpack.c.bf16 %v1028_v8, %v1024_v7  ;;  %v1034_v20 = vld [vmem:[#allocation5 + $0x468] sm:$0xff]  ;;  %v1029_v29 = vld [vmem:[#allocation5 + $0x440] sm:$0xff]  ;;  %v1031_v31 = vld [vmem:[#allocation5 + $0x450] sm:$0xff] }
 0x277   : > { %6370 = vmatprep.subr.bf16.mxu1 %v6369_v16  ;;  %v1023_v16 = vld [vmem:[#allocation5 + $0x410] sm:$0xff]  ;;  %v6135_v26 = vpack.c.bf16 %v1025_v14, %v1021_v13  ;;  %v6137_v28 = vpack.c.bf16 %v1034_v20, %v1030_v19  ;;  %v1038_v34 = vld [vmem:[#allocation5 + $0x488] sm:$0xff]  ;;  %v1041_v43 = vld [vmem:[#allocation5 + $0x4a0] sm:$0xff] }
 0x278   : > { %v6391_v27 = vpack.c.bf16 %v1027_v18, %v1023_v16  ;;  %v1035_v33 = vld [vmem:[#allocation5 + $0x470] sm:$0xff]  ;;  %v1042_v35 = vld [vmem:[#allocation5 + $0x4a8] sm:$0xff]  ;;  %v1049_v55 = vld [vmem:[#allocation5 + $0x4e0] sm:$0xff] }
 0x279   : > { %6116 = vmatpush1.bf16.msra.mxu0 %v6115_v23  ;;  %v1410_v23 = vrot.slane %v9763_v22, %v9768_v9  ;;  %v6395_v40 = vpack.c.bf16 %v1035_v33, %v1031_v31  ;;  %v6141_v41 = vpack.c.bf16 %v1042_v35, %v1038_v34  ;;  %v1039_v44 = vld [vmem:[#allocation5 + $0x490] sm:$0xff]  ;;  %v1046_v47 = vld [vmem:[#allocation5 + $0x4c8] sm:$0xff]  ;;  %v1057_v4 = vld [vmem:[#allocation5 + $0x520] sm:$0xff] }
 0x27a   : > { %6372 = vmatpush1.bf16.msra.mxu1 %v6371_v24  ;;  %6118 = vmatprep.subr.bf16.mxu0 %v6117_v25  ;;  %v1032_v24 = vld [vmem:[#allocation5 + $0x458] sm:$0xff]  ;;  %v1043_v46 = vld [vmem:[#allocation5 + $0x4b0] sm:$0xff]  ;;  %v1054_v59 = vld [vmem:[#allocation5 + $0x508] sm:$0xff] }
 0x27b   : > { %6374 = vmatprep.subr.bf16.mxu1 %v6373_v30  ;;  %v1036_v25 = vld [vmem:[#allocation5 + $0x478] sm:$0xff]  ;;  %v1033_v30 = vld [vmem:[#allocation5 + $0x460] sm:$0xff]  ;;  %v6399_v52 = vpack.c.bf16 %v1043_v46, %v1039_v44  ;;  %v1047_v56 = vld [vmem:[#allocation5 + $0x4d0] sm:$0xff] }
 0x27c   : > { %v6393_v32 = vpack.c.bf16 %v1036_v25, %v1032_v24  ;;  %v6139_v39 = vpack.c.bf16 %v1033_v30, %v1029_v29  ;;  %v1051_v58 = vld [vmem:[#allocation5 + $0x4f0] sm:$0xff]  ;;  %v1062_v8 = vld [vmem:[#allocation5 + $0x548] sm:$0xff]  ;;  %v1065_v18 = vld [vmem:[#allocation5 + $0x560] sm:$0xff] }
 0x27d   : > { %6120 = vmatpush1.bf16.msra.mxu0 %v6119_v36  ;;  %v1422_v36 = vrot.slane %v9763_v22, %v9771_v21  ;;  %v6403_v0 = vpack.c.bf16 %v1051_v58, %v1047_v56  ;;  %v1055_v5 = vld [vmem:[#allocation5 + $0x510] sm:$0xff]  ;;  %v1070_v24 = vld [vmem:[#allocation5 + $0x588] sm:$0xff]  ;;  %v1069_v31 = vld [vmem:[#allocation5 + $0x580] sm:$0xff] }
 0x27e   : > { %6376 = vmatpush1.bf16.msra.mxu1 %v6375_v37  ;;  %6122 = vmatprep.subr.bf16.mxu0 %v6121_v38  ;;  %v1040_v37 = vld [vmem:[#allocation5 + $0x498] sm:$0xff]  ;;  %v1059_v7 = vld [vmem:[#allocation5 + $0x530] sm:$0xff]  ;;  %v1074_v25 = vld [vmem:[#allocation5 + $0x5a8] sm:$0xff] }
 0x27f   : > { %6378 = vmatprep.subr.bf16.mxu1 %v6377_v42  ;;  %v1044_v38 = vld [vmem:[#allocation5 + $0x4b8] sm:$0xff]  ;;  %v1037_v42 = vld [vmem:[#allocation5 + $0x480] sm:$0xff]  ;;  %v6407_v14 = vpack.c.bf16 %v1059_v7, %v1055_v5  ;;  %v1063_v19 = vld [vmem:[#allocation5 + $0x550] sm:$0xff]  ;;  %v6157_v30 = vpack.c.bf16 %v1074_v25, %v1070_v24 }
 0x280   : > { %v6397_v45 = vpack.c.bf16 %v1044_v38, %v1040_v37  ;;  %v6143_v51 = vpack.c.bf16 %v1041_v43, %v1037_v42  ;;  %v1071_v33 = vld [vmem:[#allocation5 + $0x590] sm:$0xff]  ;;  %v1082_v37 = vld [vmem:[#allocation5 + $0x5e8] sm:$0xff]  ;;  %v1080_v38 = vld [vmem:[#allocation5 + $0x5d8] sm:$0xff] }
 0x281   : > { %6124 = vmatpush1.bf16.msra.mxu0 %v6123_v48  ;;  %v1050_v48 = vld [vmem:[#allocation5 + $0x4e8] sm:$0xff]  ;;  %v1075_v35 = vld [vmem:[#allocation5 + $0x5b0] sm:$0xff]  ;;  %v1077_v43 = vld [vmem:[#allocation5 + $0x5c0] sm:$0xff] }
 0x282   : > { %6380 = vmatpush1.bf16.msra.mxu1 %v6379_v49  ;;  %6126 = vmatprep.subr.bf16.mxu0 %v6125_v50  ;;  %v1048_v49 = vld [vmem:[#allocation5 + $0x4d8] sm:$0xff]  ;;  %v6145_v53 = vpack.c.bf16 %v1050_v48, %v1046_v47  ;;  %v1081_v44 = vld [vmem:[#allocation5 + $0x5e0] sm:$0xff]  ;;  %v1083_v47 = vld [vmem:[#allocation5 + $0x5f0] sm:$0xff] }
 0x283   : > { %6382 = vmatprep.subr.bf16.mxu1 %v6381_v54  ;;  %v1052_v50 = vld [vmem:[#allocation5 + $0x4f8] sm:$0xff]  ;;  %v1045_v54 = vld [vmem:[#allocation5 + $0x4c0] sm:$0xff]  ;;  %v1086_v48 = vld [vmem:[#allocation5 + $0x608] sm:$0xff] }
 0x284   : > { %v6401_v57 = vpack.c.bf16 %v1052_v50, %v1048_v49  ;;  %v6147_v63 = vpack.c.bf16 %v1049_v55, %v1045_v54  ;;  %v1090_v49 = vld [vmem:[#allocation5 + $0x628] sm:$0xff]  ;;  %v1088_v50 = vld [vmem:[#allocation5 + $0x618] sm:$0xff]  ;;  %v1085_v55 = vld [vmem:[#allocation5 + $0x600] sm:$0xff] }
 0x285   : > { %6128 = vmatpush1.bf16.msra.mxu0 %v6127_v60  ;;  %v1058_v60 = vld [vmem:[#allocation5 + $0x528] sm:$0xff]  ;;  %v6165_v54 = vpack.c.bf16 %v1090_v49, %v1086_v48  ;;  %v1089_v56 = vld [vmem:[#allocation5 + $0x620] sm:$0xff]  ;;  %v1107_v24 = vld [vmem:[#allocation5 + $0x6b0] sm:$0xff] }
 0x286   : > { %6384 = vmatpush1.bf16.msra.mxu1 %v6383_v61  ;;  %6130 = vmatprep.subr.bf16.mxu0 %v6129_v62  ;;  %v1056_v61 = vld [vmem:[#allocation5 + $0x518] sm:$0xff]  ;;  %v6149_v2 = vpack.c.bf16 %v1058_v60, %v1054_v59  ;;  %v1091_v59 = vld [vmem:[#allocation5 + $0x630] sm:$0xff]  ;;  %v1094_v60 = vld [vmem:[#allocation5 + $0x648] sm:$0xff] }
 0x287   : > { %6386 = vmatprep.subr.bf16.mxu1 %v6385_v3  ;;  %v1060_v62 = vld [vmem:[#allocation5 + $0x538] sm:$0xff]  ;;  %v1053_v3 = vld [vmem:[#allocation5 + $0x500] sm:$0xff]  ;;  %v1110_v25 = vld [vmem:[#allocation5 + $0x6c8] sm:$0xff] }
 0x288   : > { %v6405_v6 = vpack.c.bf16 %v1060_v62, %v1056_v61  ;;  %v6151_v13 = vpack.c.bf16 %v1057_v4, %v1053_v3  ;;  %v1098_v61 = vld [vmem:[#allocation5 + $0x668] sm:$0xff]  ;;  %v1096_v62 = vld [vmem:[#allocation5 + $0x658] sm:$0xff]  ;;  %v1093_v4 = vld [vmem:[#allocation5 + $0x640] sm:$0xff] }
 0x289   : > { %6132 = vmatpush1.bf16.msra.mxu0 %v6131_v10  ;;  %v1066_v10 = vld [vmem:[#allocation5 + $0x568] sm:$0xff]  ;;  %v6169_v3 = vpack.c.bf16 %v1098_v61, %v1094_v60  ;;  %v1097_v5 = vld [vmem:[#allocation5 + $0x660] sm:$0xff]  ;;  %v1123_v48 = vld [vmem:[#allocation5 + $0x730] sm:$0xff] }
 0x28a   : > { %6388 = vmatpush1.bf16.msra.mxu1 %v6387_v11  ;;  %6134 = vmatprep.subr.bf16.mxu0 %v6133_v12  ;;  %v1064_v11 = vld [vmem:[#allocation5 + $0x558] sm:$0xff]  ;;  %v6153_v16 = vpack.c.bf16 %v1066_v10, %v1062_v8  ;;  %v1099_v8 = vld [vmem:[#allocation5 + $0x670] sm:$0xff]  ;;  %v1102_v10 = vld [vmem:[#allocation5 + $0x688] sm:$0xff] }
 0x28b   : > { %6390 = vmatprep.subr.bf16.mxu1 %v6389_v17  ;;  %v1068_v12 = vld [vmem:[#allocation5 + $0x578] sm:$0xff]  ;;  %v1061_v17 = vld [vmem:[#allocation5 + $0x540] sm:$0xff]  ;;  %v1126_v49 = vld [vmem:[#allocation5 + $0x748] sm:$0xff] }
 0x28c   : > { %1533 = vmatmul.mubr.f32.vlgmr.msra.gmra.mrb[0].mxu0 %v1410_v23  ;;  %v6409_v20 = vpack.c.bf16 %v1068_v12, %v1064_v11  ;;  %v1106_v11 = vld [vmem:[#allocation5 + $0x6a8] sm:$0xff]  ;;  %v1104_v12 = vld [vmem:[#allocation5 + $0x698] sm:$0xff]  ;;  %v1131_v60 = vld [vmem:[#allocation5 + $0x770] sm:$0xff] }
 0x28d   : > { %6136 = vmatpush1.bf16.msra.mxu0 %v6135_v26  ;;  %1817 = vmatmul.mubr.f32.vlgmr.msra.gmra.mrb[0].mxu1 %v1410_v23  ;;  %v1067_v23 = vld [vmem:[#allocation5 + $0x570] sm:$0xff]  ;;  %v1072_v26 = vld [vmem:[#allocation5 + $0x598] sm:$0xff]  ;;  %v1134_v61 = vld [vmem:[#allocation5 + $0x788] sm:$0xff] }
 0x28e   : > { %6392 = vmatpush1.bf16.msra.mxu1 %v6391_v27  ;;  %6138 = vmatprep.subr.bf16.mxu0 %v6137_v28  ;;  %v1076_v27 = vld [vmem:[#allocation5 + $0x5b8] sm:$0xff]  ;;  %v6155_v28 = vpack.c.bf16 %v1065_v18, %v1061_v17  ;;  %v6411_v29 = vpack.c.bf16 %v1067_v23, %v1063_v19  ;;  %v6173_v17 = vpack.c.bf16 %v1106_v11, %v1102_v10  ;;  %v1101_v18 = vld [vmem:[#allocation5 + $0x680] sm:$0xff]  ;;  %v1139_v10 = vld [vmem:[#allocation5 + $0x7b0] sm:$0xff] }
 0x28f   : > { %6394 = vmatprep.subr.bf16.mxu1 %v6393_v32  ;;  %1603 = vmatprep.mubr.f32.mxu0 %v1422_v36  ;;  %v1073_v32 = vld [vmem:[#allocation5 + $0x5a0] sm:$0xff]  ;;  %v6413_v34 = vpack.c.bf16 %v1076_v27, %v1072_v26  ;;  %v1114_v26 = vld [vmem:[#allocation5 + $0x6e8] sm:$0xff]  ;;  %v1112_v27 = vld [vmem:[#allocation5 + $0x6d8] sm:$0xff] }
 0x290   : > { %1887 = vmatprep.mubr.f32.mxu1 %v1422_v36  ;;  %v1078_v36 = vld [vmem:[#allocation5 + $0x5c8] sm:$0xff]  ;;  %v1105_v19 = vld [vmem:[#allocation5 + $0x6a0] sm:$0xff] }
 0x291   : > { %6140 = vmatpush1.bf16.msra.mxu0 %v6139_v39  ;;  %v1084_v39 = vld [vmem:[#allocation5 + $0x5f8] sm:$0xff]  ;;  %v6161_v42 = vpack.c.bf16 %v1082_v37, %v1078_v36  ;;  %v1115_v36 = vld [vmem:[#allocation5 + $0x6f0] sm:$0xff]  ;;  %v1118_v37 = vld [vmem:[#allocation5 + $0x708] sm:$0xff] }
 0x292   : > { %6396 = vmatpush1.bf16.msra.mxu1 %v6395_v40  ;;  %6142 = vmatprep.subr.bf16.mxu0 %v6141_v41  ;;  %v6159_v40 = vpack.c.bf16 %v1073_v32, %v1069_v31  ;;  %v6415_v41 = vpack.c.bf16 %v1075_v35, %v1071_v33  ;;  %v6417_v46 = vpack.c.bf16 %v1084_v39, %v1080_v38  ;;  %v1109_v32 = vld [vmem:[#allocation5 + $0x6c0] sm:$0xff]  ;;  %v1122_v38 = vld [vmem:[#allocation5 + $0x728] sm:$0xff]  ;;  %v1120_v39 = vld [vmem:[#allocation5 + $0x718] sm:$0xff] }
 0x293   : > { %6398 = vmatprep.subr.bf16.mxu1 %v6397_v45  ;;  %v1079_v45 = vld [vmem:[#allocation5 + $0x5d0] sm:$0xff]  ;;  %v6177_v31 = vpack.c.bf16 %v1114_v26, %v1110_v25  ;;  %v1113_v33 = vld [vmem:[#allocation5 + $0x6e0] sm:$0xff]  ;;  %v1142_v11 = vld [vmem:[#allocation5 + $0x7c8] sm:$0xff] }
 0x294   : > { %v1147_v25 = vld [vmem:[#allocation5 + $0x7f0] sm:$0xff]  ;;  %v1150_v26 = vld [vmem:[#allocation5 + $0x808] sm:$0xff] }
 0x295   : > { %6144 = vmatpush1.bf16.msra.mxu0 %v6143_v51  ;;  %v1092_v51 = vld [vmem:[#allocation5 + $0x638] sm:$0xff] }
 0x296   : > { %6400 = vmatpush1.bf16.msra.mxu1 %v6399_v52  ;;  %6146 = vmatprep.subr.bf16.mxu0 %v6145_v53  ;;  %v6163_v52 = vpack.c.bf16 %v1081_v44, %v1077_v43  ;;  %v6419_v53 = vpack.c.bf16 %v1083_v47, %v1079_v45  ;;  %v6421_v58 = vpack.c.bf16 %v1092_v51, %v1088_v50  ;;  %v1117_v44 = vld [vmem:[#allocation5 + $0x700] sm:$0xff]  ;;  %v1130_v50 = vld [vmem:[#allocation5 + $0x768] sm:$0xff]  ;;  %v1128_v51 = vld [vmem:[#allocation5 + $0x758] sm:$0xff] }
 0x297   : > { %6402 = vmatprep.subr.bf16.mxu1 %v6401_v57  ;;  %v1087_v57 = vld [vmem:[#allocation5 + $0x610] sm:$0xff]  ;;  %v6181_v43 = vpack.c.bf16 %v1122_v38, %v1118_v37  ;;  %v1121_v45 = vld [vmem:[#allocation5 + $0x720] sm:$0xff] }
 0x298   : > { %v1155_v38 = vld [vmem:[#allocation5 + $0x830] sm:$0xff] }
 0x299   : > { %6148 = vmatpush1.bf16.msra.mxu0 %v6147_v63  ;;  %v1100_v63 = vld [vmem:[#allocation5 + $0x678] sm:$0xff] }
 0x29a   : > { %6404 = vmatpush1.bf16.msra.mxu1 %v6403_v0  ;;  %6150 = vmatprep.subr.bf16.mxu0 %v6149_v2  ;;  %v6167_v0 = vpack.c.bf16 %v1089_v56, %v1085_v55  ;;  %v6423_v2 = vpack.c.bf16 %v1091_v59, %v1087_v57  ;;  %v6425_v7 = vpack.c.bf16 %v1100_v63, %v1096_v62  ;;  %v1125_v56 = vld [vmem:[#allocation5 + $0x740] sm:$0xff]  ;;  %v1138_v62 = vld [vmem:[#allocation5 + $0x7a8] sm:$0xff]  ;;  %v1136_v63 = vld [vmem:[#allocation5 + $0x798] sm:$0xff] }
 0x29b   : > { %6406 = vmatprep.subr.bf16.mxu1 %v6405_v6  ;;  %v1095_v6 = vld [vmem:[#allocation5 + $0x650] sm:$0xff]  ;;  %v6185_v55 = vpack.c.bf16 %v1130_v50, %v1126_v49  ;;  %v1129_v57 = vld [vmem:[#allocation5 + $0x760] sm:$0xff] }
 0x29c   : > { %v1161_v49 = vld [vmem:[#allocation5 + $0x860] sm:$0xff]  ;;  %v1159_v50 = vld [vmem:[#allocation5 + $0x850] sm:$0xff] }
 0x29d   : > { %6152 = vmatpush1.bf16.msra.mxu0 %v6151_v13  ;;  %v1108_v13 = vld [vmem:[#allocation5 + $0x6b8] sm:$0xff] }
 0x29e   : > { %6408 = vmatpush1.bf16.msra.mxu1 %v6407_v14  ;;  %6154 = vmatprep.subr.bf16.mxu0 %v6153_v16  ;;  %v6171_v14 = vpack.c.bf16 %v1097_v5, %v1093_v4  ;;  %v6427_v16 = vpack.c.bf16 %v1099_v8, %v1095_v6  ;;  %v6429_v23 = vpack.c.bf16 %v1108_v13, %v1104_v12  ;;  %v1133_v5 = vld [vmem:[#allocation5 + $0x780] sm:$0xff]  ;;  %v1146_v12 = vld [vmem:[#allocation5 + $0x7e8] sm:$0xff]  ;;  %v1144_v13 = vld [vmem:[#allocation5 + $0x7d8] sm:$0xff] }
 0x29f   : > { %6410 = vmatprep.subr.bf16.mxu1 %v6409_v20  ;;  %v1103_v20 = vld [vmem:[#allocation5 + $0x690] sm:$0xff]  ;;  %v6189_v4 = vpack.c.bf16 %v1138_v62, %v1134_v61  ;;  %v1137_v6 = vld [vmem:[#allocation5 + $0x7a0] sm:$0xff] }
 0x2a0   : > { %v1165_v61 = vld [vmem:[#allocation5 + $0x880] sm:$0xff] }
 0x2a1   : > { %6156 = vmatpush1.bf16.msra.mxu0 %v6155_v28  ;;  %v1116_v28 = vld [vmem:[#allocation5 + $0x6f8] sm:$0xff]  ;;  %v1169_v62 = vld [vmem:[#allocation5 + $0x8a0] sm:$0xff] }
 0x2a2   : > { %6412 = vmatpush1.bf16.msra.mxu1 %v6411_v29  ;;  %6158 = vmatprep.subr.bf16.mxu0 %v6157_v30  ;;  %v6175_v29 = vpack.c.bf16 %v1105_v19, %v1101_v18  ;;  %v6431_v30 = vpack.c.bf16 %v1107_v24, %v1103_v20  ;;  %v6433_v35 = vpack.c.bf16 %v1116_v28, %v1112_v27  ;;  %v1141_v19 = vld [vmem:[#allocation5 + $0x7c0] sm:$0xff]  ;;  %v1154_v27 = vld [vmem:[#allocation5 + $0x828] sm:$0xff]  ;;  %v1152_v28 = vld [vmem:[#allocation5 + $0x818] sm:$0xff] }
 0x2a3   : > { %6414 = vmatprep.subr.bf16.mxu1 %v6413_v34  ;;  %v1111_v34 = vld [vmem:[#allocation5 + $0x6d0] sm:$0xff]  ;;  %v6193_v18 = vpack.c.bf16 %v1146_v12, %v1142_v11  ;;  %v1145_v20 = vld [vmem:[#allocation5 + $0x7e0] sm:$0xff] }
 0x2a4   : > { %v1173_v11 = vld [vmem:[#allocation5 + $0x8c0] sm:$0xff] }
 0x2a5   : > { %6160 = vmatpush1.bf16.msra.mxu0 %v6159_v40  ;;  %v1124_v40 = vld [vmem:[#allocation5 + $0x738] sm:$0xff]  ;;  %v1177_v12 = vld [vmem:[#allocation5 + $0x8e0] sm:$0xff] }
 0x2a6   : > { %6416 = vmatpush1.bf16.msra.mxu1 %v6415_v41  ;;  %6162 = vmatprep.subr.bf16.mxu0 %v6161_v42  ;;  %v6179_v41 = vpack.c.bf16 %v1113_v33, %v1109_v32  ;;  %v6435_v42 = vpack.c.bf16 %v1115_v36, %v1111_v34  ;;  %v6437_v47 = vpack.c.bf16 %v1124_v40, %v1120_v39  ;;  %v1149_v34 = vld [vmem:[#allocation5 + $0x800] sm:$0xff]  ;;  %v1151_v36 = vld [vmem:[#allocation5 + $0x810] sm:$0xff]  ;;  %v1158_v39 = vld [vmem:[#allocation5 + $0x848] sm:$0xff] }
 0x2a7   : > { %6418 = vmatprep.subr.bf16.mxu1 %v6417_v46  ;;  %v1119_v46 = vld [vmem:[#allocation5 + $0x710] sm:$0xff]  ;;  %v6197_v33 = vpack.c.bf16 %v1154_v27, %v1150_v26  ;;  %v1162_v40 = vld [vmem:[#allocation5 + $0x868] sm:$0xff]  ;;  %v1181_v26 = vld [vmem:[#allocation5 + $0x900] sm:$0xff] }
 0x2a8   : > { %v1185_v27 = vld [vmem:[#allocation5 + $0x920] sm:$0xff] }
 0x2a9   : > { %6164 = vmatpush1.bf16.msra.mxu0 %v6163_v52  ;;  %v1132_v52 = vld [vmem:[#allocation5 + $0x778] sm:$0xff] }
 0x2aa   : > { %6420 = vmatpush1.bf16.msra.mxu1 %v6419_v53  ;;  %6166 = vmatprep.subr.bf16.mxu0 %v6165_v54  ;;  %v6183_v53 = vpack.c.bf16 %v1121_v45, %v1117_v44  ;;  %v6439_v54 = vpack.c.bf16 %v1123_v48, %v1119_v46  ;;  %v6441_v59 = vpack.c.bf16 %v1132_v52, %v1128_v51  ;;  %v1164_v44 = vld [vmem:[#allocation5 + $0x878] sm:$0xff]  ;;  %v1157_v48 = vld [vmem:[#allocation5 + $0x840] sm:$0xff]  ;;  %v1163_v52 = vld [vmem:[#allocation5 + $0x870] sm:$0xff] }
 0x2ab   : > { %6422 = vmatprep.subr.bf16.mxu1 %v6421_v58  ;;  %v1127_v58 = vld [vmem:[#allocation5 + $0x750] sm:$0xff]  ;;  %v6455_v46 = vpack.c.bf16 %v1155_v38, %v1151_v36  ;;  %v6215_v36 = vpack.c.bf16 %v1185_v27, %v1181_v26 }
 0x2ad   : > { %6168 = vmatpush1.bf16.msra.mxu0 %v6167_v0  ;;  %v1140_v0 = vld [vmem:[#allocation5 + $0x7b8] sm:$0xff] }
 0x2ae   : > { %6424 = vmatpush1.bf16.msra.mxu1 %v6423_v2  ;;  %6170 = vmatprep.subr.bf16.mxu0 %v6169_v3  ;;  %v6187_v2 = vpack.c.bf16 %v1129_v57, %v1125_v56  ;;  %v6443_v3 = vpack.c.bf16 %v1131_v60, %v1127_v58  ;;  %v6445_v8 = vpack.c.bf16 %v1140_v0, %v1136_v63  ;;  %v1168_v56 = vld [vmem:[#allocation5 + $0x898] sm:$0xff]  ;;  %v1167_v63 = vld [vmem:[#allocation5 + $0x890] sm:$0xff] }
 0x2af   : > { %6426 = vmatprep.subr.bf16.mxu1 %v6425_v7  ;;  %v1135_v7 = vld [vmem:[#allocation5 + $0x790] sm:$0xff]  ;;  %v1172_v57 = vld [vmem:[#allocation5 + $0x8b8] sm:$0xff]  ;;  %v6203_v58 = vpack.c.bf16 %v1161_v49, %v1157_v48 }
 0x2b0   : > { %v6461_v0 = vpack.c.bf16 %v1172_v57, %v1168_v56  ;;  %v1204_v48 = vld [vmem:[#allocation5 + $0x9b8] sm:$0xff]  ;;  %v1203_v56 = vld [vmem:[#allocation5 + $0x9b0] sm:$0xff]  ;;  %v1206_v57 = vld [vmem:[#allocation5 + $0x9c8] sm:$0xff] }
 0x2b1   : > { %6172 = vmatpush1.bf16.msra.mxu0 %v6171_v14  ;;  %v1148_v14 = vld [vmem:[#allocation5 + $0x7f8] sm:$0xff] }
 0x2b2   : > { %6428 = vmatpush1.bf16.msra.mxu1 %v6427_v16  ;;  %6174 = vmatprep.subr.bf16.mxu0 %v6173_v17  ;;  %v6191_v16 = vpack.c.bf16 %v1137_v6, %v1133_v5  ;;  %v6447_v17 = vpack.c.bf16 %v1139_v10, %v1135_v7  ;;  %v6449_v24 = vpack.c.bf16 %v1148_v14, %v1144_v13  ;;  %v1176_v5 = vld [vmem:[#allocation5 + $0x8d8] sm:$0xff]  ;;  %v1175_v13 = vld [vmem:[#allocation5 + $0x8d0] sm:$0xff] }
 0x2b3   : > { %6430 = vmatprep.subr.bf16.mxu1 %v6429_v23  ;;  %v1143_v23 = vld [vmem:[#allocation5 + $0x7d0] sm:$0xff]  ;;  %v1180_v6 = vld [vmem:[#allocation5 + $0x8f8] sm:$0xff]  ;;  %v6207_v7 = vpack.c.bf16 %v1169_v62, %v1165_v61 }
 0x2b4   : > { %v6451_v32 = vpack.c.bf16 %v1147_v25, %v1143_v23  ;;  %v6465_v14 = vpack.c.bf16 %v1180_v6, %v1176_v5  ;;  %v6211_v23 = vpack.c.bf16 %v1177_v12, %v1173_v11  ;;  %v1211_v5 = vld [vmem:[#allocation5 + $0x9f0] sm:$0xff]  ;;  %v1214_v6 = vld [vmem:[#allocation5 + $0xa08] sm:$0xff] }
 0x2b5   : > { %6176 = vmatpush1.bf16.msra.mxu0 %v6175_v29  ;;  %v1156_v29 = vld [vmem:[#allocation5 + $0x838] sm:$0xff] }
 0x2b6   : > { %6432 = vmatpush1.bf16.msra.mxu1 %v6431_v30  ;;  %6178 = vmatprep.subr.bf16.mxu0 %v6177_v31  ;;  %v9778_v30 = vsub.s32 2, %v9757_v1  ;;  %v6195_v31 = vpack.c.bf16 %v1145_v20, %v1141_v19  ;;  %v6453_v37 = vpack.c.bf16 %v1156_v29, %v1152_v28  ;;  %v1184_v19 = vld [vmem:[#allocation5 + $0x918] sm:$0xff]  ;;  %v1183_v28 = vld [vmem:[#allocation5 + $0x910] sm:$0xff] }
 0x2b7   : > { %6434 = vmatprep.subr.bf16.mxu1 %v6433_v35  ;;  %v1153_v35 = vld [vmem:[#allocation5 + $0x820] sm:$0xff]  ;;  %v1188_v20 = vld [vmem:[#allocation5 + $0x938] sm:$0xff] }
 0x2b8   : > { %v6199_v45 = vpack.c.bf16 %v1153_v35, %v1149_v34  ;;  %v6469_v29 = vpack.c.bf16 %v1188_v20, %v1184_v19  ;;  %v1192_v34 = vld [vmem:[#allocation5 + $0x958] sm:$0xff]  ;;  %v1219_v19 = vld [vmem:[#allocation5 + $0xa30] sm:$0xff]  ;;  %v1222_v20 = vld [vmem:[#allocation5 + $0xa48] sm:$0xff] }
 0x2b9   : > { %6180 = vmatpush1.bf16.msra.mxu0 %v6179_v41  ;;  %v1429_v41 = vsub.s32 5, %v9757_v1  ;;  %v1196_v35 = vld [vmem:[#allocation5 + $0x978] sm:$0xff] }
 0x2ba   : > { %6436 = vmatpush1.bf16.msra.mxu1 %v6435_v42  ;;  %6182 = vmatprep.subr.bf16.mxu0 %v6181_v43  ;;  %v1418_v42 = vrot.slane %v9763_v22, %v9778_v30  ;;  %v1160_v43 = vld [vmem:[#allocation5 + $0x858] sm:$0xff] }
 0x2bb   : > { %6438 = vmatprep.subr.bf16.mxu1 %v6437_v47  ;;  %v6201_v47 = vpack.c.bf16 %v1162_v40, %v1158_v39  ;;  %v6457_v51 = vpack.c.bf16 %v1164_v44, %v1160_v43  ;;  %v1189_v39 = vld [vmem:[#allocation5 + $0x940] sm:$0xff]  ;;  %v6473_v43 = vpack.c.bf16 %v1196_v35, %v1192_v34  ;;  %v1195_v44 = vld [vmem:[#allocation5 + $0x970] sm:$0xff]  ;;  %v1230_v35 = vld [vmem:[#allocation5 + $0xa88] sm:$0xff] }
 0x2bc   : > { %v1193_v40 = vld [vmem:[#allocation5 + $0x960] sm:$0xff]  ;;  %v1227_v34 = vld [vmem:[#allocation5 + $0xa70] sm:$0xff] }
 0x2bd   : > { %6184 = vmatpush1.bf16.msra.mxu0 %v6183_v53  ;;  %v1166_v53 = vld [vmem:[#allocation5 + $0x888] sm:$0xff]  ;;  %v6219_v49 = vpack.c.bf16 %v1193_v40, %v1189_v39 }
 0x2be   : > { %6440 = vmatpush1.bf16.msra.mxu1 %v6439_v54  ;;  %6186 = vmatprep.subr.bf16.mxu0 %v6185_v55  ;;  %v1170_v54 = vld [vmem:[#allocation5 + $0x8a8] sm:$0xff]  ;;  %v1430_v55 = vrot.slane %v9763_v22, %v1429_v41 }
 0x2bf   : > { %6442 = vmatprep.subr.bf16.mxu1 %v6441_v59  ;;  %v6459_v59 = vpack.c.bf16 %v1163_v52, %v1159_v50  ;;  %v6205_v60 = vpack.c.bf16 %v1170_v54, %v1166_v53  ;;  %v1197_v52 = vld [vmem:[#allocation5 + $0x980] sm:$0xff]  ;;  %v1199_v54 = vld [vmem:[#allocation5 + $0x990] sm:$0xff] }
 0x2c0   : > { %v1201_v53 = vld [vmem:[#allocation5 + $0x9a0] sm:$0xff]  ;;  %v6479_v62 = vpack.c.bf16 %v1203_v56, %v1199_v54 }
 0x2c1   : > { %6188 = vmatpush1.bf16.msra.mxu0 %v6187_v2  ;;  %v1171_v2 = vld [vmem:[#allocation5 + $0x8b0] sm:$0xff]  ;;  %v6223_v61 = vpack.c.bf16 %v1201_v53, %v1197_v52  ;;  %v1241_v56 = vld [vmem:[#allocation5 + $0xae0] sm:$0xff] }
 0x2c2   : > { %6444 = vmatpush1.bf16.msra.mxu1 %v6443_v3  ;;  %6190 = vmatprep.subr.bf16.mxu0 %v6189_v4  ;;  %v1174_v3 = vld [vmem:[#allocation5 + $0x8c8] sm:$0xff] }
 0x2c3   : > { %6446 = vmatprep.subr.bf16.mxu1 %v6445_v8  ;;  %v1178_v4 = vld [vmem:[#allocation5 + $0x8e8] sm:$0xff]  ;;  %v6463_v8 = vpack.c.bf16 %v1171_v2, %v1167_v63  ;;  %v1209_v2 = vld [vmem:[#allocation5 + $0x9e0] sm:$0xff] }
 0x2c4   : > { %v6209_v10 = vpack.c.bf16 %v1178_v4, %v1174_v3  ;;  %v1207_v3 = vld [vmem:[#allocation5 + $0x9d0] sm:$0xff] }
 0x2c5   : > { %6192 = vmatpush1.bf16.msra.mxu0 %v6191_v16  ;;  %v1179_v16 = vld [vmem:[#allocation5 + $0x8f0] sm:$0xff]  ;;  %v6483_v12 = vpack.c.bf16 %v1211_v5, %v1207_v3  ;;  %v1249_v5 = vld [vmem:[#allocation5 + $0xb20] sm:$0xff] }
 0x2c6   : > { %6448 = vmatpush1.bf16.msra.mxu1 %v6447_v17  ;;  %6194 = vmatprep.subr.bf16.mxu0 %v6193_v18  ;;  %v1182_v17 = vld [vmem:[#allocation5 + $0x908] sm:$0xff] }
 0x2c7   : > { %6450 = vmatprep.subr.bf16.mxu1 %v6449_v24  ;;  %v1186_v18 = vld [vmem:[#allocation5 + $0x928] sm:$0xff]  ;;  %v6467_v24 = vpack.c.bf16 %v1179_v16, %v1175_v13  ;;  %v1217_v16 = vld [vmem:[#allocation5 + $0xa20] sm:$0xff] }
 0x2c8   : > { %v6213_v25 = vpack.c.bf16 %v1186_v18, %v1182_v17  ;;  %v1215_v17 = vld [vmem:[#allocation5 + $0xa10] sm:$0xff] }
 0x2c9   : > { %6196 = vmatpush1.bf16.msra.mxu0 %v6195_v31  ;;  %v1187_v31 = vld [vmem:[#allocation5 + $0x930] sm:$0xff]  ;;  %v6487_v27 = vpack.c.bf16 %v1219_v19, %v1215_v17  ;;  %v1257_v19 = vld [vmem:[#allocation5 + $0xb60] sm:$0xff] }
 0x2ca   : > { %6452 = vmatpush1.bf16.msra.mxu1 %v6451_v32  ;;  %6198 = vmatprep.subr.bf16.mxu0 %v6197_v33  ;;  %v1190_v32 = vld [vmem:[#allocation5 + $0x948] sm:$0xff] }
 0x2cb   : > { %6454 = vmatprep.subr.bf16.mxu1 %v6453_v37  ;;  %v1194_v33 = vld [vmem:[#allocation5 + $0x968] sm:$0xff]  ;;  %v6471_v37 = vpack.c.bf16 %v1187_v31, %v1183_v28  ;;  %v1225_v31 = vld [vmem:[#allocation5 + $0xa60] sm:$0xff] }
 0x2cc   : > { %1604 = vmatmul.mubr.f32.vlgmr.msra.gmra.mrb[0].mxu0 %v1418_v42  ;;  %v6217_v38 = vpack.c.bf16 %v1194_v33, %v1190_v32  ;;  %v1223_v32 = vld [vmem:[#allocation5 + $0xa50] sm:$0xff] }
 0x2cd   : > { %6200 = vmatpush1.bf16.msra.mxu0 %v6199_v45  ;;  %1888 = vmatmul.mubr.f32.vlgmr.msra.gmra.mrb[0].mxu1 %v1418_v42  ;;  %v1191_v42 = vld [vmem:[#allocation5 + $0x950] sm:$0xff]  ;;  %v1198_v45 = vld [vmem:[#allocation5 + $0x988] sm:$0xff]  ;;  %v6491_v40 = vpack.c.bf16 %v1227_v34, %v1223_v32  ;;  %v1265_v34 = vld [vmem:[#allocation5 + $0xba0] sm:$0xff] }
 0x2ce   : > { %6456 = vmatpush1.bf16.msra.mxu1 %v6455_v46  ;;  %6202 = vmatprep.subr.bf16.mxu0 %v6201_v47  ;;  %v1202_v46 = vld [vmem:[#allocation5 + $0x9a8] sm:$0xff]  ;;  %v1200_v47 = vld [vmem:[#allocation5 + $0x998] sm:$0xff]  ;;  %v6475_v50 = vpack.c.bf16 %v1195_v44, %v1191_v42  ;;  %v1233_v44 = vld [vmem:[#allocation5 + $0xaa0] sm:$0xff] }
 0x2cf   : > { %6458 = vmatprep.subr.bf16.mxu1 %v6457_v51  ;;  %1674 = vmatprep.mubr.f32.mxu0 %v1430_v55  ;;  %v6221_v51 = vpack.c.bf16 %v1202_v46, %v1198_v45  ;;  %v1231_v45 = vld [vmem:[#allocation5 + $0xa90] sm:$0xff] }
 0x2d0   : > { %1958 = vmatprep.mubr.f32.mxu1 %v1430_v55  ;;  %v6477_v55 = vpack.c.bf16 %v1204_v48, %v1200_v47  ;;  %v1235_v47 = vld [vmem:[#allocation5 + $0xab0] sm:$0xff]  ;;  %v1238_v48 = vld [vmem:[#allocation5 + $0xac8] sm:$0xff] }
 0x2d1   : > { %6204 = vmatpush1.bf16.msra.mxu0 %v6203_v58  ;;  %v1210_v58 = vld [vmem:[#allocation5 + $0x9e8] sm:$0xff]  ;;  %v6495_v53 = vpack.c.bf16 %v1235_v47, %v1231_v45  ;;  %v1273_v47 = vld [vmem:[#allocation5 + $0xbe0] sm:$0xff] }
 0x2d2   : > { %6460 = vmatpush1.bf16.msra.mxu1 %v6459_v59  ;;  %6206 = vmatprep.subr.bf16.mxu0 %v6205_v60  ;;  %v1208_v59 = vld [vmem:[#allocation5 + $0x9d8] sm:$0xff]  ;;  %v6225_v63 = vpack.c.bf16 %v1210_v58, %v1206_v57  ;;  %v1239_v57 = vld [vmem:[#allocation5 + $0xad0] sm:$0xff] }
 0x2d3   : > { %6462 = vmatprep.subr.bf16.mxu1 %v6461_v0  ;;  %v1212_v60 = vld [vmem:[#allocation5 + $0x9f8] sm:$0xff]  ;;  %v1205_v0 = vld [vmem:[#allocation5 + $0x9c0] sm:$0xff] }
 0x2d4   : > { %v6481_v4 = vpack.c.bf16 %v1212_v60, %v1208_v59  ;;  %v6227_v11 = vpack.c.bf16 %v1209_v2, %v1205_v0  ;;  %v1243_v59 = vld [vmem:[#allocation5 + $0xaf0] sm:$0xff]  ;;  %v1246_v60 = vld [vmem:[#allocation5 + $0xb08] sm:$0xff] }
 0x2d5   : > { %6208 = vmatpush1.bf16.msra.mxu0 %v6207_v7  ;;  %v1218_v7 = vld [vmem:[#allocation5 + $0xa28] sm:$0xff]  ;;  %v6499_v2 = vpack.c.bf16 %v1243_v59, %v1239_v57  ;;  %v1277_v59 = vld [vmem:[#allocation5 + $0xc00] sm:$0xff] }
 0x2d6   : > { %6464 = vmatpush1.bf16.msra.mxu1 %v6463_v8  ;;  %6210 = vmatprep.subr.bf16.mxu0 %v6209_v10  ;;  %v1216_v8 = vld [vmem:[#allocation5 + $0xa18] sm:$0xff]  ;;  %v6229_v13 = vpack.c.bf16 %v1218_v7, %v1214_v6  ;;  %v1247_v6 = vld [vmem:[#allocation5 + $0xb10] sm:$0xff] }
 0x2d7   : > { %6466 = vmatprep.subr.bf16.mxu1 %v6465_v14  ;;  %v1220_v10 = vld [vmem:[#allocation5 + $0xa38] sm:$0xff]  ;;  %v1213_v14 = vld [vmem:[#allocation5 + $0xa00] sm:$0xff] }
 0x2d8   : > { %v6485_v18 = vpack.c.bf16 %v1220_v10, %v1216_v8  ;;  %v6231_v26 = vpack.c.bf16 %v1217_v16, %v1213_v14  ;;  %v1251_v8 = vld [vmem:[#allocation5 + $0xb30] sm:$0xff]  ;;  %v1254_v10 = vld [vmem:[#allocation5 + $0xb48] sm:$0xff] }
 0x2d9   : > { %6212 = vmatpush1.bf16.msra.mxu0 %v6211_v23  ;;  %v1226_v23 = vld [vmem:[#allocation5 + $0xa68] sm:$0xff]  ;;  %v6503_v16 = vpack.c.bf16 %v1251_v8, %v1247_v6  ;;  %v1292_v6 = vld [vmem:[#allocation5 + $0xc78] sm:$0xff] }
 0x2da   : > { %6468 = vmatpush1.bf16.msra.mxu1 %v6467_v24  ;;  %6214 = vmatprep.subr.bf16.mxu0 %v6213_v25  ;;  %v1224_v24 = vld [vmem:[#allocation5 + $0xa58] sm:$0xff]  ;;  %v6233_v28 = vpack.c.bf16 %v1226_v23, %v1222_v20  ;;  %v1255_v20 = vld [vmem:[#allocation5 + $0xb50] sm:$0xff] }
 0x2db   : > { %6470 = vmatprep.subr.bf16.mxu1 %v6469_v29  ;;  %v1228_v25 = vld [vmem:[#allocation5 + $0xa78] sm:$0xff]  ;;  %v1221_v29 = vld [vmem:[#allocation5 + $0xa40] sm:$0xff] }
 0x2dc   : > { %v6489_v33 = vpack.c.bf16 %v1228_v25, %v1224_v24  ;;  %v6235_v39 = vpack.c.bf16 %v1225_v31, %v1221_v29  ;;  %v1259_v24 = vld [vmem:[#allocation5 + $0xb70] sm:$0xff]  ;;  %v1262_v25 = vld [vmem:[#allocation5 + $0xb88] sm:$0xff] }
 0x2dd   : > { %6216 = vmatpush1.bf16.msra.mxu0 %v6215_v36  ;;  %v1234_v36 = vld [vmem:[#allocation5 + $0xaa8] sm:$0xff]  ;;  %v6507_v31 = vpack.c.bf16 %v1259_v24, %v1255_v20  ;;  %v1296_v20 = vld [vmem:[#allocation5 + $0xc98] sm:$0xff] }
 0x2de   : > { %6472 = vmatpush1.bf16.msra.mxu1 %v6471_v37  ;;  %6218 = vmatprep.subr.bf16.mxu0 %v6217_v38  ;;  %v1232_v37 = vld [vmem:[#allocation5 + $0xa98] sm:$0xff]  ;;  %v6237_v42 = vpack.c.bf16 %v1234_v36, %v1230_v35  ;;  %v1263_v35 = vld [vmem:[#allocation5 + $0xb90] sm:$0xff] }
 0x2df   : > { %6474 = vmatprep.subr.bf16.mxu1 %v6473_v43  ;;  %v1236_v38 = vld [vmem:[#allocation5 + $0xab8] sm:$0xff]  ;;  %v1229_v43 = vld [vmem:[#allocation5 + $0xa80] sm:$0xff] }
 0x2e0   : > { %v6493_v46 = vpack.c.bf16 %v1236_v38, %v1232_v37  ;;  %v6239_v52 = vpack.c.bf16 %v1233_v44, %v1229_v43  ;;  %v1267_v37 = vld [vmem:[#allocation5 + $0xbb0] sm:$0xff]  ;;  %v1270_v38 = vld [vmem:[#allocation5 + $0xbc8] sm:$0xff] }
 0x2e1   : > { %6220 = vmatpush1.bf16.msra.mxu0 %v6219_v49  ;;  %v1242_v49 = vld [vmem:[#allocation5 + $0xae8] sm:$0xff]  ;;  %v6511_v44 = vpack.c.bf16 %v1267_v37, %v1263_v35  ;;  %v1304_v35 = vld [vmem:[#allocation5 + $0xcd8] sm:$0xff] }
 0x2e2   : > { %6476 = vmatpush1.bf16.msra.mxu1 %v6475_v50  ;;  %6222 = vmatprep.subr.bf16.mxu0 %v6221_v51  ;;  %v1240_v50 = vld [vmem:[#allocation5 + $0xad8] sm:$0xff]  ;;  %v6241_v54 = vpack.c.bf16 %v1242_v49, %v1238_v48  ;;  %v1271_v48 = vld [vmem:[#allocation5 + $0xbd0] sm:$0xff] }
 0x2e3   : > { %6478 = vmatprep.subr.bf16.mxu1 %v6477_v55  ;;  %v1244_v51 = vld [vmem:[#allocation5 + $0xaf8] sm:$0xff]  ;;  %v1237_v55 = vld [vmem:[#allocation5 + $0xac0] sm:$0xff] }
 0x2e4   : > { %v6497_v58 = vpack.c.bf16 %v1244_v51, %v1240_v50  ;;  %v6243_v0 = vpack.c.bf16 %v1241_v56, %v1237_v55  ;;  %v1275_v50 = vld [vmem:[#allocation5 + $0xbf0] sm:$0xff]  ;;  %v1278_v51 = vld [vmem:[#allocation5 + $0xc08] sm:$0xff]  ;;  %v1425_v55 = vsub.s32 4, %v9757_v1 }
 0x2e5   : > { %6224 = vmatpush1.bf16.msra.mxu0 %v6223_v61  ;;  %v1250_v61 = vld [vmem:[#allocation5 + $0xb28] sm:$0xff]  ;;  %v6515_v57 = vpack.c.bf16 %v1275_v50, %v1271_v48  ;;  %v1312_v48 = vld [vmem:[#allocation5 + $0xd18] sm:$0xff] }
 0x2e6   : > { %6480 = vmatpush1.bf16.msra.mxu1 %v6479_v62  ;;  %6226 = vmatprep.subr.bf16.mxu0 %v6225_v63  ;;  %v1248_v62 = vld [vmem:[#allocation5 + $0xb18] sm:$0xff]  ;;  %v6245_v3 = vpack.c.bf16 %v1250_v61, %v1246_v60  ;;  %v1281_v60 = vld [vmem:[#allocation5 + $0xc20] sm:$0xff]  ;;  %v1279_v61 = vld [vmem:[#allocation5 + $0xc10] sm:$0xff] }
 0x2e7   : > { %6482 = vmatprep.subr.bf16.mxu1 %v6481_v4  ;;  %v1252_v63 = vld [vmem:[#allocation5 + $0xb38] sm:$0xff]  ;;  %v1245_v4 = vld [vmem:[#allocation5 + $0xb00] sm:$0xff] }
 0x2e8   : > { %v6501_v7 = vpack.c.bf16 %v1252_v63, %v1248_v62  ;;  %v6247_v14 = vpack.c.bf16 %v1249_v5, %v1245_v4  ;;  %v1283_v63 = vld [vmem:[#allocation5 + $0xc30] sm:$0xff]  ;;  %v1426_v4 = vrot.slane %v9763_v22, %v1425_v55  ;;  %v1288_v5 = vld [vmem:[#allocation5 + $0xc58] sm:$0xff] }
 0x2e9   : > { %6228 = vmatpush1.bf16.msra.mxu0 %v6227_v11  ;;  %v1258_v11 = vld [vmem:[#allocation5 + $0xb68] sm:$0xff]  ;;  %v6519_v8 = vpack.c.bf16 %v1283_v63, %v1279_v61  ;;  %v1320_v61 = vld [vmem:[#allocation5 + $0xd58] sm:$0xff] }
 0x2ea   : > { %6484 = vmatpush1.bf16.msra.mxu1 %v6483_v12  ;;  %6230 = vmatprep.subr.bf16.mxu0 %v6229_v13  ;;  %v1256_v12 = vld [vmem:[#allocation5 + $0xb58] sm:$0xff]  ;;  %v6249_v17 = vpack.c.bf16 %v1258_v11, %v1254_v10  ;;  %v1285_v11 = vld [vmem:[#allocation5 + $0xc40] sm:$0xff] }
 0x2eb   : > { %6486 = vmatprep.subr.bf16.mxu1 %v6485_v18  ;;  %v1260_v13 = vld [vmem:[#allocation5 + $0xb78] sm:$0xff]  ;;  %v1253_v18 = vld [vmem:[#allocation5 + $0xb40] sm:$0xff] }
 0x2ec   : > { %v6505_v23 = vpack.c.bf16 %v1260_v13, %v1256_v12  ;;  %v6251_v29 = vpack.c.bf16 %v1257_v19, %v1253_v18  ;;  %v1289_v12 = vld [vmem:[#allocation5 + $0xc60] sm:$0xff]  ;;  %v1287_v13 = vld [vmem:[#allocation5 + $0xc50] sm:$0xff]  ;;  %v1298_v18 = vld [vmem:[#allocation5 + $0xca8] sm:$0xff] }
 0x2ed   : > { %6232 = vmatpush1.bf16.msra.mxu0 %v6231_v26  ;;  %v1266_v26 = vld [vmem:[#allocation5 + $0xba8] sm:$0xff]  ;;  %v6267_v24 = vpack.c.bf16 %v1289_v12, %v1285_v11  ;;  %v1328_v12 = vld [vmem:[#allocation5 + $0xd98] sm:$0xff] }
 0x2ee   : > { %6488 = vmatpush1.bf16.msra.mxu1 %v6487_v27  ;;  %6234 = vmatprep.subr.bf16.mxu0 %v6233_v28  ;;  %v1264_v27 = vld [vmem:[#allocation5 + $0xb98] sm:$0xff]  ;;  %v6253_v32 = vpack.c.bf16 %v1266_v26, %v1262_v25  ;;  %v1330_v11 = vld [vmem:[#allocation5 + $0xda8] sm:$0xff] }
 0x2ef   : > { %6490 = vmatprep.subr.bf16.mxu1 %v6489_v33  ;;  %v1268_v28 = vld [vmem:[#allocation5 + $0xbb8] sm:$0xff]  ;;  %v1261_v33 = vld [vmem:[#allocation5 + $0xb80] sm:$0xff] }
 0x2f0   : > { %v6509_v36 = vpack.c.bf16 %v1268_v28, %v1264_v27  ;;  %v6255_v43 = vpack.c.bf16 %v1265_v34, %v1261_v33  ;;  %v1293_v27 = vld [vmem:[#allocation5 + $0xc80] sm:$0xff]  ;;  %v1302_v33 = vld [vmem:[#allocation5 + $0xcc8] sm:$0xff] }
 0x2f1   : > { %6236 = vmatpush1.bf16.msra.mxu0 %v6235_v39  ;;  %v1274_v39 = vld [vmem:[#allocation5 + $0xbe8] sm:$0xff]  ;;  %v1297_v28 = vld [vmem:[#allocation5 + $0xca0] sm:$0xff] }
 0x2f2   : > { %6492 = vmatpush1.bf16.msra.mxu1 %v6491_v40  ;;  %6238 = vmatprep.subr.bf16.mxu0 %v6237_v42  ;;  %v1272_v40 = vld [vmem:[#allocation5 + $0xbd8] sm:$0xff]  ;;  %v6257_v45 = vpack.c.bf16 %v1274_v39, %v1270_v38  ;;  %v1306_v34 = vld [vmem:[#allocation5 + $0xce8] sm:$0xff]  ;;  %v6271_v37 = vpack.c.bf16 %v1297_v28, %v1293_v27 }
 0x2f3   : > { %6494 = vmatprep.subr.bf16.mxu1 %v6493_v46  ;;  %v1276_v42 = vld [vmem:[#allocation5 + $0xbf8] sm:$0xff]  ;;  %v1269_v46 = vld [vmem:[#allocation5 + $0xbc0] sm:$0xff]  ;;  %v6273_v39 = vpack.c.bf16 %v1306_v34, %v1302_v33 }
 0x2f4   : > { %v6513_v49 = vpack.c.bf16 %v1276_v42, %v1272_v40  ;;  %v6259_v56 = vpack.c.bf16 %v1273_v47, %v1269_v46  ;;  %v1301_v40 = vld [vmem:[#allocation5 + $0xcc0] sm:$0xff]  ;;  %v1310_v46 = vld [vmem:[#allocation5 + $0xd08] sm:$0xff]  ;;  %v1336_v27 = vld [vmem:[#allocation5 + $0xdd8] sm:$0xff] }
 0x2f5   : > { %6240 = vmatpush1.bf16.msra.mxu0 %v6239_v52  ;;  %v1282_v52 = vld [vmem:[#allocation5 + $0xc28] sm:$0xff]  ;;  %v1305_v42 = vld [vmem:[#allocation5 + $0xce0] sm:$0xff]  ;;  %v1340_v28 = vld [vmem:[#allocation5 + $0xdf8] sm:$0xff] }
 0x2f6   : > { %6496 = vmatpush1.bf16.msra.mxu1 %v6495_v53  ;;  %6242 = vmatprep.subr.bf16.mxu0 %v6241_v54  ;;  %v1280_v53 = vld [vmem:[#allocation5 + $0xc18] sm:$0xff]  ;;  %v1314_v47 = vld [vmem:[#allocation5 + $0xd28] sm:$0xff]  ;;  %v6275_v50 = vpack.c.bf16 %v1305_v42, %v1301_v40  ;;  %v1333_v33 = vld [vmem:[#allocation5 + $0xdc0] sm:$0xff] }
 0x2f7   : > { %6498 = vmatprep.subr.bf16.mxu1 %v6497_v58  ;;  %v1284_v54 = vld [vmem:[#allocation5 + $0xc38] sm:$0xff]  ;;  %v6261_v58 = vpack.c.bf16 %v1282_v52, %v1278_v51  ;;  %v6277_v52 = vpack.c.bf16 %v1314_v47, %v1310_v46  ;;  %v1337_v34 = vld [vmem:[#allocation5 + $0xde0] sm:$0xff] }
 0x2f8   : > { %v6517_v62 = vpack.c.bf16 %v1284_v54, %v1280_v53  ;;  %v1309_v53 = vld [vmem:[#allocation5 + $0xd00] sm:$0xff]  ;;  %v1344_v40 = vld [vmem:[#allocation5 + $0xe18] sm:$0xff] }
 0x2f9   : > { %6244 = vmatpush1.bf16.msra.mxu0 %v6243_v0  ;;  %v1286_v0 = vld [vmem:[#allocation5 + $0xc48] sm:$0xff]  ;;  %v1313_v54 = vld [vmem:[#allocation5 + $0xd20] sm:$0xff]  ;;  %v1348_v42 = vld [vmem:[#allocation5 + $0xe38] sm:$0xff] }
 0x2fa   : > { %6500 = vmatpush1.bf16.msra.mxu1 %v6499_v2  ;;  %6246 = vmatprep.subr.bf16.mxu0 %v6245_v3  ;;  %v1290_v2 = vld [vmem:[#allocation5 + $0xc68] sm:$0xff]  ;;  %v1437_v3 = vsub.s32 7, %v9757_v1  ;;  %v6279_v63 = vpack.c.bf16 %v1313_v54, %v1309_v53  ;;  %v1341_v46 = vld [vmem:[#allocation5 + $0xe00] sm:$0xff]  ;;  %v1352_v53 = vld [vmem:[#allocation5 + $0xe58] sm:$0xff] }
 0x2fb   : > { %6502 = vmatprep.subr.bf16.mxu1 %v6501_v7  ;;  %v6263_v7 = vpack.c.bf16 %v1281_v60, %v1277_v59  ;;  %v6265_v10 = vpack.c.bf16 %v1290_v2, %v1286_v0  ;;  %v1318_v59 = vld [vmem:[#allocation5 + $0xd48] sm:$0xff]  ;;  %v1345_v47 = vld [vmem:[#allocation5 + $0xe20] sm:$0xff]  ;;  %v1356_v54 = vld [vmem:[#allocation5 + $0xe78] sm:$0xff] }
 0x2fc   : > { %v1438_v19 = vrot.slane %v9763_v22, %v1437_v3  ;;  %v1322_v60 = vld [vmem:[#allocation5 + $0xd68] sm:$0xff] }
 0x2fd   : > { %6248 = vmatpush1.bf16.msra.mxu0 %v6247_v14  ;;  %v6521_v14 = vpack.c.bf16 %v1292_v6, %v1288_v5  ;;  %v6281_v2 = vpack.c.bf16 %v1322_v60, %v1318_v59  ;;  %v1321_v5 = vld [vmem:[#allocation5 + $0xd60] sm:$0xff]  ;;  %v1319_v6 = vld [vmem:[#allocation5 + $0xd50] sm:$0xff] }
 0x2fe   : > { %6504 = vmatpush1.bf16.msra.mxu1 %v6503_v16  ;;  %6250 = vmatprep.subr.bf16.mxu0 %v6249_v17  ;;  %v1291_v16 = vld [vmem:[#allocation5 + $0xc70] sm:$0xff]  ;;  %v1294_v17 = vld [vmem:[#allocation5 + $0xc88] sm:$0xff]  ;;  %v1349_v59 = vld [vmem:[#allocation5 + $0xe40] sm:$0xff] }
 0x2ff   : > { %6506 = vmatprep.subr.bf16.mxu1 %v6505_v23  ;;  %v1300_v23 = vld [vmem:[#allocation5 + $0xcb8] sm:$0xff]  ;;  %v6523_v25 = vpack.c.bf16 %v1291_v16, %v1287_v13  ;;  %v6269_v26 = vpack.c.bf16 %v1298_v18, %v1294_v17  ;;  %v1325_v18 = vld [vmem:[#allocation5 + $0xd80] sm:$0xff] }
 0x300   : > { %v1332_v13 = vld [vmem:[#allocation5 + $0xdb8] sm:$0xff]  ;;  %v1353_v60 = vld [vmem:[#allocation5 + $0xe60] sm:$0xff] }
 0x301   : > { %6252 = vmatpush1.bf16.msra.mxu0 %v6251_v29  ;;  %v1295_v29 = vld [vmem:[#allocation5 + $0xc90] sm:$0xff] }
 0x302   : > { %6508 = vmatpush1.bf16.msra.mxu1 %v6507_v31  ;;  %6254 = vmatprep.subr.bf16.mxu0 %v6253_v32  ;;  %v6525_v31 = vpack.c.bf16 %v1300_v23, %v1296_v20  ;;  %v1299_v32 = vld [vmem:[#allocation5 + $0xcb0] sm:$0xff]  ;;  %v6541_v23 = vpack.c.bf16 %v1332_v13, %v1328_v12 }
 0x303   : > { %6510 = vmatprep.subr.bf16.mxu1 %v6509_v36  ;;  %v1308_v36 = vld [vmem:[#allocation5 + $0xcf8] sm:$0xff]  ;;  %v6527_v38 = vpack.c.bf16 %v1299_v32, %v1295_v29  ;;  %v1327_v20 = vld [vmem:[#allocation5 + $0xd90] sm:$0xff] }
 0x304   : > { %v1359_v12 = vld [vmem:[#allocation5 + $0xe90] sm:$0xff] }
 0x305   : > { %6256 = vmatpush1.bf16.msra.mxu0 %v6255_v43  ;;  %v1303_v43 = vld [vmem:[#allocation5 + $0xcd0] sm:$0xff] }
 0x306   : > { %6512 = vmatpush1.bf16.msra.mxu1 %v6511_v44  ;;  %6258 = vmatprep.subr.bf16.mxu0 %v6257_v45  ;;  %v6529_v44 = vpack.c.bf16 %v1308_v36, %v1304_v35  ;;  %v1307_v45 = vld [vmem:[#allocation5 + $0xcf0] sm:$0xff]  ;;  %v6545_v36 = vpack.c.bf16 %v1340_v28, %v1336_v27 }
 0x307   : > { %6514 = vmatprep.subr.bf16.mxu1 %v6513_v49  ;;  %v1316_v49 = vld [vmem:[#allocation5 + $0xd38] sm:$0xff]  ;;  %v6531_v51 = vpack.c.bf16 %v1307_v45, %v1303_v43  ;;  %v1335_v35 = vld [vmem:[#allocation5 + $0xdd0] sm:$0xff]  ;;  %v6291_v43 = vpack.c.bf16 %v1337_v34, %v1333_v33 }
 0x308   : > { %v1367_v27 = vld [vmem:[#allocation5 + $0xed0] sm:$0xff]  ;;  %v1376_v33 = vld [vmem:[#allocation5 + $0xf18] sm:$0xff] }
 0x309   : > { %6260 = vmatpush1.bf16.msra.mxu0 %v6259_v56  ;;  %v1311_v56 = vld [vmem:[#allocation5 + $0xd10] sm:$0xff]  ;;  %v1380_v34 = vld [vmem:[#allocation5 + $0xf38] sm:$0xff] }
 0x30a   : > { %6516 = vmatpush1.bf16.msra.mxu1 %v6515_v57  ;;  %6262 = vmatprep.subr.bf16.mxu0 %v6261_v58  ;;  %v6533_v57 = vpack.c.bf16 %v1316_v49, %v1312_v48  ;;  %v1315_v58 = vld [vmem:[#allocation5 + $0xd30] sm:$0xff]  ;;  %v6549_v49 = vpack.c.bf16 %v1348_v42, %v1344_v40  ;;  %v6565_v42 = vpack.c.bf16 %v1380_v34, %v1376_v33  ;;  %v2047_v33 = vld [vmem:[#allocation8 + $0x38] sm:$0xff] }
 0x30b   : > { %6518 = vmatprep.subr.bf16.mxu1 %v6517_v62  ;;  %v1324_v62 = vld [vmem:[#allocation5 + $0xd78] sm:$0xff]  ;;  %v6535_v0 = vpack.c.bf16 %v1315_v58, %v1311_v56  ;;  %v1343_v48 = vld [vmem:[#allocation5 + $0xe10] sm:$0xff]  ;;  %v6295_v56 = vpack.c.bf16 %v1345_v47, %v1341_v46 }
 0x30c   : > { %1675 = vmatmul.mubr.f32.vlgmr.msra.gmra.mrb[0].mxu0 %v1426_v4  ;;  %v1375_v40 = vld [vmem:[#allocation5 + $0xf10] sm:$0xff]  ;;  %v1384_v46 = vld [vmem:[#allocation5 + $0xf58] sm:$0xff] }
 0x30d   : > { %6264 = vmatpush1.bf16.msra.mxu0 %v6263_v7  ;;  %1959 = vmatmul.mubr.f32.vlgmr.msra.gmra.mrb[0].mxu1 %v1426_v4  ;;  %v1317_v4 = vld [vmem:[#allocation5 + $0xd40] sm:$0xff]  ;;  %v6537_v7 = vpack.c.bf16 %v1324_v62, %v1320_v61  ;;  %v1351_v61 = vld [vmem:[#allocation5 + $0xe50] sm:$0xff]  ;;  %v6553_v62 = vpack.c.bf16 %v1356_v54, %v1352_v53  ;;  %v1388_v47 = vld [vmem:[#allocation5 + $0xf78] sm:$0xff] }
 0x30e   : > { %6520 = vmatpush1.bf16.msra.mxu1 %v6519_v8  ;;  %6266 = vmatprep.subr.bf16.mxu0 %v6265_v10  ;;  %v1323_v8 = vld [vmem:[#allocation5 + $0xd70] sm:$0xff]  ;;  %v1326_v10 = vld [vmem:[#allocation5 + $0xd88] sm:$0xff]  ;;  %v6569_v54 = vpack.c.bf16 %v1388_v47, %v1384_v46  ;;  %v2055_v47 = vld [vmem:[#allocation8 + $0x78] sm:$0xff] }
 0x30f   : > { %6522 = vmatprep.subr.bf16.mxu1 %v6521_v14  ;;  %1745 = vmatprep.mubr.f32.mxu0 %v1438_v19  ;;  %v6283_v14 = vpack.c.bf16 %v1321_v5, %v1317_v4  ;;  %v6539_v16 = vpack.c.bf16 %v1323_v8, %v1319_v6  ;;  %v6285_v17 = vpack.c.bf16 %v1330_v11, %v1326_v10  ;;  %v1360_v4 = vld [vmem:[#allocation5 + $0xe98] sm:$0xff]  ;;  %v1357_v10 = vld [vmem:[#allocation5 + $0xe80] sm:$0xff]  ;;  %v1383_v53 = vld [vmem:[#allocation5 + $0xf50] sm:$0xff] }
 0x310   : > { %2029 = vmatprep.mubr.f32.mxu1 %v1438_v19  ;;  %v1329_v19 = vld [vmem:[#allocation5 + $0xda0] sm:$0xff]  ;;  %v1364_v5 = vld [vmem:[#allocation5 + $0xeb8] sm:$0xff]  ;;  %v6299_v6 = vpack.c.bf16 %v1353_v60, %v1349_v59  ;;  %v2053_v46 = vld [vmem:[#allocation8 + $0x68] sm:$0xff] }
 0x311   : > { %6268 = vmatpush1.bf16.msra.mxu0 %v6267_v24  ;;  %v1331_v24 = vld [vmem:[#allocation5 + $0xdb0] sm:$0xff]  ;;  %v6287_v29 = vpack.c.bf16 %v1329_v19, %v1325_v18  ;;  %v1361_v11 = vld [vmem:[#allocation5 + $0xea0] sm:$0xff]  ;;  %v6557_v13 = vpack.c.bf16 %v1364_v5, %v1360_v4  ;;  %v1368_v18 = vld [vmem:[#allocation5 + $0xed8] sm:$0xff] }
 0x312   : > { %6524 = vmatpush1.bf16.msra.mxu1 %v6523_v25  ;;  %6270 = vmatprep.subr.bf16.mxu0 %v6269_v26  ;;  %v1334_v25 = vld [vmem:[#allocation5 + $0xdc8] sm:$0xff]  ;;  %v1372_v19 = vld [vmem:[#allocation5 + $0xef8] sm:$0xff]  ;;  %v1391_v4 = vld [vmem:[#allocation5 + $0xf90] sm:$0xff] }
 0x313   : > { %6526 = vmatprep.subr.bf16.mxu1 %v6525_v31  ;;  %v1338_v26 = vld [vmem:[#allocation5 + $0xde8] sm:$0xff]  ;;  %v6543_v31 = vpack.c.bf16 %v1331_v24, %v1327_v20  ;;  %v6303_v20 = vpack.c.bf16 %v1361_v11, %v1357_v10  ;;  %v6561_v28 = vpack.c.bf16 %v1372_v19, %v1368_v18  ;;  %v1392_v59 = vld [vmem:[#allocation5 + $0xf98] sm:$0xff]  ;;  %v1399_v18 = vld [vmem:[#allocation5 + $0xfd0] sm:$0xff] }
 0x314   : > { %v6289_v32 = vpack.c.bf16 %v1338_v26, %v1334_v25  ;;  %v1365_v25 = vld [vmem:[#allocation5 + $0xec0] sm:$0xff]  ;;  %v1396_v60 = vld [vmem:[#allocation5 + $0xfb8] sm:$0xff] }
 0x315   : > { %6272 = vmatpush1.bf16.msra.mxu0 %v6271_v37  ;;  %v1339_v37 = vld [vmem:[#allocation5 + $0xdf0] sm:$0xff]  ;;  %v1369_v26 = vld [vmem:[#allocation5 + $0xee0] sm:$0xff]  ;;  %v6573_v5 = vpack.c.bf16 %v1396_v60, %v1392_v59  ;;  %v1400_v10 = vld [vmem:[#allocation5 + $0xfd8] sm:$0xff] }
 0x316   : > { %6528 = vmatpush1.bf16.msra.mxu1 %v6527_v38  ;;  %6274 = vmatprep.subr.bf16.mxu0 %v6273_v39  ;;  %v1342_v38 = vld [vmem:[#allocation5 + $0xe08] sm:$0xff]  ;;  %v1404_v11 = vld [vmem:[#allocation5 + $0xff8] sm:$0xff] }
 0x317   : > { %6530 = vmatprep.subr.bf16.mxu1 %v6529_v44  ;;  %v1346_v39 = vld [vmem:[#allocation5 + $0xe28] sm:$0xff]  ;;  %v6547_v44 = vpack.c.bf16 %v1339_v37, %v1335_v35  ;;  %v6307_v35 = vpack.c.bf16 %v1369_v26, %v1365_v25  ;;  %v6577_v19 = vpack.c.bf16 %v1404_v11, %v1400_v10  ;;  %v1433_v25 = vsub.s32 6, %v9757_v1  ;;  %v2063_v59 = vld [vmem:[#allocation8 + $0xb8] sm:$0xff] }
 0x318   : > { %v6293_v45 = vpack.c.bf16 %v1346_v39, %v1342_v38  ;;  %v1373_v38 = vld [vmem:[#allocation5 + $0xf00] sm:$0xff] }
 0x319   : > { %6276 = vmatpush1.bf16.msra.mxu0 %v6275_v50  ;;  %v1347_v50 = vld [vmem:[#allocation5 + $0xe30] sm:$0xff]  ;;  %v1377_v39 = vld [vmem:[#allocation5 + $0xf20] sm:$0xff]  ;;  %v1434_v34 = vrot.slane %v9763_v22, %v1433_v25 }
 0x31a   : > { %6532 = vmatpush1.bf16.msra.mxu1 %v6531_v51  ;;  %6278 = vmatprep.subr.bf16.mxu0 %v6277_v52  ;;  %v1350_v51 = vld [vmem:[#allocation5 + $0xe48] sm:$0xff]  ;;  %v2071_v10 = vld [vmem:[#allocation8 + $0xf8] sm:$0xff] }
 0x31b   : > { %6534 = vmatprep.subr.bf16.mxu1 %v6533_v57  ;;  %v1354_v52 = vld [vmem:[#allocation5 + $0xe68] sm:$0xff]  ;;  %v6551_v57 = vpack.c.bf16 %v1347_v50, %v1343_v48  ;;  %v6311_v48 = vpack.c.bf16 %v1377_v39, %v1373_v38  ;;  %v2046_v38 = vld [vmem:[#allocation8 + $0x30] sm:$0xff] }
 0x31c   : > { %v6297_v58 = vpack.c.bf16 %v1354_v52, %v1350_v51  ;;  %v1381_v51 = vld [vmem:[#allocation5 + $0xf40] sm:$0xff]  ;;  %v2049_v39 = vld [vmem:[#allocation8 + $0x48] sm:$0xff] }
 0x31d   : > { %6280 = vmatpush1.bf16.msra.mxu0 %v6279_v63  ;;  %v1355_v63 = vld [vmem:[#allocation5 + $0xe70] sm:$0xff]  ;;  %v1385_v52 = vld [vmem:[#allocation5 + $0xf60] sm:$0xff] }
 0x31e   : > { %6536 = vmatpush1.bf16.msra.mxu1 %v6535_v0  ;;  %6282 = vmatprep.subr.bf16.mxu0 %v6281_v2  ;;  %v1358_v0 = vld [vmem:[#allocation5 + $0xe88] sm:$0xff] }
 0x31f   : > { %6538 = vmatprep.subr.bf16.mxu1 %v6537_v7  ;;  %v1362_v2 = vld [vmem:[#allocation5 + $0xea8] sm:$0xff]  ;;  %v6555_v7 = vpack.c.bf16 %v1355_v63, %v1351_v61  ;;  %v6315_v61 = vpack.c.bf16 %v1385_v52, %v1381_v51  ;;  %v2059_v52 = vld [vmem:[#allocation8 + $0x98] sm:$0xff] }
 0x320   : > { %v6301_v8 = vpack.c.bf16 %v1362_v2, %v1358_v0  ;;  %v1389_v0 = vld [vmem:[#allocation5 + $0xf80] sm:$0xff]  ;;  %v2057_v51 = vld [vmem:[#allocation8 + $0x88] sm:$0xff] }
 0x321   : > { %6284 = vmatpush1.bf16.msra.mxu0 %v6283_v14  ;;  %v1363_v14 = vld [vmem:[#allocation5 + $0xeb0] sm:$0xff]  ;;  %v1393_v2 = vld [vmem:[#allocation5 + $0xfa0] sm:$0xff] }
 0x322   : > { %6540 = vmatpush1.bf16.msra.mxu1 %v6539_v16  ;;  %6286 = vmatprep.subr.bf16.mxu0 %v6285_v17  ;;  %v1366_v16 = vld [vmem:[#allocation5 + $0xec8] sm:$0xff] }
 0x323   : > { %6542 = vmatprep.subr.bf16.mxu1 %v6541_v23  ;;  %v1370_v17 = vld [vmem:[#allocation5 + $0xee8] sm:$0xff]  ;;  %v6559_v23 = vpack.c.bf16 %v1363_v14, %v1359_v12  ;;  %v6319_v12 = vpack.c.bf16 %v1393_v2, %v1389_v0  ;;  %v2067_v2 = vld [vmem:[#allocation8 + $0xd8] sm:$0xff] }
 0x324   : > { %v6305_v24 = vpack.c.bf16 %v1370_v17, %v1366_v16  ;;  %v1397_v16 = vld [vmem:[#allocation5 + $0xfc0] sm:$0xff]  ;;  %v2065_v0 = vld [vmem:[#allocation8 + $0xc8] sm:$0xff] }
 0x325   : > { %6288 = vmatpush1.bf16.msra.mxu0 %v6287_v29  ;;  %v1371_v29 = vld [vmem:[#allocation5 + $0xef0] sm:$0xff]  ;;  %v1401_v17 = vld [vmem:[#allocation5 + $0xfe0] sm:$0xff] }
 0x326   : > { %6544 = vmatpush1.bf16.msra.mxu1 %v6543_v31  ;;  %6290 = vmatprep.subr.bf16.mxu0 %v6289_v32  ;;  %v1374_v31 = vld [vmem:[#allocation5 + $0xf08] sm:$0xff]  ;;  %v6323_v26 = vpack.c.bf16 %v1401_v17, %v1397_v16  ;;  %v2075_v17 = vld [vmem:[#allocation8 + $0x118] sm:$0xff] }
 0x327   : > { %6546 = vmatprep.subr.bf16.mxu1 %v6545_v36  ;;  %v1378_v32 = vld [vmem:[#allocation5 + $0xf28] sm:$0xff]  ;;  %v6563_v36 = vpack.c.bf16 %v1371_v29, %v1367_v27 }
 0x328   : > { %v6309_v37 = vpack.c.bf16 %v1378_v32, %v1374_v31  ;;  %v2040_v29 = vld [vmem:[#allocation8] sm:$0xff]  ;;  %v2042_v31 = vld [vmem:[#allocation8 + $0x10] sm:$0xff]  ;;  %v2045_v32 = vld [vmem:[#allocation8 + $0x28] sm:$0xff] }
 0x329   : > { %6292 = vmatpush1.bf16.msra.mxu0 %v6291_v43  ;;  %v1379_v43 = vld [vmem:[#allocation5 + $0xf30] sm:$0xff] }
 0x32a   : > { %6548 = vmatpush1.bf16.msra.mxu1 %v6547_v44  ;;  %6294 = vmatprep.subr.bf16.mxu0 %v6293_v45  ;;  %v1382_v44 = vld [vmem:[#allocation5 + $0xf48] sm:$0xff] }
 0x32b   : > { %6550 = vmatprep.subr.bf16.mxu1 %v6549_v49  ;;  %v1386_v45 = vld [vmem:[#allocation5 + $0xf68] sm:$0xff]  ;;  %v6567_v49 = vpack.c.bf16 %v1379_v43, %v1375_v40  ;;  %v2051_v40 = vld [vmem:[#allocation8 + $0x58] sm:$0xff] }
 0x32c   : > { %v6313_v50 = vpack.c.bf16 %v1386_v45, %v1382_v44  ;;  %v6589_v43 = vpack.c.bf16 %v2051_v40, %v2049_v39  ;;  %v2048_v44 = vld [vmem:[#allocation8 + $0x40] sm:$0xff]  ;;  %v2050_v45 = vld [vmem:[#allocation8 + $0x50] sm:$0xff]  ;;  %v2073_v16 = vld [vmem:[#allocation8 + $0x108] sm:$0xff] }
 0x32d   : > { %6296 = vmatpush1.bf16.msra.mxu0 %v6295_v56  ;;  %v1387_v56 = vld [vmem:[#allocation5 + $0xf70] sm:$0xff]  ;;  %v6591_v22 = vpack.c.bf16 %v2050_v45, %v2048_v44  ;;  %v2087_v39 = vld [vmem:[#allocation8 + $0x178] sm:$0xff] }
 0x32e   : > { %6552 = vmatpush1.bf16.msra.mxu1 %v6551_v57  ;;  %6298 = vmatprep.subr.bf16.mxu0 %v6297_v58  ;;  %v1390_v57 = vld [vmem:[#allocation5 + $0xf88] sm:$0xff]  ;;  %v2086_v44 = vld [vmem:[#allocation8 + $0x170] sm:$0xff] }
 0x32f   : > { %6554 = vmatprep.subr.bf16.mxu1 %v6553_v62  ;;  %v1394_v58 = vld [vmem:[#allocation5 + $0xfa8] sm:$0xff]  ;;  %v6571_v62 = vpack.c.bf16 %v1387_v56, %v1383_v53 }
 0x330   : > { %v6317_v63 = vpack.c.bf16 %v1394_v58, %v1390_v57  ;;  %v2056_v56 = vld [vmem:[#allocation8 + $0x80] sm:$0xff]  ;;  %v2058_v57 = vld [vmem:[#allocation8 + $0x90] sm:$0xff]  ;;  %v2061_v58 = vld [vmem:[#allocation8 + $0xa8] sm:$0xff] }
 0x331   : > { %6300 = vmatpush1.bf16.msra.mxu0 %v6299_v6  ;;  %v1395_v6 = vld [vmem:[#allocation5 + $0xfb0] sm:$0xff]  ;;  %v6599_v60 = vpack.c.bf16 %v2058_v57, %v2056_v56 }
 0x332   : > { %6556 = vmatpush1.bf16.msra.mxu1 %v6555_v7  ;;  %6302 = vmatprep.subr.bf16.mxu0 %v6301_v8  ;;  %v1398_v7 = vld [vmem:[#allocation5 + $0xfc8] sm:$0xff]  ;;  %v2094_v56 = vld [vmem:[#allocation8 + $0x1b0] sm:$0xff] }
 0x333   : > { %6558 = vmatprep.subr.bf16.mxu1 %v6557_v13  ;;  %v1402_v8 = vld [vmem:[#allocation5 + $0xfe8] sm:$0xff]  ;;  %v6575_v13 = vpack.c.bf16 %v1395_v6, %v1391_v4 }
 0x334   : > { %v6321_v14 = vpack.c.bf16 %v1402_v8, %v1398_v7  ;;  %v2064_v6 = vld [vmem:[#allocation8 + $0xc0] sm:$0xff]  ;;  %v2066_v7 = vld [vmem:[#allocation8 + $0xd0] sm:$0xff]  ;;  %v2069_v8 = vld [vmem:[#allocation8 + $0xe8] sm:$0xff] }
 0x335   : > { %6304 = vmatpush1.bf16.msra.mxu0 %v6303_v20  ;;  %v1403_v20 = vld [vmem:[#allocation5 + $0xff0] sm:$0xff]  ;;  %v6607_v11 = vpack.c.bf16 %v2066_v7, %v2064_v6 }
 0x336   : > { %6560 = vmatpush1.bf16.msra.mxu1 %v6559_v23  ;;  %6306 = vmatprep.subr.bf16.mxu0 %v6305_v24  ;;  %v2041_v23 = vld [vmem:[#allocation8 + $0x8] sm:$0xff]  ;;  %v2043_v24 = vld [vmem:[#allocation8 + $0x18] sm:$0xff]  ;;  %v6579_v27 = vpack.c.bf16 %v1403_v20, %v1399_v18  ;;  %v2072_v20 = vld [vmem:[#allocation8 + $0x100] sm:$0xff] }
 0x337   : > { %6562 = vmatprep.subr.bf16.mxu1 %v6561_v28  ;;  %v6581_v28 = vpack.c.bf16 %v2043_v24, %v2041_v23  ;;  %v2074_v23 = vld [vmem:[#allocation8 + $0x110] sm:$0xff]  ;;  %v2077_v24 = vld [vmem:[#allocation8 + $0x128] sm:$0xff] }
 0x338   : > { %v2089_v45 = vld [vmem:[#allocation8 + $0x188] sm:$0xff]  ;;  %v2102_v6 = vld [vmem:[#allocation8 + $0x1f0] sm:$0xff] }
 0x339   : > { %6308 = vmatpush1.bf16.msra.mxu0 %v6307_v35  ;;  %v6583_v35 = vpack.c.bf16 %v2042_v31, %v2040_v29  ;;  %v2076_v29 = vld [vmem:[#allocation8 + $0x120] sm:$0xff]  ;;  %v2078_v31 = vld [vmem:[#allocation8 + $0x130] sm:$0xff]  ;;  %v2097_v57 = vld [vmem:[#allocation8 + $0x1c8] sm:$0xff] }
 0x33a   : > { %6564 = vmatpush1.bf16.msra.mxu1 %v6563_v36  ;;  %6310 = vmatprep.subr.bf16.mxu0 %v6309_v37  ;;  %v6585_v36 = vpack.c.bf16 %v2047_v33, %v2045_v32  ;;  %v2044_v37 = vld [vmem:[#allocation8 + $0x20] sm:$0xff]  ;;  %v2081_v32 = vld [vmem:[#allocation8 + $0x148] sm:$0xff]  ;;  %v2083_v33 = vld [vmem:[#allocation8 + $0x158] sm:$0xff] }
 0x33b   : > { %6566 = vmatprep.subr.bf16.mxu1 %v6565_v42  ;;  %v6587_v42 = vpack.c.bf16 %v2046_v38, %v2044_v37  ;;  %v2082_v37 = vld [vmem:[#allocation8 + $0x150] sm:$0xff]  ;;  %v2085_v38 = vld [vmem:[#allocation8 + $0x168] sm:$0xff] }
 0x33d   : > { %6312 = vmatpush1.bf16.msra.mxu0 %v6311_v48  ;;  %v6593_v48 = vpack.c.bf16 %v2055_v47, %v2053_v46  ;;  %v2091_v46 = vld [vmem:[#allocation8 + $0x198] sm:$0xff] }
 0x33e   : > { %6568 = vmatpush1.bf16.msra.mxu1 %v6567_v49  ;;  %6314 = vmatprep.subr.bf16.mxu0 %v6313_v50  ;;  %v2052_v49 = vld [vmem:[#allocation8 + $0x60] sm:$0xff]  ;;  %v2054_v50 = vld [vmem:[#allocation8 + $0x70] sm:$0xff] }
 0x33f   : > { %6570 = vmatprep.subr.bf16.mxu1 %v6569_v54  ;;  %v6595_v53 = vpack.c.bf16 %v2054_v50, %v2052_v49  ;;  %v6597_v54 = vpack.c.bf16 %v2059_v52, %v2057_v51  ;;  %v2090_v49 = vld [vmem:[#allocation8 + $0x190] sm:$0xff]  ;;  %v2093_v50 = vld [vmem:[#allocation8 + $0x1a8] sm:$0xff]  ;;  %v2095_v51 = vld [vmem:[#allocation8 + $0x1b8] sm:$0xff] }
 0x341   : > { %6316 = vmatpush1.bf16.msra.mxu0 %v6315_v61  ;;  %v6601_v61 = vpack.c.bf16 %v2063_v59, %v2061_v58  ;;  %v2099_v58 = vld [vmem:[#allocation8 + $0x1d8] sm:$0xff] }
 0x342   : > { %6572 = vmatpush1.bf16.msra.mxu1 %v6571_v62  ;;  %6318 = vmatprep.subr.bf16.mxu0 %v6317_v63  ;;  %v2060_v62 = vld [vmem:[#allocation8 + $0xa0] sm:$0xff]  ;;  %v2062_v63 = vld [vmem:[#allocation8 + $0xb0] sm:$0xff] }
 0x343   : > { %6574 = vmatprep.subr.bf16.mxu1 %v6573_v5  ;;  %v6603_v4 = vpack.c.bf16 %v2062_v63, %v2060_v62  ;;  %v6605_v5 = vpack.c.bf16 %v2067_v2, %v2065_v0  ;;  %v2098_v62 = vld [vmem:[#allocation8 + $0x1d0] sm:$0xff]  ;;  %v2101_v0 = vld [vmem:[#allocation8 + $0x1e8] sm:$0xff]  ;;  %v2103_v2 = vld [vmem:[#allocation8 + $0x1f8] sm:$0xff] }
 0x345   : > { %6320 = vmatpush1.bf16.msra.mxu0 %v6319_v12  ;;  %v6609_v12 = vpack.c.bf16 %v2071_v10, %v2069_v8  ;;  %v2105_v8 = vld [vmem:[#allocation8 + $0x208] sm:$0xff]  ;;  %v2107_v10 = vld [vmem:[#allocation8 + $0x218] sm:$0xff] }
 0x346   : > { %6576 = vmatpush1.bf16.msra.mxu1 %v6575_v13  ;;  %6322 = vmatprep.subr.bf16.mxu0 %v6321_v14  ;;  %v2068_v13 = vld [vmem:[#allocation8 + $0xe0] sm:$0xff]  ;;  %v2070_v14 = vld [vmem:[#allocation8 + $0xf0] sm:$0xff] }
 0x347   : > { %6578 = vmatprep.subr.bf16.mxu1 %v6577_v19  ;;  %v6611_v18 = vpack.c.bf16 %v2070_v14, %v2068_v13  ;;  %v6613_v19 = vpack.c.bf16 %v2075_v17, %v2073_v16  ;;  %v2341_v13 = vld [vmem:[#allocation11 + $0x88] sm:$0xff]  ;;  %v2324_v16 = vld [vmem:[#allocation11] sm:$0xff] }
 0x348   : > { %v2325_v17 = vld [vmem:[#allocation11 + $0x8] sm:$0xff] }
 0x349   : > { %6324 = vmatpush1.bf16.msra.mxu0 %v6323_v26  ;;  %v2079_v26 = vld [vmem:[#allocation8 + $0x138] sm:$0xff] }
 0x34a   : > { %6580 = vmatpush1.bf16.msra.mxu1 %v6579_v27  ;;  %6582 = vmatprep.subr.bf16.mxu0 %v6581_v28  ;;  %v6615_v27 = vpack.c.bf16 %v2074_v23, %v2072_v20  ;;  %v6617_v28 = vpack.c.bf16 %v2079_v26, %v2077_v24  ;;  %v2343_v20 = vld [vmem:[#allocation11 + $0x98] sm:$0xff]  ;;  %v2326_v24 = vld [vmem:[#allocation11 + $0x10] sm:$0xff] }
 0x34b   : > { %v2327_v26 = vld [vmem:[#allocation11 + $0x18] sm:$0xff] }
 0x34c   : > { %1746 = vmatmul.mubr.f32.vlgmr.msra.gmra.mrb[0].mxu0 %v1434_v34 }
 0x34d   : > { %2030 = vmatmul.mubr.f32.vlgmr.msra.gmra.mrb[0].mxu1 %v1434_v34  ;;  %6584 = vmatpush1.bf16.msra.mxu0 %v6583_v35  ;;  %v6619_v34 = vpack.c.bf16 %v2078_v31, %v2076_v29  ;;  %v6621_v35 = vpack.c.bf16 %v2083_v33, %v2081_v32  ;;  %v2345_v29 = vld [vmem:[#allocation11 + $0xa8] sm:$0xff]  ;;  %v2328_v32 = vld [vmem:[#allocation11 + $0x20] sm:$0xff] }
 0x34e   : > { %6586 = vmatprep.subr.bf16.mxu0 %v6585_v36  ;;  %v2080_v36 = vld [vmem:[#allocation8 + $0x140] sm:$0xff]  ;;  %v2329_v33 = vld [vmem:[#allocation11 + $0x28] sm:$0xff] }
 0x34f   : > { %v6623_v40 = vpack.c.bf16 %v2082_v37, %v2080_v36  ;;  %v2347_v36 = vld [vmem:[#allocation11 + $0xb8] sm:$0xff] }
 0x351   : > { %6588 = vmatpush1.bf16.msra.mxu0 %v6587_v42  ;;  %v6625_v42 = vpack.c.bf16 %v2087_v39, %v2085_v38  ;;  %v2330_v38 = vld [vmem:[#allocation11 + $0x30] sm:$0xff]  ;;  %v2331_v39 = vld [vmem:[#allocation11 + $0x38] sm:$0xff] }
 0x352   : > { %6590 = vmatprep.subr.bf16.mxu0 %v6589_v43  ;;  %v2084_v43 = vld [vmem:[#allocation8 + $0x160] sm:$0xff] }
 0x353   : > { %v6627_v47 = vpack.c.bf16 %v2086_v44, %v2084_v43  ;;  %v2349_v43 = vld [vmem:[#allocation11 + $0xc8] sm:$0xff] }
 0x355   : > { %6592 = vmatpush1.bf16.msra.mxu0 %v6591_v22  ;;  %v6629_v22 = vpack.c.bf16 %v2091_v46, %v2089_v45  ;;  %v2332_v45 = vld [vmem:[#allocation11 + $0x40] sm:$0xff]  ;;  %v2333_v46 = vld [vmem:[#allocation11 + $0x48] sm:$0xff] }
 0x356   : > { %6594 = vmatprep.subr.bf16.mxu0 %v6593_v48  ;;  %v2088_v48 = vld [vmem:[#allocation8 + $0x180] sm:$0xff] }
 0x357   : > { %v6631_v52 = vpack.c.bf16 %v2090_v49, %v2088_v48  ;;  %v2351_v48 = vld [vmem:[#allocation11 + $0xd8] sm:$0xff] }
 0x359   : > { %6596 = vmatpush1.bf16.msra.mxu0 %v6595_v53  ;;  %v6633_v53 = vpack.c.bf16 %v2095_v51, %v2093_v50  ;;  %v2334_v50 = vld [vmem:[#allocation11 + $0x50] sm:$0xff]  ;;  %v2335_v51 = vld [vmem:[#allocation11 + $0x58] sm:$0xff] }
 0x35a   : > { %6598 = vmatprep.subr.bf16.mxu0 %v6597_v54  ;;  %v2092_v54 = vld [vmem:[#allocation8 + $0x1a0] sm:$0xff] }
 0x35b   : > { %v6635_v59 = vpack.c.bf16 %v2094_v56, %v2092_v54  ;;  %v2352_v54 = vld [vmem:[#allocation11 + $0xe0] sm:$0xff]  ;;  %v2353_v56 = vld [vmem:[#allocation11 + $0xe8] sm:$0xff] }
 0x35d   : > { %6600 = vmatpush1.bf16.msra.mxu0 %v6599_v60  ;;  %v6637_v60 = vpack.c.bf16 %v2099_v58, %v2097_v57  ;;  %v6733_v58 = vpack.c.bf16 %v2353_v56, %v2352_v54  ;;  %v2133_v54 = vld [vmem:[#allocation8 + $0x2e8] sm:$0xff]  ;;  %v2135_v56 = vld [vmem:[#allocation8 + $0x2f8] sm:$0xff] }
 0x35e   : > { %6602 = vmatprep.subr.bf16.mxu0 %v6601_v61  ;;  %v2096_v61 = vld [vmem:[#allocation8 + $0x1c0] sm:$0xff] }
 0x35f   : > { %v6639_v63 = vpack.c.bf16 %v2098_v62, %v2096_v61 }
 0x361   : > { %6604 = vmatpush1.bf16.msra.mxu0 %v6603_v4  ;;  %v6641_v4 = vpack.c.bf16 %v2103_v2, %v2101_v0  ;;  %v2104_v2 = vld [vmem:[#allocation8 + $0x200] sm:$0xff] }
 0x362   : > { %6606 = vmatprep.subr.bf16.mxu0 %v6605_v5  ;;  %v2100_v5 = vld [vmem:[#allocation8 + $0x1e0] sm:$0xff] }
 0x363   : > { %v6643_v7 = vpack.c.bf16 %v2102_v6, %v2100_v5 }
 0x365   : > { %6608 = vmatpush1.bf16.msra.mxu0 %v6607_v11  ;;  %v6645_v11 = vpack.c.bf16 %v2107_v10, %v2105_v8  ;;  %v2111_v8 = vld [vmem:[#allocation8 + $0x238] sm:$0xff] }
 0x366   : > { %6610 = vmatprep.subr.bf16.mxu0 %v6609_v12  ;;  %v2340_v12 = vld [vmem:[#allocation11 + $0x80] sm:$0xff] }
 0x367   : > { %v6709_v14 = vpack.c.bf16 %v2341_v13, %v2340_v12 }
 0x369   : > { %6612 = vmatpush1.bf16.msra.mxu0 %v6611_v18  ;;  %v6711_v18 = vpack.c.bf16 %v2325_v17, %v2324_v16  ;;  %6710 = vmatprep.subr.bf16.mxu1 %v6709_v14  ;;  %v2108_v16 = vld [vmem:[#allocation8 + $0x220] sm:$0xff]  ;;  %v2110_v17 = vld [vmem:[#allocation8 + $0x230] sm:$0xff] }
 0x36a   : > { %6614 = vmatprep.subr.bf16.mxu0 %v6613_v19  ;;  %v2342_v19 = vld [vmem:[#allocation11 + $0x90] sm:$0xff] }
 0x36b   : > { %6712 = vmatpush3.bf16.msra.mxu1 %v6711_v18  ;;  %v6713_v23 = vpack.c.bf16 %v2343_v20, %v2342_v19  ;;  %v2113_v19 = vld [vmem:[#allocation8 + $0x248] sm:$0xff]  ;;  %v2115_v20 = vld [vmem:[#allocation8 + $0x258] sm:$0xff] }
 0x36d   : > { %6616 = vmatpush1.bf16.msra.mxu0 %v6615_v27  ;;  %v6715_v27 = vpack.c.bf16 %v2327_v26, %v2326_v24  ;;  %6714 = vmatprep.subr.bf16.mxu1 %v6713_v23  ;;  %v6651_v23 = vpack.c.bf16 %v2110_v17, %v2108_v16  ;;  %v6653_v24 = vpack.c.bf16 %v2115_v20, %v2113_v19  ;;  %v2112_v26 = vld [vmem:[#allocation8 + $0x240] sm:$0xff]  ;;  %v2145_v16 = vld [vmem:[#allocation8 + $0x348] sm:$0xff]  ;;  %v2147_v17 = vld [vmem:[#allocation8 + $0x358] sm:$0xff] }
 0x36e   : > { %6618 = vmatprep.subr.bf16.mxu0 %v6617_v28  ;;  %v2344_v28 = vld [vmem:[#allocation11 + $0xa0] sm:$0xff]  ;;  %v6685_v20 = vpack.c.bf16 %v2147_v17, %v2145_v16  ;;  %v2963_v16 = vld [vmem:[#allocation25 + $0x88] sm:$0xff] }
 0x36f   : > { %6716 = vmatpush3.bf16.msra.mxu1 %v6715_v27  ;;  %v6717_v31 = vpack.c.bf16 %v2345_v29, %v2344_v28  ;;  %v2114_v27 = vld [vmem:[#allocation8 + $0x250] sm:$0xff]  ;;  %v2117_v28 = vld [vmem:[#allocation8 + $0x268] sm:$0xff]  ;;  %v2119_v29 = vld [vmem:[#allocation8 + $0x278] sm:$0xff] }
 0x370   : > { %v2967_v17 = vld [vmem:[#allocation25 + $0xa8] sm:$0xff] }
 0x371   : > { %6620 = vmatpush1.bf16.msra.mxu0 %v6619_v34  ;;  %v6719_v34 = vpack.c.bf16 %v2329_v33, %v2328_v32  ;;  %6718 = vmatprep.subr.bf16.mxu1 %v6717_v31  ;;  %v6655_v31 = vpack.c.bf16 %v2114_v27, %v2112_v26  ;;  %v6657_v32 = vpack.c.bf16 %v2119_v29, %v2117_v28  ;;  %v2116_v33 = vld [vmem:[#allocation8 + $0x260] sm:$0xff]  ;;  %v2149_v26 = vld [vmem:[#allocation8 + $0x368] sm:$0xff]  ;;  %v2151_v27 = vld [vmem:[#allocation8 + $0x378] sm:$0xff] }
 0x372   : > { %6622 = vmatprep.subr.bf16.mxu0 %v6621_v35  ;;  %v2346_v35 = vld [vmem:[#allocation11 + $0xb0] sm:$0xff]  ;;  %v6689_v29 = vpack.c.bf16 %v2151_v27, %v2149_v26 }
 0x373   : > { %6720 = vmatpush3.bf16.msra.mxu1 %v6719_v34  ;;  %v6721_v37 = vpack.c.bf16 %v2347_v36, %v2346_v35  ;;  %v2118_v34 = vld [vmem:[#allocation8 + $0x270] sm:$0xff]  ;;  %v2121_v35 = vld [vmem:[#allocation8 + $0x288] sm:$0xff]  ;;  %v2123_v36 = vld [vmem:[#allocation8 + $0x298] sm:$0xff] }
 0x374   : > { %v2975_v26 = vld [vmem:[#allocation25 + $0xe8] sm:$0xff] }
 0x375   : > { %6624 = vmatpush1.bf16.msra.mxu0 %v6623_v40  ;;  %v6723_v40 = vpack.c.bf16 %v2331_v39, %v2330_v38  ;;  %6722 = vmatprep.subr.bf16.mxu1 %v6721_v37  ;;  %v6659_v37 = vpack.c.bf16 %v2118_v34, %v2116_v33  ;;  %v6661_v38 = vpack.c.bf16 %v2123_v36, %v2121_v35  ;;  %v2120_v39 = vld [vmem:[#allocation8 + $0x280] sm:$0xff]  ;;  %v2153_v33 = vld [vmem:[#allocation8 + $0x388] sm:$0xff]  ;;  %v2155_v34 = vld [vmem:[#allocation8 + $0x398] sm:$0xff] }
 0x376   : > { %6626 = vmatprep.subr.bf16.mxu0 %v6625_v42  ;;  %v2348_v42 = vld [vmem:[#allocation11 + $0xc0] sm:$0xff]  ;;  %v6693_v36 = vpack.c.bf16 %v2155_v34, %v2153_v33  ;;  %v2983_v33 = vld [vmem:[#allocation25 + $0x128] sm:$0xff] }
 0x377   : > { %6724 = vmatpush3.bf16.msra.mxu1 %v6723_v40  ;;  %v6725_v44 = vpack.c.bf16 %v2349_v43, %v2348_v42  ;;  %v2122_v40 = vld [vmem:[#allocation8 + $0x290] sm:$0xff]  ;;  %v2125_v42 = vld [vmem:[#allocation8 + $0x2a8] sm:$0xff]  ;;  %v2127_v43 = vld [vmem:[#allocation8 + $0x2b8] sm:$0xff] }
 0x379   : > { %6628 = vmatpush1.bf16.msra.mxu0 %v6627_v47  ;;  %v6727_v47 = vpack.c.bf16 %v2333_v46, %v2332_v45  ;;  %6726 = vmatprep.subr.bf16.mxu1 %v6725_v44  ;;  %v6663_v44 = vpack.c.bf16 %v2122_v40, %v2120_v39  ;;  %v6665_v45 = vpack.c.bf16 %v2127_v43, %v2125_v42  ;;  %v2124_v46 = vld [vmem:[#allocation8 + $0x2a0] sm:$0xff]  ;;  %v2157_v39 = vld [vmem:[#allocation8 + $0x3a8] sm:$0xff]  ;;  %v2159_v40 = vld [vmem:[#allocation8 + $0x3b8] sm:$0xff] }
 0x37a   : > { %6630 = vmatprep.subr.bf16.mxu0 %v6629_v22  ;;  %v2350_v22 = vld [vmem:[#allocation11 + $0xd0] sm:$0xff]  ;;  %v6697_v43 = vpack.c.bf16 %v2159_v40, %v2157_v39 }
 0x37b   : > { %6728 = vmatpush3.bf16.msra.mxu1 %v6727_v47  ;;  %v6729_v49 = vpack.c.bf16 %v2351_v48, %v2350_v22  ;;  %v2126_v47 = vld [vmem:[#allocation8 + $0x2b0] sm:$0xff]  ;;  %v2129_v22 = vld [vmem:[#allocation8 + $0x2c8] sm:$0xff]  ;;  %v2131_v48 = vld [vmem:[#allocation8 + $0x2d8] sm:$0xff] }
 0x37c   : > { %v2991_v39 = vld [vmem:[#allocation25 + $0x168] sm:$0xff] }
 0x37d   : > { %6632 = vmatpush1.bf16.msra.mxu0 %v6631_v52  ;;  %v9798_v52 = vld [vmem:[#allocation7] sm:$0xf]  ;;  %6730 = vmatprep.subr.bf16.mxu1 %v6729_v49  ;;  %v6667_v49 = vpack.c.bf16 %v2126_v47, %v2124_v46  ;;  %v2161_v46 = vld [vmem:[#allocation8 + $0x3c8] sm:$0xff] }
 0x37e   : > { %6634 = vmatprep.subr.bf16.mxu0 %v6633_v53  ;;  %v6731_v53 = vpack.c.bf16 %v2335_v51, %v2334_v50  ;;  %v1451_v57 = vrot.slane %v9798_v52, %v9768_v9  ;;  %v6669_v50 = vpack.c.bf16 %v2131_v48, %v2129_v22  ;;  %v2128_v51 = vld [vmem:[#allocation8 + $0x2c0] sm:$0xff]  ;;  %v2163_v47 = vld [vmem:[#allocation8 + $0x3d8] sm:$0xff] }
 0x37f   : > { %v6701_v48 = vpack.c.bf16 %v2163_v47, %v2161_v46  ;;  %v2999_v46 = vld [vmem:[#allocation25 + $0x1a8] sm:$0xff] }
 0x380   : > { %6732 = vmatpush3.bf16.msra.mxu1 %v6731_v53  ;;  %v2130_v53 = vld [vmem:[#allocation8 + $0x2d0] sm:$0xff] }
 0x381   : > { %6636 = vmatpush1.bf16.msra.mxu0 %v6635_v59  ;;  %v1455_v59 = vrot.slane %v9798_v52, %v9760_v15  ;;  %6734 = vmatprep.subr.bf16.mxu1 %v6733_v58  ;;  %v6673_v58 = vpack.c.bf16 %v2135_v56, %v2133_v54  ;;  %v1459_v56 = vrot.slane %v9798_v52, %v9778_v30 }
 0x382   : > { %6638 = vmatprep.subr.bf16.mxu0 %v6637_v60  ;;  %v1463_v60 = vrot.slane %v9798_v52, %v9771_v21 }
 0x385   : > { %6640 = vmatpush1.bf16.msra.mxu0 %v6639_v63 }
 0x386   : > { %6642 = vmatprep.subr.bf16.mxu0 %v6641_v4  ;;  %v2106_v4 = vld [vmem:[#allocation8 + $0x210] sm:$0xff] }
 0x387   : > { %v6647_v12 = vpack.c.bf16 %v2106_v4, %v2104_v2  ;;  %v2136_v4 = vld [vmem:[#allocation8 + $0x300] sm:$0xff] }
 0x389   : > { %6644 = vmatpush1.bf16.msra.mxu0 %v6643_v7  ;;  %v2109_v7 = vld [vmem:[#allocation8 + $0x228] sm:$0xff] }
 0x38a   : > { %6646 = vmatprep.subr.bf16.mxu0 %v6645_v11  ;;  %v6649_v14 = vpack.c.bf16 %v2111_v8, %v2109_v7  ;;  %v2143_v7 = vld [vmem:[#allocation8 + $0x338] sm:$0xff] }
 0x41f   : > { %v1747_v61 = vpop.f32.mrb[0].mxu0 }
 0x420   : > { %v8115_v62 = vadd.f32 %v1747_v61, %v1451_v57  ;;  %v9806_v63 = vpop.f32.mrb[0].mxu1  ;;  %v1749_v0 = vpop.f32.mrb[1].mxu0  ;;  %v6671_v57 = vpack.c.bf16 %v2130_v53, %v2128_v51  ;;  %v2137_v61 = vld [vmem:[#allocation8 + $0x308] sm:$0xff]  ;;  %v2167_v53 = vld [vmem:[#allocation8 + $0x3f8] sm:$0xff] }
 0x421   : > { %v8116_v5 = vadd.f32 %v1749_v0, %v1455_v59  ;;  %v2033_v6 = vpop.f32.mrb[1].mxu1  ;;  %v2132_v59 = vld [vmem:[#allocation8 + $0x2e0] sm:$0xff]  ;;  %v2165_v51 = vld [vmem:[#allocation8 + $0x3e8] sm:$0xff] }
 0x422   : > { %v8118_v10 = vadd.f32 %v2033_v6, %v1463_v60  ;;  %v9810_v13 = vmax.f32 %v8115_v62, 0.0  ;;  %v2134_v60 = vld [vmem:[#allocation8 + $0x2f0] sm:$0xff]  ;;  %v2139_v62 = vld [vmem:[#allocation8 + $0x318] sm:$0xff]  ;;  %v2141_v6 = vld [vmem:[#allocation8 + $0x328] sm:$0xff] }
 0x423   : > { %v9808_v11 = vmax.f32 %v8116_v5, 0.0  ;;  %v6675_v0 = vpack.c.bf16 %v2134_v60, %v2132_v59  ;;  %v6677_v2 = vpack.c.bf16 %v2139_v62, %v2137_v61  ;;  %v2138_v5 = vld [vmem:[#allocation8 + $0x310] sm:$0xff] }
 0x424   : > { %v9812_v18 = vmax.f32 %v8118_v10, 0.0  ;;  %v6679_v8 = vpack.c.bf16 %v2138_v5, %v2136_v4  ;;  %v6681_v10 = vpack.c.bf16 %v2143_v7, %v2141_v6  ;;  %v2166_v59 = vld [vmem:[#allocation8 + $0x3f0] sm:$0xff] }
 0x425   : > { %2244 = vmatprep.mubr.f32.mxu0 %v9808_v11  ;;  %v2947_v60 = vld [vmem:[#allocation25 + $0x8] sm:$0xff]  ;;  %v2946_v4 = vld [vmem:[#allocation25] sm:$0xff] }
 0x426   : > { %2245 = vmatmul.mubr.f32.vlgmr.msra.gmra.mrb[2].mxu0 %v9810_v13  ;;  %v2951_v61 = vld [vmem:[#allocation25 + $0x28] sm:$0xff]  ;;  %v2950_v5 = vld [vmem:[#allocation25 + $0x20] sm:$0xff] }
 0x427   : > { %6648 = vmatpush1.bf16.msra.mxu0 %v6647_v12  ;;  %2315 = vmatprep.mubr.f32.mxu0 %v9812_v18  ;;  %v2140_v12 = vld [vmem:[#allocation8 + $0x320] sm:$0xff]  ;;  %v2955_v6 = vld [vmem:[#allocation25 + $0x48] sm:$0xff] }
 0x428   : > { %6650 = vmatprep.subr.bf16.mxu0 %v6649_v14  ;;  %v2142_v14 = vld [vmem:[#allocation8 + $0x330] sm:$0xff] }
 0x429   : > { %v6683_v19 = vpack.c.bf16 %v2142_v14, %v2140_v12  ;;  %v2959_v7 = vld [vmem:[#allocation25 + $0x68] sm:$0xff]  ;;  %v2954_v12 = vld [vmem:[#allocation25 + $0x40] sm:$0xff] }
 0x42a   : > { %v6839_v52 = vpack.c.bf16 %v2959_v7, %v2955_v6  ;;  %v2958_v14 = vld [vmem:[#allocation25 + $0x60] sm:$0xff] }
 0x42b   : > { %6652 = vmatpush1.bf16.msra.mxu0 %v6651_v23  ;;  %v2144_v23 = vld [vmem:[#allocation8 + $0x340] sm:$0xff]  ;;  %v3018_v7 = vld [vmem:[#allocation25 + $0x240] sm:$0xff] }
 0x42c   : > { %6654 = vmatprep.subr.bf16.mxu0 %v6653_v24  ;;  %v2146_v24 = vld [vmem:[#allocation8 + $0x350] sm:$0xff] }
 0x42d   : > { %v6687_v28 = vpack.c.bf16 %v2146_v24, %v2144_v23  ;;  %v2966_v23 = vld [vmem:[#allocation25 + $0xa0] sm:$0xff]  ;;  %v2971_v24 = vld [vmem:[#allocation25 + $0xc8] sm:$0xff] }
 0x42f   : > { %6656 = vmatpush1.bf16.msra.mxu0 %v6655_v31  ;;  %v2148_v31 = vld [vmem:[#allocation8 + $0x360] sm:$0xff] }
 0x430   : > { %6658 = vmatprep.subr.bf16.mxu0 %v6657_v32  ;;  %v2150_v32 = vld [vmem:[#allocation8 + $0x370] sm:$0xff] }
 0x431   : > { %v6691_v35 = vpack.c.bf16 %v2150_v32, %v2148_v31  ;;  %v2974_v31 = vld [vmem:[#allocation25 + $0xe0] sm:$0xff]  ;;  %v2979_v32 = vld [vmem:[#allocation25 + $0x108] sm:$0xff] }
 0x433   : > { %6660 = vmatpush1.bf16.msra.mxu0 %v6659_v37  ;;  %v2152_v37 = vld [vmem:[#allocation8 + $0x380] sm:$0xff] }
 0x434   : > { %6662 = vmatprep.subr.bf16.mxu0 %v6661_v38  ;;  %v2154_v38 = vld [vmem:[#allocation8 + $0x390] sm:$0xff] }
 0x435   : > { %v6695_v42 = vpack.c.bf16 %v2154_v38, %v2152_v37  ;;  %v2982_v37 = vld [vmem:[#allocation25 + $0x120] sm:$0xff]  ;;  %v2987_v38 = vld [vmem:[#allocation25 + $0x148] sm:$0xff] }
 0x437   : > { %6664 = vmatpush1.bf16.msra.mxu0 %v6663_v44  ;;  %v2156_v44 = vld [vmem:[#allocation8 + $0x3a0] sm:$0xff] }
 0x438   : > { %6666 = vmatprep.subr.bf16.mxu0 %v6665_v45  ;;  %v2158_v45 = vld [vmem:[#allocation8 + $0x3b0] sm:$0xff] }
 0x439   : > { %v6699_v22 = vpack.c.bf16 %v2158_v45, %v2156_v44  ;;  %v2990_v44 = vld [vmem:[#allocation25 + $0x160] sm:$0xff]  ;;  %v2995_v45 = vld [vmem:[#allocation25 + $0x188] sm:$0xff] }
 0x43b   : > { %6668 = vmatpush1.bf16.msra.mxu0 %v6667_v49  ;;  %v2160_v49 = vld [vmem:[#allocation8 + $0x3c0] sm:$0xff] }
 0x43c   : > { %6670 = vmatprep.subr.bf16.mxu0 %v6669_v50  ;;  %v2162_v50 = vld [vmem:[#allocation8 + $0x3d0] sm:$0xff] }
 0x43d   : > { %v6703_v54 = vpack.c.bf16 %v2162_v50, %v2160_v49  ;;  %v2998_v49 = vld [vmem:[#allocation25 + $0x1a0] sm:$0xff]  ;;  %v3003_v50 = vld [vmem:[#allocation25 + $0x1c8] sm:$0xff] }
 0x43f   : > { %6672 = vmatpush1.bf16.msra.mxu0 %v6671_v57  ;;  %v6705_v57 = vpack.c.bf16 %v2167_v53, %v2165_v51  ;;  %v3007_v51 = vld [vmem:[#allocation25 + $0x1e8] sm:$0xff] }
 0x440   : > { %6674 = vmatprep.subr.bf16.mxu0 %v6673_v58  ;;  %v2164_v58 = vld [vmem:[#allocation8 + $0x3e0] sm:$0xff] }
 0x441   : > { %v6707_v62 = vpack.c.bf16 %v2166_v59, %v2164_v58  ;;  %v3011_v58 = vld [vmem:[#allocation25 + $0x208] sm:$0xff] }
 0x442   : > { %v3015_v59 = vld [vmem:[#allocation25 + $0x228] sm:$0xff] }
 0x443   : > { %6676 = vmatpush1.bf16.msra.mxu0 %v6675_v0  ;;  %v8117_v0 = vadd.f32 %v9806_v63, %v1459_v56  ;;  %v6841_v63 = vpack.c.bf16 %v2958_v14, %v2954_v12  ;;  %v3002_v56 = vld [vmem:[#allocation25 + $0x1c0] sm:$0xff]  ;;  %v3031_v12 = vld [vmem:[#allocation25 + $0x2a8] sm:$0xff] }
 0x444   : > { %6678 = vmatprep.subr.bf16.mxu0 %v6677_v2  ;;  %v6835_v2 = vpack.c.bf16 %v2951_v61, %v2947_v60  ;;  %v6867_v61 = vpack.c.bf16 %v3015_v59, %v3011_v58  ;;  %v2338_v58 = vld [vmem:[#allocation11 + $0x70] sm:$0xff]  ;;  %v2339_v59 = vld [vmem:[#allocation11 + $0x78] sm:$0xff] }
 0x447   : > { %6680 = vmatpush1.bf16.msra.mxu0 %v6679_v8  ;;  %v6837_v8 = vpack.c.bf16 %v2950_v5, %v2946_v4  ;;  %v3023_v4 = vld [vmem:[#allocation25 + $0x268] sm:$0xff] }
 0x448   : > { %6682 = vmatprep.subr.bf16.mxu0 %v6681_v10  ;;  %v9820_v10 = vmax.f32 %v8117_v0, 0.0  ;;  %v3014_v0 = vld [vmem:[#allocation25 + $0x220] sm:$0xff] }
 0x44b   : > { %6684 = vmatpush1.bf16.msra.mxu0 %v6683_v19  ;;  %v6843_v19 = vpack.c.bf16 %v2967_v17, %v2963_v16  ;;  %v3026_v17 = vld [vmem:[#allocation25 + $0x280] sm:$0xff] }
 0x44c   : > { %6686 = vmatprep.subr.bf16.mxu0 %v6685_v20  ;;  %v2962_v20 = vld [vmem:[#allocation25 + $0x80] sm:$0xff] }
 0x44d   : > { %v6845_v27 = vpack.c.bf16 %v2966_v23, %v2962_v20  ;;  %v3039_v20 = vld [vmem:[#allocation25 + $0x2e8] sm:$0xff] }
 0x44f   : > { %6688 = vmatpush1.bf16.msra.mxu0 %v6687_v28  ;;  %v6847_v28 = vpack.c.bf16 %v2975_v26, %v2971_v24  ;;  %v3034_v26 = vld [vmem:[#allocation25 + $0x2c0] sm:$0xff] }
 0x450   : > { %6690 = vmatprep.subr.bf16.mxu0 %v6689_v29  ;;  %v2970_v29 = vld [vmem:[#allocation25 + $0xc0] sm:$0xff] }
 0x451   : > { %v6849_v34 = vpack.c.bf16 %v2974_v31, %v2970_v29  ;;  %v3047_v29 = vld [vmem:[#allocation25 + $0x328] sm:$0xff] }
 0x453   : > { %6692 = vmatpush1.bf16.msra.mxu0 %v6691_v35  ;;  %v6851_v35 = vpack.c.bf16 %v2983_v33, %v2979_v32  ;;  %v3042_v33 = vld [vmem:[#allocation25 + $0x300] sm:$0xff] }
 0x454   : > { %6694 = vmatprep.subr.bf16.mxu0 %v6693_v36  ;;  %v2978_v36 = vld [vmem:[#allocation25 + $0x100] sm:$0xff] }
 0x455   : > { %v6853_v40 = vpack.c.bf16 %v2982_v37, %v2978_v36  ;;  %v3055_v36 = vld [vmem:[#allocation25 + $0x368] sm:$0xff] }
 0x457   : > { %6696 = vmatpush1.bf16.msra.mxu0 %v6695_v42  ;;  %v6855_v42 = vpack.c.bf16 %v2991_v39, %v2987_v38  ;;  %v3050_v39 = vld [vmem:[#allocation25 + $0x340] sm:$0xff] }
 0x458   : > { %6698 = vmatprep.subr.bf16.mxu0 %v6697_v43  ;;  %v2986_v43 = vld [vmem:[#allocation25 + $0x140] sm:$0xff] }
 0x459   : > { %v6857_v47 = vpack.c.bf16 %v2990_v44, %v2986_v43  ;;  %v3063_v43 = vld [vmem:[#allocation25 + $0x3a8] sm:$0xff] }
 0x45b   : > { %6700 = vmatpush1.bf16.msra.mxu0 %v6699_v22  ;;  %v6859_v22 = vpack.c.bf16 %v2999_v46, %v2995_v45  ;;  %v2336_v46 = vld [vmem:[#allocation11 + $0x60] sm:$0xff] }
 0x45c   : > { %6702 = vmatprep.subr.bf16.mxu0 %v6701_v48  ;;  %v2994_v48 = vld [vmem:[#allocation25 + $0x180] sm:$0xff] }
 0x45d   : > { %v6861_v53 = vpack.c.bf16 %v2998_v49, %v2994_v48  ;;  %v3062_v49 = vld [vmem:[#allocation25 + $0x3a0] sm:$0xff] }
 0x45f   : > { %6704 = vmatpush1.bf16.msra.mxu0 %v6703_v54  ;;  %v6863_v54 = vpack.c.bf16 %v3007_v51, %v3003_v50  ;;  %v2354_v51 = vld [vmem:[#allocation11 + $0xf0] sm:$0xff] }
 0x460   : > { %6706 = vmatprep.subr.bf16.mxu0 %v6705_v57  ;;  %v3006_v57 = vld [vmem:[#allocation25 + $0x1e0] sm:$0xff] }
 0x461   : > { %v6865_v60 = vpack.c.bf16 %v3006_v57, %v3002_v56  ;;  %v3071_v57 = vld [vmem:[#allocation25 + $0x3e8] sm:$0xff] }
 0x463   : > { %6708 = vmatpush1.bf16.msra.mxu0 %v6707_v62  ;;  %v3010_v62 = vld [vmem:[#allocation25 + $0x200] sm:$0xff] }
 0x464   : > { %6836 = vmatprep.subr.bf16.mxu0 %v6835_v2  ;;  %v3019_v2 = vld [vmem:[#allocation25 + $0x248] sm:$0xff]  ;;  %v6869_v5 = vpack.c.bf16 %v3014_v0, %v3010_v62  ;;  %v3066_v62 = vld [vmem:[#allocation25 + $0x3c0] sm:$0xff] }
 0x465   : > { %v6871_v6 = vpack.c.bf16 %v3023_v4, %v3019_v2  ;;  %v3070_v0 = vld [vmem:[#allocation25 + $0x3e0] sm:$0xff]  ;;  %v9069_v4 = vmov 0.0|0.0  }
 0x466   : > { %2316 = vmatmul.mubr.f32.vlgmr.msra.gmra.mrb[2].mxu0 %v9820_v10  ;;  %v6897_v2 = vpack.c.bf16 %v3070_v0, %v3066_v62  ;;  %v2631_v62 = vld [vmem:[#allocation20 + $0x18] sm:$0xff] }
 0x467   : > { %6838 = vmatpush1.bf16.msra.mxu0 %v6837_v8  ;;  %v3022_v8 = vld [vmem:[#allocation25 + $0x260] sm:$0xff] }
 0x468   : > { %6840 = vmatprep.subr.bf16.mxu0 %v6839_v52  ;;  %v3027_v52 = vld [vmem:[#allocation25 + $0x288] sm:$0xff]  ;;  %v6873_v14 = vpack.c.bf16 %v3022_v8, %v3018_v7 }
 0x469   : > { %v6875_v16 = vpack.c.bf16 %v3031_v12, %v3027_v52 }
 0x46b   : > { %6842 = vmatpush1.bf16.msra.mxu0 %v6841_v63  ;;  %v3030_v63 = vld [vmem:[#allocation25 + $0x2a0] sm:$0xff] }
 0x46c   : > { %6844 = vmatprep.subr.bf16.mxu0 %v6843_v19  ;;  %v3035_v19 = vld [vmem:[#allocation25 + $0x2c8] sm:$0xff]  ;;  %v6877_v23 = vpack.c.bf16 %v3030_v63, %v3026_v17 }
 0x46d   : > { %v6879_v24 = vpack.c.bf16 %v3039_v20, %v3035_v19 }
 0x46f   : > { %6846 = vmatpush1.bf16.msra.mxu0 %v6845_v27  ;;  %v3038_v27 = vld [vmem:[#allocation25 + $0x2e0] sm:$0xff] }
 0x470   : > { %6848 = vmatprep.subr.bf16.mxu0 %v6847_v28  ;;  %v3043_v28 = vld [vmem:[#allocation25 + $0x308] sm:$0xff]  ;;  %v6881_v31 = vpack.c.bf16 %v3038_v27, %v3034_v26 }
 0x471   : > { %v6883_v32 = vpack.c.bf16 %v3047_v29, %v3043_v28  ;;  %v2432_v27 = vld [vmem:[%s10160_s4 + $0x20] sm:$0xff]  ;;  %v2433_v28 = vld [vmem:[%s10160_s4 + $0x28] sm:$0xff] }
 0x472   : > { %v6748_v29 = vpack.c.bf16 %v2433_v28, %v2432_v27 }
 0x473   : > { %6850 = vmatpush1.bf16.msra.mxu0 %v6849_v34  ;;  %v3046_v34 = vld [vmem:[#allocation25 + $0x320] sm:$0xff] }
 0x474   : > { %6852 = vmatprep.subr.bf16.mxu0 %v6851_v35  ;;  %v3051_v35 = vld [vmem:[#allocation25 + $0x348] sm:$0xff]  ;;  %v6885_v37 = vpack.c.bf16 %v3046_v34, %v3042_v33 }
 0x475   : > { %v6887_v38 = vpack.c.bf16 %v3055_v36, %v3051_v35  ;;  %v2436_v34 = vld [vmem:[%s10160_s4 + $0x40] sm:$0xff]  ;;  %v2437_v35 = vld [vmem:[%s10160_s4 + $0x48] sm:$0xff] }
 0x476   : > { %v6754_v36 = vpack.c.bf16 %v2437_v35, %v2436_v34 }
 0x477   : > { %6854 = vmatpush1.bf16.msra.mxu0 %v6853_v40  ;;  %v3054_v40 = vld [vmem:[#allocation25 + $0x360] sm:$0xff] }
 0x478   : > { %6856 = vmatprep.subr.bf16.mxu0 %v6855_v42  ;;  %v3059_v42 = vld [vmem:[#allocation25 + $0x388] sm:$0xff]  ;;  %v6889_v44 = vpack.c.bf16 %v3054_v40, %v3050_v39 }
 0x479   : > { %v6891_v45 = vpack.c.bf16 %v3063_v43, %v3059_v42  ;;  %v2440_v40 = vld [vmem:[%s10160_s4 + $0x60] sm:$0xff]  ;;  %v2441_v42 = vld [vmem:[%s10160_s4 + $0x68] sm:$0xff] }
 0x47a   : > { %v6760_v43 = vpack.c.bf16 %v2441_v42, %v2440_v40 }
 0x47b   : > { %6858 = vmatpush1.bf16.msra.mxu0 %v6857_v47  ;;  %v2337_v47 = vld [vmem:[#allocation11 + $0x68] sm:$0xff] }
 0x47c   : > { %6860 = vmatprep.subr.bf16.mxu0 %v6859_v22  ;;  %v3058_v22 = vld [vmem:[#allocation25 + $0x380] sm:$0xff]  ;;  %v6735_v48 = vpack.c.bf16 %v2337_v47, %v2336_v46  ;;  %v9071_v47 = vmov 0.0  }
 0x47d   : > { %v6893_v50 = vpack.c.bf16 %v3062_v49, %v3058_v22 }
 0x47e   : > { %6736 = vmatpush3.bf16.msra.mxu1 %v6735_v48  ;;  %v2356_v48 = vld [vmem:[#allocation13] sm:$0x1] }
 0x47f   : > { %6862 = vmatpush1.bf16.msra.mxu0 %v6861_v53  ;;  %v2355_v53 = vld [vmem:[#allocation11 + $0xf8] sm:$0xff] }
 0x480   : > { %6864 = vmatprep.subr.bf16.mxu0 %v6863_v54  ;;  %v3067_v54 = vld [vmem:[#allocation25 + $0x3c8] sm:$0xff]  ;;  %v6737_v56 = vpack.c.bf16 %v2355_v53, %v2354_v51  ;;  %v2516_v51 = vld [vmem:[#allocation16] sm:$0xff] }
 0x481   : > { %v2517_v53 = vld [vmem:[#allocation16 + $0x8] sm:$0xff] }
 0x482   : > { %6738 = vmatprep.subr.bf16.mxu1 %v6737_v56  ;;  %v6766_v56 = vpack.c.bf16 %v2517_v53, %v2516_v51  ;;  %v2653_v51 = vld [vmem:[#allocation20 + $0xc8] sm:$0xff]  ;;  %v2655_v53 = vld [vmem:[#allocation20 + $0xd8] sm:$0xff] }
 0x483   : > { %6866 = vmatpush1.bf16.msra.mxu0 %v6865_v60  ;;  %v6895_v60 = vpack.c.bf16 %v3071_v57, %v3067_v54 }
 0x484   : > { %6868 = vmatprep.subr.bf16.mxu0 %v6867_v61  ;;  %v6739_v61 = vpack.c.bf16 %v2339_v59, %v2338_v58  ;;  %v2518_v58 = vld [vmem:[#allocation16 + $0x10] sm:$0xff]  ;;  %v2519_v59 = vld [vmem:[#allocation16 + $0x18] sm:$0xff] }
 0x486   : > { %6740 = vmatpush3.bf16.msra.mxu1 %v6739_v61  ;;  %v2629_v61 = vld [vmem:[#allocation20 + $0x8] sm:$0xff] }
 0x487   : > { %6870 = vmatpush1.bf16.msra.mxu0 %v6869_v5  ;;  %6741 = vmatprep.subr.bf16.mxu1 %v9069_v4  ;;  %v2168_v5 = vld [vmem:[#allocation10] sm:$0x3]  ;;  %v6771_v0 = vpack.c.bf16 %v2631_v62, %v2629_v61  ;;  %v2657_v61 = vld [vmem:[#allocation20 + $0xe8] sm:$0xff] }
 0x488   : > { %6872 = vmatprep.subr.bf16.mxu0 %v6871_v6  ;;  %v2173_v6 = vrot.slane %v2168_v5, %v9768_v9  ;;  %v2177_v7 = vrot.slane %v2168_v5, %v9760_v15  ;;  %v2628_v5 = vld [vmem:[#allocation20] sm:$0xff]  ;;  %v2659_v62 = vld [vmem:[#allocation20 + $0xf8] sm:$0xff] }
 0x48b   : > { %6874 = vmatpush1.bf16.msra.mxu0 %v6873_v14  ;;  %v2428_v14 = vld [vmem:[%s10160_s4] sm:$0xff] }
 0x48c   : > { %6876 = vmatprep.subr.bf16.mxu0 %v6875_v16  ;;  %v2429_v16 = vld [vmem:[%s10160_s4 + $0x8] sm:$0xff] }
 0x48d   : > { %v6742_v19 = vpack.c.bf16 %v2429_v16, %v2428_v14 }
 0x48f   : > { %6878 = vmatpush1.bf16.msra.mxu0 %v6877_v23  ;;  %v2430_v23 = vld [vmem:[%s10160_s4 + $0x10] sm:$0xff] }
 0x490   : > { %6880 = vmatprep.subr.bf16.mxu0 %v6879_v24  ;;  %v2431_v24 = vld [vmem:[%s10160_s4 + $0x18] sm:$0xff] }
 0x491   : > { %v6745_v26 = vpack.c.bf16 %v2431_v24, %v2430_v23  ;;  %v2634_v23 = vld [vmem:[#allocation20 + $0x30] sm:$0xff]  ;;  %v2637_v24 = vld [vmem:[#allocation20 + $0x48] sm:$0xff] }
 0x493   : > { %6882 = vmatpush1.bf16.msra.mxu0 %v6881_v31  ;;  %v2434_v31 = vld [vmem:[%s10160_s4 + $0x30] sm:$0xff] }
 0x494   : > { %6884 = vmatprep.subr.bf16.mxu0 %v6883_v32  ;;  %v2435_v32 = vld [vmem:[%s10160_s4 + $0x38] sm:$0xff] }
 0x495   : > { %v6751_v33 = vpack.c.bf16 %v2435_v32, %v2434_v31  ;;  %v2638_v31 = vld [vmem:[#allocation20 + $0x50] sm:$0xff]  ;;  %v2641_v32 = vld [vmem:[#allocation20 + $0x68] sm:$0xff] }
 0x497   : > { %6886 = vmatpush1.bf16.msra.mxu0 %v6885_v37  ;;  %v2438_v37 = vld [vmem:[%s10160_s4 + $0x50] sm:$0xff] }
 0x498   : > { %6888 = vmatprep.subr.bf16.mxu0 %v6887_v38  ;;  %v2439_v38 = vld [vmem:[%s10160_s4 + $0x58] sm:$0xff] }
 0x499   : > { %v6757_v39 = vpack.c.bf16 %v2439_v38, %v2438_v37  ;;  %v2642_v37 = vld [vmem:[#allocation20 + $0x70] sm:$0xff]  ;;  %v2645_v38 = vld [vmem:[#allocation20 + $0x88] sm:$0xff] }
 0x49b   : > { %6890 = vmatpush1.bf16.msra.mxu0 %v6889_v44  ;;  %v2442_v44 = vld [vmem:[%s10160_s4 + $0x70] sm:$0xff] }
 0x49c   : > { %6892 = vmatprep.subr.bf16.mxu0 %v6891_v45  ;;  %v2443_v45 = vld [vmem:[%s10160_s4 + $0x78] sm:$0xff]  ;;  %s8944_s4 = scalar_lea.vmem %s8943_s0, 256 }
 0x49d   : > { %v6763_v46 = vpack.c.bf16 %v2443_v45, %v2442_v44  ;;  %v2646_v44 = vld [vmem:[#allocation20 + $0x90] sm:$0xff]  ;;  %v2649_v45 = vld [vmem:[#allocation20 + $0xa8] sm:$0xff]  ;;  %p8946_p1 = scmp.lt.s32.totalorder %s8944_s4, %s8938_s20 }
 0x49f   : > { %6894 = vmatpush1.bf16.msra.mxu0 %v6893_v50  ;;  %p8947_p11 = por %p8946_p1, %p8945_p10 }
 0x4a0   : > { %6896 = vmatprep.subr.bf16.mxu0 %v6895_v60  ;;  %v6769_v60 = vpack.c.bf16 %v2519_v59, %v2518_v58  ;;  %v6795_v58 = vpack.c.bf16 %v2655_v53, %v2653_v51  ;;  %v2652_v59 = vld [vmem:[#allocation20 + $0xc0] sm:$0xff]  ;;  %v2623_v51 = vld [vmem:[#allocation19 + $0xd8] sm:$0xff] }
 0x4a1   : > { %p8948_p12 = pnand %p8947_p11, %p8941_p5 }
 0x4a3   : > { %6898 = vmatpush1.bf16.msra.mxu0 %v6897_v2  ;;  %v2444_v2 = vld [vmem:[#allocation14] sm:$0x1] }
 0x539   : > { %v2317_v8 = vpop.f32.mrb[2].mxu0 }
 0x53a   : > { %v8119_v52 = vadd.f32 %v2317_v8, %v2173_v6  ;;  %v2319_v12 = vpop.f32.mrb[3].mxu0  ;;  %v2630_v6 = vld [vmem:[#allocation20 + $0x10] sm:$0xff]  ;;  %v2633_v8 = vld [vmem:[#allocation20 + $0x28] sm:$0xff] }
 0x53b   : > { %v8120_v17 = vadd.f32 %v2319_v12, %v2177_v7  ;;  %v6773_v16 = vpack.c.bf16 %v2630_v6, %v2628_v5  ;;  %v2656_v5 = vld [vmem:[#allocation20 + $0xe0] sm:$0xff]  ;;  %v2658_v6 = vld [vmem:[#allocation20 + $0xf0] sm:$0xff] }
 0x53c   : > { %v9834_v20 = vmax.f32 %v8119_v52, 0.0  ;;  %v2635_v52 = vld [vmem:[#allocation20 + $0x38] sm:$0xff] }
 0x53d   : > { %v9832_v63 = vmax.f32 %v8120_v17, 0.0 }
 0x53f   : > { %2421 = vmatprep.mubr.f32.mxu1 %v9832_v63  ;;  %3138 = vmatprep.mubr.f32.mxu0 %v9832_v63 }
 0x540   : > { %2422 = vmatmul.mubr.f32.vlgmr.msra.gmra.mrb[2].mxu1 %v9834_v20  ;;  %3139 = vmatmul.mubr.f32.vlgmr.msra.gmra.mrb[4].mxu0 %v9834_v20 }
 0x541   : > { %6743 = vmatpush3.bf16.msra.mxu1 %v6742_v19  ;;  %6055 = vmatprep.mubr.msk.f32.mxu1 %vm9070_vm0, %v9071_v47  ;;  %v2632_v19 = vld [vmem:[#allocation20 + $0x20] sm:$0xff] }
 0x542   : > { %6744 = vmatprep.subr.bf16.mxu1 %v9069_v4  ;;  %v6777_v27 = vpack.c.bf16 %v2634_v23, %v2632_v19 }
 0x545   : > { %6746 = vmatpush3.bf16.msra.mxu1 %v6745_v26  ;;  %v2639_v26 = vld [vmem:[#allocation20 + $0x58] sm:$0xff] }
 0x546   : > { %6747 = vmatprep.subr.bf16.mxu1 %v9069_v4  ;;  %v6779_v28 = vpack.c.bf16 %v2639_v26, %v2637_v24  ;;  %v2600_v24 = vld [vmem:[#allocation19 + $0x20] sm:$0xff]  ;;  %v2602_v26 = vld [vmem:[#allocation19 + $0x30] sm:$0xff] }
 0x549   : > { %6749 = vmatpush3.bf16.msra.mxu1 %v6748_v29  ;;  %v2636_v29 = vld [vmem:[#allocation20 + $0x40] sm:$0xff] }
 0x54a   : > { %6750 = vmatprep.subr.bf16.mxu1 %v9069_v4  ;;  %v6781_v34 = vpack.c.bf16 %v2638_v31, %v2636_v29  ;;  %v6809_v29 = vpack.c.bf16 %v2602_v26, %v2600_v24  ;;  %v2831_v24 = vld [vmem:[#allocation23 + $0x68] sm:$0xff] }
 0x54d   : > { %6752 = vmatpush3.bf16.msra.mxu1 %v6751_v33  ;;  %v2643_v33 = vld [vmem:[#allocation20 + $0x78] sm:$0xff] }
 0x54e   : > { %6753 = vmatprep.subr.bf16.mxu1 %v9069_v4  ;;  %v6783_v35 = vpack.c.bf16 %v2643_v33, %v2641_v32  ;;  %v2604_v32 = vld [vmem:[#allocation19 + $0x40] sm:$0xff]  ;;  %v2606_v33 = vld [vmem:[#allocation19 + $0x50] sm:$0xff] }
 0x551   : > { %6755 = vmatpush3.bf16.msra.mxu1 %v6754_v36  ;;  %v2640_v36 = vld [vmem:[#allocation20 + $0x60] sm:$0xff] }
 0x552   : > { %6756 = vmatprep.subr.bf16.mxu1 %v9069_v4  ;;  %v6785_v40 = vpack.c.bf16 %v2642_v37, %v2640_v36  ;;  %v6813_v36 = vpack.c.bf16 %v2606_v33, %v2604_v32  ;;  %v2839_v32 = vld [vmem:[#allocation23 + $0xa8] sm:$0xff] }
 0x555   : > { %6758 = vmatpush3.bf16.msra.mxu1 %v6757_v39  ;;  %v2647_v39 = vld [vmem:[#allocation20 + $0x98] sm:$0xff] }
 0x556   : > { %6759 = vmatprep.subr.bf16.mxu1 %v9069_v4  ;;  %v6787_v42 = vpack.c.bf16 %v2647_v39, %v2645_v38  ;;  %v2608_v38 = vld [vmem:[#allocation19 + $0x60] sm:$0xff]  ;;  %v2610_v39 = vld [vmem:[#allocation19 + $0x70] sm:$0xff] }
 0x559   : > { %6761 = vmatpush3.bf16.msra.mxu1 %v6760_v43  ;;  %v2644_v43 = vld [vmem:[#allocation20 + $0x80] sm:$0xff] }
 0x55a   : > { %6762 = vmatprep.subr.bf16.mxu1 %v9069_v4 }
 0x55d   : > { %6764 = vmatpush3.bf16.msra.mxu1 %v6763_v46  ;;  %v2651_v46 = vld [vmem:[#allocation20 + $0xb8] sm:$0xff] }
 0x55e   : > { %6765 = vmatprep.subr.bf16.mxu1 %v9069_v4 }
 0x613   : > { %v5998_v22 = vpop.f32.mrb[2].mxu1 }
 0x614   : > { %v5999_v49 = vpop.f32.mrb[3].mxu1 }
 0x615   : > { %v6000_v50 = vadd.f32 %v5999_v49, %v5998_v22  ;;  %v6789_v22 = vpack.c.bf16 %v2646_v44, %v2644_v43  ;;  %v2648_v49 = vld [vmem:[#allocation20 + $0xa0] sm:$0xff]  ;;  %v2617_v44 = vld [vmem:[#allocation19 + $0xa8] sm:$0xff] }
 0x616   : > { %v2612_v43 = vld [vmem:[#allocation19 + $0x80] sm:$0xff] }
 0x617   : > { %v9891_v54 = vadd.f32 %v6000_v50, %v2356_v48  ;;  %v6791_v48 = vpack.c.bf16 %v2651_v46, %v2649_v45  ;;  %v2650_v50 = vld [vmem:[#allocation20 + $0xb0] sm:$0xff]  ;;  %v2619_v45 = vld [vmem:[#allocation19 + $0xb8] sm:$0xff] }
 0x619   : > { %v2427_v57 = vmax.f32 %v9891_v54, 0.0  ;;  %v6817_v54 = vpack.c.bf16 %v2610_v39, %v2608_v38  ;;  %v2847_v38 = vld [vmem:[#allocation23 + $0xe8] sm:$0xff] }
 0x61b   : > { %6056 = vmatmul.mubr.f32.vlgmr.msra.gmra.mrb[4].mxu1 %v2427_v57 }
 0x61c   : > { %6767 = vmatpush3.bf16.msra.mxu1 %v6766_v56  ;;  %6066 = vmatprep.mubr.msk.f32.mxu1 %vm9070_vm0, %v9071_v47  ;;  %v6793_v56 = vpack.c.bf16 %v2650_v50, %v2648_v49  ;;  %v2618_v49 = vld [vmem:[#allocation19 + $0xb0] sm:$0xff]  ;;  %v2621_v50 = vld [vmem:[#allocation19 + $0xc8] sm:$0xff] }
 0x61d   : > { %6768 = vmatprep.subr.bf16.mxu1 %v9069_v4  ;;  %v6775_v4 = vpack.c.bf16 %v2635_v52, %v2633_v8  ;;  %v2599_v8 = vld [vmem:[#allocation19 + $0x18] sm:$0xff]  ;;  %v6801_v52 = vpack.c.bf16 %v2658_v6, %v2656_v5  ;;  %v2626_v5 = vld [vmem:[#allocation19 + $0xf0] sm:$0xff] }
 0x620   : > { %6770 = vmatpush3.bf16.msra.mxu1 %v6769_v60  ;;  %v2654_v60 = vld [vmem:[#allocation20 + $0xd0] sm:$0xff] }
 0x621   : > { %6772 = vmatprep.subr.bf16.mxu1 %v6771_v0  ;;  %v6797_v0 = vpack.c.bf16 %v2654_v60, %v2652_v59  ;;  %v2622_v59 = vld [vmem:[#allocation19 + $0xd0] sm:$0xff] }
 0x6ee   : > { %v2511_v7 = vpop.f32.mrb[4].mxu1 }
 0x6ef   : > { %v2512_v12 = vadd.f32 %v2511_v7, %v2444_v2  ;;  %v6057_v14 = vpop.f32.mrb[5].mxu1  ;;  %v6799_v2 = vpack.c.bf16 %v2659_v62, %v2657_v61  ;;  %v2597_v7 = vld [vmem:[#allocation19 + $0x8] sm:$0xff]  ;;  %v2627_v62 = vld [vmem:[#allocation19 + $0xf8] sm:$0xff] }
 0x6f0   : > { %v2596_v14 = vld [vmem:[#allocation19] sm:$0xff]  ;;  %v2625_v61 = vld [vmem:[#allocation19 + $0xe8] sm:$0xff] }
 0x6f1   : > { %v2515_v17 = vmax.f32 %v2512_v12, 0.0  ;;  %v6803_v12 = vpack.c.bf16 %v2599_v8, %v2597_v7  ;;  %v2949_v7 = vld [vmem:[#allocation25 + $0x18] sm:$0xff] }
 0x6f2   : > { %v2953_v8 = vld [vmem:[#allocation25 + $0x38] sm:$0xff] }
 0x6f3   : > { %6067 = vmatmul.mubr.msk.f32.vlgmr.msra.gmra.mrb[6].mxu1 %vm2521_vm1, %v2515_v17  ;;  %v2601_v17 = vld [vmem:[#allocation19 + $0x28] sm:$0xff] }
 0x6f4   : > { %6774 = vmatpush1.bf16.msra.mxu1 %v6773_v16  ;;  %2724 = vmatprep.mubr.f32.mxu1 %v9071_v47  ;;  %v2598_v16 = vld [vmem:[#allocation19 + $0x10] sm:$0xff] }
 0x6f5   : > { %6776 = vmatprep.subr.bf16.mxu1 %v6775_v4  ;;  %v2603_v4 = vld [vmem:[#allocation19 + $0x38] sm:$0xff]  ;;  %v6805_v19 = vpack.c.bf16 %v2598_v16, %v2596_v14  ;;  %v2823_v14 = vld [vmem:[#allocation23 + $0x28] sm:$0xff] }
 0x6f6   : > { %v6807_v23 = vpack.c.bf16 %v2603_v4, %v2601_v17  ;;  %v2818_v17 = vld [vmem:[#allocation23] sm:$0xff] }
 0x6f7   : > { %v2822_v4 = vld [vmem:[#allocation23 + $0x20] sm:$0xff] }
 0x6f8   : > { %6778 = vmatpush1.bf16.msra.mxu1 %v6777_v27  ;;  %v2605_v27 = vld [vmem:[#allocation19 + $0x48] sm:$0xff] }
 0x6f9   : > { %6780 = vmatprep.subr.bf16.mxu1 %v6779_v28  ;;  %v2607_v28 = vld [vmem:[#allocation19 + $0x58] sm:$0xff] }
 0x6fa   : > { %v6811_v31 = vpack.c.bf16 %v2607_v28, %v2605_v27  ;;  %v2826_v27 = vld [vmem:[#allocation23 + $0x40] sm:$0xff] }
 0x6fb   : > { %v2830_v28 = vld [vmem:[#allocation23 + $0x60] sm:$0xff] }
 0x6fc   : > { %6782 = vmatpush1.bf16.msra.mxu1 %v6781_v34  ;;  %v2609_v34 = vld [vmem:[#allocation19 + $0x68] sm:$0xff] }
 0x6fd   : > { %6784 = vmatprep.subr.bf16.mxu1 %v6783_v35  ;;  %v2611_v35 = vld [vmem:[#allocation19 + $0x78] sm:$0xff] }
 0x6fe   : > { %v6815_v37 = vpack.c.bf16 %v2611_v35, %v2609_v34  ;;  %v2834_v34 = vld [vmem:[#allocation23 + $0x80] sm:$0xff] }
 0x6ff   : > { %v2838_v35 = vld [vmem:[#allocation23 + $0xa0] sm:$0xff] }
 0x700   : > { %6786 = vmatpush1.bf16.msra.mxu1 %v6785_v40  ;;  %v2613_v40 = vld [vmem:[#allocation19 + $0x88] sm:$0xff] }
 0x701   : > { %6788 = vmatprep.subr.bf16.mxu1 %v6787_v42  ;;  %v2615_v42 = vld [vmem:[#allocation19 + $0x98] sm:$0xff] }
 0x704   : > { %6790 = vmatpush1.bf16.msra.mxu1 %v6789_v22  ;;  %v6823_v22 = vpack.c.bf16 %v2619_v45, %v2617_v44  ;;  %v2850_v44 = vld [vmem:[#allocation23 + $0x100] sm:$0xff] }
 0x705   : > { %6792 = vmatprep.subr.bf16.mxu1 %v6791_v48  ;;  %v2616_v48 = vld [vmem:[#allocation19 + $0xa0] sm:$0xff] }
 0x706   : > { %v6825_v53 = vpack.c.bf16 %v2618_v49, %v2616_v48  ;;  %v2854_v45 = vld [vmem:[#allocation23 + $0x120] sm:$0xff]  ;;  %v2863_v48 = vld [vmem:[#allocation23 + $0x168] sm:$0xff] }
 0x708   : > { %6794 = vmatpush1.bf16.msra.mxu1 %v6793_v56  ;;  %v6827_v56 = vpack.c.bf16 %v2623_v51, %v2621_v50  ;;  %v2858_v50 = vld [vmem:[#allocation23 + $0x140] sm:$0xff] }
 0x709   : > { %6796 = vmatprep.subr.bf16.mxu1 %v6795_v58  ;;  %v2620_v58 = vld [vmem:[#allocation19 + $0xc0] sm:$0xff] }
 0x70a   : > { %v6829_v60 = vpack.c.bf16 %v2622_v59, %v2620_v58  ;;  %v2862_v51 = vld [vmem:[#allocation23 + $0x160] sm:$0xff]  ;;  %v2871_v58 = vld [vmem:[#allocation23 + $0x1a8] sm:$0xff] }
 0x70c   : > { %6798 = vmatpush1.bf16.msra.mxu1 %v6797_v0  ;;  %v6831_v0 = vpack.c.bf16 %v2627_v62, %v2625_v61  ;;  %v2870_v61 = vld [vmem:[#allocation23 + $0x1a0] sm:$0xff] }
 0x70d   : > { %6800 = vmatprep.subr.bf16.mxu1 %v6799_v2  ;;  %v2624_v2 = vld [vmem:[#allocation19 + $0xe0] sm:$0xff] }
 0x70e   : > { %v6833_v6 = vpack.c.bf16 %v2626_v5, %v2624_v2  ;;  %v2879_v2 = vld [vmem:[#allocation23 + $0x1e8] sm:$0xff] }
 0x710   : > { %6802 = vmatpush1.bf16.msra.mxu1 %v6801_v52  ;;  %v6899_v52 = vpack.c.bf16 %v2953_v8, %v2949_v7  ;;  %v2878_v7 = vld [vmem:[#allocation23 + $0x1e0] sm:$0xff] }
 0x711   : > { %6804 = vmatprep.subr.bf16.mxu1 %v6803_v12  ;;  %v2819_v12 = vld [vmem:[#allocation23 + $0x8] sm:$0xff] }
 0x712   : > { %v6963_v16 = vpack.c.bf16 %v2823_v14, %v2819_v12  ;;  %v2887_v12 = vld [vmem:[#allocation23 + $0x228] sm:$0xff] }
 0x713   : > { %2725 = vmatmul.mubr.f32.vlgmr.msra.gmra.mrb[8].mxu1 %v2427_v57  ;;  %v6819_v57 = vpack.c.bf16 %v2615_v42, %v2613_v40  ;;  %v2842_v40 = vld [vmem:[#allocation23 + $0xc0] sm:$0xff] }
 0x714   : > { %6806 = vmatpush1.bf16.msra.mxu1 %v6805_v19  ;;  %2795 = vmatprep.mubr.f32.mxu1 %v9071_v47  ;;  %v2614_v47 = vld [vmem:[#allocation19 + $0x90] sm:$0xff]  ;;  %v6965_v19 = vpack.c.bf16 %v2822_v4, %v2818_v17  ;;  %v2846_v42 = vld [vmem:[#allocation23 + $0xe0] sm:$0xff] }
 0x715   : > { %6808 = vmatprep.subr.bf16.mxu1 %v6807_v23  ;;  %v6821_v46 = vpack.c.bf16 %v2614_v47, %v2612_v43  ;;  %v2827_v23 = vld [vmem:[#allocation23 + $0x48] sm:$0xff]  ;;  %6964 = vmatprep.subr.bf16.mxu0 %v6963_v16  ;;  %v2882_v16 = vld [vmem:[#allocation23 + $0x200] sm:$0xff] }
 0x716   : > { %6966 = vmatpush1.bf16.msra.mxu0 %v6965_v19  ;;  %v6967_v26 = vpack.c.bf16 %v2831_v24, %v2827_v23  ;;  %v2855_v43 = vld [vmem:[#allocation23 + $0x128] sm:$0xff]  ;;  %v2886_v17 = vld [vmem:[#allocation23 + $0x220] sm:$0xff] }
 0x717   : > { %v6997_v4 = vpack.c.bf16 %v2886_v17, %v2882_v16  ;;  %v2891_v19 = vld [vmem:[#allocation23 + $0x248] sm:$0xff]  ;;  %v2956_v17 = vld [vmem:[#allocation25 + $0x50] sm:$0xff] }
 0x718   : > { %6810 = vmatpush1.bf16.msra.mxu1 %v6809_v29  ;;  %v6969_v29 = vpack.c.bf16 %v2830_v28, %v2826_v27  ;;  %6968 = vmatprep.subr.bf16.mxu0 %v6967_v26  ;;  %v2895_v23 = vld [vmem:[#allocation23 + $0x268] sm:$0xff]  ;;  %v2890_v26 = vld [vmem:[#allocation23 + $0x240] sm:$0xff] }
 0x719   : > { %6812 = vmatprep.subr.bf16.mxu1 %v6811_v31  ;;  %v2835_v31 = vld [vmem:[#allocation23 + $0x88] sm:$0xff]  ;;  %v6999_v24 = vpack.c.bf16 %v2895_v23, %v2891_v19  ;;  %v2894_v27 = vld [vmem:[#allocation23 + $0x260] sm:$0xff]  ;;  %v2965_v19 = vld [vmem:[#allocation25 + $0x98] sm:$0xff] }
 0x71a   : > { %v6971_v33 = vpack.c.bf16 %v2839_v32, %v2835_v31  ;;  %6970 = vmatpush1.bf16.msra.mxu0 %v6969_v29  ;;  %v7001_v28 = vpack.c.bf16 %v2894_v27, %v2890_v26  ;;  %v2899_v29 = vld [vmem:[#allocation23 + $0x288] sm:$0xff]  ;;  %v2969_v23 = vld [vmem:[#allocation25 + $0xb8] sm:$0xff]  ;;  %v2964_v27 = vld [vmem:[#allocation25 + $0x90] sm:$0xff] }
 0x71b   : > { %v2903_v31 = vld [vmem:[#allocation23 + $0x2a8] sm:$0xff]  ;;  %v6907_v26 = vpack.c.bf16 %v2969_v23, %v2965_v19 }
 0x71c   : > { %6814 = vmatpush1.bf16.msra.mxu1 %v6813_v36  ;;  %v6973_v36 = vpack.c.bf16 %v2838_v35, %v2834_v34  ;;  %6972 = vmatprep.subr.bf16.mxu0 %v6971_v33  ;;  %v7003_v32 = vpack.c.bf16 %v2903_v31, %v2899_v29  ;;  %v2898_v33 = vld [vmem:[#allocation23 + $0x280] sm:$0xff]  ;;  %v2973_v29 = vld [vmem:[#allocation25 + $0xd8] sm:$0xff] }
 0x71d   : > { %6816 = vmatprep.subr.bf16.mxu1 %v6815_v37  ;;  %v2843_v37 = vld [vmem:[#allocation23 + $0xc8] sm:$0xff]  ;;  %v2902_v34 = vld [vmem:[#allocation23 + $0x2a0] sm:$0xff]  ;;  %v2977_v31 = vld [vmem:[#allocation25 + $0xf8] sm:$0xff] }
 0x71e   : > { %v6975_v39 = vpack.c.bf16 %v2847_v38, %v2843_v37  ;;  %6974 = vmatpush1.bf16.msra.mxu0 %v6973_v36  ;;  %v7005_v35 = vpack.c.bf16 %v2902_v34, %v2898_v33  ;;  %v2907_v36 = vld [vmem:[#allocation23 + $0x2c8] sm:$0xff]  ;;  %v6911_v33 = vpack.c.bf16 %v2977_v31, %v2973_v29  ;;  %v2972_v34 = vld [vmem:[#allocation25 + $0xd0] sm:$0xff] }
 0x71f   : > { %v2911_v37 = vld [vmem:[#allocation23 + $0x2e8] sm:$0xff] }
 0x720   : > { %6818 = vmatpush1.bf16.msra.mxu1 %v6817_v54  ;;  %v6977_v54 = vpack.c.bf16 %v2846_v42, %v2842_v40  ;;  %6976 = vmatprep.subr.bf16.mxu0 %v6975_v39  ;;  %v7007_v38 = vpack.c.bf16 %v2911_v37, %v2907_v36  ;;  %v2906_v39 = vld [vmem:[#allocation23 + $0x2c0] sm:$0xff]  ;;  %v2981_v36 = vld [vmem:[#allocation25 + $0x118] sm:$0xff] }
 0x721   : > { %6820 = vmatprep.subr.bf16.mxu1 %v6819_v57  ;;  %v2851_v57 = vld [vmem:[#allocation23 + $0x108] sm:$0xff]  ;;  %v2910_v40 = vld [vmem:[#allocation23 + $0x2e0] sm:$0xff]  ;;  %v2985_v37 = vld [vmem:[#allocation25 + $0x138] sm:$0xff] }
 0x722   : > { %v6979_v47 = vpack.c.bf16 %v2855_v43, %v2851_v57  ;;  %6978 = vmatpush1.bf16.msra.mxu0 %v6977_v54  ;;  %v7009_v42 = vpack.c.bf16 %v2910_v40, %v2906_v39  ;;  %v2915_v54 = vld [vmem:[#allocation23 + $0x308] sm:$0xff]  ;;  %v6915_v39 = vpack.c.bf16 %v2985_v37, %v2981_v36  ;;  %v2984_v40 = vld [vmem:[#allocation25 + $0x130] sm:$0xff] }
 0x723   : > { %v2919_v57 = vld [vmem:[#allocation23 + $0x328] sm:$0xff] }
 0x724   : > { %6822 = vmatpush1.bf16.msra.mxu1 %v6821_v46  ;;  %v6981_v46 = vpack.c.bf16 %v2854_v45, %v2850_v44  ;;  %6980 = vmatprep.subr.bf16.mxu0 %v6979_v47  ;;  %v7011_v43 = vpack.c.bf16 %v2919_v57, %v2915_v54  ;;  %v2914_v47 = vld [vmem:[#allocation23 + $0x300] sm:$0xff]  ;;  %v2993_v54 = vld [vmem:[#allocation25 + $0x178] sm:$0xff] }
 0x725   : > { %6824 = vmatprep.subr.bf16.mxu1 %v6823_v22  ;;  %v2859_v22 = vld [vmem:[#allocation23 + $0x148] sm:$0xff]  ;;  %v2918_v44 = vld [vmem:[#allocation23 + $0x320] sm:$0xff] }
 0x726   : > { %v6983_v49 = vpack.c.bf16 %v2863_v48, %v2859_v22  ;;  %6982 = vmatpush1.bf16.msra.mxu0 %v6981_v46  ;;  %v7013_v45 = vpack.c.bf16 %v2918_v44, %v2914_v47  ;;  %v2923_v46 = vld [vmem:[#allocation23 + $0x348] sm:$0xff]  ;;  %v2988_v47 = vld [vmem:[#allocation25 + $0x150] sm:$0xff] }
 0x727   : > { %v2927_v22 = vld [vmem:[#allocation23 + $0x368] sm:$0xff]  ;;  %v2992_v44 = vld [vmem:[#allocation25 + $0x170] sm:$0xff] }
 0x728   : > { %6826 = vmatpush1.bf16.msra.mxu1 %v6825_v53  ;;  %v6985_v53 = vpack.c.bf16 %v2862_v51, %v2858_v50  ;;  %6984 = vmatprep.subr.bf16.mxu0 %v6983_v49  ;;  %v7015_v48 = vpack.c.bf16 %v2927_v22, %v2923_v46  ;;  %v2922_v49 = vld [vmem:[#allocation23 + $0x340] sm:$0xff]  ;;  %v3001_v46 = vld [vmem:[#allocation25 + $0x1b8] sm:$0xff]  ;;  %v6921_v22 = vpack.c.bf16 %v2992_v44, %v2988_v47 }
 0x729   : > { %6828 = vmatprep.subr.bf16.mxu1 %v6827_v56  ;;  %v2867_v56 = vld [vmem:[#allocation23 + $0x188] sm:$0xff]  ;;  %v2926_v50 = vld [vmem:[#allocation23 + $0x360] sm:$0xff]  ;;  %v3061_v47 = vld [vmem:[#allocation25 + $0x398] sm:$0xff] }
 0x72a   : > { %v6987_v59 = vpack.c.bf16 %v2871_v58, %v2867_v56  ;;  %6986 = vmatpush1.bf16.msra.mxu0 %v6985_v53  ;;  %v7017_v51 = vpack.c.bf16 %v2926_v50, %v2922_v49  ;;  %v2931_v53 = vld [vmem:[#allocation23 + $0x388] sm:$0xff]  ;;  %v2996_v49 = vld [vmem:[#allocation25 + $0x190] sm:$0xff]  ;;  %v3065_v44 = vld [vmem:[#allocation25 + $0x3b8] sm:$0xff] }
 0x72b   : > { %v2935_v56 = vld [vmem:[#allocation23 + $0x3a8] sm:$0xff]  ;;  %v3000_v50 = vld [vmem:[#allocation25 + $0x1b0] sm:$0xff] }
 0x72c   : > { %6830 = vmatpush1.bf16.msra.mxu1 %v6829_v60  ;;  %v2866_v60 = vld [vmem:[#allocation23 + $0x180] sm:$0xff]  ;;  %6988 = vmatprep.subr.bf16.mxu0 %v6987_v59  ;;  %v7019_v58 = vpack.c.bf16 %v2935_v56, %v2931_v53  ;;  %v3009_v53 = vld [vmem:[#allocation25 + $0x1f8] sm:$0xff]  ;;  %v6925_v56 = vpack.c.bf16 %v3000_v50, %v2996_v49 }
 0x72d   : > { %6832 = vmatprep.subr.bf16.mxu1 %v6831_v0  ;;  %v6989_v62 = vpack.c.bf16 %v2870_v61, %v2866_v60  ;;  %v2875_v0 = vld [vmem:[#allocation23 + $0x1c8] sm:$0xff]  ;;  %v2930_v59 = vld [vmem:[#allocation23 + $0x380] sm:$0xff]  ;;  %v3069_v49 = vld [vmem:[#allocation25 + $0x3d8] sm:$0xff] }
 0x72e   : > { %v6991_v5 = vpack.c.bf16 %v2879_v2, %v2875_v0  ;;  %v2934_v60 = vld [vmem:[#allocation23 + $0x3a0] sm:$0xff]  ;;  %v2948_v0 = vld [vmem:[#allocation25 + $0x10] sm:$0xff]  ;;  %v3073_v50 = vld [vmem:[#allocation25 + $0x3f8] sm:$0xff] }
 0x72f   : > { %6990 = vmatpush1.bf16.msra.mxu0 %v6989_v62  ;;  %v7021_v61 = vpack.c.bf16 %v2934_v60, %v2930_v59  ;;  %v2520_v62 = vld [vmem:[#allocation17] sm:$0x1]  ;;  %v2952_v2 = vld [vmem:[#allocation25 + $0x30] sm:$0xff] }
 0x730   : > { %6834 = vmatpush1.bf16.msra.mxu1 %v6833_v6  ;;  %v2874_v6 = vld [vmem:[#allocation23 + $0x1c0] sm:$0xff]  ;;  %6992 = vmatprep.subr.bf16.mxu0 %v6991_v5  ;;  %v3004_v59 = vld [vmem:[#allocation25 + $0x1d0] sm:$0xff] }
 0x731   : > { %6900 = vmatprep.subr.bf16.mxu1 %v6899_v52  ;;  %v6993_v8 = vpack.c.bf16 %v2878_v7, %v2874_v6  ;;  %v2883_v52 = vld [vmem:[#allocation23 + $0x208] sm:$0xff]  ;;  %v2957_v6 = vld [vmem:[#allocation25 + $0x58] sm:$0xff]  ;;  %v3008_v60 = vld [vmem:[#allocation25 + $0x1f0] sm:$0xff] }
 0x732   : > { %v6995_v14 = vpack.c.bf16 %v2887_v12, %v2883_v52  ;;  %v2961_v7 = vld [vmem:[#allocation25 + $0x78] sm:$0xff]  ;;  %v6901_v12 = vpack.c.bf16 %v2952_v2, %v2948_v0  ;;  %v6929_v0 = vpack.c.bf16 %v3008_v60, %v3004_v59 }
 0x733   : > { %6994 = vmatpush1.bf16.msra.mxu0 %v6993_v8  ;;  %v6903_v16 = vpack.c.bf16 %v2961_v7, %v2957_v6  ;;  %v3016_v6 = vld [vmem:[#allocation25 + $0x230] sm:$0xff]  ;;  %v3021_v7 = vld [vmem:[#allocation25 + $0x258] sm:$0xff] }
 0x734   : > { %6996 = vmatprep.subr.bf16.mxu0 %v6995_v14  ;;  %v2821_v59 = vld [vmem:[#allocation23 + $0x18] sm:$0xff] }
 0x735   : > { %v2825_v60 = vld [vmem:[#allocation23 + $0x38] sm:$0xff] }
 0x737   : > { %6998 = vmatpush1.bf16.msra.mxu0 %v6997_v4  ;;  %v2960_v4 = vld [vmem:[#allocation25 + $0x70] sm:$0xff] }
 0x738   : > { %7000 = vmatprep.subr.bf16.mxu0 %v6999_v24  ;;  %v6905_v24 = vpack.c.bf16 %v2960_v4, %v2956_v17  ;;  %v3029_v17 = vld [vmem:[#allocation25 + $0x298] sm:$0xff] }
 0x739   : > { %v3033_v4 = vld [vmem:[#allocation25 + $0x2b8] sm:$0xff] }
 0x73a   : > { %v6939_v23 = vpack.c.bf16 %v3033_v4, %v3029_v17 }
 0x73b   : > { %7002 = vmatpush1.bf16.msra.mxu0 %v7001_v28  ;;  %v2968_v28 = vld [vmem:[#allocation25 + $0xb0] sm:$0xff] }
 0x73c   : > { %7004 = vmatprep.subr.bf16.mxu0 %v7003_v32  ;;  %v6909_v32 = vpack.c.bf16 %v2968_v28, %v2964_v27  ;;  %v3037_v27 = vld [vmem:[#allocation25 + $0x2d8] sm:$0xff] }
 0x73d   : > { %v3041_v28 = vld [vmem:[#allocation25 + $0x2f8] sm:$0xff] }
 0x73e   : > { %v6943_v31 = vpack.c.bf16 %v3041_v28, %v3037_v27 }
 0x73f   : > { %7006 = vmatpush1.bf16.msra.mxu0 %v7005_v35  ;;  %v2976_v35 = vld [vmem:[#allocation25 + $0xf0] sm:$0xff] }
 0x740   : > { %7008 = vmatprep.subr.bf16.mxu0 %v7007_v38  ;;  %v6913_v38 = vpack.c.bf16 %v2976_v35, %v2972_v34  ;;  %v3045_v34 = vld [vmem:[#allocation25 + $0x318] sm:$0xff] }
 0x741   : > { %v3049_v35 = vld [vmem:[#allocation25 + $0x338] sm:$0xff] }
 0x742   : > { %v6947_v37 = vpack.c.bf16 %v3049_v35, %v3045_v34  ;;  %v2852_v35 = vld [vmem:[#allocation23 + $0x110] sm:$0xff] }
 0x743   : > { %7010 = vmatpush1.bf16.msra.mxu0 %v7009_v42  ;;  %v2989_v42 = vld [vmem:[#allocation25 + $0x158] sm:$0xff] }
 0x744   : > { %7012 = vmatprep.subr.bf16.mxu0 %v7011_v43  ;;  %v6919_v43 = vpack.c.bf16 %v2993_v54, %v2989_v42 }
 0x747   : > { %7014 = vmatpush1.bf16.msra.mxu0 %v7013_v45  ;;  %v2997_v45 = vld [vmem:[#allocation25 + $0x198] sm:$0xff] }
 0x748   : > { %7016 = vmatprep.subr.bf16.mxu0 %v7015_v48  ;;  %v6923_v48 = vpack.c.bf16 %v3001_v46, %v2997_v45  ;;  %v6955_v46 = vpack.c.bf16 %v3065_v44, %v3061_v47  ;;  %v2868_v44 = vld [vmem:[#allocation23 + $0x190] sm:$0xff] }
 0x74b   : > { %7018 = vmatpush1.bf16.msra.mxu0 %v7017_v51  ;;  %v3005_v51 = vld [vmem:[#allocation25 + $0x1d8] sm:$0xff] }
 0x74c   : > { %7020 = vmatprep.subr.bf16.mxu0 %v7019_v58  ;;  %v6927_v58 = vpack.c.bf16 %v3009_v53, %v3005_v51  ;;  %v6959_v53 = vpack.c.bf16 %v3073_v50, %v3069_v49  ;;  %v2943_v49 = vld [vmem:[#allocation23 + $0x3e8] sm:$0xff] }
 0x74f   : > { %7022 = vmatpush1.bf16.msra.mxu0 %v7021_v61  ;;  %v3013_v61 = vld [vmem:[#allocation25 + $0x218] sm:$0xff] }
 0x7c6   : > { %v2591_v5 = vpop.f32.mrb[6].mxu1 }
 0x7c7   : > { %v2592_v8 = vadd.f32 %v2591_v5, %v2520_v62  ;;  %v6068_v52 = vpop.f32.mrb[7].mxu1  ;;  %v3017_v62 = vld [vmem:[#allocation25 + $0x238] sm:$0xff]  ;;  %v3012_v5 = vld [vmem:[#allocation25 + $0x210] sm:$0xff] }
 0x7c8   : > { %v6931_v2 = vpack.c.bf16 %v3017_v62, %v3013_v61  ;;  %v6933_v52 = vpack.c.bf16 %v3016_v6, %v3012_v5  ;;  %v7027_v62 = vpack.c.bf16 %v2825_v60, %v2821_v59  ;;  %v2829_v5 = vld [vmem:[#allocation23 + $0x58] sm:$0xff]  ;;  %v2876_v60 = vld [vmem:[#allocation23 + $0x1d0] sm:$0xff] }
 0x7c9   : > { %v2595_v14 = vmax.f32 %v2592_v8, 0.0  ;;  %v3025_v8 = vld [vmem:[#allocation25 + $0x278] sm:$0xff] }
 0x7ca   : > { %v2833_v6 = vld [vmem:[#allocation23 + $0x78] sm:$0xff] }
 0x7cb   : > { %2796 = vmatmul.mubr.f32.vlgmr.msra.gmra.mrb[8].mxu1 %v2595_v14  ;;  %v3020_v14 = vld [vmem:[#allocation25 + $0x250] sm:$0xff] }
 0x7cc   : > { %6902 = vmatpush1.bf16.msra.mxu1 %v6901_v12  ;;  %3209 = vmatprep.mubr.f32.mxu1 %v9832_v63  ;;  %v2980_v63 = vld [vmem:[#allocation25 + $0x110] sm:$0xff]  ;;  %v6935_v12 = vpack.c.bf16 %v3025_v8, %v3021_v7  ;;  %v7031_v8 = vpack.c.bf16 %v2833_v6, %v2829_v5 }
 0x7cd   : > { %6904 = vmatprep.subr.bf16.mxu1 %v6903_v16  ;;  %v6917_v57 = vpack.c.bf16 %v2984_v40, %v2980_v63  ;;  %v3024_v16 = vld [vmem:[#allocation25 + $0x270] sm:$0xff]  ;;  %v3053_v63 = vld [vmem:[#allocation25 + $0x358] sm:$0xff] }
 0x7ce   : > { %v6937_v19 = vpack.c.bf16 %v3024_v16, %v3020_v14  ;;  %v3057_v40 = vld [vmem:[#allocation25 + $0x378] sm:$0xff]  ;;  %v3909_v5 = vld [vmem:[#allocation29 + $0x48] sm:$0xff] }
 0x7cf   : > { %v6951_v54 = vpack.c.bf16 %v3057_v40, %v3053_v63  ;;  %v2837_v14 = vld [vmem:[#allocation23 + $0x98] sm:$0xff]  ;;  %v2860_v40 = vld [vmem:[#allocation23 + $0x150] sm:$0xff] }
 0x7d0   : > { %6906 = vmatpush1.bf16.msra.mxu1 %v6905_v24  ;;  %v3028_v24 = vld [vmem:[#allocation25 + $0x290] sm:$0xff]  ;;  %v2841_v16 = vld [vmem:[#allocation23 + $0xb8] sm:$0xff] }
 0x7d1   : > { %6908 = vmatprep.subr.bf16.mxu1 %v6907_v26  ;;  %v3032_v26 = vld [vmem:[#allocation25 + $0x2b0] sm:$0xff]  ;;  %v7035_v4 = vpack.c.bf16 %v2841_v16, %v2837_v14  ;;  %v2893_v14 = vld [vmem:[#allocation23 + $0x258] sm:$0xff] }
 0x7d2   : > { %v6941_v29 = vpack.c.bf16 %v3032_v26, %v3028_v24  ;;  %v2845_v24 = vld [vmem:[#allocation23 + $0xd8] sm:$0xff] }
 0x7d3   : > { %v2849_v26 = vld [vmem:[#allocation23 + $0xf8] sm:$0xff] }
 0x7d4   : > { %6910 = vmatpush1.bf16.msra.mxu1 %v6909_v32  ;;  %v3036_v32 = vld [vmem:[#allocation25 + $0x2d0] sm:$0xff]  ;;  %v7039_v28 = vpack.c.bf16 %v2849_v26, %v2845_v24  ;;  %v2897_v16 = vld [vmem:[#allocation23 + $0x278] sm:$0xff] }
 0x7d5   : > { %6912 = vmatprep.subr.bf16.mxu1 %v6911_v33  ;;  %v3040_v33 = vld [vmem:[#allocation25 + $0x2f0] sm:$0xff]  ;;  %v2901_v24 = vld [vmem:[#allocation23 + $0x298] sm:$0xff] }
 0x7d6   : > { %v6945_v36 = vpack.c.bf16 %v3040_v33, %v3036_v32  ;;  %v2853_v32 = vld [vmem:[#allocation23 + $0x118] sm:$0xff] }
 0x7d7   : > { %v2857_v33 = vld [vmem:[#allocation23 + $0x138] sm:$0xff] }
 0x7d8   : > { %6914 = vmatpush1.bf16.msra.mxu1 %v6913_v38  ;;  %v3044_v38 = vld [vmem:[#allocation25 + $0x310] sm:$0xff]  ;;  %v2905_v26 = vld [vmem:[#allocation23 + $0x2b8] sm:$0xff] }
 0x7d9   : > { %6916 = vmatprep.subr.bf16.mxu1 %v6915_v39  ;;  %v3048_v39 = vld [vmem:[#allocation25 + $0x330] sm:$0xff] }
 0x7da   : > { %v6949_v42 = vpack.c.bf16 %v3048_v39, %v3044_v38  ;;  %v2865_v38 = vld [vmem:[#allocation23 + $0x178] sm:$0xff] }
 0x7dc   : > { %6918 = vmatpush1.bf16.msra.mxu1 %v6917_v57  ;;  %v3052_v57 = vld [vmem:[#allocation25 + $0x350] sm:$0xff] }
 0x7dd   : > { %6920 = vmatprep.subr.bf16.mxu1 %v6919_v43  ;;  %v3056_v43 = vld [vmem:[#allocation25 + $0x370] sm:$0xff] }
 0x7de   : > { %v6953_v45 = vpack.c.bf16 %v3056_v43, %v3052_v57  ;;  %v2873_v57 = vld [vmem:[#allocation23 + $0x1b8] sm:$0xff] }
 0x7e0   : > { %6922 = vmatpush1.bf16.msra.mxu1 %v6921_v22  ;;  %v3060_v22 = vld [vmem:[#allocation25 + $0x390] sm:$0xff] }
 0x7e1   : > { %6924 = vmatprep.subr.bf16.mxu1 %v6923_v48  ;;  %v3064_v48 = vld [vmem:[#allocation25 + $0x3b0] sm:$0xff] }
 0x7e2   : > { %v6957_v51 = vpack.c.bf16 %v3064_v48, %v3060_v22  ;;  %v2881_v22 = vld [vmem:[#allocation23 + $0x1f8] sm:$0xff]  ;;  %v2939_v48 = vld [vmem:[#allocation23 + $0x3c8] sm:$0xff] }
 0x7e3   : > { %v7023_v50 = vpack.c.bf16 %v2943_v49, %v2939_v48 }
 0x7e4   : > { %6926 = vmatpush1.bf16.msra.mxu1 %v6925_v56  ;;  %v3068_v56 = vld [vmem:[#allocation25 + $0x3d0] sm:$0xff] }
 0x7e5   : > { %6928 = vmatprep.subr.bf16.mxu1 %v6927_v58  ;;  %v3072_v58 = vld [vmem:[#allocation25 + $0x3f0] sm:$0xff]  ;;  %7024 = vmatprep.subr.bf16.mxu0 %v7023_v50 }
 0x7e6   : > { %v6961_v61 = vpack.c.bf16 %v3072_v58, %v3068_v56  ;;  %v2932_v50 = vld [vmem:[#allocation23 + $0x390] sm:$0xff] }
 0x7e8   : > { %6930 = vmatpush1.bf16.msra.mxu1 %v6929_v0  ;;  %v2820_v0 = vld [vmem:[#allocation23 + $0x10] sm:$0xff] }
 0x7e9   : > { %6932 = vmatprep.subr.bf16.mxu1 %v6931_v2  ;;  %v2824_v2 = vld [vmem:[#allocation23 + $0x30] sm:$0xff] }
 0x7ea   : > { %v7029_v7 = vpack.c.bf16 %v2824_v2, %v2820_v0  ;;  %v2889_v0 = vld [vmem:[#allocation23 + $0x238] sm:$0xff]  ;;  %v3901_v2 = vld [vmem:[#allocation29 + $0x8] sm:$0xff] }
 0x7eb   : > { %v7091_v6 = vpack.c.bf16 %v3909_v5, %v3901_v2 }
 0x7ec   : > { %6934 = vmatpush1.bf16.msra.mxu1 %v6933_v52  ;;  %v2828_v52 = vld [vmem:[#allocation23 + $0x50] sm:$0xff] }
 0x7ed   : > { %6936 = vmatprep.subr.bf16.mxu1 %v6935_v12  ;;  %v2832_v12 = vld [vmem:[#allocation23 + $0x70] sm:$0xff] }
 0x7ee   : > { %v7033_v17 = vpack.c.bf16 %v2832_v12, %v2828_v52  ;;  %v2884_v52 = vld [vmem:[#allocation23 + $0x210] sm:$0xff] }
 0x7ef   : > { %v2888_v12 = vld [vmem:[#allocation23 + $0x230] sm:$0xff] }
 0x7f0   : > { %6938 = vmatpush1.bf16.msra.mxu1 %v6937_v19  ;;  %v2836_v19 = vld [vmem:[#allocation23 + $0x90] sm:$0xff] }
 0x7f1   : > { %6940 = vmatprep.subr.bf16.mxu1 %v6939_v23  ;;  %v2840_v23 = vld [vmem:[#allocation23 + $0xb0] sm:$0xff] }
 0x7f2   : > { %v7037_v27 = vpack.c.bf16 %v2840_v23, %v2836_v19  ;;  %v2892_v19 = vld [vmem:[#allocation23 + $0x250] sm:$0xff] }
 0x7f3   : > { %v2896_v23 = vld [vmem:[#allocation23 + $0x270] sm:$0xff] }
 0x7f4   : > { %6942 = vmatpush1.bf16.msra.mxu1 %v6941_v29  ;;  %v2844_v29 = vld [vmem:[#allocation23 + $0xd0] sm:$0xff] }
 0x7f5   : > { %6944 = vmatprep.subr.bf16.mxu1 %v6943_v31  ;;  %v2848_v31 = vld [vmem:[#allocation23 + $0xf0] sm:$0xff] }
 0x7f6   : > { %v7041_v34 = vpack.c.bf16 %v2848_v31, %v2844_v29  ;;  %v2900_v29 = vld [vmem:[#allocation23 + $0x290] sm:$0xff] }
 0x7f7   : > { %v2904_v31 = vld [vmem:[#allocation23 + $0x2b0] sm:$0xff] }
 0x7f8   : > { %6946 = vmatpush1.bf16.msra.mxu1 %v6945_v36  ;;  %v2856_v36 = vld [vmem:[#allocation23 + $0x130] sm:$0xff] }
 0x7f9   : > { %6948 = vmatprep.subr.bf16.mxu1 %v6947_v37  ;;  %v2861_v37 = vld [vmem:[#allocation23 + $0x158] sm:$0xff]  ;;  %v7045_v39 = vpack.c.bf16 %v2856_v36, %v2852_v35  ;;  %v2908_v35 = vld [vmem:[#allocation23 + $0x2d0] sm:$0xff] }
 0x7fa   : > { %v7047_v63 = vpack.c.bf16 %v2865_v38, %v2861_v37  ;;  %v2912_v36 = vld [vmem:[#allocation23 + $0x2f0] sm:$0xff]  ;;  %v2917_v37 = vld [vmem:[#allocation23 + $0x318] sm:$0xff] }
 0x7fb   : > { %v2921_v38 = vld [vmem:[#allocation23 + $0x338] sm:$0xff] }
 0x7fc   : > { %6950 = vmatpush1.bf16.msra.mxu1 %v6949_v42  ;;  %v2864_v42 = vld [vmem:[#allocation23 + $0x170] sm:$0xff] }
 0x7fd   : > { %6952 = vmatprep.subr.bf16.mxu1 %v6951_v54  ;;  %v2869_v54 = vld [vmem:[#allocation23 + $0x198] sm:$0xff]  ;;  %v7049_v43 = vpack.c.bf16 %v2864_v42, %v2860_v40  ;;  %v2916_v40 = vld [vmem:[#allocation23 + $0x310] sm:$0xff] }
 0x7fe   : > { %v7051_v47 = vpack.c.bf16 %v2873_v57, %v2869_v54  ;;  %v2920_v42 = vld [vmem:[#allocation23 + $0x330] sm:$0xff]  ;;  %v2925_v54 = vld [vmem:[#allocation23 + $0x358] sm:$0xff] }
 0x7ff   : > { %v2929_v57 = vld [vmem:[#allocation23 + $0x378] sm:$0xff] }
 0x800   : > { %6954 = vmatpush1.bf16.msra.mxu1 %v6953_v45  ;;  %v2872_v45 = vld [vmem:[#allocation23 + $0x1b0] sm:$0xff] }
 0x801   : > { %6956 = vmatprep.subr.bf16.mxu1 %v6955_v46  ;;  %v2877_v46 = vld [vmem:[#allocation23 + $0x1d8] sm:$0xff]  ;;  %v7053_v56 = vpack.c.bf16 %v2872_v45, %v2868_v44  ;;  %v2924_v44 = vld [vmem:[#allocation23 + $0x350] sm:$0xff] }
 0x802   : > { %v7055_v59 = vpack.c.bf16 %v2881_v22, %v2877_v46  ;;  %v2928_v45 = vld [vmem:[#allocation23 + $0x370] sm:$0xff]  ;;  %v2933_v46 = vld [vmem:[#allocation23 + $0x398] sm:$0xff] }
 0x803   : > { %v2937_v22 = vld [vmem:[#allocation23 + $0x3b8] sm:$0xff]  ;;  %v7081_v48 = vpack.c.bf16 %v2928_v45, %v2924_v44 }
 0x804   : > { %6958 = vmatpush1.bf16.msra.mxu1 %v6957_v51  ;;  %v2938_v51 = vld [vmem:[#allocation23 + $0x3c0] sm:$0xff]  ;;  %v7083_v49 = vpack.c.bf16 %v2937_v22, %v2933_v46  ;;  %v3934_v46 = vld [vmem:[#allocation29 + $0x110] sm:$0xff] }
 0x805   : > { %6960 = vmatprep.subr.bf16.mxu1 %v6959_v53  ;;  %v2942_v53 = vld [vmem:[#allocation23 + $0x3e0] sm:$0xff]  ;;  %v3942_v22 = vld [vmem:[#allocation29 + $0x150] sm:$0xff] }
 0x806   : > { %v7025_v58 = vpack.c.bf16 %v2942_v53, %v2938_v51  ;;  %v2936_v51 = vld [vmem:[#allocation23 + $0x3b0] sm:$0xff]  ;;  %v2941_v53 = vld [vmem:[#allocation23 + $0x3d8] sm:$0xff] }
 0x808   : > { %6962 = vmatpush1.bf16.msra.mxu1 %v6961_v61  ;;  %v2880_v61 = vld [vmem:[#allocation23 + $0x1f0] sm:$0xff]  ;;  %7026 = vmatpush1.bf16.msra.mxu0 %v7025_v58  ;;  %v7085_v58 = vpack.c.bf16 %v2936_v51, %v2932_v50  ;;  %v3951_v50 = vld [vmem:[#allocation29 + $0x198] sm:$0xff] }
 0x809   : > { %7028 = vmatprep.subr.bf16.mxu1 %v7027_v62  ;;  %v2885_v62 = vld [vmem:[#allocation23 + $0x218] sm:$0xff]  ;;  %7092 = vmatprep.subr.bf16.mxu0 %v7091_v6 }
 0x80a   : > { %v2802_v6 = vld [vmem:[#allocation22] sm:$0x3] }
 0x80b   : > { %3210 = vmatmul.mubr.f32.vlgmr.msra.gmra.mrb[10].mxu1 %v9834_v20  ;;  %v7043_v20 = vpack.c.bf16 %v2857_v33, %v2853_v32  ;;  %v2909_v32 = vld [vmem:[#allocation23 + $0x2d8] sm:$0xff] }
 0x80c   : > { %7030 = vmatpush1.bf16.msra.mxu1 %v7029_v7  ;;  %v7057_v7 = vpack.c.bf16 %v2880_v61, %v2876_v60  ;;  %v2913_v33 = vld [vmem:[#allocation23 + $0x2f8] sm:$0xff]  ;;  %v2940_v60 = vld [vmem:[#allocation23 + $0x3d0] sm:$0xff] }
 0x80d   : > { %7032 = vmatprep.subr.bf16.mxu1 %v7031_v8  ;;  %v7059_v8 = vpack.c.bf16 %v2889_v0, %v2885_v62  ;;  %v2944_v61 = vld [vmem:[#allocation23 + $0x3f0] sm:$0xff]  ;;  %v3903_v62 = vld [vmem:[#allocation29 + $0x18] sm:$0xff] }
 0x80e   : > { %v3911_v0 = vld [vmem:[#allocation29 + $0x58] sm:$0xff]  ;;  %v7089_v2 = vpack.c.bf16 %v2944_v61, %v2940_v60 }
 0x80f   : > { %v7219_v5 = vpack.c.bf16 %v3911_v0, %v3903_v62  ;;  %v3959_v51 = vld [vmem:[#allocation29 + $0x1d8] sm:$0xff]  ;;  %v3950_v62 = vld [vmem:[#allocation29 + $0x190] sm:$0xff] }
 0x810   : > { %7034 = vmatpush1.bf16.msra.mxu1 %v7033_v17  ;;  %v7061_v17 = vpack.c.bf16 %v2888_v12, %v2884_v52  ;;  %v3900_v12 = vld [vmem:[#allocation29] sm:$0xff]  ;;  %v7231_v61 = vpack.c.bf16 %v3959_v51, %v3951_v50  ;;  %v3958_v0 = vld [vmem:[#allocation29 + $0x1d0] sm:$0xff] }
 0x811   : > { %7036 = vmatprep.subr.bf16.mxu1 %v7035_v4  ;;  %v7063_v4 = vpack.c.bf16 %v2897_v16, %v2893_v14  ;;  %v4012_v51 = vld [vmem:[#allocation29 + $0x380] sm:$0xff] }
 0x814   : > { %7038 = vmatpush1.bf16.msra.mxu1 %v7037_v27  ;;  %v7065_v27 = vpack.c.bf16 %v2896_v23, %v2892_v19  ;;  %v3910_v19 = vld [vmem:[#allocation29 + $0x50] sm:$0xff] }
 0x815   : > { %7040 = vmatprep.subr.bf16.mxu1 %v7039_v28  ;;  %v7067_v28 = vpack.c.bf16 %v2905_v26, %v2901_v24  ;;  %v3917_v24 = vld [vmem:[#allocation29 + $0x88] sm:$0xff] }
 0x816   : > { %v3925_v26 = vld [vmem:[#allocation29 + $0xc8] sm:$0xff] }
 0x818   : > { %7042 = vmatpush1.bf16.msra.mxu1 %v7041_v34  ;;  %v7069_v34 = vpack.c.bf16 %v2904_v31, %v2900_v29 }
 0x819   : > { %7044 = vmatprep.subr.bf16.mxu1 %v7043_v20  ;;  %v7071_v20 = vpack.c.bf16 %v2913_v33, %v2909_v32  ;;  %v3916_v33 = vld [vmem:[#allocation29 + $0x80] sm:$0xff] }
 0x81c   : > { %7046 = vmatpush1.bf16.msra.mxu1 %v7045_v39  ;;  %v7073_v39 = vpack.c.bf16 %v2912_v36, %v2908_v35  ;;  %v3918_v35 = vld [vmem:[#allocation29 + $0x90] sm:$0xff] }
 0x81d   : > { %7048 = vmatprep.subr.bf16.mxu1 %v7047_v63  ;;  %v7075_v63 = vpack.c.bf16 %v2921_v38, %v2917_v37  ;;  %v3926_v36 = vld [vmem:[#allocation29 + $0xd0] sm:$0xff]  ;;  %v3933_v37 = vld [vmem:[#allocation29 + $0x108] sm:$0xff]  ;;  %v7095_v38 = vpack.c.bf16 %v3925_v26, %v3917_v24  ;;  %v3983_v26 = vld [vmem:[#allocation29 + $0x298] sm:$0xff] }
 0x81e   : > { %v3989_v24 = vld [vmem:[#allocation29 + $0x2c8] sm:$0xff] }
 0x820   : > { %7050 = vmatpush1.bf16.msra.mxu1 %v7049_v43  ;;  %v7077_v43 = vpack.c.bf16 %v2920_v42, %v2916_v40  ;;  %v3935_v40 = vld [vmem:[#allocation29 + $0x118] sm:$0xff] }
 0x821   : > { %7052 = vmatprep.subr.bf16.mxu1 %v7051_v47  ;;  %v7079_v47 = vpack.c.bf16 %v2929_v57, %v2925_v54  ;;  %v3943_v42 = vld [vmem:[#allocation29 + $0x158] sm:$0xff]  ;;  %v7225_v57 = vpack.c.bf16 %v3926_v36, %v3918_v35  ;;  %v3990_v35 = vld [vmem:[#allocation29 + $0x2d0] sm:$0xff]  ;;  %v3997_v36 = vld [vmem:[#allocation29 + $0x308] sm:$0xff] }
 0x822   : > { %v7227_v45 = vpack.c.bf16 %v3943_v42, %v3935_v40  ;;  %v3996_v42 = vld [vmem:[#allocation29 + $0x300] sm:$0xff] }
 0x824   : > { %7054 = vmatpush1.bf16.msra.mxu1 %v7053_v56  ;;  %v2945_v56 = vld [vmem:[#allocation23 + $0x3f8] sm:$0xff] }
 0x825   : > { %7056 = vmatprep.subr.bf16.mxu1 %v7055_v59  ;;  %v7087_v59 = vpack.c.bf16 %v2945_v56, %v2941_v53  ;;  %v7229_v56 = vpack.c.bf16 %v3942_v22, %v3934_v46  ;;  %v4021_v46 = vld [vmem:[#allocation29 + $0x3c8] sm:$0xff]  ;;  %v4015_v22 = vld [vmem:[#allocation29 + $0x398] sm:$0xff] }
 0x828   : > { %7058 = vmatpush1.bf16.msra.mxu1 %v7057_v7  ;;  %v2807_v7 = vrot.slane %v2802_v6, %v9768_v9 }
 0x829   : > { %7060 = vmatprep.subr.bf16.mxu1 %v7059_v8  ;;  %v2811_v8 = vrot.slane %v2802_v6, %v9760_v15  ;;  %v3967_v6 = vld [vmem:[#allocation29 + $0x218] sm:$0xff] }
 0x82c   : > { %7062 = vmatpush1.bf16.msra.mxu1 %v7061_v17  ;;  %v3908_v17 = vld [vmem:[#allocation29 + $0x40] sm:$0xff] }
 0x82d   : > { %7064 = vmatprep.subr.bf16.mxu1 %v7063_v4  ;;  %v3902_v4 = vld [vmem:[#allocation29 + $0x10] sm:$0xff]  ;;  %v7093_v31 = vpack.c.bf16 %v3908_v17, %v3900_v12  ;;  %v3964_v12 = vld [vmem:[#allocation29 + $0x200] sm:$0xff] }
 0x82e   : > { %v7221_v32 = vpack.c.bf16 %v3910_v19, %v3902_v4  ;;  %v3966_v4 = vld [vmem:[#allocation29 + $0x210] sm:$0xff] }
 0x82f   : > { %v3974_v19 = vld [vmem:[#allocation29 + $0x250] sm:$0xff] }
 0x830   : > { %7066 = vmatpush1.bf16.msra.mxu1 %v7065_v27  ;;  %v3919_v27 = vld [vmem:[#allocation29 + $0x98] sm:$0xff] }
 0x831   : > { %7068 = vmatprep.subr.bf16.mxu1 %v7067_v28  ;;  %v3927_v28 = vld [vmem:[#allocation29 + $0xd8] sm:$0xff] }
 0x834   : > { %7070 = vmatpush1.bf16.msra.mxu1 %v7069_v34  ;;  %v3924_v34 = vld [vmem:[#allocation29 + $0xc0] sm:$0xff] }
 0x835   : > { %7072 = vmatprep.subr.bf16.mxu1 %v7071_v20  ;;  %v7097_v54 = vpack.c.bf16 %v3924_v34, %v3916_v33 }
 0x838   : > { %7074 = vmatpush1.bf16.msra.mxu1 %v7073_v39  ;;  %v7223_v39 = vpack.c.bf16 %v3927_v28, %v3919_v27  ;;  %v3991_v27 = vld [vmem:[#allocation29 + $0x2d8] sm:$0xff] }
 0x839   : > { %7076 = vmatprep.subr.bf16.mxu1 %v7075_v63  ;;  %v3941_v63 = vld [vmem:[#allocation29 + $0x148] sm:$0xff]  ;;  %v7239_v34 = vpack.c.bf16 %v3991_v27, %v3983_v26  ;;  %v4044_v27 = vld [vmem:[#allocation29 + $0x480] sm:$0xff] }
 0x83a   : > { %v7099_v44 = vpack.c.bf16 %v3941_v63, %v3933_v37  ;;  %v4005_v37 = vld [vmem:[#allocation29 + $0x348] sm:$0xff] }
 0x83c   : > { %7078 = vmatpush1.bf16.msra.mxu1 %v7077_v43  ;;  %v3932_v43 = vld [vmem:[#allocation29 + $0x100] sm:$0xff] }
 0x83d   : > { %7080 = vmatprep.subr.bf16.mxu1 %v7079_v47  ;;  %v3940_v47 = vld [vmem:[#allocation29 + $0x140] sm:$0xff] }
 0x83e   : > { %v7101_v53 = vpack.c.bf16 %v3940_v47, %v3932_v43  ;;  %v3998_v47 = vld [vmem:[#allocation29 + $0x310] sm:$0xff] }
 0x840   : > { %7082 = vmatpush1.bf16.msra.mxu1 %v7081_v48  ;;  %v3949_v48 = vld [vmem:[#allocation29 + $0x188] sm:$0xff] }
 0x841   : > { %7084 = vmatprep.subr.bf16.mxu1 %v7083_v49  ;;  %v3957_v49 = vld [vmem:[#allocation29 + $0x1c8] sm:$0xff] }
 0x842   : > { %v7103_v60 = vpack.c.bf16 %v3957_v49, %v3949_v48  ;;  %v4023_v48 = vld [vmem:[#allocation29 + $0x3d8] sm:$0xff] }
 0x844   : > { %7086 = vmatpush1.bf16.msra.mxu1 %v7085_v58  ;;  %v3948_v58 = vld [vmem:[#allocation29 + $0x180] sm:$0xff] }
 0x845   : > { %7088 = vmatprep.subr.bf16.mxu1 %v7087_v59  ;;  %v3956_v59 = vld [vmem:[#allocation29 + $0x1c0] sm:$0xff] }
 0x848   : > { %7090 = vmatpush1.bf16.msra.mxu1 %v7089_v2  ;;  %v3965_v2 = vld [vmem:[#allocation29 + $0x208] sm:$0xff] }
 0x849   : > { %7220 = vmatprep.subr.bf16.mxu1 %v7219_v5  ;;  %v3973_v5 = vld [vmem:[#allocation29 + $0x248] sm:$0xff] }
 0x89e   : > { %v2797_v52 = vpop.f32.mrb[8].mxu1 }
 0x89f   : > { %v2814_v14 = vadd.f32 %v2807_v7, %v2797_v52  ;;  %v2799_v16 = vpop.f32.mrb[9].mxu1  ;;  %v3975_v7 = vld [vmem:[#allocation29 + $0x258] sm:$0xff]  ;;  %v7233_v52 = vpack.c.bf16 %v3958_v0, %v3950_v62  ;;  %v4037_v62 = vld [vmem:[#allocation29 + $0x448] sm:$0xff] }
 0x8a0   : > { %v2815_v23 = vadd.f32 %v2811_v8, %v2799_v16  ;;  %v7105_v8 = vpack.c.bf16 %v3956_v59, %v3948_v58  ;;  %v7107_v16 = vpack.c.bf16 %v3973_v5, %v3965_v2  ;;  %v7235_v17 = vpack.c.bf16 %v3975_v7, %v3967_v6  ;;  %v4014_v59 = vld [vmem:[#allocation29 + $0x390] sm:$0xff]  ;;  %v4031_v0 = vld [vmem:[#allocation29 + $0x418] sm:$0xff]  ;;  %v4028_v7 = vld [vmem:[#allocation29 + $0x400] sm:$0xff] }
 0x8a1   : > { %v2816_v20 = vmax.f32 %v2814_v14, 0.0  ;;  %v3972_v14 = vld [vmem:[#allocation29 + $0x240] sm:$0xff]  ;;  %v7247_v58 = vpack.c.bf16 %v4023_v48, %v4015_v22  ;;  %v4039_v2 = vld [vmem:[#allocation29 + $0x458] sm:$0xff] }
 0x8a2   : > { %v2817_v29 = vmax.f32 %v2815_v23, 0.0  ;;  %v3981_v23 = vld [vmem:[#allocation29 + $0x288] sm:$0xff]  ;;  %v7109_v28 = vpack.c.bf16 %v3972_v14, %v3964_v12  ;;  %v7251_v12 = vpack.c.bf16 %v4039_v2, %v4031_v0  ;;  %v4030_v14 = vld [vmem:[#allocation29 + $0x410] sm:$0xff]  ;;  %v4076_v48 = vld [vmem:[#allocation29 + $0x580] sm:$0xff] }
 0x8a3   : > { %v7111_v33 = vpack.c.bf16 %v3989_v24, %v3981_v23  ;;  %v4055_v23 = vld [vmem:[#allocation29 + $0x4d8] sm:$0xff]  ;;  %v4092_v2 = vld [vmem:[#allocation29 + $0x600] sm:$0xff] }
 0x8a4   : > { %3280 = vmatprep.mubr.f32.mxu0 %v2817_v29  ;;  %3351 = vmatprep.mubr.f32.mxu1 %v2817_v29  ;;  %v7237_v29 = vpack.c.bf16 %v3974_v19, %v3966_v4  ;;  %v4053_v4 = vld [vmem:[#allocation29 + $0x4c8] sm:$0xff]  ;;  %v4047_v19 = vld [vmem:[#allocation29 + $0x498] sm:$0xff] }
 0x8a5   : > { %3281 = vmatmul.mubr.f32.vlgmr.msra.gmra.mrb[4].mxu0 %v2816_v20  ;;  %3352 = vmatmul.mubr.f32.vlgmr.msra.gmra.mrb[10].mxu1 %v2816_v20  ;;  %v3982_v20 = vld [vmem:[#allocation29 + $0x290] sm:$0xff] }
 0x8a6   : > { %7094 = vmatpush1.bf16.msra.mxu0 %v7093_v31  ;;  %7222 = vmatpush1.bf16.msra.mxu1 %v7221_v32  ;;  %v3980_v31 = vld [vmem:[#allocation29 + $0x280] sm:$0xff]  ;;  %v7241_v40 = vpack.c.bf16 %v3990_v35, %v3982_v20  ;;  %v4069_v20 = vld [vmem:[#allocation29 + $0x548] sm:$0xff]  ;;  %v4063_v35 = vld [vmem:[#allocation29 + $0x518] sm:$0xff] }
 0x8a7   : > { %4476 = vmatprep.mubr.f32.mxu0 %v9808_v11  ;;  %4618 = vmatprep.mubr.f32.mxu1 %v9808_v11  ;;  %v3988_v32 = vld [vmem:[#allocation29 + $0x2c0] sm:$0xff] }
 0x8a8   : > { %7096 = vmatprep.subr.bf16.mxu0 %v7095_v38  ;;  %7224 = vmatprep.subr.bf16.mxu1 %v7223_v39  ;;  %v3999_v38 = vld [vmem:[#allocation29 + $0x318] sm:$0xff]  ;;  %v7113_v63 = vpack.c.bf16 %v3988_v32, %v3980_v31  ;;  %v7255_v31 = vpack.c.bf16 %v4055_v23, %v4047_v19  ;;  %v4046_v32 = vld [vmem:[#allocation29 + $0x490] sm:$0xff]  ;;  %v4108_v23 = vld [vmem:[#allocation29 + $0x680] sm:$0xff] }
 0x8a9   : > { %v4007_v39 = vld [vmem:[#allocation29 + $0x358] sm:$0xff] }
 0x8aa   : > { %7098 = vmatpush1.bf16.msra.mxu0 %v7097_v54  ;;  %7226 = vmatpush1.bf16.msra.mxu1 %v7225_v57  ;;  %v4004_v54 = vld [vmem:[#allocation29 + $0x340] sm:$0xff]  ;;  %v7115_v57 = vpack.c.bf16 %v4005_v37, %v3997_v36  ;;  %v7243_v43 = vpack.c.bf16 %v4007_v39, %v3999_v38  ;;  %v4071_v36 = vld [vmem:[#allocation29 + $0x558] sm:$0xff] }
 0x8ab   : > { %7100 = vmatprep.subr.bf16.mxu0 %v7099_v44  ;;  %7228 = vmatprep.subr.bf16.mxu1 %v7227_v45  ;;  %v4006_v44 = vld [vmem:[#allocation29 + $0x350] sm:$0xff]  ;;  %v4013_v45 = vld [vmem:[#allocation29 + $0x388] sm:$0xff]  ;;  %v7117_v49 = vpack.c.bf16 %v4004_v54, %v3996_v42  ;;  %v4060_v39 = vld [vmem:[#allocation29 + $0x500] sm:$0xff]  ;;  %v7259_v42 = vpack.c.bf16 %v4071_v36, %v4063_v35 }
 0x8ac   : > { %v7245_v50 = vpack.c.bf16 %v4006_v44, %v3998_v47  ;;  %v4062_v54 = vld [vmem:[#allocation29 + $0x510] sm:$0xff]  ;;  %v4085_v47 = vld [vmem:[#allocation29 + $0x5c8] sm:$0xff]  ;;  %v4079_v44 = vld [vmem:[#allocation29 + $0x598] sm:$0xff] }
 0x8ad   : > { %v4124_v36 = vld [vmem:[#allocation29 + $0x700] sm:$0xff] }
 0x8ae   : > { %7102 = vmatpush1.bf16.msra.mxu0 %v7101_v53  ;;  %7230 = vmatpush1.bf16.msra.mxu1 %v7229_v56  ;;  %v4020_v53 = vld [vmem:[#allocation29 + $0x3c0] sm:$0xff]  ;;  %v7119_v56 = vpack.c.bf16 %v4021_v46, %v4013_v45  ;;  %v4087_v45 = vld [vmem:[#allocation29 + $0x5d8] sm:$0xff] }
 0x8af   : > { %7104 = vmatprep.subr.bf16.mxu0 %v7103_v60  ;;  %7232 = vmatprep.subr.bf16.mxu1 %v7231_v61  ;;  %v4022_v60 = vld [vmem:[#allocation29 + $0x3d0] sm:$0xff]  ;;  %v4029_v61 = vld [vmem:[#allocation29 + $0x408] sm:$0xff]  ;;  %v7121_v5 = vpack.c.bf16 %v4020_v53, %v4012_v51  ;;  %v7263_v51 = vpack.c.bf16 %v4087_v45, %v4079_v44  ;;  %v4140_v45 = vld [vmem:[#allocation29 + $0x780] sm:$0xff] }
 0x8b0   : > { %v7249_v6 = vpack.c.bf16 %v4022_v60, %v4014_v59  ;;  %v4078_v53 = vld [vmem:[#allocation29 + $0x590] sm:$0xff]  ;;  %v4101_v59 = vld [vmem:[#allocation29 + $0x648] sm:$0xff]  ;;  %v4095_v60 = vld [vmem:[#allocation29 + $0x618] sm:$0xff] }
 0x8b2   : > { %7106 = vmatpush1.bf16.msra.mxu0 %v7105_v8  ;;  %7234 = vmatpush1.bf16.msra.mxu1 %v7233_v52  ;;  %v4036_v8 = vld [vmem:[#allocation29 + $0x440] sm:$0xff]  ;;  %v7123_v52 = vpack.c.bf16 %v4037_v62, %v4029_v61  ;;  %v4103_v61 = vld [vmem:[#allocation29 + $0x658] sm:$0xff] }
 0x8b3   : > { %7108 = vmatprep.subr.bf16.mxu0 %v7107_v16  ;;  %7236 = vmatprep.subr.bf16.mxu1 %v7235_v17  ;;  %v4038_v16 = vld [vmem:[#allocation29 + $0x450] sm:$0xff]  ;;  %v4045_v17 = vld [vmem:[#allocation29 + $0x488] sm:$0xff]  ;;  %v7125_v24 = vpack.c.bf16 %v4036_v8, %v4028_v7  ;;  %v7267_v7 = vpack.c.bf16 %v4103_v61, %v4095_v60 }
 0x8b4   : > { %v7253_v26 = vpack.c.bf16 %v4038_v16, %v4030_v14  ;;  %v4094_v8 = vld [vmem:[#allocation29 + $0x610] sm:$0xff]  ;;  %v4117_v14 = vld [vmem:[#allocation29 + $0x6c8] sm:$0xff]  ;;  %v4111_v16 = vld [vmem:[#allocation29 + $0x698] sm:$0xff] }
 0x8b6   : > { %7110 = vmatpush1.bf16.msra.mxu0 %v7109_v28  ;;  %7238 = vmatpush1.bf16.msra.mxu1 %v7237_v29  ;;  %v4052_v28 = vld [vmem:[#allocation29 + $0x4c0] sm:$0xff]  ;;  %v7127_v29 = vpack.c.bf16 %v4053_v4, %v4045_v17  ;;  %v4119_v17 = vld [vmem:[#allocation29 + $0x6d8] sm:$0xff] }
 0x8b7   : > { %7112 = vmatprep.subr.bf16.mxu0 %v7111_v33  ;;  %7240 = vmatprep.subr.bf16.mxu1 %v7239_v34  ;;  %v4054_v33 = vld [vmem:[#allocation29 + $0x4d0] sm:$0xff]  ;;  %v4061_v34 = vld [vmem:[#allocation29 + $0x508] sm:$0xff]  ;;  %v7129_v37 = vpack.c.bf16 %v4052_v28, %v4044_v27  ;;  %v7271_v27 = vpack.c.bf16 %v4119_v17, %v4111_v16  ;;  %v4172_v17 = vld [vmem:[#allocation29 + $0x880] sm:$0xff] }
 0x8b8   : > { %v7257_v38 = vpack.c.bf16 %v4054_v33, %v4046_v32  ;;  %v4110_v28 = vld [vmem:[#allocation29 + $0x690] sm:$0xff]  ;;  %v4133_v32 = vld [vmem:[#allocation29 + $0x748] sm:$0xff]  ;;  %v4127_v33 = vld [vmem:[#allocation29 + $0x718] sm:$0xff] }
 0x8ba   : > { %7114 = vmatpush1.bf16.msra.mxu0 %v7113_v63  ;;  %7242 = vmatpush1.bf16.msra.mxu1 %v7241_v40  ;;  %v4068_v63 = vld [vmem:[#allocation29 + $0x540] sm:$0xff]  ;;  %v7131_v40 = vpack.c.bf16 %v4069_v20, %v4061_v34  ;;  %v4135_v34 = vld [vmem:[#allocation29 + $0x758] sm:$0xff] }
 0x8bb   : > { %7116 = vmatprep.subr.bf16.mxu0 %v7115_v57  ;;  %7244 = vmatprep.subr.bf16.mxu1 %v7243_v43  ;;  %v4070_v57 = vld [vmem:[#allocation29 + $0x550] sm:$0xff]  ;;  %v4077_v43 = vld [vmem:[#allocation29 + $0x588] sm:$0xff]  ;;  %v7133_v46 = vpack.c.bf16 %v4068_v63, %v4060_v39  ;;  %v7275_v39 = vpack.c.bf16 %v4135_v34, %v4127_v33 }
 0x8bc   : > { %v7261_v22 = vpack.c.bf16 %v4070_v57, %v4062_v54  ;;  %v4126_v63 = vld [vmem:[#allocation29 + $0x710] sm:$0xff]  ;;  %v4149_v54 = vld [vmem:[#allocation29 + $0x7c8] sm:$0xff]  ;;  %v4143_v57 = vld [vmem:[#allocation29 + $0x798] sm:$0xff] }
 0x8be   : > { %7118 = vmatpush1.bf16.msra.mxu0 %v7117_v49  ;;  %7246 = vmatpush1.bf16.msra.mxu1 %v7245_v50  ;;  %v4084_v49 = vld [vmem:[#allocation29 + $0x5c0] sm:$0xff]  ;;  %v7135_v50 = vpack.c.bf16 %v4085_v47, %v4077_v43  ;;  %v4151_v43 = vld [vmem:[#allocation29 + $0x7d8] sm:$0xff] }
 0x8bf   : > { %7120 = vmatprep.subr.bf16.mxu0 %v7119_v56  ;;  %7248 = vmatprep.subr.bf16.mxu1 %v7247_v58  ;;  %v4086_v56 = vld [vmem:[#allocation29 + $0x5d0] sm:$0xff]  ;;  %v4093_v58 = vld [vmem:[#allocation29 + $0x608] sm:$0xff]  ;;  %v7137_v62 = vpack.c.bf16 %v4084_v49, %v4076_v48  ;;  %v7279_v48 = vpack.c.bf16 %v4151_v43, %v4143_v57 }
 0x8c0   : > { %v7265_v0 = vpack.c.bf16 %v4086_v56, %v4078_v53  ;;  %v4142_v49 = vld [vmem:[#allocation29 + $0x790] sm:$0xff]  ;;  %v4165_v53 = vld [vmem:[#allocation29 + $0x848] sm:$0xff]  ;;  %v4159_v56 = vld [vmem:[#allocation29 + $0x818] sm:$0xff] }
 0x8c2   : > { %7122 = vmatpush1.bf16.msra.mxu0 %v7121_v5  ;;  %7250 = vmatpush1.bf16.msra.mxu1 %v7249_v6  ;;  %v4100_v5 = vld [vmem:[#allocation29 + $0x640] sm:$0xff]  ;;  %v7139_v6 = vpack.c.bf16 %v4101_v59, %v4093_v58  ;;  %v4167_v58 = vld [vmem:[#allocation29 + $0x858] sm:$0xff] }
 0x8c3   : > { %7124 = vmatprep.subr.bf16.mxu0 %v7123_v52  ;;  %7252 = vmatprep.subr.bf16.mxu1 %v7251_v12  ;;  %v4102_v52 = vld [vmem:[#allocation29 + $0x650] sm:$0xff]  ;;  %v4109_v12 = vld [vmem:[#allocation29 + $0x688] sm:$0xff]  ;;  %v7141_v4 = vpack.c.bf16 %v4100_v5, %v4092_v2  ;;  %v4164_v2 = vld [vmem:[#allocation29 + $0x840] sm:$0xff] }
 0x8c4   : > { %v7269_v19 = vpack.c.bf16 %v4102_v52, %v4094_v8  ;;  %v4158_v5 = vld [vmem:[#allocation29 + $0x810] sm:$0xff]  ;;  %v4181_v8 = vld [vmem:[#allocation29 + $0x8c8] sm:$0xff]  ;;  %v4175_v52 = vld [vmem:[#allocation29 + $0x898] sm:$0xff] }
 0x8c6   : > { %7126 = vmatpush1.bf16.msra.mxu0 %v7125_v24  ;;  %7254 = vmatpush1.bf16.msra.mxu1 %v7253_v26  ;;  %v4116_v24 = vld [vmem:[#allocation29 + $0x6c0] sm:$0xff]  ;;  %v7143_v26 = vpack.c.bf16 %v4117_v14, %v4109_v12  ;;  %v4183_v12 = vld [vmem:[#allocation29 + $0x8d8] sm:$0xff] }
 0x8c7   : > { %7128 = vmatprep.subr.bf16.mxu0 %v7127_v29  ;;  %7256 = vmatprep.subr.bf16.mxu1 %v7255_v31  ;;  %v4118_v29 = vld [vmem:[#allocation29 + $0x6d0] sm:$0xff]  ;;  %v4125_v31 = vld [vmem:[#allocation29 + $0x708] sm:$0xff]  ;;  %v7145_v20 = vpack.c.bf16 %v4116_v24, %v4108_v23  ;;  %v7287_v24 = vpack.c.bf16 %v4183_v12, %v4175_v52 }
 0x8c8   : > { %v7273_v35 = vpack.c.bf16 %v4118_v29, %v4110_v28  ;;  %v4197_v28 = vld [vmem:[#allocation29 + $0x948] sm:$0xff]  ;;  %v4191_v29 = vld [vmem:[#allocation29 + $0x918] sm:$0xff] }
 0x8ca   : > { %7130 = vmatpush1.bf16.msra.mxu0 %v7129_v37  ;;  %7258 = vmatpush1.bf16.msra.mxu1 %v7257_v38  ;;  %v4132_v37 = vld [vmem:[#allocation29 + $0x740] sm:$0xff]  ;;  %v7147_v38 = vpack.c.bf16 %v4133_v32, %v4125_v31  ;;  %v4199_v31 = vld [vmem:[#allocation29 + $0x958] sm:$0xff] }
 0x8cb   : > { %7132 = vmatprep.subr.bf16.mxu0 %v7131_v40  ;;  %7260 = vmatprep.subr.bf16.mxu1 %v7259_v42  ;;  %v4134_v40 = vld [vmem:[#allocation29 + $0x750] sm:$0xff]  ;;  %v4141_v42 = vld [vmem:[#allocation29 + $0x788] sm:$0xff]  ;;  %v7149_v47 = vpack.c.bf16 %v4132_v37, %v4124_v36  ;;  %v7291_v37 = vpack.c.bf16 %v4199_v31, %v4191_v29 }
 0x8cc   : > { %v7277_v44 = vpack.c.bf16 %v4134_v40, %v4126_v63  ;;  %v4190_v36 = vld [vmem:[#allocation29 + $0x910] sm:$0xff]  ;;  %v4213_v63 = vld [vmem:[#allocation29 + $0x9c8] sm:$0xff]  ;;  %v4207_v40 = vld [vmem:[#allocation29 + $0x998] sm:$0xff] }
 0x8ce   : > { %7134 = vmatpush1.bf16.msra.mxu0 %v7133_v46  ;;  %7262 = vmatpush1.bf16.msra.mxu1 %v7261_v22  ;;  %v4148_v46 = vld [vmem:[#allocation29 + $0x7c0] sm:$0xff]  ;;  %v7151_v22 = vpack.c.bf16 %v4149_v54, %v4141_v42  ;;  %v4215_v42 = vld [vmem:[#allocation29 + $0x9d8] sm:$0xff] }
 0x8cf   : > { %7136 = vmatprep.subr.bf16.mxu0 %v7135_v50  ;;  %7264 = vmatprep.subr.bf16.mxu1 %v7263_v51  ;;  %v4150_v50 = vld [vmem:[#allocation29 + $0x7d0] sm:$0xff]  ;;  %v4157_v51 = vld [vmem:[#allocation29 + $0x808] sm:$0xff]  ;;  %v7153_v59 = vpack.c.bf16 %v4148_v46, %v4140_v45  ;;  %v7295_v46 = vpack.c.bf16 %v4215_v42, %v4207_v40 }
 0x8d0   : > { %v7281_v60 = vpack.c.bf16 %v4150_v50, %v4142_v49  ;;  %v7155_v61 = vpack.c.bf16 %v4165_v53, %v4157_v51  ;;  %v4206_v45 = vld [vmem:[#allocation29 + $0x990] sm:$0xff]  ;;  %v4229_v49 = vld [vmem:[#allocation29 + $0xa48] sm:$0xff]  ;;  %v4223_v50 = vld [vmem:[#allocation29 + $0xa18] sm:$0xff] }
 0x8d1   : > { %v4231_v51 = vld [vmem:[#allocation29 + $0xa58] sm:$0xff] }
 0x8d2   : > { %7138 = vmatpush1.bf16.msra.mxu0 %v7137_v62  ;;  %7266 = vmatpush1.bf16.msra.mxu1 %v7265_v0  ;;  %v7283_v62 = vpack.c.bf16 %v4167_v58, %v4159_v56  ;;  %v4156_v0 = vld [vmem:[#allocation29 + $0x800] sm:$0xff] }
 0x8d3   : > { %7140 = vmatprep.subr.bf16.mxu0 %v7139_v6  ;;  %7268 = vmatprep.subr.bf16.mxu1 %v7267_v7  ;;  %v4166_v6 = vld [vmem:[#allocation29 + $0x850] sm:$0xff]  ;;  %v4173_v7 = vld [vmem:[#allocation29 + $0x888] sm:$0xff]  ;;  %v7157_v14 = vpack.c.bf16 %v4164_v2, %v4156_v0 }
 0x8d4   : > { %v7285_v16 = vpack.c.bf16 %v4166_v6, %v4158_v5  ;;  %v7159_v23 = vpack.c.bf16 %v4181_v8, %v4173_v7  ;;  %v4230_v0 = vld [vmem:[#allocation29 + $0xa50] sm:$0xff]  ;;  %v4237_v2 = vld [vmem:[#allocation29 + $0xa88] sm:$0xff]  ;;  %v4239_v6 = vld [vmem:[#allocation29 + $0xa98] sm:$0xff] }
 0x8d5   : > { %v4245_v5 = vld [vmem:[#allocation29 + $0xac8] sm:$0xff]  ;;  %v4247_v7 = vld [vmem:[#allocation29 + $0xad8] sm:$0xff] }
 0x8d6   : > { %7142 = vmatpush1.bf16.msra.mxu0 %v7141_v4  ;;  %7270 = vmatpush1.bf16.msra.mxu1 %v7269_v19  ;;  %v4180_v4 = vld [vmem:[#allocation29 + $0x8c0] sm:$0xff]  ;;  %v4174_v19 = vld [vmem:[#allocation29 + $0x890] sm:$0xff]  ;;  %v7175_v12 = vpack.c.bf16 %v4245_v5, %v4237_v2  ;;  %v4311_v2 = vld [vmem:[#allocation29 + $0xcd8] sm:$0xff] }
 0x8d7   : > { %7144 = vmatprep.subr.bf16.mxu0 %v7143_v26  ;;  %7272 = vmatprep.subr.bf16.mxu1 %v7271_v27  ;;  %v4182_v26 = vld [vmem:[#allocation29 + $0x8d0] sm:$0xff]  ;;  %v4189_v27 = vld [vmem:[#allocation29 + $0x908] sm:$0xff]  ;;  %v7161_v32 = vpack.c.bf16 %v4180_v4, %v4172_v17  ;;  %v7303_v4 = vpack.c.bf16 %v4247_v7, %v4239_v6 }
 0x8d8   : > { %v7289_v33 = vpack.c.bf16 %v4182_v26, %v4174_v19  ;;  %v7163_v34 = vpack.c.bf16 %v4197_v28, %v4189_v27  ;;  %v4238_v17 = vld [vmem:[#allocation29 + $0xa90] sm:$0xff]  ;;  %v4255_v26 = vld [vmem:[#allocation29 + $0xb18] sm:$0xff] }
 0x8d9   : > { %v4246_v19 = vld [vmem:[#allocation29 + $0xad0] sm:$0xff]  ;;  %v4263_v27 = vld [vmem:[#allocation29 + $0xb58] sm:$0xff] }
 0x8da   : > { %7146 = vmatpush1.bf16.msra.mxu0 %v7145_v20  ;;  %7274 = vmatpush1.bf16.msra.mxu1 %v7273_v35  ;;  %v4188_v20 = vld [vmem:[#allocation29 + $0x900] sm:$0xff]  ;;  %v7305_v29 = vpack.c.bf16 %v4246_v19, %v4238_v17  ;;  %v4317_v17 = vld [vmem:[#allocation29 + $0xd08] sm:$0xff]  ;;  %v4319_v19 = vld [vmem:[#allocation29 + $0xd18] sm:$0xff] }
 0x8db   : > { %7148 = vmatprep.subr.bf16.mxu0 %v7147_v38  ;;  %7276 = vmatprep.subr.bf16.mxu1 %v7275_v39  ;;  %v4196_v35 = vld [vmem:[#allocation29 + $0x940] sm:$0xff]  ;;  %v4198_v38 = vld [vmem:[#allocation29 + $0x950] sm:$0xff]  ;;  %v4205_v39 = vld [vmem:[#allocation29 + $0x988] sm:$0xff] }
 0x8dc   : > { %v7165_v54 = vpack.c.bf16 %v4196_v35, %v4188_v20  ;;  %v7293_v57 = vpack.c.bf16 %v4198_v38, %v4190_v36  ;;  %v7167_v43 = vpack.c.bf16 %v4213_v63, %v4205_v39  ;;  %v7307_v20 = vpack.c.bf16 %v4263_v27, %v4255_v26  ;;  %v4262_v35 = vld [vmem:[#allocation29 + $0xb50] sm:$0xff]  ;;  %v4269_v36 = vld [vmem:[#allocation29 + $0xb88] sm:$0xff]  ;;  %v4271_v38 = vld [vmem:[#allocation29 + $0xb98] sm:$0xff] }
 0x8dd   : > { %v4279_v39 = vld [vmem:[#allocation29 + $0xbd8] sm:$0xff] }
 0x8de   : > { %7150 = vmatpush1.bf16.msra.mxu0 %v7149_v47  ;;  %7278 = vmatpush1.bf16.msra.mxu1 %v7277_v44  ;;  %v4204_v47 = vld [vmem:[#allocation29 + $0x980] sm:$0xff] }
 0x8df   : > { %7152 = vmatprep.subr.bf16.mxu0 %v7151_v22  ;;  %7280 = vmatprep.subr.bf16.mxu1 %v7279_v48  ;;  %v4212_v44 = vld [vmem:[#allocation29 + $0x9c0] sm:$0xff]  ;;  %v4214_v22 = vld [vmem:[#allocation29 + $0x9d0] sm:$0xff]  ;;  %v4221_v48 = vld [vmem:[#allocation29 + $0xa08] sm:$0xff] }
 0x8e0   : > { %v7169_v53 = vpack.c.bf16 %v4212_v44, %v4204_v47  ;;  %v7297_v56 = vpack.c.bf16 %v4214_v22, %v4206_v45  ;;  %v7171_v58 = vpack.c.bf16 %v4229_v49, %v4221_v48  ;;  %v7311_v47 = vpack.c.bf16 %v4279_v39, %v4271_v38  ;;  %v4278_v44 = vld [vmem:[#allocation29 + $0xbd0] sm:$0xff]  ;;  %v4285_v45 = vld [vmem:[#allocation29 + $0xc08] sm:$0xff]  ;;  %v4287_v22 = vld [vmem:[#allocation29 + $0xc18] sm:$0xff] }
 0x8e1   : > { %v4295_v48 = vld [vmem:[#allocation29 + $0xc58] sm:$0xff] }
 0x8e2   : > { %7154 = vmatpush1.bf16.msra.mxu0 %v7153_v59  ;;  %7282 = vmatpush1.bf16.msra.mxu1 %v7281_v60  ;;  %v4220_v59 = vld [vmem:[#allocation29 + $0xa00] sm:$0xff] }
 0x8e3   : > { %7156 = vmatprep.subr.bf16.mxu0 %v7155_v61  ;;  %7284 = vmatprep.subr.bf16.mxu1 %v7283_v62  ;;  %v4228_v60 = vld [vmem:[#allocation29 + $0xa40] sm:$0xff]  ;;  %v4222_v61 = vld [vmem:[#allocation29 + $0xa10] sm:$0xff]  ;;  %v7299_v62 = vpack.c.bf16 %v4231_v51, %v4223_v50 }
 0x8e4   : > { %v7173_v8 = vpack.c.bf16 %v4228_v60, %v4220_v59  ;;  %v7301_v52 = vpack.c.bf16 %v4230_v0, %v4222_v61  ;;  %v7315_v59 = vpack.c.bf16 %v4295_v48, %v4287_v22  ;;  %v4294_v60 = vld [vmem:[#allocation29 + $0xc50] sm:$0xff]  ;;  %v4301_v61 = vld [vmem:[#allocation29 + $0xc88] sm:$0xff]  ;;  %v4303_v0 = vld [vmem:[#allocation29 + $0xc98] sm:$0xff] }
 0x8e5   : > { %4477 = vmatmul.mubr.f32.vlgmr.msra.gmra.mrb[6].mxu0 %v9810_v13  ;;  %4619 = vmatmul.mubr.f32.vlgmr.msra.gmra.mrb[12].mxu1 %v9810_v13 }
 0x8e6   : > { %7158 = vmatpush1.bf16.msra.mxu0 %v7157_v14  ;;  %4547 = vmatprep.mubr.f32.mxu0 %v9812_v18  ;;  %v4236_v14 = vld [vmem:[#allocation29 + $0xa80] sm:$0xff] }
 0x8e7   : > { %7286 = vmatpush1.bf16.msra.mxu1 %v7285_v16  ;;  %4689 = vmatprep.mubr.f32.mxu1 %v9812_v18  ;;  %v4244_v16 = vld [vmem:[#allocation29 + $0xac0] sm:$0xff] }
 0x8e8   : > { %7160 = vmatprep.subr.bf16.mxu0 %v7159_v23  ;;  %7288 = vmatprep.subr.bf16.mxu1 %v7287_v24  ;;  %v4253_v23 = vld [vmem:[#allocation29 + $0xb08] sm:$0xff]  ;;  %v7177_v28 = vpack.c.bf16 %v4244_v16, %v4236_v14  ;;  %v7319_v14 = vpack.c.bf16 %v4311_v2, %v4303_v0  ;;  %v4310_v16 = vld [vmem:[#allocation29 + $0xcd0] sm:$0xff] }
 0x8e9   : > { %v4261_v24 = vld [vmem:[#allocation29 + $0xb48] sm:$0xff] }
 0x8ea   : > { %7162 = vmatpush1.bf16.msra.mxu0 %v7161_v32  ;;  %v7179_v31 = vpack.c.bf16 %v4261_v24, %v4253_v23  ;;  %v4252_v32 = vld [vmem:[#allocation29 + $0xb00] sm:$0xff]  ;;  %v4327_v23 = vld [vmem:[#allocation29 + $0xd58] sm:$0xff] }
 0x8eb   : > { %7290 = vmatpush1.bf16.msra.mxu1 %v7289_v33  ;;  %7164 = vmatprep.subr.bf16.mxu0 %v7163_v34  ;;  %v4260_v33 = vld [vmem:[#allocation29 + $0xb40] sm:$0xff]  ;;  %v4254_v34 = vld [vmem:[#allocation29 + $0xb10] sm:$0xff] }
 0x8ec   : > { %7292 = vmatprep.subr.bf16.mxu1 %v7291_v37  ;;  %v4277_v37 = vld [vmem:[#allocation29 + $0xbc8] sm:$0xff]  ;;  %v7181_v63 = vpack.c.bf16 %v4260_v33, %v4252_v32  ;;  %v7309_v40 = vpack.c.bf16 %v4262_v35, %v4254_v34  ;;  %v7323_v32 = vpack.c.bf16 %v4327_v23, %v4319_v19  ;;  %v4326_v33 = vld [vmem:[#allocation29 + $0xd50] sm:$0xff]  ;;  %v4335_v35 = vld [vmem:[#allocation29 + $0xd98] sm:$0xff] }
 0x8ed   : > { %v7183_v42 = vpack.c.bf16 %v4277_v37, %v4269_v36  ;;  %v4333_v34 = vld [vmem:[#allocation29 + $0xd88] sm:$0xff]  ;;  %v4343_v36 = vld [vmem:[#allocation29 + $0xdd8] sm:$0xff] }
 0x8ee   : > { %7166 = vmatpush1.bf16.msra.mxu0 %v7165_v54  ;;  %v4268_v54 = vld [vmem:[#allocation29 + $0xb80] sm:$0xff] }
 0x8ef   : > { %7294 = vmatpush1.bf16.msra.mxu1 %v7293_v57  ;;  %7168 = vmatprep.subr.bf16.mxu0 %v7167_v43  ;;  %v4276_v57 = vld [vmem:[#allocation29 + $0xbc0] sm:$0xff]  ;;  %v4270_v43 = vld [vmem:[#allocation29 + $0xb90] sm:$0xff] }
 0x8f0   : > { %7296 = vmatprep.subr.bf16.mxu1 %v7295_v46  ;;  %v4293_v46 = vld [vmem:[#allocation29 + $0xc48] sm:$0xff]  ;;  %v7185_v49 = vpack.c.bf16 %v4276_v57, %v4268_v54  ;;  %v7313_v50 = vpack.c.bf16 %v4278_v44, %v4270_v43  ;;  %v7327_v54 = vpack.c.bf16 %v4343_v36, %v4335_v35  ;;  %v4342_v57 = vld [vmem:[#allocation29 + $0xdd0] sm:$0xff]  ;;  %v4351_v44 = vld [vmem:[#allocation29 + $0xe18] sm:$0xff] }
 0x8f1   : > { %v7187_v51 = vpack.c.bf16 %v4293_v46, %v4285_v45  ;;  %v4349_v43 = vld [vmem:[#allocation29 + $0xe08] sm:$0xff]  ;;  %v4359_v45 = vld [vmem:[#allocation29 + $0xe58] sm:$0xff] }
 0x8f2   : > { %7170 = vmatpush1.bf16.msra.mxu0 %v7169_v53  ;;  %v4284_v53 = vld [vmem:[#allocation29 + $0xc00] sm:$0xff] }
 0x8f3   : > { %7298 = vmatpush1.bf16.msra.mxu1 %v7297_v56  ;;  %7172 = vmatprep.subr.bf16.mxu0 %v7171_v58  ;;  %v4292_v56 = vld [vmem:[#allocation29 + $0xc40] sm:$0xff]  ;;  %v4286_v58 = vld [vmem:[#allocation29 + $0xc10] sm:$0xff] }
 0x8f4   : > { %7300 = vmatprep.subr.bf16.mxu1 %v7299_v62  ;;  %v4309_v62 = vld [vmem:[#allocation29 + $0xcc8] sm:$0xff]  ;;  %v7189_v5 = vpack.c.bf16 %v4292_v56, %v4284_v53  ;;  %v7317_v6 = vpack.c.bf16 %v4294_v60, %v4286_v58  ;;  %v7331_v53 = vpack.c.bf16 %v4359_v45, %v4351_v44  ;;  %v4358_v56 = vld [vmem:[#allocation29 + $0xe50] sm:$0xff]  ;;  %v4367_v60 = vld [vmem:[#allocation29 + $0xe98] sm:$0xff] }
 0x8f5   : > { %v7191_v7 = vpack.c.bf16 %v4309_v62, %v4301_v61  ;;  %v4365_v58 = vld [vmem:[#allocation29 + $0xe88] sm:$0xff]  ;;  %v4375_v61 = vld [vmem:[#allocation29 + $0xed8] sm:$0xff] }
 0x8f6   : > { %7174 = vmatpush1.bf16.msra.mxu0 %v7173_v8  ;;  %v4300_v8 = vld [vmem:[#allocation29 + $0xc80] sm:$0xff] }
 0x8f7   : > { %7302 = vmatpush1.bf16.msra.mxu1 %v7301_v52  ;;  %7176 = vmatprep.subr.bf16.mxu0 %v7175_v12  ;;  %v4308_v52 = vld [vmem:[#allocation29 + $0xcc0] sm:$0xff]  ;;  %v4302_v12 = vld [vmem:[#allocation29 + $0xc90] sm:$0xff] }
 0x8f8   : > { %7304 = vmatprep.subr.bf16.mxu1 %v7303_v4  ;;  %v4325_v4 = vld [vmem:[#allocation29 + $0xd48] sm:$0xff]  ;;  %v7193_v24 = vpack.c.bf16 %v4308_v52, %v4300_v8  ;;  %v7321_v26 = vpack.c.bf16 %v4310_v16, %v4302_v12  ;;  %v7335_v8 = vpack.c.bf16 %v4375_v61, %v4367_v60  ;;  %v4374_v52 = vld [vmem:[#allocation29 + $0xed0] sm:$0xff]  ;;  %v4383_v16 = vld [vmem:[#allocation29 + $0xf18] sm:$0xff] }
 0x8f9   : > { %v7195_v27 = vpack.c.bf16 %v4325_v4, %v4317_v17  ;;  %v4381_v12 = vld [vmem:[#allocation29 + $0xf08] sm:$0xff]  ;;  %v4391_v17 = vld [vmem:[#allocation29 + $0xf58] sm:$0xff]  ;;  %v3920_v61 = vld [vmem:[#allocation29 + $0xa0] sm:$0xff] }
 0x8fa   : > { %7178 = vmatpush1.bf16.msra.mxu0 %v7177_v28  ;;  %v4316_v28 = vld [vmem:[#allocation29 + $0xd00] sm:$0xff] }
 0x8fb   : > { %7306 = vmatpush1.bf16.msra.mxu1 %v7305_v29  ;;  %7180 = vmatprep.subr.bf16.mxu0 %v7179_v31  ;;  %v4324_v29 = vld [vmem:[#allocation29 + $0xd40] sm:$0xff]  ;;  %v4318_v31 = vld [vmem:[#allocation29 + $0xd10] sm:$0xff] }
 0x8fc   : > { %7308 = vmatprep.subr.bf16.mxu1 %v7307_v20  ;;  %v4341_v20 = vld [vmem:[#allocation29 + $0xdc8] sm:$0xff]  ;;  %v7197_v37 = vpack.c.bf16 %v4324_v29, %v4316_v28  ;;  %v7325_v38 = vpack.c.bf16 %v4326_v33, %v4318_v31  ;;  %v7339_v28 = vpack.c.bf16 %v4391_v17, %v4383_v16  ;;  %v4390_v29 = vld [vmem:[#allocation29 + $0xf50] sm:$0xff]  ;;  %v4399_v33 = vld [vmem:[#allocation29 + $0xf98] sm:$0xff] }
 0x8fd   : > { %v7199_v39 = vpack.c.bf16 %v4341_v20, %v4333_v34  ;;  %v4397_v31 = vld [vmem:[#allocation29 + $0xf88] sm:$0xff]  ;;  %v4407_v34 = vld [vmem:[#allocation29 + $0xfd8] sm:$0xff] }
 0x8fe   : > { %7182 = vmatpush1.bf16.msra.mxu0 %v7181_v63  ;;  %v4332_v63 = vld [vmem:[#allocation29 + $0xd80] sm:$0xff] }
 0x8ff   : > { %7310 = vmatpush1.bf16.msra.mxu1 %v7309_v40  ;;  %7184 = vmatprep.subr.bf16.mxu0 %v7183_v42  ;;  %v4340_v40 = vld [vmem:[#allocation29 + $0xdc0] sm:$0xff]  ;;  %v4334_v42 = vld [vmem:[#allocation29 + $0xd90] sm:$0xff] }
 0x900   : > { %7312 = vmatprep.subr.bf16.mxu1 %v7311_v47  ;;  %v4357_v47 = vld [vmem:[#allocation29 + $0xe48] sm:$0xff]  ;;  %v7201_v46 = vpack.c.bf16 %v4340_v40, %v4332_v63  ;;  %v7329_v22 = vpack.c.bf16 %v4342_v57, %v4334_v42  ;;  %v7343_v63 = vpack.c.bf16 %v4407_v34, %v4399_v33  ;;  %v4406_v40 = vld [vmem:[#allocation29 + $0xfd0] sm:$0xff]  ;;  %v3907_v57 = vld [vmem:[#allocation29 + $0x38] sm:$0xff] }
 0x901   : > { %v7203_v48 = vpack.c.bf16 %v4357_v47, %v4349_v43  ;;  %v3905_v42 = vld [vmem:[#allocation29 + $0x28] sm:$0xff]  ;;  %v3915_v43 = vld [vmem:[#allocation29 + $0x78] sm:$0xff] }
 0x902   : > { %7186 = vmatpush1.bf16.msra.mxu0 %v7185_v49  ;;  %v4348_v49 = vld [vmem:[#allocation29 + $0xe00] sm:$0xff] }
 0x903   : > { %7314 = vmatpush1.bf16.msra.mxu1 %v7313_v50  ;;  %7188 = vmatprep.subr.bf16.mxu0 %v7187_v51  ;;  %v4356_v50 = vld [vmem:[#allocation29 + $0xe40] sm:$0xff]  ;;  %v4350_v51 = vld [vmem:[#allocation29 + $0xe10] sm:$0xff] }
 0x904   : > { %7316 = vmatprep.subr.bf16.mxu1 %v7315_v59  ;;  %v4373_v59 = vld [vmem:[#allocation29 + $0xec8] sm:$0xff]  ;;  %v7205_v62 = vpack.c.bf16 %v4356_v50, %v4348_v49  ;;  %v7333_v0 = vpack.c.bf16 %v4358_v56, %v4350_v51  ;;  %v3906_v49 = vld [vmem:[#allocation29 + $0x30] sm:$0xff] }
 0x905   : > { %v7207_v2 = vpack.c.bf16 %v4373_v59, %v4365_v58  ;;  %v3914_v50 = vld [vmem:[#allocation29 + $0x70] sm:$0xff]  ;;  %v3921_v51 = vld [vmem:[#allocation29 + $0xa8] sm:$0xff]  ;;  %v3923_v58 = vld [vmem:[#allocation29 + $0xb8] sm:$0xff] }
 0x906   : > { %7190 = vmatpush1.bf16.msra.mxu0 %v7189_v5  ;;  %v4364_v5 = vld [vmem:[#allocation29 + $0xe80] sm:$0xff]  ;;  %v3931_v59 = vld [vmem:[#allocation29 + $0xf8] sm:$0xff]  ;;  %v7477_v60 = vpack.c.bf16 %v3914_v50, %v3906_v49 }
 0x907   : > { %7318 = vmatpush1.bf16.msra.mxu1 %v7317_v6  ;;  %7192 = vmatprep.subr.bf16.mxu0 %v7191_v7  ;;  %v4372_v6 = vld [vmem:[#allocation29 + $0xec0] sm:$0xff]  ;;  %v4366_v7 = vld [vmem:[#allocation29 + $0xe90] sm:$0xff]  ;;  %v3987_v49 = vld [vmem:[#allocation29 + $0x2b8] sm:$0xff] }
 0x908   : > { %7320 = vmatprep.subr.bf16.mxu1 %v7319_v14  ;;  %v4389_v14 = vld [vmem:[#allocation29 + $0xf48] sm:$0xff]  ;;  %v7209_v4 = vpack.c.bf16 %v4372_v6, %v4364_v5  ;;  %v7337_v19 = vpack.c.bf16 %v4374_v52, %v4366_v7  ;;  %v3930_v5 = vld [vmem:[#allocation29 + $0xf0] sm:$0xff]  ;;  %v3939_v52 = vld [vmem:[#allocation29 + $0x138] sm:$0xff] }
 0x909   : > { %v7211_v23 = vpack.c.bf16 %v4389_v14, %v4381_v12  ;;  %v3937_v6 = vld [vmem:[#allocation29 + $0x128] sm:$0xff]  ;;  %v3947_v12 = vld [vmem:[#allocation29 + $0x178] sm:$0xff] }
 0x90a   : > { %7194 = vmatpush1.bf16.msra.mxu0 %v7193_v24  ;;  %v4380_v24 = vld [vmem:[#allocation29 + $0xf00] sm:$0xff]  ;;  %v3945_v7 = vld [vmem:[#allocation29 + $0x168] sm:$0xff]  ;;  %v3995_v50 = vld [vmem:[#allocation29 + $0x2f8] sm:$0xff] }
 0x90b   : > { %7322 = vmatpush1.bf16.msra.mxu1 %v7321_v26  ;;  %7196 = vmatprep.subr.bf16.mxu0 %v7195_v27  ;;  %v4388_v26 = vld [vmem:[#allocation29 + $0xf40] sm:$0xff]  ;;  %v4382_v27 = vld [vmem:[#allocation29 + $0xf10] sm:$0xff]  ;;  %v7355_v17 = vpack.c.bf16 %v3945_v7, %v3937_v6  ;;  %v4011_v6 = vld [vmem:[#allocation29 + $0x378] sm:$0xff] }
 0x90c   : > { %7324 = vmatprep.subr.bf16.mxu1 %v7323_v32  ;;  %v4405_v32 = vld [vmem:[#allocation29 + $0xfc8] sm:$0xff]  ;;  %v7213_v20 = vpack.c.bf16 %v4388_v26, %v4380_v24  ;;  %v7341_v35 = vpack.c.bf16 %v4390_v29, %v4382_v27  ;;  %v7483_v24 = vpack.c.bf16 %v3947_v12, %v3939_v52  ;;  %v3946_v26 = vld [vmem:[#allocation29 + $0x170] sm:$0xff]  ;;  %v3955_v29 = vld [vmem:[#allocation29 + $0x1b8] sm:$0xff] }
 0x90d   : > { %v7215_v36 = vpack.c.bf16 %v4405_v32, %v4397_v31  ;;  %v3953_v27 = vld [vmem:[#allocation29 + $0x1a8] sm:$0xff]  ;;  %v3963_v31 = vld [vmem:[#allocation29 + $0x1f8] sm:$0xff]  ;;  %v4000_v12 = vld [vmem:[#allocation29 + $0x320] sm:$0xff] }
 0x90e   : > { %7198 = vmatpush1.bf16.msra.mxu0 %v7197_v37  ;;  %v4396_v37 = vld [vmem:[#allocation29 + $0xf80] sm:$0xff] }
 0x90f   : > { %7326 = vmatpush1.bf16.msra.mxu1 %v7325_v38  ;;  %7200 = vmatprep.subr.bf16.mxu0 %v7199_v39  ;;  %v4404_v38 = vld [vmem:[#allocation29 + $0xfc0] sm:$0xff]  ;;  %v4398_v39 = vld [vmem:[#allocation29 + $0xf90] sm:$0xff] }
 0x910   : > { %7328 = vmatprep.subr.bf16.mxu1 %v7327_v54  ;;  %v3913_v54 = vld [vmem:[#allocation29 + $0x68] sm:$0xff]  ;;  %v7217_v47 = vpack.c.bf16 %v4404_v38, %v4396_v37  ;;  %v7345_v44 = vpack.c.bf16 %v4406_v40, %v4398_v39  ;;  %v7487_v37 = vpack.c.bf16 %v3963_v31, %v3955_v29  ;;  %v3979_v40 = vld [vmem:[#allocation29 + $0x278] sm:$0xff]  ;;  %v4016_v31 = vld [vmem:[#allocation29 + $0x3a0] sm:$0xff] }
 0x911   : > { %v7347_v45 = vpack.c.bf16 %v3913_v54, %v3905_v42  ;;  %v3969_v38 = vld [vmem:[#allocation29 + $0x228] sm:$0xff] }
 0x912   : > { %7202 = vmatpush1.bf16.msra.mxu0 %v7201_v46  ;;  %v3904_v46 = vld [vmem:[#allocation29 + $0x20] sm:$0xff]  ;;  %v3977_v39 = vld [vmem:[#allocation29 + $0x268] sm:$0xff] }
 0x913   : > { %7330 = vmatpush1.bf16.msra.mxu1 %v7329_v22  ;;  %7204 = vmatprep.subr.bf16.mxu0 %v7203_v48  ;;  %v3912_v22 = vld [vmem:[#allocation29 + $0x60] sm:$0xff]  ;;  %v7475_v48 = vpack.c.bf16 %v3915_v43, %v3907_v57  ;;  %v7363_v57 = vpack.c.bf16 %v3977_v39, %v3969_v38 }
 0x914   : > { %7332 = vmatprep.subr.bf16.mxu1 %v7331_v53  ;;  %v3929_v53 = vld [vmem:[#allocation29 + $0xe8] sm:$0xff]  ;;  %v7349_v56 = vpack.c.bf16 %v3912_v22, %v3904_v46  ;;  %v3968_v43 = vld [vmem:[#allocation29 + $0x220] sm:$0xff]  ;;  %v3978_v46 = vld [vmem:[#allocation29 + $0x270] sm:$0xff] }
 0x915   : > { %v3985_v22 = vld [vmem:[#allocation29 + $0x2a8] sm:$0xff] }
 0x916   : > { %7206 = vmatpush1.bf16.msra.mxu0 %v7205_v62  ;;  %v3928_v62 = vld [vmem:[#allocation29 + $0xe0] sm:$0xff] }
 0x917   : > { %7334 = vmatpush1.bf16.msra.mxu1 %v7333_v0  ;;  %7208 = vmatprep.subr.bf16.mxu0 %v7207_v2  ;;  %v3922_v0 = vld [vmem:[#allocation29 + $0xb0] sm:$0xff]  ;;  %v7351_v2 = vpack.c.bf16 %v3929_v53, %v3921_v51  ;;  %v7353_v14 = vpack.c.bf16 %v3928_v62, %v3920_v61  ;;  %v7495_v61 = vpack.c.bf16 %v3995_v50, %v3987_v49  ;;  %v4048_v50 = vld [vmem:[#allocation29 + $0x4a0] sm:$0xff] }
 0x918   : > { %7336 = vmatprep.subr.bf16.mxu1 %v7335_v8  ;;  %v7479_v8 = vpack.c.bf16 %v3931_v59, %v3923_v58  ;;  %v7481_v16 = vpack.c.bf16 %v3930_v5, %v3922_v0  ;;  %v3984_v58 = vld [vmem:[#allocation29 + $0x2a0] sm:$0xff]  ;;  %v3994_v62 = vld [vmem:[#allocation29 + $0x2f0] sm:$0xff]  ;;  %v4001_v0 = vld [vmem:[#allocation29 + $0x328] sm:$0xff] }
 0x919   : > { %v3992_v59 = vld [vmem:[#allocation29 + $0x2e0] sm:$0xff]  ;;  %v4003_v5 = vld [vmem:[#allocation29 + $0x338] sm:$0xff] }
 0x91a   : > { %7210 = vmatpush1.bf16.msra.mxu0 %v7209_v4  ;;  %v3936_v4 = vld [vmem:[#allocation29 + $0x120] sm:$0xff]  ;;  %v7369_v7 = vpack.c.bf16 %v3992_v59, %v3984_v58  ;;  %v4058_v58 = vld [vmem:[#allocation29 + $0x4f0] sm:$0xff]  ;;  %v4065_v59 = vld [vmem:[#allocation29 + $0x528] sm:$0xff] }
 0x91b   : > { %7338 = vmatpush1.bf16.msra.mxu1 %v7337_v19  ;;  %7212 = vmatprep.subr.bf16.mxu0 %v7211_v23  ;;  %v3944_v19 = vld [vmem:[#allocation29 + $0x160] sm:$0xff]  ;;  %v3938_v23 = vld [vmem:[#allocation29 + $0x130] sm:$0xff] }
 0x91c   : > { %7340 = vmatprep.subr.bf16.mxu1 %v7339_v28  ;;  %v3961_v28 = vld [vmem:[#allocation29 + $0x1e8] sm:$0xff]  ;;  %v7357_v32 = vpack.c.bf16 %v3944_v19, %v3936_v4  ;;  %v7485_v33 = vpack.c.bf16 %v3946_v26, %v3938_v23  ;;  %v4010_v4 = vld [vmem:[#allocation29 + $0x370] sm:$0xff]  ;;  %v4027_v26 = vld [vmem:[#allocation29 + $0x3f8] sm:$0xff] }
 0x91d   : > { %v7359_v34 = vpack.c.bf16 %v3961_v28, %v3953_v27  ;;  %v4017_v19 = vld [vmem:[#allocation29 + $0x3a8] sm:$0xff] }
 0x91e   : > { %7214 = vmatpush1.bf16.msra.mxu0 %v7213_v20  ;;  %v3952_v20 = vld [vmem:[#allocation29 + $0x1a0] sm:$0xff]  ;;  %v4025_v23 = vld [vmem:[#allocation29 + $0x3e8] sm:$0xff] }
 0x91f   : > { %7342 = vmatpush1.bf16.msra.mxu1 %v7341_v35  ;;  %7216 = vmatprep.subr.bf16.mxu0 %v7215_v36  ;;  %v3960_v35 = vld [vmem:[#allocation29 + $0x1e0] sm:$0xff]  ;;  %v3954_v36 = vld [vmem:[#allocation29 + $0x1b0] sm:$0xff]  ;;  %v7375_v29 = vpack.c.bf16 %v4025_v23, %v4017_v19 }
 0x920   : > { %7344 = vmatprep.subr.bf16.mxu1 %v7343_v63  ;;  %v3971_v63 = vld [vmem:[#allocation29 + $0x238] sm:$0xff]  ;;  %v7361_v42 = vpack.c.bf16 %v3960_v35, %v3952_v20  ;;  %v4026_v20 = vld [vmem:[#allocation29 + $0x3f0] sm:$0xff]  ;;  %v4033_v35 = vld [vmem:[#allocation29 + $0x428] sm:$0xff] }
 0x922   : > { %7218 = vmatpush1.bf16.msra.mxu0 %v7217_v47  ;;  %v3976_v47 = vld [vmem:[#allocation29 + $0x260] sm:$0xff] }
 0x923   : > { %7346 = vmatpush1.bf16.msra.mxu1 %v7345_v44  ;;  %7348 = vmatprep.subr.bf16.mxu0 %v7347_v45  ;;  %v3970_v44 = vld [vmem:[#allocation29 + $0x230] sm:$0xff]  ;;  %v7491_v45 = vpack.c.bf16 %v3979_v40, %v3971_v63  ;;  %v7365_v51 = vpack.c.bf16 %v3976_v47, %v3968_v43  ;;  %v4032_v40 = vld [vmem:[#allocation29 + $0x420] sm:$0xff]  ;;  %v4049_v47 = vld [vmem:[#allocation29 + $0x4a8] sm:$0xff] }
 0x924   : > { %7476 = vmatprep.subr.bf16.mxu1 %v7475_v48  ;;  %v3993_v48 = vld [vmem:[#allocation29 + $0x2e8] sm:$0xff]  ;;  %v7493_v53 = vpack.c.bf16 %v3978_v46, %v3970_v44  ;;  %v4042_v43 = vld [vmem:[#allocation29 + $0x470] sm:$0xff]  ;;  %v4059_v46 = vld [vmem:[#allocation29 + $0x4f8] sm:$0xff] }
 0x925   : > { %4548 = vmatmul.mubr.f32.vlgmr.msra.gmra.mrb[6].mxu0 %v9820_v10  ;;  %v4057_v44 = vld [vmem:[#allocation29 + $0x4e8] sm:$0xff] }
 0x926   : > { %4690 = vmatmul.mubr.f32.vlgmr.msra.gmra.mrb[12].mxu1 %v9820_v10  ;;  %7350 = vmatpush1.bf16.msra.mxu0 %v7349_v56  ;;  %v7367_v56 = vpack.c.bf16 %v3993_v48, %v3985_v22  ;;  %v7383_v49 = vpack.c.bf16 %v4057_v44, %v4049_v47 }
 0x927   : > { %4760 = vmatprep.mubr.f32.mxu0 %v9808_v11  ;;  %7478 = vmatpush1.bf16.msra.mxu1 %v7477_v60  ;;  %v3986_v60 = vld [vmem:[#allocation29 + $0x2b0] sm:$0xff] }
 0x928   : > { %4902 = vmatprep.mubr.f32.mxu1 %v9808_v11  ;;  %7352 = vmatprep.subr.bf16.mxu0 %v7351_v2  ;;  %v3962_v11 = vld [vmem:[#allocation29 + $0x1f0] sm:$0xff]  ;;  %v4009_v2 = vld [vmem:[#allocation29 + $0x368] sm:$0xff] }
 0x929   : > { %7480 = vmatprep.subr.bf16.mxu1 %v7479_v8  ;;  %v7489_v54 = vpack.c.bf16 %v3962_v11, %v3954_v36  ;;  %v7497_v8 = vpack.c.bf16 %v3994_v62, %v3986_v60  ;;  %v7371_v52 = vpack.c.bf16 %v4009_v2, %v4001_v0  ;;  %v4041_v36 = vld [vmem:[#allocation29 + $0x468] sm:$0xff]  ;;  %v4043_v11 = vld [vmem:[#allocation29 + $0x478] sm:$0xff] }
 0x92a   : > { %7354 = vmatpush1.bf16.msra.mxu0 %v7353_v14  ;;  %v4008_v14 = vld [vmem:[#allocation29 + $0x360] sm:$0xff]  ;;  %v7379_v63 = vpack.c.bf16 %v4041_v36, %v4033_v35  ;;  %v4073_v60 = vld [vmem:[#allocation29 + $0x568] sm:$0xff]  ;;  %v4075_v62 = vld [vmem:[#allocation29 + $0x578] sm:$0xff] }
 0x92b   : > { %7482 = vmatpush1.bf16.msra.mxu1 %v7481_v16  ;;  %7356 = vmatprep.subr.bf16.mxu0 %v7355_v17  ;;  %v4002_v16 = vld [vmem:[#allocation29 + $0x330] sm:$0xff]  ;;  %v7499_v17 = vpack.c.bf16 %v4011_v6, %v4003_v5  ;;  %v7373_v27 = vpack.c.bf16 %v4008_v14, %v4000_v12  ;;  %v7387_v5 = vpack.c.bf16 %v4073_v60, %v4065_v59  ;;  %v4064_v6 = vld [vmem:[#allocation29 + $0x520] sm:$0xff]  ;;  %v4081_v14 = vld [vmem:[#allocation29 + $0x5a8] sm:$0xff] }
 0x92c   : > { %7484 = vmatprep.subr.bf16.mxu1 %v7483_v24  ;;  %v4019_v24 = vld [vmem:[#allocation29 + $0x3b8] sm:$0xff]  ;;  %v7501_v28 = vpack.c.bf16 %v4010_v4, %v4002_v16  ;;  %v4074_v12 = vld [vmem:[#allocation29 + $0x570] sm:$0xff]  ;;  %v4089_v16 = vld [vmem:[#allocation29 + $0x5e8] sm:$0xff] }
 0x92d   : > { %v4091_v4 = vld [vmem:[#allocation29 + $0x5f8] sm:$0xff] }
 0x92e   : > { %7358 = vmatpush1.bf16.msra.mxu0 %v7357_v32  ;;  %v4024_v32 = vld [vmem:[#allocation29 + $0x3e0] sm:$0xff] }
 0x92f   : > { %7486 = vmatpush1.bf16.msra.mxu1 %v7485_v33  ;;  %7360 = vmatprep.subr.bf16.mxu0 %v7359_v34  ;;  %v4018_v33 = vld [vmem:[#allocation29 + $0x3b0] sm:$0xff]  ;;  %v7503_v34 = vpack.c.bf16 %v4027_v26, %v4019_v24  ;;  %v7377_v38 = vpack.c.bf16 %v4024_v32, %v4016_v31  ;;  %v7391_v24 = vpack.c.bf16 %v4089_v16, %v4081_v14  ;;  %v4080_v26 = vld [vmem:[#allocation29 + $0x5a0] sm:$0xff]  ;;  %v4097_v32 = vld [vmem:[#allocation29 + $0x628] sm:$0xff] }
 0x930   : > { %7488 = vmatprep.subr.bf16.mxu1 %v7487_v37  ;;  %v4035_v37 = vld [vmem:[#allocation29 + $0x438] sm:$0xff]  ;;  %v7505_v39 = vpack.c.bf16 %v4026_v20, %v4018_v33  ;;  %v4090_v31 = vld [vmem:[#allocation29 + $0x5f0] sm:$0xff]  ;;  %v4105_v33 = vld [vmem:[#allocation29 + $0x668] sm:$0xff] }
 0x931   : > { %v4107_v20 = vld [vmem:[#allocation29 + $0x678] sm:$0xff] }
 0x932   : > { %7362 = vmatpush1.bf16.msra.mxu0 %v7361_v42  ;;  %v4040_v42 = vld [vmem:[#allocation29 + $0x460] sm:$0xff] }
 0x933   : > { %7490 = vmatpush1.bf16.msra.mxu1 %v7489_v54  ;;  %7364 = vmatprep.subr.bf16.mxu0 %v7363_v57  ;;  %v4034_v54 = vld [vmem:[#allocation29 + $0x430] sm:$0xff]  ;;  %v7507_v57 = vpack.c.bf16 %v4043_v11, %v4035_v37  ;;  %v7381_v22 = vpack.c.bf16 %v4040_v42, %v4032_v40  ;;  %v7395_v37 = vpack.c.bf16 %v4105_v33, %v4097_v32  ;;  %v4096_v11 = vld [vmem:[#allocation29 + $0x620] sm:$0xff]  ;;  %v4113_v42 = vld [vmem:[#allocation29 + $0x6a8] sm:$0xff] }
 0x934   : > { %7492 = vmatprep.subr.bf16.mxu1 %v7491_v45  ;;  %v4051_v45 = vld [vmem:[#allocation29 + $0x4b8] sm:$0xff]  ;;  %v7509_v48 = vpack.c.bf16 %v4042_v43, %v4034_v54  ;;  %v4106_v40 = vld [vmem:[#allocation29 + $0x670] sm:$0xff]  ;;  %v4121_v54 = vld [vmem:[#allocation29 + $0x6e8] sm:$0xff] }
 0x935   : > { %v4123_v43 = vld [vmem:[#allocation29 + $0x6f8] sm:$0xff] }
 0x936   : > { %7366 = vmatpush1.bf16.msra.mxu0 %v7365_v51  ;;  %v4056_v51 = vld [vmem:[#allocation29 + $0x4e0] sm:$0xff] }
 0x937   : > { %7494 = vmatpush1.bf16.msra.mxu1 %v7493_v53  ;;  %7368 = vmatprep.subr.bf16.mxu0 %v7367_v56  ;;  %v4050_v53 = vld [vmem:[#allocation29 + $0x4b0] sm:$0xff]  ;;  %v7511_v56 = vpack.c.bf16 %v4059_v46, %v4051_v45  ;;  %v7385_v0 = vpack.c.bf16 %v4056_v51, %v4048_v50  ;;  %v7399_v45 = vpack.c.bf16 %v4121_v54, %v4113_v42  ;;  %v4112_v46 = vld [vmem:[#allocation29 + $0x6a0] sm:$0xff]  ;;  %v4129_v51 = vld [vmem:[#allocation29 + $0x728] sm:$0xff] }
 0x938   : > { %7496 = vmatprep.subr.bf16.mxu1 %v7495_v61  ;;  %v4067_v61 = vld [vmem:[#allocation29 + $0x538] sm:$0xff]  ;;  %v7513_v2 = vpack.c.bf16 %v4058_v58, %v4050_v53  ;;  %v4122_v50 = vld [vmem:[#allocation29 + $0x6f0] sm:$0xff]  ;;  %v4137_v53 = vld [vmem:[#allocation29 + $0x768] sm:$0xff] }
 0x939   : > { %v4139_v58 = vld [vmem:[#allocation29 + $0x778] sm:$0xff] }
 0x93a   : > { %7370 = vmatpush1.bf16.msra.mxu0 %v7369_v7  ;;  %v4072_v7 = vld [vmem:[#allocation29 + $0x560] sm:$0xff]  ;;  %v4187_v42 = vld [vmem:[#allocation29 + $0x8f8] sm:$0xff] }
 0x93b   : > { %7498 = vmatpush1.bf16.msra.mxu1 %v7497_v8  ;;  %7372 = vmatprep.subr.bf16.mxu0 %v7371_v52  ;;  %v4066_v8 = vld [vmem:[#allocation29 + $0x530] sm:$0xff]  ;;  %v7515_v52 = vpack.c.bf16 %v4075_v62, %v4067_v61  ;;  %v7389_v19 = vpack.c.bf16 %v4072_v7, %v4064_v6  ;;  %v7403_v61 = vpack.c.bf16 %v4137_v53, %v4129_v51  ;;  %v4128_v62 = vld [vmem:[#allocation29 + $0x720] sm:$0xff]  ;;  %v4145_v7 = vld [vmem:[#allocation29 + $0x7a8] sm:$0xff] }
 0x93c   : > { %7500 = vmatprep.subr.bf16.mxu1 %v7499_v17  ;;  %v4083_v17 = vld [vmem:[#allocation29 + $0x5b8] sm:$0xff]  ;;  %v7517_v23 = vpack.c.bf16 %v4074_v12, %v4066_v8  ;;  %v4138_v6 = vld [vmem:[#allocation29 + $0x770] sm:$0xff]  ;;  %v4153_v8 = vld [vmem:[#allocation29 + $0x7e8] sm:$0xff] }
 0x93d   : > { %v4155_v12 = vld [vmem:[#allocation29 + $0x7f8] sm:$0xff] }
 0x93e   : > { %7374 = vmatpush1.bf16.msra.mxu0 %v7373_v27  ;;  %v4088_v27 = vld [vmem:[#allocation29 + $0x5e0] sm:$0xff] }
 0x93f   : > { %7502 = vmatpush1.bf16.msra.mxu1 %v7501_v28  ;;  %7376 = vmatprep.subr.bf16.mxu0 %v7375_v29  ;;  %v4082_v28 = vld [vmem:[#allocation29 + $0x5b0] sm:$0xff]  ;;  %v7519_v29 = vpack.c.bf16 %v4091_v4, %v4083_v17  ;;  %v7393_v35 = vpack.c.bf16 %v4088_v27, %v4080_v26  ;;  %v7407_v17 = vpack.c.bf16 %v4153_v8, %v4145_v7  ;;  %v4144_v4 = vld [vmem:[#allocation29 + $0x7a0] sm:$0xff]  ;;  %v4161_v27 = vld [vmem:[#allocation29 + $0x828] sm:$0xff] }
 0x940   : > { %7504 = vmatprep.subr.bf16.mxu1 %v7503_v34  ;;  %v4099_v34 = vld [vmem:[#allocation29 + $0x638] sm:$0xff]  ;;  %v7521_v36 = vpack.c.bf16 %v4090_v31, %v4082_v28  ;;  %v4154_v26 = vld [vmem:[#allocation29 + $0x7f0] sm:$0xff]  ;;  %v4169_v28 = vld [vmem:[#allocation29 + $0x868] sm:$0xff] }
 0x941   : > { %v4171_v31 = vld [vmem:[#allocation29 + $0x878] sm:$0xff] }
 0x942   : > { %7378 = vmatpush1.bf16.msra.mxu0 %v7377_v38  ;;  %v4104_v38 = vld [vmem:[#allocation29 + $0x660] sm:$0xff] }
 0x943   : > { %7506 = vmatpush1.bf16.msra.mxu1 %v7505_v39  ;;  %7380 = vmatprep.subr.bf16.mxu0 %v7379_v63  ;;  %v4098_v39 = vld [vmem:[#allocation29 + $0x630] sm:$0xff]  ;;  %v7523_v63 = vpack.c.bf16 %v4107_v20, %v4099_v34  ;;  %v7397_v47 = vpack.c.bf16 %v4104_v38, %v4096_v11  ;;  %v7411_v34 = vpack.c.bf16 %v4169_v28, %v4161_v27  ;;  %v4160_v20 = vld [vmem:[#allocation29 + $0x820] sm:$0xff]  ;;  %v4177_v38 = vld [vmem:[#allocation29 + $0x8a8] sm:$0xff] }
 0x944   : > { %7508 = vmatprep.subr.bf16.mxu1 %v7507_v57  ;;  %v4115_v57 = vld [vmem:[#allocation29 + $0x6b8] sm:$0xff]  ;;  %v7525_v44 = vpack.c.bf16 %v4106_v40, %v4098_v39  ;;  %v4170_v11 = vld [vmem:[#allocation29 + $0x870] sm:$0xff]  ;;  %v4185_v39 = vld [vmem:[#allocation29 + $0x8e8] sm:$0xff] }
 0x945   : > { %v4179_v40 = vld [vmem:[#allocation29 + $0x8b8] sm:$0xff]  ;;  %v4224_v28 = vld [vmem:[#allocation29 + $0xa20] sm:$0xff] }
 0x946   : > { %7382 = vmatpush1.bf16.msra.mxu0 %v7381_v22  ;;  %v4120_v22 = vld [vmem:[#allocation29 + $0x6e0] sm:$0xff] }
 0x947   : > { %7510 = vmatpush1.bf16.msra.mxu1 %v7509_v48  ;;  %7384 = vmatprep.subr.bf16.mxu0 %v7383_v49  ;;  %v4114_v48 = vld [vmem:[#allocation29 + $0x6b0] sm:$0xff]  ;;  %v7527_v49 = vpack.c.bf16 %v4123_v43, %v4115_v57  ;;  %v7401_v59 = vpack.c.bf16 %v4120_v22, %v4112_v46  ;;  %v4176_v57 = vld [vmem:[#allocation29 + $0x8a0] sm:$0xff]  ;;  %v4193_v46 = vld [vmem:[#allocation29 + $0x928] sm:$0xff] }
 0x948   : > { %7512 = vmatprep.subr.bf16.mxu1 %v7511_v56  ;;  %v4131_v56 = vld [vmem:[#allocation29 + $0x738] sm:$0xff]  ;;  %v7529_v60 = vpack.c.bf16 %v4122_v50, %v4114_v48  ;;  %v4184_v43 = vld [vmem:[#allocation29 + $0x8e0] sm:$0xff]  ;;  %v4201_v22 = vld [vmem:[#allocation29 + $0x968] sm:$0xff]  ;;  %v7543_v48 = vpack.c.bf16 %v4187_v42, %v4179_v40 }
 0x949   : > { %v4203_v50 = vld [vmem:[#allocation29 + $0x978] sm:$0xff]  ;;  %v7417_v51 = vpack.c.bf16 %v4184_v43, %v4176_v57  ;;  %v4248_v40 = vld [vmem:[#allocation29 + $0xae0] sm:$0xff]  ;;  %v4242_v42 = vld [vmem:[#allocation29 + $0xab0] sm:$0xff] }
 0x94a   : > { %7386 = vmatpush1.bf16.msra.mxu0 %v7385_v0  ;;  %v4136_v0 = vld [vmem:[#allocation29 + $0x760] sm:$0xff]  ;;  %v4250_v57 = vld [vmem:[#allocation29 + $0xaf0] sm:$0xff]  ;;  %v4257_v43 = vld [vmem:[#allocation29 + $0xb28] sm:$0xff] }
 0x94b   : > { %7514 = vmatpush1.bf16.msra.mxu1 %v7513_v2  ;;  %7388 = vmatprep.subr.bf16.mxu0 %v7387_v5  ;;  %v4130_v2 = vld [vmem:[#allocation29 + $0x730] sm:$0xff]  ;;  %v7531_v5 = vpack.c.bf16 %v4139_v58, %v4131_v56  ;;  %v7405_v14 = vpack.c.bf16 %v4136_v0, %v4128_v62  ;;  %v7419_v56 = vpack.c.bf16 %v4201_v22, %v4193_v46  ;;  %v4192_v58 = vld [vmem:[#allocation29 + $0x920] sm:$0xff]  ;;  %v4209_v0 = vld [vmem:[#allocation29 + $0x9a8] sm:$0xff] }
 0x94c   : > { %7516 = vmatprep.subr.bf16.mxu1 %v7515_v52  ;;  %v4147_v52 = vld [vmem:[#allocation29 + $0x7b8] sm:$0xff]  ;;  %v7533_v16 = vpack.c.bf16 %v4138_v6, %v4130_v2  ;;  %v4202_v62 = vld [vmem:[#allocation29 + $0x970] sm:$0xff]  ;;  %v4217_v2 = vld [vmem:[#allocation29 + $0x9e8] sm:$0xff] }
 0x94d   : > { %v7423_v8 = vpack.c.bf16 %v4217_v2, %v4209_v0  ;;  %v4267_v46 = vld [vmem:[#allocation29 + $0xb78] sm:$0xff]  ;;  %v4281_v0 = vld [vmem:[#allocation29 + $0xbe8] sm:$0xff] }
 0x94e   : > { %7390 = vmatpush1.bf16.msra.mxu0 %v7389_v19  ;;  %v4152_v19 = vld [vmem:[#allocation29 + $0x7e0] sm:$0xff] }
 0x94f   : > { %7518 = vmatpush1.bf16.msra.mxu1 %v7517_v23  ;;  %7392 = vmatprep.subr.bf16.mxu0 %v7391_v24  ;;  %v4146_v23 = vld [vmem:[#allocation29 + $0x7b0] sm:$0xff]  ;;  %v7535_v24 = vpack.c.bf16 %v4155_v12, %v4147_v52  ;;  %v7409_v32 = vpack.c.bf16 %v4152_v19, %v4144_v4  ;;  %v4208_v52 = vld [vmem:[#allocation29 + $0x9a0] sm:$0xff]  ;;  %v4233_v4 = vld [vmem:[#allocation29 + $0xa68] sm:$0xff] }
 0x950   : > { %7520 = vmatprep.subr.bf16.mxu1 %v7519_v29  ;;  %v4163_v29 = vld [vmem:[#allocation29 + $0x838] sm:$0xff]  ;;  %v7537_v33 = vpack.c.bf16 %v4154_v26, %v4146_v23  ;;  %v4216_v12 = vld [vmem:[#allocation29 + $0x9e0] sm:$0xff] }
 0x951   : > { %v4227_v19 = vld [vmem:[#allocation29 + $0xa38] sm:$0xff] }
 0x952   : > { %7394 = vmatpush1.bf16.msra.mxu0 %v7393_v35  ;;  %v4168_v35 = vld [vmem:[#allocation29 + $0x860] sm:$0xff]  ;;  %v4235_v23 = vld [vmem:[#allocation29 + $0xa78] sm:$0xff] }
 0x953   : > { %7522 = vmatpush1.bf16.msra.mxu1 %v7521_v36  ;;  %7396 = vmatprep.subr.bf16.mxu0 %v7395_v37  ;;  %v7539_v36 = vpack.c.bf16 %v4171_v31, %v4163_v29  ;;  %v4162_v37 = vld [vmem:[#allocation29 + $0x830] sm:$0xff]  ;;  %v4232_v29 = vld [vmem:[#allocation29 + $0xa60] sm:$0xff] }
 0x954   : > { %7524 = vmatprep.subr.bf16.mxu1 %v7523_v63  ;;  %v7413_v63 = vpack.c.bf16 %v4168_v35, %v4160_v20  ;;  %v7541_v54 = vpack.c.bf16 %v4170_v11, %v4162_v37  ;;  %v4226_v31 = vld [vmem:[#allocation29 + $0xa30] sm:$0xff]  ;;  %v4249_v20 = vld [vmem:[#allocation29 + $0xae8] sm:$0xff]  ;;  %v4243_v35 = vld [vmem:[#allocation29 + $0xab8] sm:$0xff]  ;;  %v7429_v37 = vpack.c.bf16 %v4232_v29, %v4224_v28 }
 0x955   : > { %v9920_v11 = vld [vmem:[#allocation26] sm:$0xf] }
 0x956   : > { %7398 = vmatpush1.bf16.msra.mxu0 %v7397_v47  ;;  %v4178_v47 = vld [vmem:[#allocation29 + $0x8b0] sm:$0xff]  ;;  %v3375_v22 = vrot.slane %v9920_v11, %v9771_v21 }
 0x957   : > { %7526 = vmatpush1.bf16.msra.mxu1 %v7525_v44  ;;  %7400 = vmatprep.subr.bf16.mxu0 %v7399_v45  ;;  %v7415_v44 = vpack.c.bf16 %v4185_v39, %v4177_v38  ;;  %v4186_v45 = vld [vmem:[#allocation29 + $0x8f0] sm:$0xff] }
 0x958   : > { %7528 = vmatprep.subr.bf16.mxu1 %v7527_v49  ;;  %v4195_v49 = vld [vmem:[#allocation29 + $0x938] sm:$0xff]  ;;  %v7545_v53 = vpack.c.bf16 %v4186_v45, %v4178_v47  ;;  %v4265_v47 = vld [vmem:[#allocation29 + $0xb68] sm:$0xff] }
 0x959   : > { %v4259_v45 = vld [vmem:[#allocation29 + $0xb38] sm:$0xff] }
 0x95a   : > { %7402 = vmatpush1.bf16.msra.mxu0 %v7401_v59  ;;  %v4200_v59 = vld [vmem:[#allocation29 + $0x960] sm:$0xff] }
 0x95b   : > { %7530 = vmatpush1.bf16.msra.mxu1 %v7529_v60  ;;  %7404 = vmatprep.subr.bf16.mxu0 %v7403_v61  ;;  %v4194_v60 = vld [vmem:[#allocation29 + $0x930] sm:$0xff]  ;;  %v7547_v61 = vpack.c.bf16 %v4203_v50, %v4195_v49  ;;  %v7421_v6 = vpack.c.bf16 %v4200_v59, %v4192_v58  ;;  %v7561_v49 = vpack.c.bf16 %v4250_v57, %v4242_v42  ;;  %v4312_v57 = vld [vmem:[#allocation29 + $0xce0] sm:$0xff] }
 0x95c   : > { %7532 = vmatprep.subr.bf16.mxu1 %v7531_v5  ;;  %v4211_v5 = vld [vmem:[#allocation29 + $0x9b8] sm:$0xff]  ;;  %v7549_v7 = vpack.c.bf16 %v4202_v62, %v4194_v60  ;;  %v7435_v50 = vpack.c.bf16 %v4265_v47, %v4257_v43  ;;  %v7563_v60 = vpack.c.bf16 %v4267_v46, %v4259_v45  ;;  %v4273_v62 = vld [vmem:[#allocation29 + $0xba8] sm:$0xff]  ;;  %v4306_v43 = vld [vmem:[#allocation29 + $0xcb0] sm:$0xff] }
 0x95d   : > { %v4321_v45 = vld [vmem:[#allocation29 + $0xd28] sm:$0xff] }
 0x95e   : > { %7406 = vmatpush1.bf16.msra.mxu0 %v7405_v14  ;;  %v4210_v14 = vld [vmem:[#allocation29 + $0x9b0] sm:$0xff]  ;;  %v4329_v46 = vld [vmem:[#allocation29 + $0xd68] sm:$0xff] }
 0x95f   : > { %7534 = vmatpush1.bf16.msra.mxu1 %v7533_v16  ;;  %7408 = vmatprep.subr.bf16.mxu0 %v7407_v17  ;;  %v4225_v17 = vld [vmem:[#allocation29 + $0xa28] sm:$0xff] }
 0x960   : > { %7536 = vmatprep.subr.bf16.mxu1 %v7535_v24  ;;  %v7425_v24 = vpack.c.bf16 %v4216_v12, %v4208_v52  ;;  %v7427_v27 = vpack.c.bf16 %v4233_v4, %v4225_v17  ;;  %v4274_v17 = vld [vmem:[#allocation29 + $0xbb0] sm:$0xff] }
 0x962   : > { %7410 = vmatpush1.bf16.msra.mxu0 %v7409_v32  ;;  %v7555_v32 = vpack.c.bf16 %v4235_v23, %v4227_v19  ;;  %v4282_v19 = vld [vmem:[#allocation29 + $0xbf0] sm:$0xff]  ;;  %v4289_v23 = vld [vmem:[#allocation29 + $0xc28] sm:$0xff] }
 0x963   : > { %7538 = vmatpush1.bf16.msra.mxu1 %v7537_v33  ;;  %7412 = vmatprep.subr.bf16.mxu0 %v7411_v34  ;;  %v4234_v33 = vld [vmem:[#allocation29 + $0xa70] sm:$0xff]  ;;  %v4241_v34 = vld [vmem:[#allocation29 + $0xaa8] sm:$0xff]  ;;  %v7569_v29 = vpack.c.bf16 %v4282_v19, %v4274_v17 }
 0x964   : > { %7540 = vmatprep.subr.bf16.mxu1 %v7539_v36  ;;  %v4251_v36 = vld [vmem:[#allocation29 + $0xaf8] sm:$0xff]  ;;  %v7557_v38 = vpack.c.bf16 %v4234_v33, %v4226_v31  ;;  %v7431_v39 = vpack.c.bf16 %v4249_v20, %v4241_v34  ;;  %v4296_v33 = vld [vmem:[#allocation29 + $0xc60] sm:$0xff]  ;;  %v4290_v34 = vld [vmem:[#allocation29 + $0xc30] sm:$0xff] }
 0x965   : > { %4761 = vmatmul.mubr.f32.vlgmr.msra.gmra.mrb[8].mxu0 %v9810_v13  ;;  %v4353_v19 = vld [vmem:[#allocation29 + $0xe28] sm:$0xff] }
 0x966   : > { %4903 = vmatmul.mubr.f32.vlgmr.msra.gmra.mrb[14].mxu1 %v9810_v13  ;;  %7414 = vmatpush1.bf16.msra.mxu0 %v7413_v63  ;;  %v4219_v13 = vld [vmem:[#allocation29 + $0x9f8] sm:$0xff]  ;;  %v4240_v63 = vld [vmem:[#allocation29 + $0xaa0] sm:$0xff] }
 0x967   : > { %4831 = vmatprep.mubr.f32.mxu0 %v9812_v18  ;;  %7542 = vmatpush1.bf16.msra.mxu1 %v7541_v54  ;;  %v7551_v16 = vpack.c.bf16 %v4219_v13, %v4211_v5  ;;  %v7559_v54 = vpack.c.bf16 %v4251_v36, %v4243_v35  ;;  %v4298_v35 = vld [vmem:[#allocation29 + $0xc70] sm:$0xff]  ;;  %v4305_v36 = vld [vmem:[#allocation29 + $0xca8] sm:$0xff] }
 0x968   : > { %4973 = vmatprep.mubr.f32.mxu1 %v9812_v18  ;;  %7416 = vmatprep.subr.bf16.mxu0 %v7415_v44  ;;  %v4218_v18 = vld [vmem:[#allocation29 + $0x9f0] sm:$0xff]  ;;  %v3371_v44 = vrot.slane %v9920_v11, %v9778_v30 }
 0x969   : > { %7544 = vmatprep.subr.bf16.mxu1 %v7543_v48  ;;  %v7553_v26 = vpack.c.bf16 %v4218_v18, %v4210_v14  ;;  %v7433_v48 = vpack.c.bf16 %v4248_v40, %v4240_v63  ;;  %v7439_v14 = vpack.c.bf16 %v4281_v0, %v4273_v62  ;;  %v4280_v18 = vld [vmem:[#allocation29 + $0xbe0] sm:$0xff]  ;;  %v7573_v40 = vpack.c.bf16 %v4298_v35, %v4290_v34  ;;  %v4337_v62 = vld [vmem:[#allocation29 + $0xda8] sm:$0xff] }
 0x96a   : > { %7418 = vmatpush1.bf16.msra.mxu0 %v7417_v51  ;;  %v4256_v51 = vld [vmem:[#allocation29 + $0xb20] sm:$0xff]  ;;  %v4345_v0 = vld [vmem:[#allocation29 + $0xde8] sm:$0xff] }
 0x96b   : > { %7546 = vmatpush1.bf16.msra.mxu1 %v7545_v53  ;;  %7420 = vmatprep.subr.bf16.mxu0 %v7419_v56  ;;  %v4264_v53 = vld [vmem:[#allocation29 + $0xb60] sm:$0xff]  ;;  %v4258_v56 = vld [vmem:[#allocation29 + $0xb30] sm:$0xff]  ;;  %v4369_v35 = vld [vmem:[#allocation29 + $0xea8] sm:$0xff] }
 0x96c   : > { %7548 = vmatprep.subr.bf16.mxu1 %v7547_v61  ;;  %v4266_v61 = vld [vmem:[#allocation29 + $0xb70] sm:$0xff]  ;;  %v7437_v52 = vpack.c.bf16 %v4264_v53, %v4256_v51  ;;  %v7451_v51 = vpack.c.bf16 %v4329_v46, %v4321_v45  ;;  %v4320_v53 = vld [vmem:[#allocation29 + $0xd20] sm:$0xff]  ;;  %v4393_v45 = vld [vmem:[#allocation29 + $0xf68] sm:$0xff] }
 0x96d   : > { %v7565_v12 = vpack.c.bf16 %v4266_v61, %v4258_v56  ;;  %v4328_v56 = vld [vmem:[#allocation29 + $0xd60] sm:$0xff]  ;;  %v4330_v61 = vld [vmem:[#allocation29 + $0xd70] sm:$0xff]  ;;  %v4387_v46 = vld [vmem:[#allocation29 + $0xf38] sm:$0xff] }
 0x96e   : > { %7422 = vmatpush1.bf16.msra.mxu0 %v7421_v6  ;;  %v4275_v6 = vld [vmem:[#allocation29 + $0xbb8] sm:$0xff] }
 0x96f   : > { %7550 = vmatpush1.bf16.msra.mxu1 %v7549_v7  ;;  %7424 = vmatprep.subr.bf16.mxu0 %v7423_v8  ;;  %v4283_v7 = vld [vmem:[#allocation29 + $0xbf8] sm:$0xff] }
 0x970   : > { %7552 = vmatprep.subr.bf16.mxu1 %v7551_v16  ;;  %v4272_v16 = vld [vmem:[#allocation29 + $0xba0] sm:$0xff]  ;;  %v7567_v4 = vpack.c.bf16 %v4283_v7, %v4275_v6  ;;  %v4347_v6 = vld [vmem:[#allocation29 + $0xdf8] sm:$0xff]  ;;  %v7453_v7 = vpack.c.bf16 %v4328_v56, %v4320_v53  ;;  %v4386_v56 = vld [vmem:[#allocation29 + $0xf30] sm:$0xff] }
 0x971   : > { %v7441_v28 = vpack.c.bf16 %v4280_v18, %v4272_v16  ;;  %v4344_v16 = vld [vmem:[#allocation29 + $0xde0] sm:$0xff]  ;;  %v4338_v18 = vld [vmem:[#allocation29 + $0xdb0] sm:$0xff] }
 0x972   : > { %7426 = vmatpush1.bf16.msra.mxu0 %v7425_v24  ;;  %v4297_v24 = vld [vmem:[#allocation29 + $0xc68] sm:$0xff]  ;;  %v4392_v53 = vld [vmem:[#allocation29 + $0xf60] sm:$0xff] }
 0x973   : > { %7554 = vmatpush1.bf16.msra.mxu1 %v7553_v26  ;;  %7428 = vmatprep.subr.bf16.mxu0 %v7427_v27  ;;  %v4291_v26 = vld [vmem:[#allocation29 + $0xc38] sm:$0xff]  ;;  %v7443_v31 = vpack.c.bf16 %v4297_v24, %v4289_v23  ;;  %v4361_v23 = vld [vmem:[#allocation29 + $0xe68] sm:$0xff] }
 0x974   : > { %7556 = vmatprep.subr.bf16.mxu1 %v7555_v32  ;;  %v4299_v27 = vld [vmem:[#allocation29 + $0xc78] sm:$0xff]  ;;  %v4288_v32 = vld [vmem:[#allocation29 + $0xc20] sm:$0xff] }
 0x975   : > { %v7571_v20 = vpack.c.bf16 %v4299_v27, %v4291_v26  ;;  %v7445_v63 = vpack.c.bf16 %v4296_v33, %v4288_v32  ;;  %v4355_v24 = vld [vmem:[#allocation29 + $0xe38] sm:$0xff]  ;;  %v4360_v32 = vld [vmem:[#allocation29 + $0xe60] sm:$0xff]  ;;  %v4354_v33 = vld [vmem:[#allocation29 + $0xe30] sm:$0xff] }
 0x976   : > { %7430 = vmatpush1.bf16.msra.mxu0 %v7429_v37  ;;  %v4313_v37 = vld [vmem:[#allocation29 + $0xce8] sm:$0xff]  ;;  %v4363_v26 = vld [vmem:[#allocation29 + $0xe78] sm:$0xff] }
 0x977   : > { %7558 = vmatpush1.bf16.msra.mxu1 %v7557_v38  ;;  %7432 = vmatprep.subr.bf16.mxu0 %v7431_v39  ;;  %v4307_v38 = vld [vmem:[#allocation29 + $0xcb8] sm:$0xff]  ;;  %v7447_v42 = vpack.c.bf16 %v4313_v37, %v4305_v36  ;;  %v7587_v34 = vpack.c.bf16 %v4363_v26, %v4355_v24  ;;  %v4377_v36 = vld [vmem:[#allocation29 + $0xee8] sm:$0xff] }
 0x978   : > { %v9926_v58 = vpop.f32.mrb[4].mxu0  ;;  %v3353_v59 = vpop.f32.mrb[10].mxu1  ;;  %7560 = vmatprep.subr.bf16.mxu1 %v7559_v54  ;;  %v4315_v39 = vld [vmem:[#allocation29 + $0xcf8] sm:$0xff]  ;;  %v4304_v54 = vld [vmem:[#allocation29 + $0xca0] sm:$0xff] }
 0x979   : > { %v9928_v2 = vadd.f32 %v3371_v44, %v3353_v59  ;;  %v9930_v5 = vpop.f32.mrb[5].mxu0  ;;  %v3355_v13 = vpop.f32.mrb[11].mxu1  ;;  %v7575_v47 = vpack.c.bf16 %v4315_v39, %v4307_v38  ;;  %v4314_v44 = vld [vmem:[#allocation29 + $0xcf0] sm:$0xff]  ;;  %v4371_v37 = vld [vmem:[#allocation29 + $0xeb8] sm:$0xff] }
 0x97a   : > { %v9932_v8 = vadd.f32 %v3375_v22, %v3355_v13  ;;  %7434 = vmatpush1.bf16.msra.mxu0 %v7433_v48  ;;  %v4323_v22 = vld [vmem:[#allocation29 + $0xd38] sm:$0xff]  ;;  %v4322_v59 = vld [vmem:[#allocation29 + $0xd30] sm:$0xff] }
 0x97b   : > { %7562 = vmatpush1.bf16.msra.mxu1 %v7561_v49  ;;  %7436 = vmatprep.subr.bf16.mxu0 %v7435_v50  ;;  %v4331_v48 = vld [vmem:[#allocation29 + $0xd78] sm:$0xff]  ;;  %v7449_v49 = vpack.c.bf16 %v4312_v57, %v4304_v54  ;;  %v7577_v50 = vpack.c.bf16 %v4314_v44, %v4306_v43  ;;  %v4376_v54 = vld [vmem:[#allocation29 + $0xee0] sm:$0xff]  ;;  %v4370_v57 = vld [vmem:[#allocation29 + $0xeb0] sm:$0xff] }
 0x97c   : > { %7564 = vmatprep.subr.bf16.mxu1 %v7563_v60  ;;  %v7579_v60 = vpack.c.bf16 %v4331_v48, %v4323_v22  ;;  %v4339_v13 = vld [vmem:[#allocation29 + $0xdb8] sm:$0xff]  ;;  %v4385_v44 = vld [vmem:[#allocation29 + $0xf28] sm:$0xff] }
 0x97d   : > { %v7583_v17 = vpack.c.bf16 %v4347_v6, %v4339_v13  ;;  %v4379_v38 = vld [vmem:[#allocation29 + $0xef8] sm:$0xff] }
 0x97e   : > { %7438 = vmatpush1.bf16.msra.mxu0 %v7437_v52  ;;  %v7581_v52 = vpack.c.bf16 %v4330_v61, %v4322_v59  ;;  %v7591_v43 = vpack.c.bf16 %v4379_v38, %v4371_v37  ;;  %v4395_v22 = vld [vmem:[#allocation29 + $0xf78] sm:$0xff]  ;;  %v4401_v61 = vld [vmem:[#allocation29 + $0xfa8] sm:$0xff] }
 0x97f   : > { %7566 = vmatpush1.bf16.msra.mxu1 %v7565_v12  ;;  %7440 = vmatprep.subr.bf16.mxu0 %v7439_v14  ;;  %v7455_v12 = vpack.c.bf16 %v4345_v0, %v4337_v62  ;;  %v4336_v14 = vld [vmem:[#allocation29 + $0xda0] sm:$0xff]  ;;  %v7595_v59 = vpack.c.bf16 %v4395_v22, %v4387_v46  ;;  %v4409_v62 = vld [vmem:[#allocation29 + $0xfe8] sm:$0xff]  ;;  %v4403_v0 = vld [vmem:[#allocation29 + $0xfb8] sm:$0xff] }
 0x980   : > { %7568 = vmatprep.subr.bf16.mxu1 %v7567_v4  ;;  %v4346_v4 = vld [vmem:[#allocation29 + $0xdf0] sm:$0xff]  ;;  %v7457_v27 = vpack.c.bf16 %v4344_v16, %v4336_v14  ;;  %v4411_v13 = vld [vmem:[#allocation29 + $0xff8] sm:$0xff]  ;;  %v4408_v14 = vld [vmem:[#allocation29 + $0xfe0] sm:$0xff] }
 0x981   : > { %v4402_v16 = vld [vmem:[#allocation29 + $0xfb0] sm:$0xff]  ;;  %v3391_v24 = vld [vmem:[#allocation28 + $0x18] sm:$0xff]  ;;  %v3413_v37 = vld [vmem:[#allocation28 + $0xc8] sm:$0xff] }
 0x982   : > { %7442 = vmatpush1.bf16.msra.mxu0 %v7441_v28  ;;  %v7585_v28 = vpack.c.bf16 %v4346_v4, %v4338_v18  ;;  %v7599_v18 = vpack.c.bf16 %v4411_v13, %v4403_v0  ;;  %v3389_v4 = vld [vmem:[#allocation28 + $0x8] sm:$0xff]  ;;  %v3399_v26 = vld [vmem:[#allocation28 + $0x58] sm:$0xff] }
 0x983   : > { %7570 = vmatpush1.bf16.msra.mxu1 %v7569_v29  ;;  %7444 = vmatprep.subr.bf16.mxu0 %v7443_v31  ;;  %v7459_v29 = vpack.c.bf16 %v4361_v23, %v4353_v19  ;;  %v4352_v31 = vld [vmem:[#allocation29 + $0xe20] sm:$0xff]  ;;  %v3397_v19 = vld [vmem:[#allocation28 + $0x48] sm:$0xff]  ;;  %v3367_v23 = vrot.slane %v9920_v11, %v9760_v15  ;;  %v3423_v22 = vld [vmem:[#allocation28 + $0x118] sm:$0xff] }
 0x984   : > { %7572 = vmatprep.subr.bf16.mxu1 %v7571_v20  ;;  %v4362_v20 = vld [vmem:[#allocation29 + $0xe70] sm:$0xff]  ;;  %v7461_v39 = vpack.c.bf16 %v4360_v32, %v4352_v31  ;;  %v3388_v31 = vld [vmem:[#allocation28] sm:$0xff]  ;;  %v3445_v0 = vld [vmem:[#allocation28 + $0x1c8] sm:$0xff] }
 0x985   : > { %v3396_v32 = vld [vmem:[#allocation28 + $0x40] sm:$0xff]  ;;  %v3439_v13 = vld [vmem:[#allocation28 + $0x198] sm:$0xff] }
 0x986   : > { %7446 = vmatpush1.bf16.msra.mxu0 %v7445_v63  ;;  %v7589_v63 = vpack.c.bf16 %v4362_v20, %v4354_v33  ;;  %v7731_v33 = vpack.c.bf16 %v3399_v26, %v3391_v24  ;;  %v3398_v20 = vld [vmem:[#allocation28 + $0x50] sm:$0xff]  ;;  %v7605_v38 = vpack.c.bf16 %v3396_v32, %v3388_v31  ;;  %v3463_v24 = vld [vmem:[#allocation28 + $0x258] sm:$0xff]  ;;  %v3460_v31 = vld [vmem:[#allocation28 + $0x240] sm:$0xff] }
 0x987   : > { %7574 = vmatpush1.bf16.msra.mxu1 %v7573_v40  ;;  %7448 = vmatprep.subr.bf16.mxu0 %v7447_v42  ;;  %v7463_v40 = vpack.c.bf16 %v4377_v36, %v4369_v35  ;;  %v4368_v42 = vld [vmem:[#allocation29 + $0xea0] sm:$0xff]  ;;  %v3381_v35 = vadd.f32 %v3367_v23, %v9930_v5  ;;  %v3405_v36 = vld [vmem:[#allocation28 + $0x88] sm:$0xff]  ;;  %v3455_v23 = vld [vmem:[#allocation28 + $0x218] sm:$0xff] }
 0x988   : > { %7576 = vmatprep.subr.bf16.mxu1 %v7575_v47  ;;  %v4378_v47 = vld [vmem:[#allocation29 + $0xef0] sm:$0xff]  ;;  %v7465_v48 = vpack.c.bf16 %v4376_v54, %v4368_v42  ;;  %v3404_v42 = vld [vmem:[#allocation28 + $0x80] sm:$0xff] }
 0x989   : > { %v3412_v54 = vld [vmem:[#allocation28 + $0xc0] sm:$0xff]  ;;  %v9937_v46 = vmax.f32 %v3381_v35, 0.0  ;;  %v3454_v32 = vld [vmem:[#allocation28 + $0x210] sm:$0xff]  ;;  %v3477_v35 = vld [vmem:[#allocation28 + $0x2c8] sm:$0xff] }
 0x98a   : > { %7450 = vmatpush1.bf16.msra.mxu0 %v7449_v49  ;;  %v7593_v49 = vpack.c.bf16 %v4378_v47, %v4370_v57  ;;  %v3406_v57 = vld [vmem:[#allocation28 + $0x90] sm:$0xff] }
 0x98b   : > { %7578 = vmatpush1.bf16.msra.mxu1 %v7577_v50  ;;  %7452 = vmatprep.subr.bf16.mxu0 %v7451_v51  ;;  %v7467_v50 = vpack.c.bf16 %v4393_v45, %v4385_v44  ;;  %v4384_v51 = vld [vmem:[#allocation29 + $0xf20] sm:$0xff]  ;;  %v3414_v47 = vld [vmem:[#allocation28 + $0xd0] sm:$0xff]  ;;  %v3421_v44 = vld [vmem:[#allocation28 + $0x108] sm:$0xff] }
 0x98c   : > { %7580 = vmatprep.subr.bf16.mxu1 %v7579_v60  ;;  %v4394_v60 = vld [vmem:[#allocation29 + $0xf70] sm:$0xff]  ;;  %v7469_v6 = vpack.c.bf16 %v4392_v53, %v4384_v51  ;;  %v3429_v45 = vld [vmem:[#allocation28 + $0x148] sm:$0xff]  ;;  %v3420_v53 = vld [vmem:[#allocation28 + $0x100] sm:$0xff] }
 0x98d   : > { %v7611_v51 = vpack.c.bf16 %v3429_v45, %v3421_v44  ;;  %v3493_v44 = vld [vmem:[#allocation28 + $0x348] sm:$0xff]  ;;  %v3487_v45 = vld [vmem:[#allocation28 + $0x318] sm:$0xff] }
 0x98e   : > { %7454 = vmatpush1.bf16.msra.mxu0 %v7453_v7  ;;  %v7597_v7 = vpack.c.bf16 %v4394_v60, %v4386_v56  ;;  %v3428_v56 = vld [vmem:[#allocation28 + $0x140] sm:$0xff] }
 0x98f   : > { %7582 = vmatpush1.bf16.msra.mxu1 %v7581_v52  ;;  %7456 = vmatprep.subr.bf16.mxu0 %v7455_v12  ;;  %v7471_v52 = vpack.c.bf16 %v4409_v62, %v4401_v61  ;;  %v4400_v12 = vld [vmem:[#allocation29 + $0xfa0] sm:$0xff]  ;;  %v3430_v61 = vld [vmem:[#allocation28 + $0x150] sm:$0xff]  ;;  %v3437_v62 = vld [vmem:[#allocation28 + $0x188] sm:$0xff] }
 0x990   : > { %7584 = vmatprep.subr.bf16.mxu1 %v7583_v17  ;;  %v4410_v17 = vld [vmem:[#allocation29 + $0xff0] sm:$0xff] }
 0x992   : > { %7458 = vmatpush1.bf16.msra.mxu0 %v7457_v27  ;;  %v7473_v27 = vpack.c.bf16 %v4408_v14, %v4400_v12  ;;  %v3436_v12 = vld [vmem:[#allocation28 + $0x180] sm:$0xff] }
 0x993   : > { %7586 = vmatpush1.bf16.msra.mxu1 %v7585_v28  ;;  %7460 = vmatprep.subr.bf16.mxu0 %v7459_v29  ;;  %v7601_v28 = vpack.c.bf16 %v4410_v17, %v4402_v16  ;;  %v7603_v29 = vpack.c.bf16 %v3397_v19, %v3389_v4  ;;  %v3444_v14 = vld [vmem:[#allocation28 + $0x1c0] sm:$0xff]  ;;  %v3438_v16 = vld [vmem:[#allocation28 + $0x190] sm:$0xff]  ;;  %v3453_v4 = vld [vmem:[#allocation28 + $0x208] sm:$0xff] }
 0x994   : > { %7588 = vmatprep.subr.bf16.mxu1 %v7587_v34  ;;  %v3390_v34 = vld [vmem:[#allocation28 + $0x10] sm:$0xff]  ;;  %v3461_v19 = vld [vmem:[#allocation28 + $0x248] sm:$0xff]  ;;  %v7617_v26 = vpack.c.bf16 %v3444_v14, %v3436_v12 }
 0x995   : > { %v3446_v17 = vld [vmem:[#allocation28 + $0x1d0] sm:$0xff] }
 0x996   : > { %7462 = vmatpush1.bf16.msra.mxu0 %v7461_v39  ;;  %v3407_v39 = vld [vmem:[#allocation28 + $0x98] sm:$0xff]  ;;  %v3502_v12 = vld [vmem:[#allocation28 + $0x390] sm:$0xff] }
 0x997   : > { %7590 = vmatpush1.bf16.msra.mxu1 %v7589_v63  ;;  %7464 = vmatprep.subr.bf16.mxu0 %v7463_v40  ;;  %v3415_v63 = vld [vmem:[#allocation28 + $0xd8] sm:$0xff]  ;;  %v7733_v40 = vpack.c.bf16 %v3398_v20, %v3390_v34  ;;  %v3462_v34 = vld [vmem:[#allocation28 + $0x250] sm:$0xff]  ;;  %v3469_v20 = vld [vmem:[#allocation28 + $0x288] sm:$0xff] }
 0x998   : > { %7592 = vmatprep.subr.bf16.mxu1 %v7591_v43  ;;  %v7607_v43 = vpack.c.bf16 %v3413_v37, %v3405_v36  ;;  %v7735_v5 = vpack.c.bf16 %v3415_v63, %v3407_v39  ;;  %v3471_v36 = vld [vmem:[#allocation28 + $0x298] sm:$0xff]  ;;  %v7749_v39 = vpack.c.bf16 %v3462_v34, %v3454_v32  ;;  %v7623_v63 = vpack.c.bf16 %v3477_v35, %v3469_v20  ;;  %v3526_v32 = vld [vmem:[#allocation28 + $0x450] sm:$0xff]  ;;  %v3541_v34 = vld [vmem:[#allocation28 + $0x4c8] sm:$0xff] }
 0x999   : > { %v3479_v37 = vld [vmem:[#allocation28 + $0x2d8] sm:$0xff] }
 0x99a   : > { %7466 = vmatpush1.bf16.msra.mxu0 %v7465_v48  ;;  %v3431_v48 = vld [vmem:[#allocation28 + $0x158] sm:$0xff] }
 0x99b   : > { %7594 = vmatpush1.bf16.msra.mxu1 %v7593_v49  ;;  %7468 = vmatprep.subr.bf16.mxu0 %v7467_v50  ;;  %v7609_v49 = vpack.c.bf16 %v3412_v54, %v3404_v42  ;;  %v7737_v50 = vpack.c.bf16 %v3414_v47, %v3406_v57  ;;  %v7739_v60 = vpack.c.bf16 %v3431_v48, %v3423_v22  ;;  %v3476_v42 = vld [vmem:[#allocation28 + $0x2c0] sm:$0xff]  ;;  %v3470_v54 = vld [vmem:[#allocation28 + $0x290] sm:$0xff]  ;;  %v3485_v47 = vld [vmem:[#allocation28 + $0x308] sm:$0xff] }
 0x99c   : > { %7596 = vmatprep.subr.bf16.mxu1 %v7595_v59  ;;  %v3422_v59 = vld [vmem:[#allocation28 + $0x110] sm:$0xff]  ;;  %v7751_v57 = vpack.c.bf16 %v3479_v37, %v3471_v36  ;;  %v3535_v20 = vld [vmem:[#allocation28 + $0x498] sm:$0xff] }
 0x99d   : > { %v3543_v35 = vld [vmem:[#allocation28 + $0x4d8] sm:$0xff] }
 0x99e   : > { %7470 = vmatpush1.bf16.msra.mxu0 %v7469_v6  ;;  %v7613_v6 = vpack.c.bf16 %v3428_v56, %v3420_v53  ;;  %v3486_v53 = vld [vmem:[#allocation28 + $0x310] sm:$0xff] }
 0x99f   : > { %7598 = vmatpush1.bf16.msra.mxu1 %v7597_v7  ;;  %7472 = vmatprep.subr.bf16.mxu0 %v7471_v52  ;;  %v7741_v7 = vpack.c.bf16 %v3430_v61, %v3422_v59  ;;  %v7615_v52 = vpack.c.bf16 %v3445_v0, %v3437_v62  ;;  %v3494_v59 = vld [vmem:[#allocation28 + $0x350] sm:$0xff]  ;;  %v3509_v61 = vld [vmem:[#allocation28 + $0x3c8] sm:$0xff]  ;;  %v3503_v62 = vld [vmem:[#allocation28 + $0x398] sm:$0xff] }
 0x9a0   : > { %7600 = vmatprep.subr.bf16.mxu1 %v7599_v18  ;;  %v3511_v0 = vld [vmem:[#allocation28 + $0x3d8] sm:$0xff] }
 0x9a1   : > { %v7759_v14 = vpack.c.bf16 %v3511_v0, %v3503_v62 }
 0x9a2   : > { %7474 = vmatpush1.bf16.msra.mxu0 %v7473_v27  ;;  %v7745_v27 = vpack.c.bf16 %v3446_v17, %v3438_v16  ;;  %v3510_v16 = vld [vmem:[#allocation28 + $0x3d0] sm:$0xff]  ;;  %v3525_v17 = vld [vmem:[#allocation28 + $0x448] sm:$0xff] }
 0x9a3   : > { %7602 = vmatpush1.bf16.msra.mxu1 %v7601_v28  ;;  %7604 = vmatprep.subr.bf16.mxu0 %v7603_v29  ;;  %v7619_v28 = vpack.c.bf16 %v3461_v19, %v3453_v4  ;;  %v3452_v29 = vld [vmem:[#allocation28 + $0x200] sm:$0xff]  ;;  %v3519_v4 = vld [vmem:[#allocation28 + $0x418] sm:$0xff] }
 0x9a4   : > { %7732 = vmatprep.subr.bf16.mxu1 %v7731_v33  ;;  %v7747_v33 = vpack.c.bf16 %v3463_v24, %v3455_v23  ;;  %v3527_v19 = vld [vmem:[#allocation28 + $0x458] sm:$0xff]  ;;  %v7761_v24 = vpack.c.bf16 %v3510_v16, %v3502_v12  ;;  %v3574_v12 = vld [vmem:[#allocation28 + $0x5d0] sm:$0xff]  ;;  %v3589_v16 = vld [vmem:[#allocation28 + $0x648] sm:$0xff] }
 0x9a5   : > { %4832 = vmatmul.mubr.f32.vlgmr.msra.gmra.mrb[8].mxu0 %v9820_v10 }
 0x9a6   : > { %4974 = vmatmul.mubr.f32.vlgmr.msra.gmra.mrb[14].mxu1 %v9820_v10  ;;  %7606 = vmatpush1.bf16.msra.mxu0 %v7605_v38  ;;  %v3447_v10 = vld [vmem:[#allocation28 + $0x1d8] sm:$0xff]  ;;  %v7621_v38 = vpack.c.bf16 %v3460_v31, %v3452_v29  ;;  %v3518_v29 = vld [vmem:[#allocation28 + $0x410] sm:$0xff]  ;;  %v7763_v31 = vpack.c.bf16 %v3527_v19, %v3519_v4 }
 0x9a7   : > { %5044 = vmatprep.mubr.f32.mxu0 %v9937_v46  ;;  %7734 = vmatpush1.bf16.msra.mxu1 %v7733_v40  ;;  %v7743_v18 = vpack.c.bf16 %v3447_v10, %v3439_v13  ;;  %v3468_v40 = vld [vmem:[#allocation28 + $0x280] sm:$0xff]  ;;  %v7757_v10 = vpack.c.bf16 %v3494_v59, %v3486_v53  ;;  %v7765_v37 = vpack.c.bf16 %v3526_v32, %v3518_v29  ;;  %v3558_v53 = vld [vmem:[#allocation28 + $0x550] sm:$0xff]  ;;  %v3573_v59 = vld [vmem:[#allocation28 + $0x5c8] sm:$0xff] }
 0x9a8   : > { %5186 = vmatprep.mubr.f32.mxu1 %v9937_v46  ;;  %7608 = vmatprep.subr.bf16.mxu0 %v7607_v43  ;;  %v3478_v43 = vld [vmem:[#allocation28 + $0x2d0] sm:$0xff]  ;;  %v7625_v22 = vpack.c.bf16 %v3476_v42, %v3468_v40  ;;  %v7767_v42 = vpack.c.bf16 %v3543_v35, %v3535_v20  ;;  %v3605_v32 = vld [vmem:[#allocation28 + $0x6c8] sm:$0xff] }
 0x9a9   : > { %7736 = vmatprep.subr.bf16.mxu1 %v7735_v5  ;;  %v3495_v5 = vld [vmem:[#allocation28 + $0x358] sm:$0xff]  ;;  %v7753_v48 = vpack.c.bf16 %v3478_v43, %v3470_v54  ;;  %v3534_v40 = vld [vmem:[#allocation28 + $0x490] sm:$0xff]  ;;  %v3557_v43 = vld [vmem:[#allocation28 + $0x548] sm:$0xff] }
 0x9aa   : > { %7610 = vmatpush1.bf16.msra.mxu0 %v7609_v49  ;;  %v7627_v49 = vpack.c.bf16 %v3493_v44, %v3485_v47  ;;  %v7755_v56 = vpack.c.bf16 %v3495_v5, %v3487_v45  ;;  %v3542_v54 = vld [vmem:[#allocation28 + $0x4d0] sm:$0xff]  ;;  %v3551_v47 = vld [vmem:[#allocation28 + $0x518] sm:$0xff] }
 0x9ab   : > { %7738 = vmatpush1.bf16.msra.mxu1 %v7737_v50  ;;  %7612 = vmatprep.subr.bf16.mxu0 %v7611_v51  ;;  %v3484_v50 = vld [vmem:[#allocation28 + $0x300] sm:$0xff]  ;;  %v3559_v44 = vld [vmem:[#allocation28 + $0x558] sm:$0xff]  ;;  %v7769_v5 = vpack.c.bf16 %v3542_v54, %v3534_v40  ;;  %v3590_v29 = vld [vmem:[#allocation28 + $0x650] sm:$0xff] }
 0x9ac   : > { %7740 = vmatprep.subr.bf16.mxu1 %v7739_v60  ;;  %v3492_v51 = vld [vmem:[#allocation28 + $0x340] sm:$0xff]  ;;  %v3501_v60 = vld [vmem:[#allocation28 + $0x388] sm:$0xff]  ;;  %v3606_v40 = vld [vmem:[#allocation28 + $0x6d0] sm:$0xff] }
 0x9ad   : > { %v7629_v13 = vpack.c.bf16 %v3492_v51, %v3484_v50  ;;  %v3550_v50 = vld [vmem:[#allocation28 + $0x510] sm:$0xff]  ;;  %v7771_v51 = vpack.c.bf16 %v3559_v44, %v3551_v47  ;;  %v3621_v54 = vld [vmem:[#allocation28 + $0x748] sm:$0xff] }
 0x9ae   : > { %7614 = vmatpush1.bf16.msra.mxu0 %v7613_v6  ;;  %v7631_v6 = vpack.c.bf16 %v3509_v61, %v3501_v60  ;;  %v3567_v60 = vld [vmem:[#allocation28 + $0x598] sm:$0xff]  ;;  %v7773_v0 = vpack.c.bf16 %v3558_v53, %v3550_v50  ;;  %v3622_v50 = vld [vmem:[#allocation28 + $0x750] sm:$0xff]  ;;  %v3637_v53 = vld [vmem:[#allocation28 + $0x7c8] sm:$0xff] }
 0x9af   : > { %7742 = vmatpush1.bf16.msra.mxu1 %v7741_v7  ;;  %7616 = vmatprep.subr.bf16.mxu0 %v7615_v52  ;;  %v3500_v7 = vld [vmem:[#allocation28 + $0x380] sm:$0xff]  ;;  %v3575_v61 = vld [vmem:[#allocation28 + $0x5d8] sm:$0xff] }
 0x9b0   : > { %7744 = vmatprep.subr.bf16.mxu1 %v7743_v18  ;;  %v3508_v52 = vld [vmem:[#allocation28 + $0x3c0] sm:$0xff]  ;;  %v3517_v18 = vld [vmem:[#allocation28 + $0x408] sm:$0xff] }
 0x9b1   : > { %v7633_v23 = vpack.c.bf16 %v3508_v52, %v3500_v7  ;;  %v3566_v7 = vld [vmem:[#allocation28 + $0x590] sm:$0xff]  ;;  %v7775_v52 = vpack.c.bf16 %v3575_v61, %v3567_v60  ;;  %v3363_v61 = vrot.slane %v9920_v11, %v9768_v9 }
 0x9b2   : > { %7618 = vmatpush1.bf16.msra.mxu0 %v7617_v26  ;;  %v7635_v26 = vpack.c.bf16 %v3525_v17, %v3517_v18  ;;  %v3583_v18 = vld [vmem:[#allocation28 + $0x618] sm:$0xff]  ;;  %v7777_v19 = vpack.c.bf16 %v3574_v12, %v3566_v7  ;;  %v3645_v12 = vld [vmem:[#allocation28 + $0x808] sm:$0xff] }
 0x9b3   : > { %7746 = vmatpush1.bf16.msra.mxu1 %v7745_v27  ;;  %7620 = vmatprep.subr.bf16.mxu0 %v7619_v28  ;;  %v3516_v27 = vld [vmem:[#allocation28 + $0x400] sm:$0xff]  ;;  %v3591_v17 = vld [vmem:[#allocation28 + $0x658] sm:$0xff] }
 0x9b4   : > { %7748 = vmatprep.subr.bf16.mxu1 %v7747_v33  ;;  %v3524_v28 = vld [vmem:[#allocation28 + $0x440] sm:$0xff]  ;;  %v3533_v33 = vld [vmem:[#allocation28 + $0x488] sm:$0xff] }
 0x9b5   : > { %v7637_v36 = vpack.c.bf16 %v3524_v28, %v3516_v27  ;;  %v3582_v27 = vld [vmem:[#allocation28 + $0x610] sm:$0xff]  ;;  %v7779_v28 = vpack.c.bf16 %v3591_v17, %v3583_v18  ;;  %v3655_v18 = vld [vmem:[#allocation28 + $0x858] sm:$0xff] }
 0x9b6   : > { %7622 = vmatpush1.bf16.msra.mxu0 %v7621_v38  ;;  %v7639_v38 = vpack.c.bf16 %v3541_v34, %v3533_v33  ;;  %v3599_v33 = vld [vmem:[#allocation28 + $0x698] sm:$0xff]  ;;  %v7781_v35 = vpack.c.bf16 %v3590_v29, %v3582_v27  ;;  %v3646_v27 = vld [vmem:[#allocation28 + $0x810] sm:$0xff]  ;;  %v3661_v29 = vld [vmem:[#allocation28 + $0x888] sm:$0xff] }
 0x9b7   : > { %7750 = vmatpush1.bf16.msra.mxu1 %v7749_v39  ;;  %7624 = vmatprep.subr.bf16.mxu0 %v7623_v63  ;;  %v3532_v39 = vld [vmem:[#allocation28 + $0x480] sm:$0xff]  ;;  %v3607_v34 = vld [vmem:[#allocation28 + $0x6d8] sm:$0xff] }
 0x9b8   : > { %7752 = vmatprep.subr.bf16.mxu1 %v7751_v57  ;;  %v3540_v63 = vld [vmem:[#allocation28 + $0x4c0] sm:$0xff]  ;;  %v3549_v57 = vld [vmem:[#allocation28 + $0x508] sm:$0xff] }
 0x9b9   : > { %v7641_v45 = vpack.c.bf16 %v3540_v63, %v3532_v39  ;;  %v3598_v39 = vld [vmem:[#allocation28 + $0x690] sm:$0xff]  ;;  %v7783_v63 = vpack.c.bf16 %v3607_v34, %v3599_v33  ;;  %v3663_v33 = vld [vmem:[#allocation28 + $0x898] sm:$0xff] }
 0x9ba   : > { %7626 = vmatpush1.bf16.msra.mxu0 %v7625_v22  ;;  %v7643_v22 = vpack.c.bf16 %v3557_v43, %v3549_v57  ;;  %v3615_v57 = vld [vmem:[#allocation28 + $0x718] sm:$0xff]  ;;  %v7785_v44 = vpack.c.bf16 %v3606_v40, %v3598_v39  ;;  %v3670_v39 = vld [vmem:[#allocation28 + $0x8d0] sm:$0xff]  ;;  %v3685_v40 = vld [vmem:[#allocation28 + $0x948] sm:$0xff] }
 0x9bb   : > { %7754 = vmatpush1.bf16.msra.mxu1 %v7753_v48  ;;  %7628 = vmatprep.subr.bf16.mxu0 %v7627_v49  ;;  %v3548_v48 = vld [vmem:[#allocation28 + $0x500] sm:$0xff]  ;;  %v3623_v43 = vld [vmem:[#allocation28 + $0x758] sm:$0xff] }
 0x9bc   : > { %7756 = vmatprep.subr.bf16.mxu1 %v7755_v56  ;;  %v3556_v49 = vld [vmem:[#allocation28 + $0x540] sm:$0xff]  ;;  %v3565_v56 = vld [vmem:[#allocation28 + $0x588] sm:$0xff]  ;;  %v3671_v34 = vld [vmem:[#allocation28 + $0x8d8] sm:$0xff] }
 0x9bd   : > { %v7645_v62 = vpack.c.bf16 %v3556_v49, %v3548_v48  ;;  %v3614_v48 = vld [vmem:[#allocation28 + $0x710] sm:$0xff]  ;;  %v7787_v49 = vpack.c.bf16 %v3623_v43, %v3615_v57  ;;  %v3679_v57 = vld [vmem:[#allocation28 + $0x918] sm:$0xff] }
 0x9be   : > { %7630 = vmatpush1.bf16.msra.mxu0 %v7629_v13  ;;  %v7647_v13 = vpack.c.bf16 %v3573_v59, %v3565_v56  ;;  %v3631_v56 = vld [vmem:[#allocation28 + $0x798] sm:$0xff] }
 0x9bf   : > { %7758 = vmatpush1.bf16.msra.mxu1 %v7757_v10  ;;  %7632 = vmatprep.subr.bf16.mxu0 %v7631_v6  ;;  %v3564_v10 = vld [vmem:[#allocation28 + $0x580] sm:$0xff]  ;;  %v3639_v59 = vld [vmem:[#allocation28 + $0x7d8] sm:$0xff] }
 0x9c0   : > { %7760 = vmatprep.subr.bf16.mxu1 %v7759_v14  ;;  %v3572_v6 = vld [vmem:[#allocation28 + $0x5c0] sm:$0xff]  ;;  %v3581_v14 = vld [vmem:[#allocation28 + $0x608] sm:$0xff]  ;;  %v7791_v7 = vpack.c.bf16 %v3639_v59, %v3631_v56  ;;  %v3687_v43 = vld [vmem:[#allocation28 + $0x958] sm:$0xff] }
 0x9c1   : > { %v7649_v4 = vpack.c.bf16 %v3572_v6, %v3564_v10  ;;  %v3636_v10 = vld [vmem:[#allocation28 + $0x7c0] sm:$0xff]  ;;  %v3630_v6 = vld [vmem:[#allocation28 + $0x790] sm:$0xff]  ;;  %v3703_v56 = vld [vmem:[#allocation28 + $0x9d8] sm:$0xff] }
 0x9c2   : > { %7634 = vmatpush1.bf16.msra.mxu0 %v7633_v23  ;;  %v7651_v23 = vpack.c.bf16 %v3589_v16, %v3581_v14  ;;  %v3653_v14 = vld [vmem:[#allocation28 + $0x848] sm:$0xff]  ;;  %v3647_v16 = vld [vmem:[#allocation28 + $0x818] sm:$0xff] }
 0x9c3   : > { %7762 = vmatpush1.bf16.msra.mxu1 %v7761_v24  ;;  %7636 = vmatprep.subr.bf16.mxu0 %v7635_v26  ;;  %v3580_v24 = vld [vmem:[#allocation28 + $0x600] sm:$0xff] }
 0x9c4   : > { %7764 = vmatprep.subr.bf16.mxu1 %v7763_v31  ;;  %v3588_v26 = vld [vmem:[#allocation28 + $0x640] sm:$0xff]  ;;  %v3597_v31 = vld [vmem:[#allocation28 + $0x688] sm:$0xff] }
 0x9c5   : > { %v7653_v20 = vpack.c.bf16 %v3588_v26, %v3580_v24  ;;  %v3652_v24 = vld [vmem:[#allocation28 + $0x840] sm:$0xff]  ;;  %v7795_v26 = vpack.c.bf16 %v3655_v18, %v3647_v16 }
 0x9c6   : > { %7638 = vmatpush1.bf16.msra.mxu0 %v7637_v36  ;;  %v7655_v36 = vpack.c.bf16 %v3605_v32, %v3597_v31  ;;  %v3669_v31 = vld [vmem:[#allocation28 + $0x8c8] sm:$0xff] }
 0x9c7   : > { %7766 = vmatpush1.bf16.msra.mxu1 %v7765_v37  ;;  %7640 = vmatprep.subr.bf16.mxu0 %v7639_v38  ;;  %v3596_v37 = vld [vmem:[#allocation28 + $0x680] sm:$0xff] }
 0x9c8   : > { %7768 = vmatprep.subr.bf16.mxu1 %v7767_v42  ;;  %v3604_v38 = vld [vmem:[#allocation28 + $0x6c0] sm:$0xff]  ;;  %v3613_v42 = vld [vmem:[#allocation28 + $0x708] sm:$0xff] }
 0x9c9   : > { %v7657_v47 = vpack.c.bf16 %v3604_v38, %v3596_v37  ;;  %v3662_v37 = vld [vmem:[#allocation28 + $0x890] sm:$0xff]  ;;  %v7671_v38 = vpack.c.bf16 %v3669_v31, %v3661_v29  ;;  %v3735_v29 = vld [vmem:[#allocation28 + $0xad8] sm:$0xff] }
 0x9ca   : > { %7642 = vmatpush1.bf16.msra.mxu0 %v7641_v45  ;;  %v7659_v45 = vpack.c.bf16 %v3621_v54, %v3613_v42  ;;  %v9949_v42 = vmax.f32 %v9932_v8, 0.0  ;;  %v7799_v54 = vpack.c.bf16 %v3671_v34, %v3663_v33  ;;  %v7803_v8 = vpack.c.bf16 %v3687_v43, %v3679_v57  ;;  %v3724_v34 = vld [vmem:[#allocation28 + $0xa80] sm:$0xff] }
 0x9cb   : > { %7770 = vmatpush1.bf16.msra.mxu1 %v7769_v5  ;;  %7644 = vmatprep.subr.bf16.mxu0 %v7643_v22  ;;  %v3612_v5 = vld [vmem:[#allocation28 + $0x700] sm:$0xff] }
 0x9cc   : > { %7772 = vmatprep.subr.bf16.mxu1 %v7771_v51  ;;  %v3620_v22 = vld [vmem:[#allocation28 + $0x740] sm:$0xff]  ;;  %v3629_v51 = vld [vmem:[#allocation28 + $0x788] sm:$0xff] }
 0x9cd   : > { %v7661_v60 = vpack.c.bf16 %v3620_v22, %v3612_v5  ;;  %v3676_v5 = vld [vmem:[#allocation28 + $0x900] sm:$0xff] }
 0x9ce   : > { %7646 = vmatpush1.bf16.msra.mxu0 %v7645_v62  ;;  %v7789_v62 = vpack.c.bf16 %v3622_v50, %v3614_v48  ;;  %v3684_v22 = vld [vmem:[#allocation28 + $0x940] sm:$0xff]  ;;  %v3678_v48 = vld [vmem:[#allocation28 + $0x910] sm:$0xff]  ;;  %v3693_v50 = vld [vmem:[#allocation28 + $0x988] sm:$0xff] }
 0x9cf   : > { %7774 = vmatpush1.bf16.msra.mxu1 %v7773_v0  ;;  %7648 = vmatprep.subr.bf16.mxu0 %v7647_v13  ;;  %v7663_v0 = vpack.c.bf16 %v3637_v53, %v3629_v51  ;;  %v3628_v13 = vld [vmem:[#allocation28 + $0x780] sm:$0xff]  ;;  %v3701_v51 = vld [vmem:[#allocation28 + $0x9c8] sm:$0xff]  ;;  %v3695_v53 = vld [vmem:[#allocation28 + $0x998] sm:$0xff]  ;;  %v7677_v59 = vpack.c.bf16 %v3684_v22, %v3676_v5 }
 0x9d0   : > { %7776 = vmatprep.subr.bf16.mxu1 %v7775_v52  ;;  %v3638_v52 = vld [vmem:[#allocation28 + $0x7d0] sm:$0xff]  ;;  %v7665_v17 = vpack.c.bf16 %v3636_v10, %v3628_v13  ;;  %v7807_v10 = vpack.c.bf16 %v3703_v56, %v3695_v53 }
 0x9d1   : > { %v7793_v11 = vpack.c.bf16 %v3638_v52, %v3630_v6  ;;  %v3694_v13 = vld [vmem:[#allocation28 + $0x990] sm:$0xff]  ;;  %v3717_v52 = vld [vmem:[#allocation28 + $0xa48] sm:$0xff] }
 0x9d2   : > { %7650 = vmatpush1.bf16.msra.mxu0 %v7649_v4  ;;  %v3380_v4 = vadd.f32 %v3363_v61, %v9926_v58  ;;  %v7679_v61 = vpack.c.bf16 %v3701_v51, %v3693_v50  ;;  %v3702_v6 = vld [vmem:[#allocation28 + $0x9d0] sm:$0xff]  ;;  %v3767_v50 = vld [vmem:[#allocation28 + $0xbd8] sm:$0xff] }
 0x9d3   : > { %7778 = vmatpush1.bf16.msra.mxu1 %v7777_v19  ;;  %7652 = vmatprep.subr.bf16.mxu0 %v7651_v23  ;;  %v7667_v19 = vpack.c.bf16 %v3653_v14, %v3645_v12  ;;  %v3644_v23 = vld [vmem:[#allocation28 + $0x800] sm:$0xff]  ;;  %v3711_v12 = vld [vmem:[#allocation28 + $0xa18] sm:$0xff]  ;;  %v7809_v18 = vpack.c.bf16 %v3702_v6, %v3694_v13  ;;  %v3750_v22 = vld [vmem:[#allocation28 + $0xb50] sm:$0xff] }
 0x9d4   : > { %7780 = vmatprep.subr.bf16.mxu1 %v7779_v28  ;;  %v3654_v28 = vld [vmem:[#allocation28 + $0x850] sm:$0xff]  ;;  %v7669_v32 = vpack.c.bf16 %v3652_v24, %v3644_v23  ;;  %v3719_v14 = vld [vmem:[#allocation28 + $0xa58] sm:$0xff]  ;;  %v3773_v13 = vld [vmem:[#allocation28 + $0xc08] sm:$0xff] }
 0x9d5   : > { %v7797_v58 = vpack.c.bf16 %v3654_v28, %v3646_v27  ;;  %v7811_v23 = vpack.c.bf16 %v3719_v14, %v3711_v12  ;;  %v3718_v24 = vld [vmem:[#allocation28 + $0xa50] sm:$0xff]  ;;  %v3733_v27 = vld [vmem:[#allocation28 + $0xac8] sm:$0xff]  ;;  %v3727_v28 = vld [vmem:[#allocation28 + $0xa98] sm:$0xff] }
 0x9d6   : > { %7654 = vmatpush1.bf16.msra.mxu0 %v7653_v20  ;;  %v9946_v20 = vmax.f32 %v3380_v4, 0.0  ;;  %v3708_v4 = vld [vmem:[#allocation28 + $0xa00] sm:$0xff]  ;;  %v3775_v6 = vld [vmem:[#allocation28 + $0xc18] sm:$0xff] }
 0x9d7   : > { %7782 = vmatpush1.bf16.msra.mxu1 %v7781_v35  ;;  %7656 = vmatprep.subr.bf16.mxu0 %v7655_v36  ;;  %v3660_v35 = vld [vmem:[#allocation28 + $0x880] sm:$0xff] }
 0x9d8   : > { %7784 = vmatprep.subr.bf16.mxu1 %v7783_v63  ;;  %v3668_v36 = vld [vmem:[#allocation28 + $0x8c0] sm:$0xff]  ;;  %v3677_v63 = vld [vmem:[#allocation28 + $0x908] sm:$0xff] }
 0x9da   : > { %7658 = vmatpush1.bf16.msra.mxu0 %v7657_v47  ;;  %v7673_v47 = vpack.c.bf16 %v3668_v36, %v3660_v35  ;;  %v3726_v35 = vld [vmem:[#allocation28 + $0xa90] sm:$0xff]  ;;  %v7815_v36 = vpack.c.bf16 %v3735_v29, %v3727_v28 }
 0x9db   : > { %7786 = vmatpush1.bf16.msra.mxu1 %v7785_v44  ;;  %7660 = vmatprep.subr.bf16.mxu0 %v7659_v45  ;;  %v7801_v44 = vpack.c.bf16 %v3670_v39, %v3662_v37  ;;  %v7675_v45 = vpack.c.bf16 %v3685_v40, %v3677_v63  ;;  %v3734_v37 = vld [vmem:[#allocation28 + $0xad0] sm:$0xff]  ;;  %v3749_v39 = vld [vmem:[#allocation28 + $0xb48] sm:$0xff]  ;;  %v3743_v63 = vld [vmem:[#allocation28 + $0xb18] sm:$0xff] }
 0x9dc   : > { %7788 = vmatprep.subr.bf16.mxu1 %v7787_v49  ;;  %v3686_v49 = vld [vmem:[#allocation28 + $0x950] sm:$0xff]  ;;  %v3751_v40 = vld [vmem:[#allocation28 + $0xb58] sm:$0xff]  ;;  %v7817_v57 = vpack.c.bf16 %v3734_v37, %v3726_v35  ;;  %v3805_v35 = vld [vmem:[#allocation28 + $0xd08] sm:$0xff] }
 0x9dd   : > { %v7819_v5 = vpack.c.bf16 %v3751_v40, %v3743_v63  ;;  %v3807_v37 = vld [vmem:[#allocation28 + $0xd18] sm:$0xff] }
 0x9de   : > { %7662 = vmatpush1.bf16.msra.mxu0 %v7661_v60  ;;  %v7805_v60 = vpack.c.bf16 %v3686_v49, %v3678_v48  ;;  %v3757_v48 = vld [vmem:[#allocation28 + $0xb88] sm:$0xff]  ;;  %v3759_v49 = vld [vmem:[#allocation28 + $0xb98] sm:$0xff] }
 0x9df   : > { %7790 = vmatpush1.bf16.msra.mxu1 %v7789_v62  ;;  %7664 = vmatprep.subr.bf16.mxu0 %v7663_v0  ;;  %v3692_v62 = vld [vmem:[#allocation28 + $0x980] sm:$0xff] }
 0x9e0   : > { %7792 = vmatprep.subr.bf16.mxu1 %v7791_v7  ;;  %v3700_v0 = vld [vmem:[#allocation28 + $0x9c0] sm:$0xff]  ;;  %v3709_v7 = vld [vmem:[#allocation28 + $0xa08] sm:$0xff] }
 0x9e1   : > { %v7681_v16 = vpack.c.bf16 %v3700_v0, %v3692_v62  ;;  %v7823_v62 = vpack.c.bf16 %v3767_v50, %v3759_v49  ;;  %v3766_v0 = vld [vmem:[#allocation28 + $0xbd0] sm:$0xff] }
 0x9e2   : > { %7666 = vmatpush1.bf16.msra.mxu0 %v7665_v17  ;;  %v7683_v17 = vpack.c.bf16 %v3717_v52, %v3709_v7  ;;  %v3783_v7 = vld [vmem:[#allocation28 + $0xc58] sm:$0xff] }
 0x9e3   : > { %7794 = vmatpush1.bf16.msra.mxu1 %v7793_v11  ;;  %7668 = vmatprep.subr.bf16.mxu0 %v7667_v19  ;;  %v3716_v11 = vld [vmem:[#allocation28 + $0xa40] sm:$0xff]  ;;  %v3710_v19 = vld [vmem:[#allocation28 + $0xa10] sm:$0xff] }
 0x9e4   : > { %7796 = vmatprep.subr.bf16.mxu1 %v7795_v26  ;;  %v3725_v26 = vld [vmem:[#allocation28 + $0xa88] sm:$0xff]  ;;  %v7685_v31 = vpack.c.bf16 %v3716_v11, %v3708_v4  ;;  %v7827_v4 = vpack.c.bf16 %v3783_v7, %v3775_v6  ;;  %v3782_v11 = vld [vmem:[#allocation28 + $0xc50] sm:$0xff] }
 0x9e5   : > { %5045 = vmatmul.mubr.f32.vlgmr.msra.gmra.mrb[6].mxu0 %v9946_v20  ;;  %v7687_v33 = vpack.c.bf16 %v3733_v27, %v3725_v26  ;;  %v3799_v26 = vld [vmem:[#allocation28 + $0xcd8] sm:$0xff] }
 0x9e6   : > { %5187 = vmatmul.mubr.f32.vlgmr.msra.gmra.mrb[12].mxu1 %v9946_v20  ;;  %7670 = vmatpush1.bf16.msra.mxu0 %v7669_v32  ;;  %v7813_v32 = vpack.c.bf16 %v3718_v24, %v3710_v19  ;;  %v3789_v19 = vld [vmem:[#allocation28 + $0xc88] sm:$0xff]  ;;  %v3791_v24 = vld [vmem:[#allocation28 + $0xc98] sm:$0xff] }
 0x9e7   : > { %5115 = vmatprep.mubr.f32.mxu0 %v9949_v42  ;;  %7798 = vmatpush1.bf16.msra.mxu1 %v7797_v58  ;;  %v3732_v58 = vld [vmem:[#allocation28 + $0xac0] sm:$0xff] }
 0x9e8   : > { %5257 = vmatprep.mubr.f32.mxu1 %v9949_v42  ;;  %7672 = vmatprep.subr.bf16.mxu0 %v7671_v38  ;;  %v3741_v38 = vld [vmem:[#allocation28 + $0xb08] sm:$0xff] }
 0x9e9   : > { %7800 = vmatprep.subr.bf16.mxu1 %v7799_v54  ;;  %v7689_v54 = vpack.c.bf16 %v3732_v58, %v3724_v34  ;;  %v7691_v43 = vpack.c.bf16 %v3749_v39, %v3741_v38  ;;  %v7831_v34 = vpack.c.bf16 %v3799_v26, %v3791_v24  ;;  %v3798_v58 = vld [vmem:[#allocation28 + $0xcd0] sm:$0xff]  ;;  %v3815_v38 = vld [vmem:[#allocation28 + $0xd58] sm:$0xff] }
 0x9ea   : > { %7674 = vmatpush1.bf16.msra.mxu0 %v7673_v47  ;;  %v3740_v47 = vld [vmem:[#allocation28 + $0xb00] sm:$0xff] }
 0x9eb   : > { %7802 = vmatpush1.bf16.msra.mxu1 %v7801_v44  ;;  %7676 = vmatprep.subr.bf16.mxu0 %v7675_v45  ;;  %v3748_v44 = vld [vmem:[#allocation28 + $0xb40] sm:$0xff]  ;;  %v3742_v45 = vld [vmem:[#allocation28 + $0xb10] sm:$0xff] }
 0x9ec   : > { %7804 = vmatprep.subr.bf16.mxu1 %v7803_v8  ;;  %v3765_v8 = vld [vmem:[#allocation28 + $0xbc8] sm:$0xff]  ;;  %v7693_v51 = vpack.c.bf16 %v3748_v44, %v3740_v47  ;;  %v7821_v53 = vpack.c.bf16 %v3750_v22, %v3742_v45  ;;  %v7835_v47 = vpack.c.bf16 %v3815_v38, %v3807_v37  ;;  %v3814_v44 = vld [vmem:[#allocation28 + $0xd50] sm:$0xff]  ;;  %v3823_v22 = vld [vmem:[#allocation28 + $0xd98] sm:$0xff] }
 0x9ed   : > { %v7695_v56 = vpack.c.bf16 %v3765_v8, %v3757_v48  ;;  %v3821_v45 = vld [vmem:[#allocation28 + $0xd88] sm:$0xff]  ;;  %v3831_v48 = vld [vmem:[#allocation28 + $0xdd8] sm:$0xff] }
 0x9ee   : > { %7678 = vmatpush1.bf16.msra.mxu0 %v7677_v59  ;;  %v3756_v59 = vld [vmem:[#allocation28 + $0xb80] sm:$0xff] }
 0x9ef   : > { %7806 = vmatpush1.bf16.msra.mxu1 %v7805_v60  ;;  %7680 = vmatprep.subr.bf16.mxu0 %v7679_v61  ;;  %v3764_v60 = vld [vmem:[#allocation28 + $0xbc0] sm:$0xff]  ;;  %v3758_v61 = vld [vmem:[#allocation28 + $0xb90] sm:$0xff] }
 0x9f0   : > { %7808 = vmatprep.subr.bf16.mxu1 %v7807_v10  ;;  %v3781_v10 = vld [vmem:[#allocation28 + $0xc48] sm:$0xff]  ;;  %v7697_v52 = vpack.c.bf16 %v3764_v60, %v3756_v59  ;;  %v7825_v12 = vpack.c.bf16 %v3766_v0, %v3758_v61  ;;  %v7839_v59 = vpack.c.bf16 %v3831_v48, %v3823_v22  ;;  %v3830_v60 = vld [vmem:[#allocation28 + $0xdd0] sm:$0xff]  ;;  %v3839_v0 = vld [vmem:[#allocation28 + $0xe18] sm:$0xff] }
 0x9f1   : > { %v7699_v14 = vpack.c.bf16 %v3781_v10, %v3773_v13  ;;  %v3837_v61 = vld [vmem:[#allocation28 + $0xe08] sm:$0xff]  ;;  %v3847_v13 = vld [vmem:[#allocation28 + $0xe58] sm:$0xff] }
 0x9f2   : > { %7682 = vmatpush1.bf16.msra.mxu0 %v7681_v16  ;;  %v3772_v16 = vld [vmem:[#allocation28 + $0xc00] sm:$0xff] }
 0x9f3   : > { %7810 = vmatpush1.bf16.msra.mxu1 %v7809_v18  ;;  %7684 = vmatprep.subr.bf16.mxu0 %v7683_v17  ;;  %v3780_v18 = vld [vmem:[#allocation28 + $0xc40] sm:$0xff]  ;;  %v3774_v17 = vld [vmem:[#allocation28 + $0xc10] sm:$0xff] }
 0x9f4   : > { %7812 = vmatprep.subr.bf16.mxu1 %v7811_v23  ;;  %v3797_v23 = vld [vmem:[#allocation28 + $0xcc8] sm:$0xff]  ;;  %v7701_v27 = vpack.c.bf16 %v3780_v18, %v3772_v16  ;;  %v7829_v28 = vpack.c.bf16 %v3782_v11, %v3774_v17  ;;  %v7843_v16 = vpack.c.bf16 %v3847_v13, %v3839_v0  ;;  %v3846_v18 = vld [vmem:[#allocation28 + $0xe50] sm:$0xff]  ;;  %v3855_v11 = vld [vmem:[#allocation28 + $0xe98] sm:$0xff] }
 0x9f5   : > { %v7703_v29 = vpack.c.bf16 %v3797_v23, %v3789_v19  ;;  %v3853_v17 = vld [vmem:[#allocation28 + $0xe88] sm:$0xff]  ;;  %v3863_v19 = vld [vmem:[#allocation28 + $0xed8] sm:$0xff] }
 0x9f6   : > { %7686 = vmatpush1.bf16.msra.mxu0 %v7685_v31  ;;  %v3788_v31 = vld [vmem:[#allocation28 + $0xc80] sm:$0xff] }
 0x9f7   : > { %7814 = vmatpush1.bf16.msra.mxu1 %v7813_v32  ;;  %7688 = vmatprep.subr.bf16.mxu0 %v7687_v33  ;;  %v3796_v32 = vld [vmem:[#allocation28 + $0xcc0] sm:$0xff]  ;;  %v3790_v33 = vld [vmem:[#allocation28 + $0xc90] sm:$0xff] }
 0x9f8   : > { %7816 = vmatprep.subr.bf16.mxu1 %v7815_v36  ;;  %v3813_v36 = vld [vmem:[#allocation28 + $0xd48] sm:$0xff]  ;;  %v7705_v39 = vpack.c.bf16 %v3796_v32, %v3788_v31  ;;  %v7833_v63 = vpack.c.bf16 %v3798_v58, %v3790_v33  ;;  %v7847_v31 = vpack.c.bf16 %v3863_v19, %v3855_v11  ;;  %v3862_v32 = vld [vmem:[#allocation28 + $0xed0] sm:$0xff]  ;;  %v3871_v58 = vld [vmem:[#allocation28 + $0xf18] sm:$0xff]  ;;  %v9956_v11 = vmax.f32 %v9928_v2, 0.0 }
 0x9f9   : > { %v7707_v40 = vpack.c.bf16 %v3813_v36, %v3805_v35  ;;  %v3869_v33 = vld [vmem:[#allocation28 + $0xf08] sm:$0xff]  ;;  %v3879_v35 = vld [vmem:[#allocation28 + $0xf58] sm:$0xff] }
 0x9fa   : > { %7690 = vmatpush1.bf16.msra.mxu0 %v7689_v54  ;;  %v3804_v54 = vld [vmem:[#allocation28 + $0xd00] sm:$0xff] }
 0x9fb   : > { %7818 = vmatpush1.bf16.msra.mxu1 %v7817_v57  ;;  %7692 = vmatprep.subr.bf16.mxu0 %v7691_v43  ;;  %v3812_v57 = vld [vmem:[#allocation28 + $0xd40] sm:$0xff]  ;;  %v3806_v43 = vld [vmem:[#allocation28 + $0xd10] sm:$0xff] }
 0x9fc   : > { %7820 = vmatprep.subr.bf16.mxu1 %v7819_v5  ;;  %v3829_v5 = vld [vmem:[#allocation28 + $0xdc8] sm:$0xff]  ;;  %v7709_v8 = vpack.c.bf16 %v3812_v57, %v3804_v54  ;;  %v7837_v49 = vpack.c.bf16 %v3814_v44, %v3806_v43  ;;  %v7851_v54 = vpack.c.bf16 %v3879_v35, %v3871_v58  ;;  %v3878_v57 = vld [vmem:[#allocation28 + $0xf50] sm:$0xff]  ;;  %v3887_v44 = vld [vmem:[#allocation28 + $0xf98] sm:$0xff] }
 0x9fd   : > { %v7711_v50 = vpack.c.bf16 %v3829_v5, %v3821_v45  ;;  %v3885_v43 = vld [vmem:[#allocation28 + $0xf88] sm:$0xff]  ;;  %v3895_v45 = vld [vmem:[#allocation28 + $0xfd8] sm:$0xff] }
 0x9fe   : > { %7694 = vmatpush1.bf16.msra.mxu0 %v7693_v51  ;;  %v3820_v51 = vld [vmem:[#allocation28 + $0xd80] sm:$0xff] }
 0x9ff   : > { %7822 = vmatpush1.bf16.msra.mxu1 %v7821_v53  ;;  %7696 = vmatprep.subr.bf16.mxu0 %v7695_v56  ;;  %v3828_v53 = vld [vmem:[#allocation28 + $0xdc0] sm:$0xff]  ;;  %v3822_v56 = vld [vmem:[#allocation28 + $0xd90] sm:$0xff] }
 0xa00   : > { %7824 = vmatprep.subr.bf16.mxu1 %v7823_v62  ;;  %v3845_v62 = vld [vmem:[#allocation28 + $0xe48] sm:$0xff]  ;;  %v7713_v10 = vpack.c.bf16 %v3828_v53, %v3820_v51  ;;  %v7841_v6 = vpack.c.bf16 %v3830_v60, %v3822_v56  ;;  %v7855_v51 = vpack.c.bf16 %v3895_v45, %v3887_v44  ;;  %v3894_v53 = vld [vmem:[#allocation28 + $0xfd0] sm:$0xff]  ;;  %v3395_v60 = vld [vmem:[#allocation28 + $0x38] sm:$0xff] }
 0xa01   : > { %v7715_v7 = vpack.c.bf16 %v3845_v62, %v3837_v61  ;;  %v3393_v56 = vld [vmem:[#allocation28 + $0x28] sm:$0xff]  ;;  %v3403_v61 = vld [vmem:[#allocation28 + $0x78] sm:$0xff] }
 0xa02   : > { %7698 = vmatpush1.bf16.msra.mxu0 %v7697_v52  ;;  %v3836_v52 = vld [vmem:[#allocation28 + $0xe00] sm:$0xff] }
 0xa03   : > { %7826 = vmatpush1.bf16.msra.mxu1 %v7825_v12  ;;  %7700 = vmatprep.subr.bf16.mxu0 %v7699_v14  ;;  %v3844_v12 = vld [vmem:[#allocation28 + $0xe40] sm:$0xff]  ;;  %v3838_v14 = vld [vmem:[#allocation28 + $0xe10] sm:$0xff] }
 0xa04   : > { %7828 = vmatprep.subr.bf16.mxu1 %v7827_v4  ;;  %v3861_v4 = vld [vmem:[#allocation28 + $0xec8] sm:$0xff]  ;;  %v7717_v23 = vpack.c.bf16 %v3844_v12, %v3836_v52  ;;  %v7845_v24 = vpack.c.bf16 %v3846_v18, %v3838_v14  ;;  %v3394_v52 = vld [vmem:[#allocation28 + $0x30] sm:$0xff] }
 0xa05   : > { %v7719_v26 = vpack.c.bf16 %v3861_v4, %v3853_v17  ;;  %v3402_v12 = vld [vmem:[#allocation28 + $0x70] sm:$0xff]  ;;  %v3409_v14 = vld [vmem:[#allocation28 + $0xa8] sm:$0xff]  ;;  %v3411_v17 = vld [vmem:[#allocation28 + $0xb8] sm:$0xff] }
 0xa06   : > { %7702 = vmatpush1.bf16.msra.mxu0 %v7701_v27  ;;  %v3852_v27 = vld [vmem:[#allocation28 + $0xe80] sm:$0xff]  ;;  %v3419_v4 = vld [vmem:[#allocation28 + $0xf8] sm:$0xff]  ;;  %v7989_v19 = vpack.c.bf16 %v3402_v12, %v3394_v52 }
 0xa07   : > { %7830 = vmatpush1.bf16.msra.mxu1 %v7829_v28  ;;  %7704 = vmatprep.subr.bf16.mxu0 %v7703_v29  ;;  %v3860_v28 = vld [vmem:[#allocation28 + $0xec0] sm:$0xff]  ;;  %v3854_v29 = vld [vmem:[#allocation28 + $0xe90] sm:$0xff]  ;;  %v3475_v52 = vld [vmem:[#allocation28 + $0x2b8] sm:$0xff] }
 0xa08   : > { %7832 = vmatprep.subr.bf16.mxu1 %v7831_v34  ;;  %v3877_v34 = vld [vmem:[#allocation28 + $0xf48] sm:$0xff]  ;;  %v7721_v36 = vpack.c.bf16 %v3860_v28, %v3852_v27  ;;  %v7849_v37 = vpack.c.bf16 %v3862_v32, %v3854_v29  ;;  %v3418_v28 = vld [vmem:[#allocation28 + $0xf0] sm:$0xff]  ;;  %v7991_v32 = vpack.c.bf16 %v3419_v4, %v3411_v17  ;;  %v3483_v12 = vld [vmem:[#allocation28 + $0x2f8] sm:$0xff] }
 0xa09   : > { %v7723_v38 = vpack.c.bf16 %v3877_v34, %v3869_v33  ;;  %v3425_v29 = vld [vmem:[#allocation28 + $0x128] sm:$0xff]  ;;  %v3427_v33 = vld [vmem:[#allocation28 + $0x138] sm:$0xff]  ;;  %v3472_v17 = vld [vmem:[#allocation28 + $0x2a0] sm:$0xff] }
 0xa0a   : > { %7706 = vmatpush1.bf16.msra.mxu0 %v7705_v39  ;;  %v3868_v39 = vld [vmem:[#allocation28 + $0xf00] sm:$0xff]  ;;  %v3435_v34 = vld [vmem:[#allocation28 + $0x178] sm:$0xff] }
 0xa0b   : > { %7834 = vmatpush1.bf16.msra.mxu1 %v7833_v63  ;;  %7708 = vmatprep.subr.bf16.mxu0 %v7707_v40  ;;  %v3876_v63 = vld [vmem:[#allocation28 + $0xf40] sm:$0xff]  ;;  %v3870_v40 = vld [vmem:[#allocation28 + $0xf10] sm:$0xff] }
 0xa0c   : > { %7836 = vmatprep.subr.bf16.mxu1 %v7835_v47  ;;  %v3893_v47 = vld [vmem:[#allocation28 + $0xfc8] sm:$0xff]  ;;  %v7725_v5 = vpack.c.bf16 %v3876_v63, %v3868_v39  ;;  %v7853_v22 = vpack.c.bf16 %v3878_v57, %v3870_v40  ;;  %v7995_v39 = vpack.c.bf16 %v3435_v34, %v3427_v33  ;;  %v3434_v63 = vld [vmem:[#allocation28 + $0x170] sm:$0xff]  ;;  %v3443_v57 = vld [vmem:[#allocation28 + $0x1b8] sm:$0xff] }
 0xa0d   : > { %v7727_v48 = vpack.c.bf16 %v3893_v47, %v3885_v43  ;;  %v3441_v40 = vld [vmem:[#allocation28 + $0x1a8] sm:$0xff]  ;;  %v3451_v43 = vld [vmem:[#allocation28 + $0x1f8] sm:$0xff]  ;;  %v3480_v4 = vld [vmem:[#allocation28 + $0x2e0] sm:$0xff] }
 0xa0e   : > { %7710 = vmatpush1.bf16.msra.mxu0 %v7709_v8  ;;  %v3884_v8 = vld [vmem:[#allocation28 + $0xf80] sm:$0xff] }
 0xa0f   : > { %7838 = vmatpush1.bf16.msra.mxu1 %v7837_v49  ;;  %7712 = vmatprep.subr.bf16.mxu0 %v7711_v50  ;;  %v3892_v49 = vld [vmem:[#allocation28 + $0xfc0] sm:$0xff]  ;;  %v3886_v50 = vld [vmem:[#allocation28 + $0xf90] sm:$0xff] }
 0xa10   : > { %7840 = vmatprep.subr.bf16.mxu1 %v7839_v59  ;;  %v3401_v59 = vld [vmem:[#allocation28 + $0x68] sm:$0xff]  ;;  %v7729_v62 = vpack.c.bf16 %v3892_v49, %v3884_v8  ;;  %v7857_v0 = vpack.c.bf16 %v3894_v53, %v3886_v50  ;;  %v7999_v8 = vpack.c.bf16 %v3451_v43, %v3443_v57  ;;  %v3467_v53 = vld [vmem:[#allocation28 + $0x278] sm:$0xff]  ;;  %v3488_v34 = vld [vmem:[#allocation28 + $0x320] sm:$0xff] }
 0xa11   : > { %v7859_v13 = vpack.c.bf16 %v3401_v59, %v3393_v56  ;;  %v3457_v49 = vld [vmem:[#allocation28 + $0x228] sm:$0xff]  ;;  %v3504_v43 = vld [vmem:[#allocation28 + $0x3a0] sm:$0xff] }
 0xa12   : > { %7714 = vmatpush1.bf16.msra.mxu0 %v7713_v10  ;;  %v3392_v10 = vld [vmem:[#allocation28 + $0x20] sm:$0xff]  ;;  %v3465_v50 = vld [vmem:[#allocation28 + $0x268] sm:$0xff] }
 0xa13   : > { %7842 = vmatpush1.bf16.msra.mxu1 %v7841_v6  ;;  %7716 = vmatprep.subr.bf16.mxu0 %v7715_v7  ;;  %v3400_v6 = vld [vmem:[#allocation28 + $0x60] sm:$0xff]  ;;  %v7987_v7 = vpack.c.bf16 %v3403_v61, %v3395_v60  ;;  %v7875_v60 = vpack.c.bf16 %v3465_v50, %v3457_v49 }
 0xa14   : > { %7844 = vmatprep.subr.bf16.mxu1 %v7843_v16  ;;  %v3417_v16 = vld [vmem:[#allocation28 + $0xe8] sm:$0xff]  ;;  %v7861_v18 = vpack.c.bf16 %v3400_v6, %v3392_v10  ;;  %v3456_v61 = vld [vmem:[#allocation28 + $0x220] sm:$0xff]  ;;  %v3466_v10 = vld [vmem:[#allocation28 + $0x270] sm:$0xff] }
 0xa15   : > { %v7863_v27 = vpack.c.bf16 %v3417_v16, %v3409_v14  ;;  %v3473_v6 = vld [vmem:[#allocation28 + $0x2a8] sm:$0xff] }
 0xa16   : > { %7718 = vmatpush1.bf16.msra.mxu0 %v7717_v23  ;;  %v3408_v23 = vld [vmem:[#allocation28 + $0xa0] sm:$0xff] }
 0xa17   : > { %7846 = vmatpush1.bf16.msra.mxu1 %v7845_v24  ;;  %7720 = vmatprep.subr.bf16.mxu0 %v7719_v26  ;;  %v3416_v24 = vld [vmem:[#allocation28 + $0xe0] sm:$0xff]  ;;  %v3410_v26 = vld [vmem:[#allocation28 + $0xb0] sm:$0xff] }
 0xa18   : > { %7848 = vmatprep.subr.bf16.mxu1 %v7847_v31  ;;  %v3433_v31 = vld [vmem:[#allocation28 + $0x168] sm:$0xff]  ;;  %v7865_v2 = vpack.c.bf16 %v3416_v24, %v3408_v23  ;;  %v7993_v58 = vpack.c.bf16 %v3418_v28, %v3410_v26  ;;  %v8007_v23 = vpack.c.bf16 %v3483_v12, %v3475_v52  ;;  %v3482_v24 = vld [vmem:[#allocation28 + $0x2f0] sm:$0xff]  ;;  %v3491_v28 = vld [vmem:[#allocation28 + $0x338] sm:$0xff] }
 0xa19   : > { %v7867_v35 = vpack.c.bf16 %v3433_v31, %v3425_v29  ;;  %v3489_v26 = vld [vmem:[#allocation28 + $0x328] sm:$0xff]  ;;  %v3499_v29 = vld [vmem:[#allocation28 + $0x378] sm:$0xff]  ;;  %v7881_v31 = vpack.c.bf16 %v3480_v4, %v3472_v17  ;;  %v3536_v12 = vld [vmem:[#allocation28 + $0x4a0] sm:$0xff] }
 0xa1a   : > { %7722 = vmatpush1.bf16.msra.mxu0 %v7721_v36  ;;  %v3424_v36 = vld [vmem:[#allocation28 + $0x120] sm:$0xff]  ;;  %v3546_v17 = vld [vmem:[#allocation28 + $0x4f0] sm:$0xff]  ;;  %v3553_v4 = vld [vmem:[#allocation28 + $0x528] sm:$0xff] }
 0xa1b   : > { %7850 = vmatpush1.bf16.msra.mxu1 %v7849_v37  ;;  %7724 = vmatprep.subr.bf16.mxu0 %v7723_v38  ;;  %v3432_v37 = vld [vmem:[#allocation28 + $0x160] sm:$0xff]  ;;  %v3426_v38 = vld [vmem:[#allocation28 + $0x130] sm:$0xff] }
 0xa1c   : > { %7852 = vmatprep.subr.bf16.mxu1 %v7851_v54  ;;  %v3449_v54 = vld [vmem:[#allocation28 + $0x1e8] sm:$0xff]  ;;  %v7869_v47 = vpack.c.bf16 %v3432_v37, %v3424_v36  ;;  %v7997_v44 = vpack.c.bf16 %v3434_v63, %v3426_v38  ;;  %v3498_v36 = vld [vmem:[#allocation28 + $0x370] sm:$0xff]  ;;  %v3515_v63 = vld [vmem:[#allocation28 + $0x3f8] sm:$0xff] }
 0xa1d   : > { %v7871_v45 = vpack.c.bf16 %v3449_v54, %v3441_v40  ;;  %v3505_v37 = vld [vmem:[#allocation28 + $0x3a8] sm:$0xff] }
 0xa1e   : > { %7726 = vmatpush1.bf16.msra.mxu0 %v7725_v5  ;;  %v3440_v5 = vld [vmem:[#allocation28 + $0x1a0] sm:$0xff]  ;;  %v3513_v38 = vld [vmem:[#allocation28 + $0x3e8] sm:$0xff] }
 0xa1f   : > { %7854 = vmatpush1.bf16.msra.mxu1 %v7853_v22  ;;  %7728 = vmatprep.subr.bf16.mxu0 %v7727_v48  ;;  %v3448_v22 = vld [vmem:[#allocation28 + $0x1e0] sm:$0xff]  ;;  %v3442_v48 = vld [vmem:[#allocation28 + $0x1b0] sm:$0xff]  ;;  %v7887_v57 = vpack.c.bf16 %v3513_v38, %v3505_v37 }
 0xa20   : > { %7856 = vmatprep.subr.bf16.mxu1 %v7855_v51  ;;  %v3459_v51 = vld [vmem:[#allocation28 + $0x238] sm:$0xff]  ;;  %v7873_v56 = vpack.c.bf16 %v3448_v22, %v3440_v5  ;;  %v3514_v5 = vld [vmem:[#allocation28 + $0x3f0] sm:$0xff]  ;;  %v3521_v22 = vld [vmem:[#allocation28 + $0x428] sm:$0xff] }
 0xa22   : > { %7730 = vmatpush1.bf16.msra.mxu0 %v7729_v62  ;;  %v3464_v62 = vld [vmem:[#allocation28 + $0x260] sm:$0xff] }
 0xa23   : > { %7858 = vmatpush1.bf16.msra.mxu1 %v7857_v0  ;;  %7860 = vmatprep.subr.bf16.mxu0 %v7859_v13  ;;  %v3458_v0 = vld [vmem:[#allocation28 + $0x230] sm:$0xff]  ;;  %v8003_v13 = vpack.c.bf16 %v3467_v53, %v3459_v51  ;;  %v7877_v14 = vpack.c.bf16 %v3464_v62, %v3456_v61  ;;  %v3520_v53 = vld [vmem:[#allocation28 + $0x420] sm:$0xff]  ;;  %v3537_v62 = vld [vmem:[#allocation28 + $0x4a8] sm:$0xff] }
 0xa24   : > { %7988 = vmatprep.subr.bf16.mxu1 %v7987_v7  ;;  %v3481_v7 = vld [vmem:[#allocation28 + $0x2e8] sm:$0xff]  ;;  %v8005_v16 = vpack.c.bf16 %v3466_v10, %v3458_v0  ;;  %v3530_v61 = vld [vmem:[#allocation28 + $0x470] sm:$0xff]  ;;  %v3547_v10 = vld [vmem:[#allocation28 + $0x4f8] sm:$0xff] }
 0xa25   : > { %5116 = vmatmul.mubr.f32.vlgmr.msra.gmra.mrb[6].mxu0 %v9956_v11  ;;  %v3545_v0 = vld [vmem:[#allocation28 + $0x4e8] sm:$0xff] }
 0xa26   : > { %5258 = vmatmul.mubr.f32.vlgmr.msra.gmra.mrb[12].mxu1 %v9956_v11  ;;  %7862 = vmatpush1.bf16.msra.mxu0 %v7861_v18  ;;  %v7879_v18 = vpack.c.bf16 %v3481_v7, %v3473_v6  ;;  %v7895_v52 = vpack.c.bf16 %v3545_v0, %v3537_v62 }
 0xa27   : > { %5328 = vmatprep.mubr.f32.mxu0 %v9937_v46  ;;  %7990 = vmatpush1.bf16.msra.mxu1 %v7989_v19  ;;  %v3474_v19 = vld [vmem:[#allocation28 + $0x2b0] sm:$0xff] }
 0xa28   : > { %5470 = vmatprep.mubr.f32.mxu1 %v9937_v46  ;;  %7864 = vmatprep.subr.bf16.mxu0 %v7863_v27  ;;  %v3450_v46 = vld [vmem:[#allocation28 + $0x1f0] sm:$0xff]  ;;  %v3497_v27 = vld [vmem:[#allocation28 + $0x368] sm:$0xff] }
 0xa29   : > { %7992 = vmatprep.subr.bf16.mxu1 %v7991_v32  ;;  %v8001_v59 = vpack.c.bf16 %v3450_v46, %v3442_v48  ;;  %v8009_v32 = vpack.c.bf16 %v3482_v24, %v3474_v19  ;;  %v7883_v33 = vpack.c.bf16 %v3497_v27, %v3489_v26  ;;  %v3529_v48 = vld [vmem:[#allocation28 + $0x468] sm:$0xff]  ;;  %v3531_v46 = vld [vmem:[#allocation28 + $0x478] sm:$0xff] }
 0xa2a   : > { %7866 = vmatpush1.bf16.msra.mxu0 %v7865_v2  ;;  %v3496_v2 = vld [vmem:[#allocation28 + $0x360] sm:$0xff]  ;;  %v7891_v51 = vpack.c.bf16 %v3529_v48, %v3521_v22  ;;  %v3561_v19 = vld [vmem:[#allocation28 + $0x568] sm:$0xff]  ;;  %v3563_v24 = vld [vmem:[#allocation28 + $0x578] sm:$0xff] }
 0xa2b   : > { %7994 = vmatpush1.bf16.msra.mxu1 %v7993_v58  ;;  %7868 = vmatprep.subr.bf16.mxu0 %v7867_v35  ;;  %v3490_v58 = vld [vmem:[#allocation28 + $0x330] sm:$0xff]  ;;  %v8011_v35 = vpack.c.bf16 %v3499_v29, %v3491_v28  ;;  %v7885_v40 = vpack.c.bf16 %v3496_v2, %v3488_v34  ;;  %v7899_v28 = vpack.c.bf16 %v3561_v19, %v3553_v4  ;;  %v3552_v29 = vld [vmem:[#allocation28 + $0x520] sm:$0xff]  ;;  %v3569_v2 = vld [vmem:[#allocation28 + $0x5a8] sm:$0xff] }
 0xa2c   : > { %7996 = vmatprep.subr.bf16.mxu1 %v7995_v39  ;;  %v3507_v39 = vld [vmem:[#allocation28 + $0x3b8] sm:$0xff]  ;;  %v8013_v54 = vpack.c.bf16 %v3498_v36, %v3490_v58  ;;  %v3562_v34 = vld [vmem:[#allocation28 + $0x570] sm:$0xff]  ;;  %v3577_v58 = vld [vmem:[#allocation28 + $0x5e8] sm:$0xff] }
 0xa2d   : > { %v3579_v36 = vld [vmem:[#allocation28 + $0x5f8] sm:$0xff] }
 0xa2e   : > { %7870 = vmatpush1.bf16.msra.mxu0 %v7869_v47  ;;  %v3512_v47 = vld [vmem:[#allocation28 + $0x3e0] sm:$0xff] }
 0xa2f   : > { %7998 = vmatpush1.bf16.msra.mxu1 %v7997_v44  ;;  %7872 = vmatprep.subr.bf16.mxu0 %v7871_v45  ;;  %v3506_v44 = vld [vmem:[#allocation28 + $0x3b0] sm:$0xff]  ;;  %v8015_v45 = vpack.c.bf16 %v3515_v63, %v3507_v39  ;;  %v7889_v49 = vpack.c.bf16 %v3512_v47, %v3504_v43  ;;  %v7903_v39 = vpack.c.bf16 %v3577_v58, %v3569_v2  ;;  %v3568_v63 = vld [vmem:[#allocation28 + $0x5a0] sm:$0xff]  ;;  %v3585_v47 = vld [vmem:[#allocation28 + $0x628] sm:$0xff] }
 0xa30   : > { %8000 = vmatprep.subr.bf16.mxu1 %v7999_v8  ;;  %v3523_v8 = vld [vmem:[#allocation28 + $0x438] sm:$0xff]  ;;  %v8017_v50 = vpack.c.bf16 %v3514_v5, %v3506_v44  ;;  %v3578_v43 = vld [vmem:[#allocation28 + $0x5f0] sm:$0xff]  ;;  %v3593_v44 = vld [vmem:[#allocation28 + $0x668] sm:$0xff] }
 0xa31   : > { %v3595_v5 = vld [vmem:[#allocation28 + $0x678] sm:$0xff] }
 0xa32   : > { %7874 = vmatpush1.bf16.msra.mxu0 %v7873_v56  ;;  %v3528_v56 = vld [vmem:[#allocation28 + $0x460] sm:$0xff] }
 0xa33   : > { %8002 = vmatpush1.bf16.msra.mxu1 %v8001_v59  ;;  %7876 = vmatprep.subr.bf16.mxu0 %v7875_v60  ;;  %v3522_v59 = vld [vmem:[#allocation28 + $0x430] sm:$0xff]  ;;  %v8019_v60 = vpack.c.bf16 %v3531_v46, %v3523_v8  ;;  %v7893_v6 = vpack.c.bf16 %v3528_v56, %v3520_v53  ;;  %v7907_v8 = vpack.c.bf16 %v3593_v44, %v3585_v47  ;;  %v3584_v46 = vld [vmem:[#allocation28 + $0x620] sm:$0xff]  ;;  %v3601_v56 = vld [vmem:[#allocation28 + $0x6a8] sm:$0xff] }
 0xa34   : > { %8004 = vmatprep.subr.bf16.mxu1 %v8003_v13  ;;  %v3539_v13 = vld [vmem:[#allocation28 + $0x4b8] sm:$0xff]  ;;  %v8021_v7 = vpack.c.bf16 %v3530_v61, %v3522_v59  ;;  %v3594_v53 = vld [vmem:[#allocation28 + $0x670] sm:$0xff]  ;;  %v3609_v59 = vld [vmem:[#allocation28 + $0x6e8] sm:$0xff] }
 0xa35   : > { %v3611_v61 = vld [vmem:[#allocation28 + $0x6f8] sm:$0xff] }
 0xa36   : > { %7878 = vmatpush1.bf16.msra.mxu0 %v7877_v14  ;;  %v3544_v14 = vld [vmem:[#allocation28 + $0x4e0] sm:$0xff] }
 0xa37   : > { %8006 = vmatpush1.bf16.msra.mxu1 %v8005_v16  ;;  %7880 = vmatprep.subr.bf16.mxu0 %v7879_v18  ;;  %v3538_v16 = vld [vmem:[#allocation28 + $0x4b0] sm:$0xff]  ;;  %v8023_v18 = vpack.c.bf16 %v3547_v10, %v3539_v13  ;;  %v7897_v26 = vpack.c.bf16 %v3544_v14, %v3536_v12  ;;  %v7911_v13 = vpack.c.bf16 %v3609_v59, %v3601_v56  ;;  %v3600_v10 = vld [vmem:[#allocation28 + $0x6a0] sm:$0xff]  ;;  %v3617_v14 = vld [vmem:[#allocation28 + $0x728] sm:$0xff] }
 0xa38   : > { %8008 = vmatprep.subr.bf16.mxu1 %v8007_v23  ;;  %v3555_v23 = vld [vmem:[#allocation28 + $0x538] sm:$0xff]  ;;  %v8025_v27 = vpack.c.bf16 %v3546_v17, %v3538_v16  ;;  %v3610_v12 = vld [vmem:[#allocation28 + $0x6f0] sm:$0xff]  ;;  %v3625_v16 = vld [vmem:[#allocation28 + $0x768] sm:$0xff] }
 0xa39   : > { %v3627_v17 = vld [vmem:[#allocation28 + $0x778] sm:$0xff] }
 0xa3a   : > { %7882 = vmatpush1.bf16.msra.mxu0 %v7881_v31  ;;  %v3560_v31 = vld [vmem:[#allocation28 + $0x560] sm:$0xff]  ;;  %v3675_v56 = vld [vmem:[#allocation28 + $0x8f8] sm:$0xff] }
 0xa3b   : > { %8010 = vmatpush1.bf16.msra.mxu1 %v8009_v32  ;;  %7884 = vmatprep.subr.bf16.mxu0 %v7883_v33  ;;  %v3554_v32 = vld [vmem:[#allocation28 + $0x530] sm:$0xff]  ;;  %v8027_v33 = vpack.c.bf16 %v3563_v24, %v3555_v23  ;;  %v7901_v37 = vpack.c.bf16 %v3560_v31, %v3552_v29  ;;  %v7915_v23 = vpack.c.bf16 %v3625_v16, %v3617_v14  ;;  %v3616_v24 = vld [vmem:[#allocation28 + $0x720] sm:$0xff]  ;;  %v3633_v31 = vld [vmem:[#allocation28 + $0x7a8] sm:$0xff] }
 0xa3c   : > { %8012 = vmatprep.subr.bf16.mxu1 %v8011_v35  ;;  %v3571_v35 = vld [vmem:[#allocation28 + $0x5b8] sm:$0xff]  ;;  %v8029_v38 = vpack.c.bf16 %v3562_v34, %v3554_v32  ;;  %v3626_v29 = vld [vmem:[#allocation28 + $0x770] sm:$0xff]  ;;  %v3641_v32 = vld [vmem:[#allocation28 + $0x7e8] sm:$0xff] }
 0xa3d   : > { %v3643_v34 = vld [vmem:[#allocation28 + $0x7f8] sm:$0xff] }
 0xa3e   : > { %7886 = vmatpush1.bf16.msra.mxu0 %v7885_v40  ;;  %v3576_v40 = vld [vmem:[#allocation28 + $0x5e0] sm:$0xff] }
 0xa3f   : > { %8014 = vmatpush1.bf16.msra.mxu1 %v8013_v54  ;;  %7888 = vmatprep.subr.bf16.mxu0 %v7887_v57  ;;  %v3570_v54 = vld [vmem:[#allocation28 + $0x5b0] sm:$0xff]  ;;  %v8031_v57 = vpack.c.bf16 %v3579_v36, %v3571_v35  ;;  %v7905_v22 = vpack.c.bf16 %v3576_v40, %v3568_v63  ;;  %v7919_v35 = vpack.c.bf16 %v3641_v32, %v3633_v31  ;;  %v3632_v36 = vld [vmem:[#allocation28 + $0x7a0] sm:$0xff]  ;;  %v3649_v40 = vld [vmem:[#allocation28 + $0x828] sm:$0xff] }
 0xa40   : > { %8016 = vmatprep.subr.bf16.mxu1 %v8015_v45  ;;  %v3587_v45 = vld [vmem:[#allocation28 + $0x638] sm:$0xff]  ;;  %v8033_v48 = vpack.c.bf16 %v3578_v43, %v3570_v54  ;;  %v3642_v63 = vld [vmem:[#allocation28 + $0x7f0] sm:$0xff]  ;;  %v3657_v54 = vld [vmem:[#allocation28 + $0x868] sm:$0xff] }
 0xa41   : > { %v3659_v43 = vld [vmem:[#allocation28 + $0x878] sm:$0xff] }
 0xa42   : > { %7890 = vmatpush1.bf16.msra.mxu0 %v7889_v49  ;;  %v3592_v49 = vld [vmem:[#allocation28 + $0x660] sm:$0xff] }
 0xa43   : > { %8018 = vmatpush1.bf16.msra.mxu1 %v8017_v50  ;;  %7892 = vmatprep.subr.bf16.mxu0 %v7891_v51  ;;  %v3586_v50 = vld [vmem:[#allocation28 + $0x630] sm:$0xff]  ;;  %v8035_v51 = vpack.c.bf16 %v3595_v5, %v3587_v45  ;;  %v7909_v62 = vpack.c.bf16 %v3592_v49, %v3584_v46  ;;  %v7923_v45 = vpack.c.bf16 %v3657_v54, %v3649_v40  ;;  %v3648_v5 = vld [vmem:[#allocation28 + $0x820] sm:$0xff]  ;;  %v3665_v49 = vld [vmem:[#allocation28 + $0x8a8] sm:$0xff] }
 0xa44   : > { %8020 = vmatprep.subr.bf16.mxu1 %v8019_v60  ;;  %v3603_v60 = vld [vmem:[#allocation28 + $0x6b8] sm:$0xff]  ;;  %v8037_v0 = vpack.c.bf16 %v3594_v53, %v3586_v50  ;;  %v3658_v46 = vld [vmem:[#allocation28 + $0x870] sm:$0xff]  ;;  %v3673_v50 = vld [vmem:[#allocation28 + $0x8e8] sm:$0xff] }
 0xa45   : > { %v3667_v53 = vld [vmem:[#allocation28 + $0x8b8] sm:$0xff]  ;;  %v3712_v54 = vld [vmem:[#allocation28 + $0xa20] sm:$0xff] }
 0xa46   : > { %7894 = vmatpush1.bf16.msra.mxu0 %v7893_v6  ;;  %v3608_v6 = vld [vmem:[#allocation28 + $0x6e0] sm:$0xff] }
 0xa47   : > { %8022 = vmatpush1.bf16.msra.mxu1 %v8021_v7  ;;  %7896 = vmatprep.subr.bf16.mxu0 %v7895_v52  ;;  %v3602_v7 = vld [vmem:[#allocation28 + $0x6b0] sm:$0xff]  ;;  %v8039_v52 = vpack.c.bf16 %v3611_v61, %v3603_v60  ;;  %v7913_v4 = vpack.c.bf16 %v3608_v6, %v3600_v10  ;;  %v3664_v60 = vld [vmem:[#allocation28 + $0x8a0] sm:$0xff]  ;;  %v3681_v10 = vld [vmem:[#allocation28 + $0x928] sm:$0xff] }
 0xa48   : > { %8024 = vmatprep.subr.bf16.mxu1 %v8023_v18  ;;  %v3619_v18 = vld [vmem:[#allocation28 + $0x738] sm:$0xff]  ;;  %v8041_v19 = vpack.c.bf16 %v3610_v12, %v3602_v7  ;;  %v3672_v61 = vld [vmem:[#allocation28 + $0x8e0] sm:$0xff]  ;;  %v3689_v6 = vld [vmem:[#allocation28 + $0x968] sm:$0xff]  ;;  %v8055_v7 = vpack.c.bf16 %v3675_v56, %v3667_v53 }
 0xa49   : > { %v3691_v12 = vld [vmem:[#allocation28 + $0x978] sm:$0xff]  ;;  %v7929_v14 = vpack.c.bf16 %v3672_v61, %v3664_v60  ;;  %v3730_v53 = vld [vmem:[#allocation28 + $0xab0] sm:$0xff]  ;;  %v3745_v60 = vld [vmem:[#allocation28 + $0xb28] sm:$0xff] }
 0xa4a   : > { %7898 = vmatpush1.bf16.msra.mxu0 %v7897_v26  ;;  %v3624_v26 = vld [vmem:[#allocation28 + $0x760] sm:$0xff]  ;;  %v3753_v61 = vld [vmem:[#allocation28 + $0xb68] sm:$0xff] }
 0xa4b   : > { %8026 = vmatpush1.bf16.msra.mxu1 %v8025_v27  ;;  %7900 = vmatprep.subr.bf16.mxu0 %v7899_v28  ;;  %v3618_v27 = vld [vmem:[#allocation28 + $0x730] sm:$0xff]  ;;  %v8043_v28 = vpack.c.bf16 %v3627_v17, %v3619_v18  ;;  %v7917_v2 = vpack.c.bf16 %v3624_v26, %v3616_v24  ;;  %v7931_v18 = vpack.c.bf16 %v3689_v6, %v3681_v10  ;;  %v3680_v17 = vld [vmem:[#allocation28 + $0x920] sm:$0xff]  ;;  %v3697_v26 = vld [vmem:[#allocation28 + $0x9a8] sm:$0xff] }
 0xa4c   : > { %8028 = vmatprep.subr.bf16.mxu1 %v8027_v33  ;;  %v3635_v33 = vld [vmem:[#allocation28 + $0x7b8] sm:$0xff]  ;;  %v8045_v58 = vpack.c.bf16 %v3626_v29, %v3618_v27  ;;  %v3690_v24 = vld [vmem:[#allocation28 + $0x970] sm:$0xff]  ;;  %v3705_v27 = vld [vmem:[#allocation28 + $0x9e8] sm:$0xff]  ;;  %v7947_v6 = vpack.c.bf16 %v3753_v61, %v3745_v60 }
 0xa4d   : > { %v7935_v32 = vpack.c.bf16 %v3705_v27, %v3697_v26  ;;  %v3760_v27 = vld [vmem:[#allocation28 + $0xba0] sm:$0xff] }
 0xa4e   : > { %7902 = vmatpush1.bf16.msra.mxu0 %v7901_v37  ;;  %v3640_v37 = vld [vmem:[#allocation28 + $0x7e0] sm:$0xff] }
 0xa4f   : > { %8030 = vmatpush1.bf16.msra.mxu1 %v8029_v38  ;;  %7904 = vmatprep.subr.bf16.mxu0 %v7903_v39  ;;  %v3634_v38 = vld [vmem:[#allocation28 + $0x7b0] sm:$0xff]  ;;  %v8047_v39 = vpack.c.bf16 %v3643_v34, %v3635_v33  ;;  %v7921_v47 = vpack.c.bf16 %v3640_v37, %v3632_v36  ;;  %v3696_v33 = vld [vmem:[#allocation28 + $0x9a0] sm:$0xff]  ;;  %v3721_v36 = vld [vmem:[#allocation28 + $0xa68] sm:$0xff] }
 0xa50   : > { %8032 = vmatprep.subr.bf16.mxu1 %v8031_v57  ;;  %v3651_v57 = vld [vmem:[#allocation28 + $0x838] sm:$0xff]  ;;  %v8049_v44 = vpack.c.bf16 %v3642_v63, %v3634_v38  ;;  %v3704_v34 = vld [vmem:[#allocation28 + $0x9e0] sm:$0xff] }
 0xa51   : > { %v3715_v37 = vld [vmem:[#allocation28 + $0xa38] sm:$0xff]  ;;  %v3808_v61 = vld [vmem:[#allocation28 + $0xd20] sm:$0xff] }
 0xa52   : > { %7906 = vmatpush1.bf16.msra.mxu0 %v7905_v22  ;;  %v3656_v22 = vld [vmem:[#allocation28 + $0x860] sm:$0xff]  ;;  %v3723_v38 = vld [vmem:[#allocation28 + $0xa78] sm:$0xff] }
 0xa53   : > { %8034 = vmatpush1.bf16.msra.mxu1 %v8033_v48  ;;  %7908 = vmatprep.subr.bf16.mxu0 %v7907_v8  ;;  %v8051_v48 = vpack.c.bf16 %v3659_v43, %v3651_v57  ;;  %v3650_v8 = vld [vmem:[#allocation28 + $0x830] sm:$0xff]  ;;  %v3720_v57 = vld [vmem:[#allocation28 + $0xa60] sm:$0xff] }
 0xa54   : > { %8036 = vmatprep.subr.bf16.mxu1 %v8035_v51  ;;  %v7925_v51 = vpack.c.bf16 %v3656_v22, %v3648_v5  ;;  %v8053_v59 = vpack.c.bf16 %v3658_v46, %v3650_v8  ;;  %v3714_v43 = vld [vmem:[#allocation28 + $0xa30] sm:$0xff]  ;;  %v3737_v5 = vld [vmem:[#allocation28 + $0xae8] sm:$0xff]  ;;  %v3731_v22 = vld [vmem:[#allocation28 + $0xab8] sm:$0xff]  ;;  %v7941_v8 = vpack.c.bf16 %v3720_v57, %v3712_v54 }
 0xa55   : > { %v3801_v54 = vld [vmem:[#allocation28 + $0xce8] sm:$0xff]  ;;  %v3795_v57 = vld [vmem:[#allocation28 + $0xcb8] sm:$0xff] }
 0xa56   : > { %7910 = vmatpush1.bf16.msra.mxu0 %v7909_v62  ;;  %v3666_v62 = vld [vmem:[#allocation28 + $0x8b0] sm:$0xff] }
 0xa57   : > { %8038 = vmatpush1.bf16.msra.mxu1 %v8037_v0  ;;  %7912 = vmatprep.subr.bf16.mxu0 %v7911_v13  ;;  %v7927_v0 = vpack.c.bf16 %v3673_v50, %v3665_v49  ;;  %v3674_v13 = vld [vmem:[#allocation28 + $0x8f0] sm:$0xff]  ;;  %v3728_v50 = vld [vmem:[#allocation28 + $0xaa0] sm:$0xff] }
 0xa58   : > { %8040 = vmatprep.subr.bf16.mxu1 %v8039_v52  ;;  %v3683_v52 = vld [vmem:[#allocation28 + $0x938] sm:$0xff]  ;;  %v8057_v16 = vpack.c.bf16 %v3674_v13, %v3666_v62 }
 0xa59   : > { %v3747_v62 = vld [vmem:[#allocation28 + $0xb38] sm:$0xff] }
 0xa5a   : > { %7914 = vmatpush1.bf16.msra.mxu0 %v7913_v4  ;;  %v3688_v4 = vld [vmem:[#allocation28 + $0x960] sm:$0xff] }
 0xa5b   : > { %8042 = vmatpush1.bf16.msra.mxu1 %v8041_v19  ;;  %7916 = vmatprep.subr.bf16.mxu0 %v7915_v23  ;;  %v3682_v19 = vld [vmem:[#allocation28 + $0x930] sm:$0xff]  ;;  %v8059_v23 = vpack.c.bf16 %v3691_v12, %v3683_v52  ;;  %v7933_v29 = vpack.c.bf16 %v3688_v4, %v3680_v17  ;;  %v3752_v52 = vld [vmem:[#allocation28 + $0xb60] sm:$0xff]  ;;  %v3769_v17 = vld [vmem:[#allocation28 + $0xbe8] sm:$0xff] }
 0xa5c   : > { %8044 = vmatprep.subr.bf16.mxu1 %v8043_v28  ;;  %v3699_v28 = vld [vmem:[#allocation28 + $0x9b8] sm:$0xff]  ;;  %v8061_v31 = vpack.c.bf16 %v3690_v24, %v3682_v19  ;;  %v3746_v12 = vld [vmem:[#allocation28 + $0xb30] sm:$0xff] }
 0xa5d   : > { %v3763_v4 = vld [vmem:[#allocation28 + $0xbb8] sm:$0xff] }
 0xa5e   : > { %7918 = vmatpush1.bf16.msra.mxu0 %v7917_v2  ;;  %v3698_v2 = vld [vmem:[#allocation28 + $0x9b0] sm:$0xff]  ;;  %v3771_v19 = vld [vmem:[#allocation28 + $0xbf8] sm:$0xff] }
 0xa5f   : > { %8046 = vmatpush1.bf16.msra.mxu1 %v8045_v58  ;;  %7920 = vmatprep.subr.bf16.mxu0 %v7919_v35  ;;  %v3713_v35 = vld [vmem:[#allocation28 + $0xa28] sm:$0xff] }
 0xa60   : > { %8048 = vmatprep.subr.bf16.mxu1 %v8047_v39  ;;  %v7937_v39 = vpack.c.bf16 %v3704_v34, %v3696_v33  ;;  %v7939_v40 = vpack.c.bf16 %v3721_v36, %v3713_v35  ;;  %v3785_v33 = vld [vmem:[#allocation28 + $0xc68] sm:$0xff]  ;;  %v3779_v34 = vld [vmem:[#allocation28 + $0xc38] sm:$0xff]  ;;  %v3776_v36 = vld [vmem:[#allocation28 + $0xc20] sm:$0xff] }
 0xa62   : > { %7922 = vmatpush1.bf16.msra.mxu0 %v7921_v47  ;;  %v8067_v47 = vpack.c.bf16 %v3723_v38, %v3715_v37  ;;  %v3784_v37 = vld [vmem:[#allocation28 + $0xc60] sm:$0xff]  ;;  %v3778_v38 = vld [vmem:[#allocation28 + $0xc30] sm:$0xff] }
 0xa63   : > { %8050 = vmatpush1.bf16.msra.mxu1 %v8049_v44  ;;  %7924 = vmatprep.subr.bf16.mxu0 %v7923_v45  ;;  %v3722_v44 = vld [vmem:[#allocation28 + $0xa70] sm:$0xff]  ;;  %v3729_v45 = vld [vmem:[#allocation28 + $0xaa8] sm:$0xff] }
 0xa64   : > { %8052 = vmatprep.subr.bf16.mxu1 %v8051_v48  ;;  %v3739_v48 = vld [vmem:[#allocation28 + $0xaf8] sm:$0xff]  ;;  %v8069_v46 = vpack.c.bf16 %v3722_v44, %v3714_v43  ;;  %v7943_v49 = vpack.c.bf16 %v3737_v5, %v3729_v45  ;;  %v3792_v5 = vld [vmem:[#allocation28 + $0xca0] sm:$0xff] }
 0xa65   : > { %5329 = vmatmul.mubr.f32.vlgmr.msra.gmra.mrb[8].mxu0 %v9946_v20  ;;  %v8071_v56 = vpack.c.bf16 %v3739_v48, %v3731_v22  ;;  %v3803_v43 = vld [vmem:[#allocation28 + $0xcf8] sm:$0xff]  ;;  %v3800_v22 = vld [vmem:[#allocation28 + $0xce0] sm:$0xff]  ;;  %v3794_v48 = vld [vmem:[#allocation28 + $0xcb0] sm:$0xff] }
 0xa66   : > { %5471 = vmatmul.mubr.f32.vlgmr.msra.gmra.mrb[14].mxu1 %v9946_v20  ;;  %7926 = vmatpush1.bf16.msra.mxu0 %v7925_v51  ;;  %v3707_v20 = vld [vmem:[#allocation28 + $0x9f8] sm:$0xff]  ;;  %v3736_v51 = vld [vmem:[#allocation28 + $0xae0] sm:$0xff] }
 0xa67   : > { %5399 = vmatprep.mubr.f32.mxu0 %v9949_v42  ;;  %8054 = vmatpush1.bf16.msra.mxu1 %v8053_v59  ;;  %v8063_v58 = vpack.c.bf16 %v3707_v20, %v3699_v28  ;;  %v3738_v59 = vld [vmem:[#allocation28 + $0xaf0] sm:$0xff]  ;;  %v7945_v13 = vpack.c.bf16 %v3736_v51, %v3728_v50  ;;  %v3768_v28 = vld [vmem:[#allocation28 + $0xbe0] sm:$0xff]  ;;  %v3817_v50 = vld [vmem:[#allocation28 + $0xd68] sm:$0xff] }
 0xa68   : > { %5541 = vmatprep.mubr.f32.mxu1 %v9949_v42  ;;  %7928 = vmatprep.subr.bf16.mxu0 %v7927_v0  ;;  %v3706_v42 = vld [vmem:[#allocation28 + $0x9f0] sm:$0xff]  ;;  %v3755_v0 = vld [vmem:[#allocation28 + $0xb78] sm:$0xff]  ;;  %v8073_v10 = vpack.c.bf16 %v3738_v59, %v3730_v53 }
 0xa69   : > { %8056 = vmatprep.subr.bf16.mxu1 %v8055_v7  ;;  %v8065_v63 = vpack.c.bf16 %v3706_v42, %v3698_v2  ;;  %v3744_v7 = vld [vmem:[#allocation28 + $0xb20] sm:$0xff]  ;;  %v3762_v20 = vld [vmem:[#allocation28 + $0xbb0] sm:$0xff]  ;;  %v3787_v2 = vld [vmem:[#allocation28 + $0xc78] sm:$0xff] }
 0xa6a   : > { %7930 = vmatpush1.bf16.msra.mxu0 %v7929_v14  ;;  %v8075_v14 = vpack.c.bf16 %v3755_v0, %v3747_v62  ;;  %v3811_v51 = vld [vmem:[#allocation28 + $0xd38] sm:$0xff]  ;;  %v3816_v62 = vld [vmem:[#allocation28 + $0xd60] sm:$0xff]  ;;  %v3810_v0 = vld [vmem:[#allocation28 + $0xd30] sm:$0xff] }
 0xa6b   : > { %8058 = vmatpush1.bf16.msra.mxu1 %v8057_v16  ;;  %7932 = vmatprep.subr.bf16.mxu0 %v7931_v18  ;;  %v3754_v16 = vld [vmem:[#allocation28 + $0xb70] sm:$0xff]  ;;  %v3761_v18 = vld [vmem:[#allocation28 + $0xba8] sm:$0xff]  ;;  %v3819_v53 = vld [vmem:[#allocation28 + $0xd78] sm:$0xff] }
 0xa6c   : > { %8060 = vmatprep.subr.bf16.mxu1 %v8059_v23  ;;  %v7949_v23 = vpack.c.bf16 %v3752_v52, %v3744_v7  ;;  %v8077_v24 = vpack.c.bf16 %v3754_v16, %v3746_v12  ;;  %v7951_v26 = vpack.c.bf16 %v3769_v17, %v3761_v18  ;;  %v3833_v7 = vld [vmem:[#allocation28 + $0xde8] sm:$0xff]  ;;  %v3827_v52 = vld [vmem:[#allocation28 + $0xdb8] sm:$0xff]  ;;  %v3824_v17 = vld [vmem:[#allocation28 + $0xda0] sm:$0xff] }
 0xa6d   : > { %v3835_v12 = vld [vmem:[#allocation28 + $0xdf8] sm:$0xff] }
 0xa6e   : > { %7934 = vmatpush1.bf16.msra.mxu0 %v7933_v29  ;;  %v8079_v29 = vpack.c.bf16 %v3771_v19, %v3763_v4  ;;  %v3832_v4 = vld [vmem:[#allocation28 + $0xde0] sm:$0xff]  ;;  %v3826_v19 = vld [vmem:[#allocation28 + $0xdb0] sm:$0xff] }
 0xa6f   : > { %8062 = vmatpush1.bf16.msra.mxu1 %v8061_v31  ;;  %7936 = vmatprep.subr.bf16.mxu0 %v7935_v32  ;;  %v3770_v31 = vld [vmem:[#allocation28 + $0xbf0] sm:$0xff]  ;;  %v3777_v32 = vld [vmem:[#allocation28 + $0xc28] sm:$0xff] }
 0xa70   : > { %8064 = vmatprep.subr.bf16.mxu1 %v8063_v58  ;;  %v7953_v58 = vpack.c.bf16 %v3768_v28, %v3760_v27  ;;  %v8081_v42 = vpack.c.bf16 %v3770_v31, %v3762_v20  ;;  %v7955_v35 = vpack.c.bf16 %v3785_v33, %v3777_v32  ;;  %v3849_v27 = vld [vmem:[#allocation28 + $0xe68] sm:$0xff]  ;;  %v3843_v28 = vld [vmem:[#allocation28 + $0xe38] sm:$0xff]  ;;  %v3840_v33 = vld [vmem:[#allocation28 + $0xe20] sm:$0xff] }
 0xa71   : > { %v3851_v20 = vld [vmem:[#allocation28 + $0xe78] sm:$0xff] }
 0xa72   : > { %7938 = vmatpush1.bf16.msra.mxu0 %v7937_v39  ;;  %v8083_v39 = vpack.c.bf16 %v3787_v2, %v3779_v34  ;;  %v3848_v34 = vld [vmem:[#allocation28 + $0xe60] sm:$0xff]  ;;  %v3842_v2 = vld [vmem:[#allocation28 + $0xe30] sm:$0xff] }
 0xa73   : > { %8066 = vmatpush1.bf16.msra.mxu1 %v8065_v63  ;;  %7940 = vmatprep.subr.bf16.mxu0 %v7939_v40  ;;  %v3786_v63 = vld [vmem:[#allocation28 + $0xc70] sm:$0xff]  ;;  %v3793_v40 = vld [vmem:[#allocation28 + $0xca8] sm:$0xff] }
 0xa74   : > { %8068 = vmatprep.subr.bf16.mxu1 %v8067_v47  ;;  %v7957_v47 = vpack.c.bf16 %v3784_v37, %v3776_v36  ;;  %v8085_v44 = vpack.c.bf16 %v3786_v63, %v3778_v38  ;;  %v7959_v45 = vpack.c.bf16 %v3801_v54, %v3793_v40  ;;  %v3865_v36 = vld [vmem:[#allocation28 + $0xee8] sm:$0xff]  ;;  %v3859_v37 = vld [vmem:[#allocation28 + $0xeb8] sm:$0xff]  ;;  %v3856_v54 = vld [vmem:[#allocation28 + $0xea0] sm:$0xff] }
 0xa75   : > { %v3867_v38 = vld [vmem:[#allocation28 + $0xef8] sm:$0xff] }
 0xa76   : > { %7942 = vmatpush1.bf16.msra.mxu0 %v7941_v8  ;;  %v8087_v8 = vpack.c.bf16 %v3803_v43, %v3795_v57  ;;  %v3864_v57 = vld [vmem:[#allocation28 + $0xee0] sm:$0xff]  ;;  %v3858_v43 = vld [vmem:[#allocation28 + $0xeb0] sm:$0xff] }
 0xa77   : > { %8070 = vmatpush1.bf16.msra.mxu1 %v8069_v46  ;;  %7944 = vmatprep.subr.bf16.mxu0 %v7943_v49  ;;  %v3802_v46 = vld [vmem:[#allocation28 + $0xcf0] sm:$0xff]  ;;  %v3809_v49 = vld [vmem:[#allocation28 + $0xd28] sm:$0xff] }
 0xa78   : > { %8072 = vmatprep.subr.bf16.mxu1 %v8071_v56  ;;  %v7961_v56 = vpack.c.bf16 %v3800_v22, %v3792_v5  ;;  %v8089_v59 = vpack.c.bf16 %v3802_v46, %v3794_v48  ;;  %v7963_v60 = vpack.c.bf16 %v3817_v50, %v3809_v49  ;;  %v3881_v5 = vld [vmem:[#allocation28 + $0xf68] sm:$0xff]  ;;  %v3875_v22 = vld [vmem:[#allocation28 + $0xf38] sm:$0xff]  ;;  %v3872_v50 = vld [vmem:[#allocation28 + $0xf20] sm:$0xff] }
 0xa79   : > { %v3883_v48 = vld [vmem:[#allocation28 + $0xf78] sm:$0xff] }
 0xa7a   : > { %7946 = vmatpush1.bf16.msra.mxu0 %v7945_v13  ;;  %v8091_v13 = vpack.c.bf16 %v3819_v53, %v3811_v51  ;;  %v3880_v51 = vld [vmem:[#allocation28 + $0xf60] sm:$0xff]  ;;  %v3874_v53 = vld [vmem:[#allocation28 + $0xf30] sm:$0xff] }
 0xa7b   : > { %8074 = vmatpush1.bf16.msra.mxu1 %v8073_v10  ;;  %7948 = vmatprep.subr.bf16.mxu0 %v7947_v6  ;;  %v3818_v10 = vld [vmem:[#allocation28 + $0xd70] sm:$0xff]  ;;  %v3825_v6 = vld [vmem:[#allocation28 + $0xda8] sm:$0xff] }
 0xa7c   : > { %8076 = vmatprep.subr.bf16.mxu1 %v8075_v14  ;;  %v7965_v14 = vpack.c.bf16 %v3816_v62, %v3808_v61  ;;  %v8093_v16 = vpack.c.bf16 %v3818_v10, %v3810_v0  ;;  %v7967_v18 = vpack.c.bf16 %v3833_v7, %v3825_v6  ;;  %v3897_v61 = vld [vmem:[#allocation28 + $0xfe8] sm:$0xff]  ;;  %v3891_v62 = vld [vmem:[#allocation28 + $0xfb8] sm:$0xff]  ;;  %v3888_v7 = vld [vmem:[#allocation28 + $0xfa0] sm:$0xff] }
 0xa7d   : > { %v3899_v0 = vld [vmem:[#allocation28 + $0xff8] sm:$0xff] }
 0xa7e   : > { %7950 = vmatpush1.bf16.msra.mxu0 %v7949_v23  ;;  %v8095_v23 = vpack.c.bf16 %v3835_v12, %v3827_v52  ;;  %v3896_v52 = vld [vmem:[#allocation28 + $0xfe0] sm:$0xff]  ;;  %v8111_v12 = vpack.c.bf16 %v3899_v0, %v3891_v62 }
 0xa7f   : > { %8078 = vmatpush1.bf16.msra.mxu1 %v8077_v24  ;;  %7952 = vmatprep.subr.bf16.mxu0 %v7951_v26  ;;  %v3834_v24 = vld [vmem:[#allocation28 + $0xdf0] sm:$0xff]  ;;  %v3841_v26 = vld [vmem:[#allocation28 + $0xe28] sm:$0xff] }
 0xa80   : > { %8080 = vmatprep.subr.bf16.mxu1 %v8079_v29  ;;  %v7969_v29 = vpack.c.bf16 %v3832_v4, %v3824_v17  ;;  %v8097_v31 = vpack.c.bf16 %v3834_v24, %v3826_v19  ;;  %v7971_v32 = vpack.c.bf16 %v3849_v27, %v3841_v26  ;;  %v5548_v4 = vld [vmem:[#allocation31] sm:$0xff]  ;;  %v9072_v19 = vmov 1966171168  }
 0xa81   : > { %v5553_v24 = vrot.slane %v5548_v4, %v9768_v9  ;;  %v5561_v26 = vrot.slane %v5548_v4, %v9778_v30  ;;  %v5557_v27 = vrot.slane %v5548_v4, %v9760_v15  ;;  %v5569_v15 = vrot.slane %v5548_v4, %v1425_v55 }
 0xa82   : > { %7954 = vmatpush1.bf16.msra.mxu0 %v7953_v58  ;;  %v8099_v58 = vpack.c.bf16 %v3851_v20, %v3843_v28  ;;  %v5565_v20 = vrot.slane %v5548_v4, %v9771_v21  ;;  %v5577_v21 = vrot.slane %v5548_v4, %v1433_v25 }
 0xa83   : > { %8082 = vmatpush1.bf16.msra.mxu1 %v8081_v42  ;;  %7956 = vmatprep.subr.bf16.mxu0 %v7955_v35  ;;  %v3850_v42 = vld [vmem:[#allocation28 + $0xe70] sm:$0xff]  ;;  %v3857_v35 = vld [vmem:[#allocation28 + $0xea8] sm:$0xff] }
 0xa84   : > { %8084 = vmatprep.subr.bf16.mxu1 %v8083_v39  ;;  %v7973_v39 = vpack.c.bf16 %v3848_v34, %v3840_v33  ;;  %v8101_v63 = vpack.c.bf16 %v3850_v42, %v3842_v2  ;;  %v7975_v40 = vpack.c.bf16 %v3865_v36, %v3857_v35 }
 0xa86   : > { %7958 = vmatpush1.bf16.msra.mxu0 %v7957_v47  ;;  %v8103_v47 = vpack.c.bf16 %v3867_v38, %v3859_v37  ;;  %v5573_v38 = vrot.slane %v5548_v4, %v1429_v41 }
 0xa87   : > { %8086 = vmatpush1.bf16.msra.mxu1 %v8085_v44  ;;  %7960 = vmatprep.subr.bf16.mxu0 %v7959_v45  ;;  %v3866_v44 = vld [vmem:[#allocation28 + $0xef0] sm:$0xff]  ;;  %v3873_v45 = vld [vmem:[#allocation28 + $0xf28] sm:$0xff] }
 0xa88   : > { %8088 = vmatprep.subr.bf16.mxu1 %v8087_v8  ;;  %v7977_v8 = vpack.c.bf16 %v3864_v57, %v3856_v54  ;;  %v8105_v46 = vpack.c.bf16 %v3866_v44, %v3858_v43  ;;  %v7979_v49 = vpack.c.bf16 %v3881_v5, %v3873_v45 }
 0xa8a   : > { %7962 = vmatpush1.bf16.msra.mxu0 %v7961_v56  ;;  %v8107_v56 = vpack.c.bf16 %v3883_v48, %v3875_v22 }
 0xa8b   : > { %8090 = vmatpush1.bf16.msra.mxu1 %v8089_v59  ;;  %7964 = vmatprep.subr.bf16.mxu0 %v7963_v60  ;;  %v3882_v59 = vld [vmem:[#allocation28 + $0xf70] sm:$0xff]  ;;  %v3889_v60 = vld [vmem:[#allocation28 + $0xfa8] sm:$0xff] }
 0xa8c   : > { %8092 = vmatprep.subr.bf16.mxu1 %v8091_v13  ;;  %v7981_v13 = vpack.c.bf16 %v3880_v51, %v3872_v50  ;;  %v8109_v10 = vpack.c.bf16 %v3882_v59, %v3874_v53  ;;  %v7983_v6 = vpack.c.bf16 %v3897_v61, %v3889_v60 }
 0xa8e   : > { %7966 = vmatpush1.bf16.msra.mxu0 %v7965_v14  ;;  %v3890_v14 = vld [vmem:[#allocation28 + $0xfb0] sm:$0xff] }
 0xa8f   : > { %8094 = vmatpush1.bf16.msra.mxu1 %v8093_v16  ;;  %7968 = vmatprep.subr.bf16.mxu0 %v7967_v18  ;;  %v3898_v16 = vld [vmem:[#allocation28 + $0xff0] sm:$0xff]  ;;  %v7985_v18 = vpack.c.bf16 %v3896_v52, %v3888_v7 }
 0xa90   : > { %8096 = vmatprep.subr.bf16.mxu1 %v8095_v23  ;;  %v8113_v17 = vpack.c.bf16 %v3898_v16, %v3890_v14  ;;  %v5611_v23 = vunpack.c.l.s4 %v9072_v19 }
 0xa92   : > { %7970 = vmatpush1.bf16.msra.mxu0 %v7969_v29  ;;  %v5612_v28 = vunpack.c.0.s8 %v5611_v23 }
 0xa93   : > { %8098 = vmatpush1.bf16.msra.mxu1 %v8097_v31  ;;  %7972 = vmatprep.subr.bf16.mxu0 %v7971_v32 }
 0xa94   : > { %8100 = vmatprep.subr.bf16.mxu1 %v8099_v58 }
 0xa96   : > { %7974 = vmatpush1.bf16.msra.mxu0 %v7973_v39  ;;  %v5581_v39 = vrot.slane %v5548_v4, %v1437_v3 }
 0xa97   : > { %8102 = vmatpush1.bf16.msra.mxu1 %v8101_v63  ;;  %7976 = vmatprep.subr.bf16.mxu0 %v7975_v40 }
 0xa98   : > { %8104 = vmatprep.subr.bf16.mxu1 %v8103_v47 }
 0xa9a   : > { %7978 = vmatpush1.bf16.msra.mxu0 %v7977_v8 }
 0xa9b   : > { %8106 = vmatpush1.bf16.msra.mxu1 %v8105_v46  ;;  %7980 = vmatprep.subr.bf16.mxu0 %v7979_v49 }
 0xa9c   : > { %8108 = vmatprep.subr.bf16.mxu1 %v8107_v56 }
 0xa9e   : > { %7982 = vmatpush1.bf16.msra.mxu0 %v7981_v13 }
 0xa9f   : > { %8110 = vmatpush1.bf16.msra.mxu1 %v8109_v10  ;;  %7984 = vmatprep.subr.bf16.mxu0 %v7983_v6 }
 0xaa0   : > { %8112 = vmatprep.subr.bf16.mxu1 %v8111_v12 }
 0xaa2   : > { %7986 = vmatpush1.bf16.msra.mxu0 %v7985_v18 }
 0xaa3   : > { %8114 = vmatpush1.bf16.msra.mxu1 %v8113_v17 }
 0xaa5   : > { %5400 = vmatmul.mubr.f32.vlgmr.msra.gmra.mrb[8].mxu0 %v9956_v11 }
 0xaa6   : > { %5542 = vmatmul.mubr.f32.vlgmr.msra.gmra.mrb[14].mxu1 %v9956_v11  ;;  %v5615_v11 = vsub.s32 %v5612_v28, %v9757_v1 }
 0xaf8   : > { %v5117_v29 = vpop.f32.mrb[6].mxu0 }
 0xaf9   : > { %v5590_v31 = vadd.f32 %v5553_v24, %v5117_v29  ;;  %v5259_v32 = vpop.f32.mrb[12].mxu1  ;;  %v5119_v33 = vpop.f32.mrb[7].mxu0 }
 0xafa   : > { %v5592_v34 = vadd.f32 %v5561_v26, %v5259_v32  ;;  %v5591_v2 = vadd.f32 %v5557_v27, %v5119_v33  ;;  %v5261_v58 = vpop.f32.mrb[13].mxu1 }
 0xafb   : > { %v5593_v42 = vadd.f32 %v5565_v20, %v5261_v58 }
 0xafc   : > { %v5606_v35 = vcombine.low %v5590_v31, %v5591_v2 }
 0xafd   : > { %v5607_v36 = vcombine.low %v5592_v34, %v5593_v42 }
 0xafe   : > { %v5616_v9 = vrot.slane %v5606_v35, %v5615_v11 }
 0xaff   : > { %v5623_v37 = vrot.slane %v5607_v36, %v5615_v11 }
 0xb01   : > { %v5638_v30 = vcombine.low %v5616_v9, %v5623_v37 }
 0xb03   : > { %v5646_v1 = vrot.slane %v5638_v30, %v5615_v11 }
 0xb78   : > { %v5401_v63 = vpop.f32.mrb[8].mxu0 }
 0xb79   : > { %v5594_v40 = vadd.f32 %v5569_v15, %v5401_v63  ;;  %v5543_v54 = vpop.f32.mrb[14].mxu1  ;;  %v5403_v57 = vpop.f32.mrb[9].mxu0 }
 0xb7a   : > { %v5596_v43 = vadd.f32 %v5577_v21, %v5543_v54  ;;  %v5595_v47 = vadd.f32 %v5573_v38, %v5403_v57  ;;  %v5545_v44 = vpop.f32.mrb[15].mxu1 }
 0xb7b   : > { %v5597_v55 = vadd.f32 %v5581_v39, %v5545_v44 }
 0xb7c   : > { %v5608_v45 = vcombine.low %v5594_v40, %v5595_v47 }
 0xb7d   : > { %v5609_v5 = vcombine.low %v5596_v43, %v5597_v55 }
 0xb7e   : > { %v5630_v25 = vrot.slane %v5608_v45, %v5615_v11 }
 0xb7f   : > { %v5637_v22 = vrot.slane %v5609_v5, %v5615_v11 }
 0xb81   : > { %v5639_v48 = vcombine.low %v5630_v25, %v5637_v22 }
 0xb83   : > { %v5653_v41 = vrot.slane %v5639_v48, %v5615_v11 }
 0xb85   : > { %v5654_v3 = vcombine.low %v5646_v1, %v5653_v41 }
 0xb87   : > { %5656 = vst [vmem:[%s890_s3] sm:$0xff] %v5654_v3 }
 0xb88   : > { %8951 = shalt.err (!%p8948_p12)
}
 0xb89   : > { %s8952_s22 = scalar_lea.hbm %s9987_s29, 128  ;;  %s8956_s23 = scalar_lea.hbm %s10161_s21, 256 }
 0xb8a   : > { %p8953_p13 = scmp.ne.s32.totalorder %s9987_s29, %s8952_s22  ;;  %p8957_p9 = scmp.lt.u32.totalorder %s9987_s29, %s10161_s21 }
 0xb8b   : > { %p8958_p4 = scmp.lt.u32.totalorder %s8956_s23, %s8952_s22  ;;  %p8960_p0 = scmp.lt.u32.totalorder %s8952_s22, %s9987_s29 }
 0xb8c   : > { %p8954_p3 = pnand %p8953_p13, %p10162_p2 }
 0xb8d   : > { %p8959_p8 = por %p8958_p4, %p8957_p9 }
 0xb8e   : > { %p8955_p7 = pneg %p8954_p3 }
 0xb8f   : > { %p8961_p6 = por %p8960_p0, %p8959_p8 }
 0xb91   : > { %p8962_p5 = pnand %p8961_p6, %p8955_p7 }
 0xb93   : > { %8965 = shalt.err (!%p8962_p5)
}
 0xb94   : > { %8239 = dma.vmem_to_hbm [thread:$0]  (%p10162_p2), %s9989_s8, 128, %s9987_s29, %s5658_s1  }
 0xb95 PF: > { %s10163_s4 = sld [smem:[#allocation44_spill]]  ;;  %s10164_s20 = sld [smem:[#allocation47_spill]] }
 0xb96   : > { %p10165_p10 = scmp.ne.s32.totalorder %s10135_s7, 0 }
 0xb9b   : > { %s5684_s0 = sand.u32 1, %s10163_s4   ;;  %p10166_p1 = scmp.ge.s32.totalorder %s10164_s20, 2 }
 0xb9c   : > { %s5685_s5 = scalar_lea.sflag [#allocation4], %s5684_s0 }
 0xb9d   : > { %p8301_p11 = pnand %p10166_p1, %p10165_p10 }
 0xb9f   : > { %9023 = dma.done.wait (!%p8301_p11), %s5685_s5, 128  }
 0xba0   : > { %9025 = vsyncadd (!%p8301_p11), %s5685_s5, 4294967168  ;;  %s10167_s1 = sld [smem:[#allocation45_spill]]  ;;  %s10168_s22 = sld [smem:[#allocation46_spill]] }
 0xba1   : > { %p42_p12 = scmp.ge.s32.totalorder %s9633_s24, 4   ;;  %s10169_s23 = smov %s9644_s2 }
 0xba3   :  { %44 = sbr.rel (!%p42_p12) target bundleno = 27 (0x1b), region = 217 }
 0xbaa   :  { %5690 = vsyncpa [#allocation3], 1 }
 0xbab   :  { %5692 = vsyncpa [#allocation3 + $0x1], 1 }
 0xbac   :  { %5693 = vsyncpa [#allocation6], 1 }
 0xbad   :  { %5694 = vsyncpa [#allocation9], 1 }
 0xbae   :  { %5695 = vsyncpa [#allocation12], 1 }
 0xbaf   :  { %5696 = vsyncpa [#allocation15], 1 }
 0xbb0   :  { %5697 = vsyncpa [#allocation18], 1 }
 0xbb1   :  { %5698 = vsyncpa [#allocation21], 1 }
 0xbb2   :  { %5699 = vsyncpa [#allocation24], 1 }
 0xbb3   :  { %5700 = vsyncpa [#allocation27], 1 }
 0xbb4   :  { %5701 = vsyncpa [#allocation30], 1 }
 0xbb5   :  { %5702 = vsyncpa [#allocation4], 1 }
 0xbb6   :  { %5704 = vsyncpa [#allocation4 + $0x1], 1 }

</bundles_post_ra>
